<compile_context>
chip_gen: v7x
topology: tpu7x:2x2x1
jax: 0.10.0
libtpu: 0.0.40
codegen_flags: <defaults>
</compile_context>

<pallas_src>
import functools

import jax
import jax.numpy as jnp
from jax.experimental import pallas as pl
from jax.experimental.pallas import tpu as pltpu


def _vae_kernel(x_ref, noise_ref,
                w1f_ref, mw2_ref, sw2_ref, w3f_ref,       # encoder weights (bf16)
                dw1_ref, dw2_ref, dw3_ref,                # decoder weights (bf16)
                bias_ref,                                  # all 9 biases packed (f32)
                xhat_ref, ml_ref,
                *, hidden, latent_dim, input_dim, normalize_decoder):
    H, L, D = hidden, latent_dim, input_dim
    bf16 = jnp.bfloat16

    def mm(h_bf16, w_ref):
        # bf16 MXU matmul with f32 accumulation.
        return jnp.dot(h_bf16, w_ref[...], preferred_element_type=jnp.float32)

    def bias(off, width):
        # All offsets/widths are multiples of 128 -> lane-aligned static slices.
        return bias_ref[:, off:off + width]

    relu = lambda v: jnp.maximum(v, 0.0)

    # Fused encoder layer 1: x @ [W_mu1 | W_sig1] -> (T, 2H).  x is already bf16.
    h1 = relu(mm(x_ref[...], w1f_ref) + bias(0, 2 * H))
    hm = h1[:, :H].astype(bf16)      # lane-aligned slices (H % 128 == 0)
    hs = h1[:, H:].astype(bf16)

    # Encoder layer 2, one matmul per branch.
    hm = relu(mm(hm, mw2_ref) + bias(2 * H, H)).astype(bf16)
    hs = relu(mm(hs, sw2_ref) + bias(3 * H, H)).astype(bf16)

    # Fused encoder layer 3: [hm | hs] @ [[mw3, 0], [0, sw3]] -> lane-dense
    # (T, 2L) slab ml = [mu | log_sigma] in a single K = 2H matmul.
    h2 = jnp.concatenate([hm, hs], axis=1)            # aligned bf16 lane concat
    ml = mm(h2, w3f_ref) + bias(4 * H, 2 * L)

    # Reparameterization on 64-lane f32 arrays (no padded noise slab needed):
    #   mu        = ml[:, :L]
    #   log_sigma = roll(ml, L)[:, :L]    (XLU roll + offset-0 slice)
    mu64 = ml[:, :L]
    ls64 = pltpu.roll(ml, shift=L, axis=1)[:, :L]
    z = mu64 + jnp.exp(0.5 * ls64) * noise_ref[...]   # (T, L) f32

    # Decoder (layer 1 contracts over K = L = 64 with the un-padded weight).
    h = relu(mm(z.astype(bf16), dw1_ref) + bias(4 * H + 2 * L, H)).astype(bf16)
    h = relu(mm(h, dw2_ref) + bias(5 * H + 2 * L, H)).astype(bf16)
    x_hat = mm(h, dw3_ref) + bias(6 * H + 2 * L, D)

    if normalize_decoder:
        # F.normalize(x, p=2, dim=1) == x * rsqrt(max(sum(x^2), eps^2)).
        # The clamp also keeps padded (all-zero-ish) batch rows finite.
        ssq = jnp.sum(x_hat * x_hat, axis=-1, keepdims=True)
        x_hat = x_hat * jax.lax.rsqrt(jnp.maximum(ssq, 1e-24))

    xhat_ref[...] = x_hat.astype(xhat_ref.dtype)
    ml_ref[...] = ml.astype(ml_ref.dtype)


def pack_params(params, weight_dtype=jnp.bfloat16):
    """Pack/fuse the 9 Linear layers into the kernel's weight layout (bf16)."""
    (mw1, mb1), (mw2, mb2), (mw3, mb3) = params["enc_mu"]
    (sw1, sb1), (sw2, sb2), (sw3, sb3) = params["enc_sigma"]
    (dw1, db1), (dw2, db2), (dw3, db3) = params["dec"]
    f32 = jnp.float32
    input_dim, hidden = mw1.shape
    latent = mw3.shape[1]
    # Lane alignment of packed layouts / bias slices.
    assert hidden % 128 == 0 and (2 * latent) % 128 == 0 and input_dim % 128 == 0

    zeros_hl = jnp.zeros((hidden, latent), f32)
    w1f = jnp.concatenate([mw1, sw1], axis=1).astype(weight_dtype)        # (D, 2H)
    w3f = jnp.concatenate(
        [jnp.concatenate([mw3, zeros_hl], axis=1),                        # (H, 2L)
         jnp.concatenate([zeros_hl, sw3], axis=1)],                       # (H, 2L)
        axis=0).astype(weight_dtype)                                      # (2H, 2L)
    # Bias layout: [mb1|sb1 | mb2 | sb2 | mb3|sb3 | db1 | db2 | db3].
    bias_all = jnp.concatenate(
        [mb1, sb1, mb2, sb2, mb3, sb3, db1, db2, db3], axis=1).astype(f32)

    weights = [
        w1f,
        mw2.astype(weight_dtype), sw2.astype(weight_dtype),
        w3f,
        dw1.astype(weight_dtype), dw2.astype(weight_dtype), dw3.astype(weight_dtype),
        bias_all,
    ]
    return weights, hidden, latent


def _round_up(n, m):
    return ((n + m - 1) // m) * m


def _choose_tile(batch, requested):
    """Round the batch to a multiple of 8 and pick the largest tile <= requested
    that divides it, bounding padding waste at < 8 rows."""
    b8 = _round_up(max(batch, 1), 8)
    for t in (512, 256, 128, 64, 32, 16, 8):
        if t <= requested and b8 % t == 0:
            return t, b8
    return 8, b8


def _vae_pallas_call(x, noise, weights, *, batch_tile, hidden, latent_dim,
                     normalize_decoder):
    B_pad, input_dim = x.shape
    two_lat = 2 * latent_dim
    grid = (B_pad // batch_tile,)

    # Real VMEM footprint: double-buffered weights + double-buffered I/O tiles
    # + per-tile intermediates + slack.  Lands around 16 MiB (well under the
    # 32 MiB scoped default / 64 MiB physical on v7x).
    weight_bytes = sum(int(a.size) * a.dtype.itemsize for a in weights)
    io_tile_bytes = batch_tile * (2 * input_dim        # x (bf16)
                                  + 4 * latent_dim     # noise (f32)
                                  + 4 * input_dim      # x_hat (f32)
                                  + 4 * two_lat)       # ml (f32)
    interm_bytes = batch_tile * (4 * 2 * hidden        # h1 f32
                                 + 2 * 2 * hidden      # [hm|hs] bf16
                                 + 4 * 2 * hidden      # hm/hs f32
                                 + 4 * hidden          # decoder hidden f32
                                 + 4 * input_dim)      # x_hat f32 temp
    vmem_limit = 2 * weight_bytes + 2 * io_tile_bytes + interm_bytes + (4 << 20)
    vmem_limit = int(max(16 << 20, min(vmem_limit, 32 << 20)))

    kernel = functools.partial(
        _vae_kernel, hidden=hidden, latent_dim=latent_dim, input_dim=input_dim,
        normalize_decoder=normalize_decoder)

    # Grid-invariant weights: constant block index -> fetched once, not per step.
    # TODO(synk): on v7x, ("parallel",) makes each TensorCore pull its own copy
    # of the ~3.4 MB weight set; sharing one copy via core_map + VMEM_SHARED
    # would halve that HBM traffic.
    weight_specs = [pl.BlockSpec(a.shape, lambda i, nd=a.ndim: (0,) * nd)
                    for a in weights]
    in_specs = [
        pl.BlockSpec((batch_tile, input_dim), lambda i: (i, 0)),    # x (bf16)
        pl.BlockSpec((batch_tile, latent_dim), lambda i: (i, 0)),   # noise (f32)
    ] + weight_specs
    out_specs = [
        pl.BlockSpec((batch_tile, input_dim), lambda i: (i, 0)),    # x_hat
        pl.BlockSpec((batch_tile, two_lat), lambda i: (i, 0)),      # [mu|log_sigma]
    ]
    out_shapes = (
        jax.ShapeDtypeStruct((B_pad, input_dim), jnp.float32),
        jax.ShapeDtypeStruct((B_pad, two_lat), jnp.float32),
    )

    return pl.pallas_call(
        kernel,
        out_shape=out_shapes,
        grid_spec=pltpu.PrefetchScalarGridSpec(
            num_scalar_prefetch=0,
            grid=grid,
            in_specs=in_specs,
            out_specs=out_specs,
        ),
        compiler_params=pltpu.CompilerParams(
            dimension_semantics=("parallel",),
            vmem_limit_bytes=vmem_limit,
        ),
    )(x, noise, *weights)


def vae_forward(x, noise, params, *, normalize_decoder=False, batch_tile=128):
    """Run the VAE forward pass. Returns (x_hat, mu, log_sigma).

    batch_tile=128 by default: the batch (M) dim is streamed through the MXU,
    so smaller tiles give the auto-pipeline enough steps to overlap activation
    DMA with compute; sweep {128, 256} per chip if needed.
    """
    B, input_dim = x.shape
    weights, hidden, latent_dim = pack_params(params)
    batch_tile, B_pad = _choose_tile(B, batch_tile)

    # x goes in as bf16 (the MXU matmul truncates to bf16 anyway); noise stays
    # f32 and un-padded (B, latent_dim).
    x_in = x.astype(jnp.bfloat16)
    noise_in = noise.astype(jnp.float32)
    if B_pad != B:
        pad = B_pad - B
        x_in = jnp.concatenate(
            [x_in, jnp.zeros((pad, input_dim), jnp.bfloat16)], axis=0)
        noise_in = jnp.concatenate(
            [noise_in, jnp.zeros((pad, latent_dim), jnp.float32)], axis=0)

    x_hat, ml = _vae_pallas_call(
        x_in, noise_in, weights, batch_tile=batch_tile, hidden=hidden,
        latent_dim=latent_dim, normalize_decoder=normalize_decoder)

    x_hat = x_hat[:B]
    mu = ml[:B, :latent_dim]
    log_sigma = ml[:B, latent_dim:]
    return x_hat, mu, log_sigma


def init_params(key, input_dim, hidden, latent_dim):
    """PyTorch-style uniform(+-1/sqrt(fan_in)) init; W as (in, out), b as (1, out)."""
    def linear_params(k, fan_in, fan_out):
        kw, kb = jax.random.split(k)
        bound = 1.0 / jnp.sqrt(fan_in)
        w = jax.random.uniform(kw, (fan_in, fan_out), jnp.float32, -bound, bound)
        b = jax.random.uniform(kb, (1, fan_out), jnp.float32, -bound, bound)
        return (w, b)

    keys = jax.random.split(key, 9)
    return {
        "enc_mu": [linear_params(keys[0], input_dim, hidden),
                   linear_params(keys[1], hidden, hidden),
                   linear_params(keys[2], hidden, latent_dim)],
        "enc_sigma": [linear_params(keys[3], input_dim, hidden),
                      linear_params(keys[4], hidden, hidden),
                      linear_params(keys[5], hidden, latent_dim)],
        "dec": [linear_params(keys[6], latent_dim, hidden),
                linear_params(keys[7], hidden, hidden),
                linear_params(keys[8], hidden, input_dim)],
    }


def reference_forward(x, noise, params, normalize_decoder=False):
    """Pure-JAX reference with the same bf16-weight / f32-accumulate numerics."""
    bf16 = jnp.bfloat16

    def mlp(h, layers):
        for li, (w, b) in enumerate(layers):
            h = jnp.dot(h.astype(bf16), w.astype(bf16),
                        preferred_element_type=jnp.float32) + b
            if li < len(layers) - 1:
                h = jnp.maximum(h, 0.0)
        return h

    mu = mlp(x, params["enc_mu"])
    log_sigma = mlp(x, params["enc_sigma"])
    sigma = jnp.exp(0.5 * log_sigma)
    z = mu + sigma * noise
    x_hat = mlp(z, params["dec"])
    if normalize_decoder:
        ssq = jnp.sum(x_hat * x_hat, axis=1, keepdims=True)
        x_hat = x_hat * jax.lax.rsqrt(jnp.maximum(ssq, 1e-24))
    return x_hat, mu, log_sigma


if __name__ == "__main__":
    # Module defaults: input_dim=512, hidden=512, latent_dim=64.
    # Batch 512 -> four 128-row tiles (pipelined grid; both v7x TCs busy).
    BATCH = 512
    INPUT_DIM = 512
    HIDDEN = 512
    LATENT_DIM = 64

    key = jax.random.PRNGKey(0)
    k_params, k_x, k_noise = jax.random.split(key, 3)

    params = init_params(k_params, INPUT_DIM, HIDDEN, LATENT_DIM)
    x = jax.random.normal(k_x, (BATCH, INPUT_DIM), jnp.float32)
    # torch.randn_like(sigma) -> deterministic host-side Gaussian noise passed in.
    noise = jax.random.normal(k_noise, (BATCH, LATENT_DIM), jnp.float32)

    for norm in (False, True):
        x_hat, mu, log_sigma = vae_forward(x, noise, params,
                                           normalize_decoder=norm, batch_tile=128)
        jax.block_until_ready((x_hat, mu, log_sigma))

        x_hat_r, mu_r, ls_r = reference_forward(x, noise, params,
                                                normalize_decoder=norm)
        assert x_hat.shape == (BATCH, INPUT_DIM)
        assert mu.shape == (BATCH, LATENT_DIM)
        assert log_sigma.shape == (BATCH, LATENT_DIM)
        # bf16 matmuls -> slightly looser tolerances than a pure-f32 version.
        assert jnp.allclose(mu, mu_r, atol=5e-3, rtol=5e-3), "mu mismatch"
        assert jnp.allclose(log_sigma, ls_r, atol=5e-3, rtol=5e-3), "log_sigma mismatch"
        assert jnp.allclose(x_hat, x_hat_r, atol=5e-3, rtol=5e-3), "x_hat mismatch"

    print("KERNEL_OK")
</pallas_src>

<mosaic_0001>
module attributes {stable_mosaic.version = 11 : i64} {
  func.func @_vae_kernel(%arg0: i32, %arg1: memref<128x512xbf16, #tpu.memory_space<vmem>>, %arg2: memref<128x64xf32, #tpu.memory_space<vmem>>, %arg3: memref<512x1024xbf16, #tpu.memory_space<vmem>>, %arg4: memref<512x512xbf16, #tpu.memory_space<vmem>>, %arg5: memref<512x512xbf16, #tpu.memory_space<vmem>>, %arg6: memref<1024x128xbf16, #tpu.memory_space<vmem>>, %arg7: memref<64x512xbf16, #tpu.memory_space<vmem>>, %arg8: memref<512x512xbf16, #tpu.memory_space<vmem>>, %arg9: memref<512x512xbf16, #tpu.memory_space<vmem>>, %arg10: memref<1x3712xf32, #tpu.memory_space<vmem>>, %arg11: memref<128x512xf32, #tpu.memory_space<vmem>>, %arg12: memref<128x128xf32, #tpu.memory_space<vmem>>) attributes {dimension_semantics = [#tpu.dimension_semantics<parallel>], iteration_bounds = array<i64: 4>, scalar_prefetch = 0 : i64, scratch_operands = 0 : i64, tpu.core_type = #tpu.core_type<tc>, window_params = [{transform_indices = @transform_0, window_bounds = array<i64: 128, 512>}, {transform_indices = @transform_1, window_bounds = array<i64: 128, 64>}, {pipeline_mode = #tpu.pipeline_mode<synchronous>, transform_indices = @transform_2, window_bounds = array<i64: 512, 1024>}, {pipeline_mode = #tpu.pipeline_mode<synchronous>, transform_indices = @transform_3, window_bounds = array<i64: 512, 512>}, {pipeline_mode = #tpu.pipeline_mode<synchronous>, transform_indices = @transform_4, window_bounds = array<i64: 512, 512>}, {pipeline_mode = #tpu.pipeline_mode<synchronous>, transform_indices = @transform_5, window_bounds = array<i64: 1024, 128>}, {pipeline_mode = #tpu.pipeline_mode<synchronous>, transform_indices = @transform_6, window_bounds = array<i64: 64, 512>}, {pipeline_mode = #tpu.pipeline_mode<synchronous>, transform_indices = @transform_7, window_bounds = array<i64: 512, 512>}, {pipeline_mode = #tpu.pipeline_mode<synchronous>, transform_indices = @transform_8, window_bounds = array<i64: 512, 512>}, {pipeline_mode = #tpu.pipeline_mode<synchronous>, transform_indices = @transform_9, window_bounds = array<i64: 1, 3712>}, {transform_indices = @transform_10, window_bounds = array<i64: 128, 512>}, {transform_indices = @transform_11, window_bounds = array<i64: 128, 128>}]} {
    %c0 = arith.constant 0 : index
    %c0_0 = arith.constant 0 : index
    %0 = vector.load %arg1[%c0, %c0_0] : memref<128x512xbf16, #tpu.memory_space<vmem>>, vector<128x512xbf16>
    %c0_1 = arith.constant 0 : index
    %c0_2 = arith.constant 0 : index
    %1 = vector.load %arg3[%c0_1, %c0_2] : memref<512x1024xbf16, #tpu.memory_space<vmem>>, vector<512x1024xbf16>
    %cst = arith.constant dense<0.000000e+00> : vector<128x1024xf32>
    %2 = tpu.matmul %0, %1, %cst {dimension_numbers = #tpu.dot_dimension_numbers<[1], [0], [0], [1], [0, 0, 1, 1], [], []>} : vector<128x512xbf16>, vector<512x1024xbf16>, vector<128x1024xf32> -> vector<128x1024xf32>
    %c0_3 = arith.constant 0 : index
    %c0_4 = arith.constant 0 : index
    %3 = vector.load %arg10[%c0_3, %c0_4] : memref<1x3712xf32, #tpu.memory_space<vmem>>, vector<1x1024xf32>
    %4 = vector.broadcast %3 : vector<1x1024xf32> to vector<128x1024xf32>
    %5 = arith.addf %2, %4 : vector<128x1024xf32>
    %cst_5 = arith.constant 0.000000e+00 : f32
    %6 = vector.broadcast %cst_5 : f32 to vector<128x1024xf32>
    %7 = arith.maximumf %5, %6 : vector<128x1024xf32>
    %8 = vector.extract_strided_slice %7 {offsets = [0, 0], sizes = [128, 512], strides = [1, 1]} : vector<128x1024xf32> to vector<128x512xf32>
    %9 = arith.truncf %8 : vector<128x512xf32> to vector<128x512xbf16>
    %10 = vector.extract_strided_slice %7 {offsets = [0, 512], sizes = [128, 512], strides = [1, 1]} : vector<128x1024xf32> to vector<128x512xf32>
    %11 = arith.truncf %10 : vector<128x512xf32> to vector<128x512xbf16>
    %c0_6 = arith.constant 0 : index
    %c0_7 = arith.constant 0 : index
    %12 = vector.load %arg4[%c0_6, %c0_7] : memref<512x512xbf16, #tpu.memory_space<vmem>>, vector<512x512xbf16>
    %cst_8 = arith.constant dense<0.000000e+00> : vector<128x512xf32>
    %13 = tpu.matmul %9, %12, %cst_8 {dimension_numbers = #tpu.dot_dimension_numbers<[1], [0], [0], [1], [0, 0, 1, 1], [], []>} : vector<128x512xbf16>, vector<512x512xbf16>, vector<128x512xf32> -> vector<128x512xf32>
    %c0_9 = arith.constant 0 : index
    %c1024 = arith.constant 1024 : index
    %14 = vector.load %arg10[%c0_9, %c1024] : memref<1x3712xf32, #tpu.memory_space<vmem>>, vector<1x512xf32>
    %15 = vector.broadcast %14 : vector<1x512xf32> to vector<128x512xf32>
    %16 = arith.addf %13, %15 : vector<128x512xf32>
    %cst_10 = arith.constant 0.000000e+00 : f32
    %17 = vector.broadcast %cst_10 : f32 to vector<128x512xf32>
    %18 = arith.maximumf %16, %17 : vector<128x512xf32>
    %19 = arith.truncf %18 : vector<128x512xf32> to vector<128x512xbf16>
    %c0_11 = arith.constant 0 : index
    %c0_12 = arith.constant 0 : index
    %20 = vector.load %arg5[%c0_11, %c0_12] : memref<512x512xbf16, #tpu.memory_space<vmem>>, vector<512x512xbf16>
    %cst_13 = arith.constant dense<0.000000e+00> : vector<128x512xf32>
    %21 = tpu.matmul %11, %20, %cst_13 {dimension_numbers = #tpu.dot_dimension_numbers<[1], [0], [0], [1], [0, 0, 1, 1], [], []>} : vector<128x512xbf16>, vector<512x512xbf16>, vector<128x512xf32> -> vector<128x512xf32>
    %c0_14 = arith.constant 0 : index
    %c1536 = arith.constant 1536 : index
    %22 = vector.load %arg10[%c0_14, %c1536] : memref<1x3712xf32, #tpu.memory_space<vmem>>, vector<1x512xf32>
    %23 = vector.broadcast %22 : vector<1x512xf32> to vector<128x512xf32>
    %24 = arith.addf %21, %23 : vector<128x512xf32>
    %cst_15 = arith.constant 0.000000e+00 : f32
    %25 = vector.broadcast %cst_15 : f32 to vector<128x512xf32>
    %26 = arith.maximumf %24, %25 : vector<128x512xf32>
    %27 = arith.truncf %26 : vector<128x512xf32> to vector<128x512xbf16>
    %28 = tpu.concatenate %19, %27 in 1 : vector<128x512xbf16>, vector<128x512xbf16> -> vector<128x1024xbf16>
    %c0_16 = arith.constant 0 : index
    %c0_17 = arith.constant 0 : index
    %29 = vector.load %arg6[%c0_16, %c0_17] : memref<1024x128xbf16, #tpu.memory_space<vmem>>, vector<1024x128xbf16>
    %cst_18 = arith.constant dense<0.000000e+00> : vector<128x128xf32>
    %30 = tpu.matmul %28, %29, %cst_18 {dimension_numbers = #tpu.dot_dimension_numbers<[1], [0], [0], [1], [0, 0, 1, 1], [], []>} : vector<128x1024xbf16>, vector<1024x128xbf16>, vector<128x128xf32> -> vector<128x128xf32>
    %c0_19 = arith.constant 0 : index
    %c2048 = arith.constant 2048 : index
    %31 = vector.load %arg10[%c0_19, %c2048] : memref<1x3712xf32, #tpu.memory_space<vmem>>, vector<1x128xf32>
    %32 = vector.broadcast %31 : vector<1x128xf32> to vector<128x128xf32>
    %33 = arith.addf %30, %32 : vector<128x128xf32>
    %34 = vector.extract_strided_slice %33 {offsets = [0, 0], sizes = [128, 64], strides = [1, 1]} : vector<128x128xf32> to vector<128x64xf32>
    %c64_i32 = arith.constant 64 : i32
    %35 = tpu.dynamic_rotate %33 by %c64_i32 dim 1 : vector<128x128xf32>, i32 -> vector<128x128xf32>
    %36 = vector.extract_strided_slice %35 {offsets = [0, 0], sizes = [128, 64], strides = [1, 1]} : vector<128x128xf32> to vector<128x64xf32>
    %cst_20 = arith.constant 5.000000e-01 : f32
    %37 = vector.broadcast %cst_20 : f32 to vector<128x64xf32>
    %38 = arith.mulf %37, %36 : vector<128x64xf32>
    %39 = math.exp %38 : vector<128x64xf32>
    %c0_21 = arith.constant 0 : index
    %c0_22 = arith.constant 0 : index
    %40 = vector.load %arg2[%c0_21, %c0_22] : memref<128x64xf32, #tpu.memory_space<vmem>>, vector<128x64xf32>
    %41 = arith.mulf %39, %40 : vector<128x64xf32>
    %42 = arith.addf %34, %41 : vector<128x64xf32>
    %43 = arith.truncf %42 : vector<128x64xf32> to vector<128x64xbf16>
    %c0_23 = arith.constant 0 : index
    %c0_24 = arith.constant 0 : index
    %44 = vector.load %arg7[%c0_23, %c0_24] : memref<64x512xbf16, #tpu.memory_space<vmem>>, vector<64x512xbf16>
    %cst_25 = arith.constant dense<0.000000e+00> : vector<128x512xf32>
    %45 = tpu.matmul %43, %44, %cst_25 {dimension_numbers = #tpu.dot_dimension_numbers<[1], [0], [0], [1], [0, 0, 1, 1], [], []>} : vector<128x64xbf16>, vector<64x512xbf16>, vector<128x512xf32> -> vector<128x512xf32>
    %c0_26 = arith.constant 0 : index
    %c2176 = arith.constant 2176 : index
    %46 = vector.load %arg10[%c0_26, %c2176] : memref<1x3712xf32, #tpu.memory_space<vmem>>, vector<1x512xf32>
    %47 = vector.broadcast %46 : vector<1x512xf32> to vector<128x512xf32>
    %48 = arith.addf %45, %47 : vector<128x512xf32>
    %cst_27 = arith.constant 0.000000e+00 : f32
    %49 = vector.broadcast %cst_27 : f32 to vector<128x512xf32>
    %50 = arith.maximumf %48, %49 : vector<128x512xf32>
    %51 = arith.truncf %50 : vector<128x512xf32> to vector<128x512xbf16>
    %c0_28 = arith.constant 0 : index
    %c0_29 = arith.constant 0 : index
    %52 = vector.load %arg8[%c0_28, %c0_29] : memref<512x512xbf16, #tpu.memory_space<vmem>>, vector<512x512xbf16>
    %cst_30 = arith.constant dense<0.000000e+00> : vector<128x512xf32>
    %53 = tpu.matmul %51, %52, %cst_30 {dimension_numbers = #tpu.dot_dimension_numbers<[1], [0], [0], [1], [0, 0, 1, 1], [], []>} : vector<128x512xbf16>, vector<512x512xbf16>, vector<128x512xf32> -> vector<128x512xf32>
    %c0_31 = arith.constant 0 : index
    %c2688 = arith.constant 2688 : index
    %54 = vector.load %arg10[%c0_31, %c2688] : memref<1x3712xf32, #tpu.memory_space<vmem>>, vector<1x512xf32>
    %55 = vector.broadcast %54 : vector<1x512xf32> to vector<128x512xf32>
    %56 = arith.addf %53, %55 : vector<128x512xf32>
    %cst_32 = arith.constant 0.000000e+00 : f32
    %57 = vector.broadcast %cst_32 : f32 to vector<128x512xf32>
    %58 = arith.maximumf %56, %57 : vector<128x512xf32>
    %59 = arith.truncf %58 : vector<128x512xf32> to vector<128x512xbf16>
    %c0_33 = arith.constant 0 : index
    %c0_34 = arith.constant 0 : index
    %60 = vector.load %arg9[%c0_33, %c0_34] : memref<512x512xbf16, #tpu.memory_space<vmem>>, vector<512x512xbf16>
    %cst_35 = arith.constant dense<0.000000e+00> : vector<128x512xf32>
    %61 = tpu.matmul %59, %60, %cst_35 {dimension_numbers = #tpu.dot_dimension_numbers<[1], [0], [0], [1], [0, 0, 1, 1], [], []>} : vector<128x512xbf16>, vector<512x512xbf16>, vector<128x512xf32> -> vector<128x512xf32>
    %c0_36 = arith.constant 0 : index
    %c3200 = arith.constant 3200 : index
    %62 = vector.load %arg10[%c0_36, %c3200] : memref<1x3712xf32, #tpu.memory_space<vmem>>, vector<1x512xf32>
    %63 = vector.broadcast %62 : vector<1x512xf32> to vector<128x512xf32>
    %64 = arith.addf %61, %63 : vector<128x512xf32>
    %c0_37 = arith.constant 0 : index
    %c0_38 = arith.constant 0 : index
    %65 = vector.load %arg11[%c0_37, %c0_38] : memref<128x512xf32, #tpu.memory_space<vmem>>, vector<128x512xf32>
    tpu.vector_store %arg11[%c0_37, %c0_38], %64 {strides = array<i32>} : memref<128x512xf32, #tpu.memory_space<vmem>>, vector<128x512xf32>,
    %c0_39 = arith.constant 0 : index
    %c0_40 = arith.constant 0 : index
    %66 = vector.load %arg12[%c0_39, %c0_40] : memref<128x128xf32, #tpu.memory_space<vmem>>, vector<128x128xf32>
    tpu.vector_store %arg12[%c0_39, %c0_40], %33 {strides = array<i32>} : memref<128x128xf32, #tpu.memory_space<vmem>>, vector<128x128xf32>,
    return
  }
  func.func @transform_0(%arg0: i32) -> (i32, i32) {
    %c0_i32 = arith.constant 0 : i32
    %c0_i32_0 = arith.constant 0 : i32
    return %arg0, %c0_i32 : i32, i32
  }
  func.func @transform_1(%arg0: i32) -> (i32, i32) {
    %c0_i32 = arith.constant 0 : i32
    %c0_i32_0 = arith.constant 0 : i32
    return %arg0, %c0_i32 : i32, i32
  }
  func.func @transform_2(%arg0: i32) -> (i32, i32) {
    %c0_i32 = arith.constant 0 : i32
    %c0_i32_0 = arith.constant 0 : i32
    %c0_i32_1 = arith.constant 0 : i32
    return %c0_i32, %c0_i32_0 : i32, i32
  }
  func.func @transform_3(%arg0: i32) -> (i32, i32) {
    %c0_i32 = arith.constant 0 : i32
    %c0_i32_0 = arith.constant 0 : i32
    %c0_i32_1 = arith.constant 0 : i32
    return %c0_i32, %c0_i32_0 : i32, i32
  }
  func.func @transform_4(%arg0: i32) -> (i32, i32) {
    %c0_i32 = arith.constant 0 : i32
    %c0_i32_0 = arith.constant 0 : i32
    %c0_i32_1 = arith.constant 0 : i32
    return %c0_i32, %c0_i32_0 : i32, i32
  }
  func.func @transform_5(%arg0: i32) -> (i32, i32) {
    %c0_i32 = arith.constant 0 : i32
    %c0_i32_0 = arith.constant 0 : i32
    %c0_i32_1 = arith.constant 0 : i32
    return %c0_i32, %c0_i32_0 : i32, i32
  }
  func.func @transform_6(%arg0: i32) -> (i32, i32) {
    %c0_i32 = arith.constant 0 : i32
    %c0_i32_0 = arith.constant 0 : i32
    %c0_i32_1 = arith.constant 0 : i32
    return %c0_i32, %c0_i32_0 : i32, i32
  }
  func.func @transform_7(%arg0: i32) -> (i32, i32) {
    %c0_i32 = arith.constant 0 : i32
    %c0_i32_0 = arith.constant 0 : i32
    %c0_i32_1 = arith.constant 0 : i32
    return %c0_i32, %c0_i32_0 : i32, i32
  }
  func.func @transform_8(%arg0: i32) -> (i32, i32) {
    %c0_i32 = arith.constant 0 : i32
    %c0_i32_0 = arith.constant 0 : i32
    %c0_i32_1 = arith.constant 0 : i32
    return %c0_i32, %c0_i32_0 : i32, i32
  }
  func.func @transform_9(%arg0: i32) -> (i32, i32) {
    %c0_i32 = arith.constant 0 : i32
    %c0_i32_0 = arith.constant 0 : i32
    %c0_i32_1 = arith.constant 0 : i32
    return %c0_i32, %c0_i32_0 : i32, i32
  }
  func.func @transform_10(%arg0: i32) -> (i32, i32) {
    %c0_i32 = arith.constant 0 : i32
    %c0_i32_0 = arith.constant 0 : i32
    return %arg0, %c0_i32 : i32, i32
  }
  func.func @transform_11(%arg0: i32) -> (i32, i32) {
    %c0_i32 = arith.constant 0 : i32
    %c0_i32_0 = arith.constant 0 : i32
    return %arg0, %c0_i32 : i32, i32
  }
}

</mosaic_0001>

<bundles_post_ra>
// kernel: tpu_custom_call.1
= control target key start
LH: loop header
LB: loop body
LE: loop exit
PB: predicated region body
PF: predicated region fallthrough
CT: control target
= control target key end

     0   :  { %s15596_s0 = inlined_call_operand.hbm [shape: bf16[512,512], index: 0, kind: input, shape index: {}]   ;;  %s15597_s1 = inlined_call_operand.vmem [shape: f32[512,64], index: 1, kind: input, shape index: {}]   ;;  %s15598_s2 = inlined_call_operand.hbm [shape: bf16[512,1024], index: 2, kind: input, shape index: {}]   ;;  %s15599_s3 = inlined_call_operand.hbm [shape: bf16[512,512], index: 3, kind: input, shape index: {}]   ;;  %s15600_s4 = inlined_call_operand.hbm [shape: bf16[512,512], index: 4, kind: input, shape index: {}]   ;;  %s15601_s5 = inlined_call_operand.vmem [shape: bf16[1024,128], index: 5, kind: input, shape index: {}]   ;;  %s15602_s6 = inlined_call_operand.vmem [shape: bf16[64,512], index: 6, kind: input, shape index: {}]   ;;  %s15603_s7 = inlined_call_operand.hbm [shape: bf16[512,512], index: 7, kind: input, shape index: {}]   ;;  %s15604_s8 = inlined_call_operand.hbm [shape: bf16[512,512], index: 8, kind: input, shape index: {}]   ;;  %s15605_s9 = inlined_call_operand.vmem [shape: f32[1,3712], index: 9, kind: input, shape index: {}]   ;;  %s15606_s10 = inlined_call_operand.hbm [shape: f32[512,512], index: 10, kind: output, shape index: {0}]   ;;  %s15607_s11 = inlined_call_operand.hbm [shape: f32[512,128], index: 11, kind: output, shape index: {1}]  }
   0x1   :  { %15614 = sst [smem:[#allocation22_spill]] %s15597_s1 }
   0x2   :  { %15615 = sst [smem:[#allocation23_spill]] %s15598_s2 }
   0x3   :  { %15616 = sst [smem:[#allocation24_spill]] %s15606_s10 }
   0x4   :  { %15617 = sst [smem:[#allocation25_spill]] %s15607_s11 }
   0x5   :  { %17 = vsyncpa [#allocation3], 0 }
   0x6   :  { %19 = vsyncpa [#allocation3 + $0x1], 0 }
   0x7   :  { %20 = vsyncpa [#allocation6], 0 }
   0x8   :  { %21 = vsyncpa [#allocation9], 0 }
   0x9   :  { %22 = vsyncpa [#allocation12], 0 }
   0xa   :  { %23 = vsyncpa [#allocation4], 0 }
   0xb   :  { %25 = vsyncpa [#allocation4 + $0x1], 0 }
   0xc   :  { %26 = vsyncpa [#allocation15], 0 }
   0xd   :  { %28 = vsyncpa [#allocation15 + $0x1], 0  ;;  %s13826_s17 = smov 0   ;;  %s13828_s18 = smov 0  }
   0xe   :  { %s13830_s19 = smov 0   ;;  %s13832_s20 = smov 0  }
   0xf LB: > { %s13748_s21 = smov [#allocation5]   ;;  %s13847_s23 = sadd.s32 4294967295, %s13746_s20   ;;  %s13746_s20 = sphi %s13832_s20, %s15643_s20   ;;  %s13742_s19 = sphi %s13830_s19, %s15642_s19   ;;  %s13738_s18 = sphi %s13828_s18, %s15641_s18   ;;  %s13734_s17 = sphi %s13826_s17, %s15640_s17  }
  0x10   : > { %s323_s22 = sshll.u32 %s13748_s21, 4  ;;  %p10428_p0 = scmp.ge.s32.totalorder %s13746_s20, 1  ;;  %s13852_s22 = int_to_ptr.vmem [resolvable:$true] %s323_s22 }
  0x11   : > { %p15610_p1 = scmp.eq.s32.totalorder %s13847_s23, 0  ;;  %p311_p2 = scmp.lt.s32.totalorder %s13746_s20, 5 }
  0x12   : > { %s13749_s26 = smov [#allocation8]   ;;  %s13750_s28 = smov [#allocation7]  }
  0x13   : > { %p13854_p3 = pnand %p10428_p0, %p311_p2  ;;  %s349_s27 = sshll.u32 %s13749_s26, 4  ;;  %s13866_s27 = int_to_ptr.vmem [resolvable:$true] %s349_s27 }
  0x14   : > { %s13868_s29 = sshll.u32 %s13750_s28, 4  ;;  %s15620_s2 = sld [smem:[#allocation23_spill]]  ;;  %s337_s29 = int_to_ptr.vmem [resolvable:$true] %s13868_s29 }
  0x15   : > { %s15618_s24 = scalar_select %p13854_p3, 1, 0 }
  0x16   : > { %p12411_p4 = pneg %p13854_p3 }
  0x18   : > { %p13862_p5 = pnand %p12411_p4, %p15610_p1 }
  0x1a   : > { %s13466_s13 = scalar_lea.hbm %s15620_s2, 32768  ;;  %p13878_p7 = pneg %p13862_p5 }
  0x1b   : > { %p13467_p6 = scmp.ne.s32.totalorder %s15620_s2, %s13466_s13  ;;  %p13473_p10 = scmp.lt.u32.totalorder %s13466_s13, %s15620_s2 }
  0x1d   : > { %p13469_p8 = pnand %p13878_p7, %p13467_p6 }
  0x1f   : > { %p13470_p9 = pneg %p13469_p8 }
  0x21   : > { %p13475_p11 = pnand %p13473_p10, %p13470_p9 }
  0x23   : > { %13478 = shalt.err (!%p13475_p11)
}
  0x24   : > { %s13479_s28 = scalar_lea.vmem %s13852_s22, 32768  ;;  %p13487_p2 = scmp.lt.s32.totalorder %s13852_s22, %s13852_s22 }
  0x25   : > { %p13480_p12 = scmp.ne.s32.totalorder %s13852_s22, %s13479_s28  ;;  %p13488_p4 = scmp.lt.s32.totalorder %s13479_s28, %s13479_s28 }
  0x27   : > { %p13482_p13 = pnand %p13480_p12, %p13878_p7  ;;  %p13489_p6 = por %p13488_p4, %p13487_p2 }
  0x29   : > { %p13483_p0 = pneg %p13482_p13 }
  0x2b   : > { %p13490_p8 = pnand %p13489_p6, %p13483_p0 }
  0x2d   : > { %13493 = shalt.err (!%p13490_p8)
}
  0x2e   : > { %s13751_s30 = smov 512   ;;  %s13752_s12 = smov 32  }
  0x2f   : > { %12414 = dma.hbm_to_vmem [thread:$0]  (!%p13862_p5), %s15620_s2, 32768, %s13852_s22, [#allocation6], %s13751_s30, %s13751_s30, %s13752_s12  }
  0x30   : > { %s13494_s26 = scalar_lea.hbm %s15600_s4, 16384 }
  0x31   : > { %p13495_p9 = scmp.ne.s32.totalorder %s15600_s4, %s13494_s26  ;;  %p13501_p12 = scmp.lt.u32.totalorder %s13494_s26, %s15600_s4 }
  0x33   : > { %p13497_p10 = pnand %p13495_p9, %p13878_p7 }
  0x35   : > { %p13498_p11 = pneg %p13497_p10 }
  0x37   : > { %p13503_p13 = pnand %p13501_p12, %p13498_p11 }
  0x39   : > { %13506 = shalt.err (!%p13503_p13)
}
  0x3a   : > { %s13507_s22 = scalar_lea.vmem %s13866_s27, 16384  ;;  %p13515_p6 = scmp.lt.s32.totalorder %s13866_s27, %s13866_s27 }
  0x3b   : > { %p13508_p0 = scmp.ne.s32.totalorder %s13866_s27, %s13507_s22  ;;  %p13516_p8 = scmp.lt.s32.totalorder %s13507_s22, %s13507_s22 }
  0x3d   : > { %p13510_p2 = pnand %p13508_p0, %p13878_p7  ;;  %p13517_p9 = por %p13516_p8, %p13515_p6 }
  0x3f   : > { %p13511_p4 = pneg %p13510_p2 }
  0x41   : > { %p13518_p10 = pnand %p13517_p9, %p13511_p4 }
  0x43   : > { %13521 = shalt.err (!%p13518_p10)
}
  0x44   : > { %s15612_s10 = smov 256   ;;  %s13754_s1 = smov 16  }
  0x45   : > { %12420 = dma.hbm_to_vmem [thread:$0]  (!%p13862_p5), %s15600_s4, 16384, %s13866_s27, [#allocation9], %s15612_s10, %s15612_s10, %s13754_s1  }
  0x46   : > { %s13522_s14 = scalar_lea.hbm %s15599_s3, 16384 }
  0x47   : > { %p13523_p11 = scmp.ne.s32.totalorder %s15599_s3, %s13522_s14  ;;  %p13529_p0 = scmp.lt.u32.totalorder %s13522_s14, %s15599_s3 }
  0x49   : > { %p13525_p12 = pnand %p13523_p11, %p13878_p7 }
  0x4b   : > { %p13526_p13 = pneg %p13525_p12 }
  0x4d   : > { %p13531_p2 = pnand %p13529_p0, %p13526_p13 }
  0x4f   : > { %13534 = shalt.err (!%p13531_p2)
}
  0x50   : > { %s13535_s22 = scalar_lea.vmem %s337_s29, 16384  ;;  %p13543_p9 = scmp.lt.s32.totalorder %s337_s29, %s337_s29 }
  0x51   : > { %p13536_p4 = scmp.ne.s32.totalorder %s337_s29, %s13535_s22  ;;  %p13544_p10 = scmp.lt.s32.totalorder %s13535_s22, %s13535_s22 }
  0x53   : > { %p13538_p6 = pnand %p13536_p4, %p13878_p7  ;;  %p13545_p1 = por %p13544_p10, %p13543_p9 }
  0x55   : > { %p13539_p8 = pneg %p13538_p6 }
  0x57   : > { %p13546_p3 = pnand %p13545_p1, %p13539_p8 }
  0x59   : > { %13549 = shalt.err (!%p13546_p3)
}
  0x5a   : > { %12417 = dma.hbm_to_vmem [thread:$0]  (!%p13862_p5), %s15599_s3, 16384, %s337_s29, [#allocation6], %s15612_s10, %s15612_s10, %s13754_s1  }
  0x5b   : > { %s13755_s30 = smov [#allocation10]   ;;  %s13756_s13 = smov [#allocation11]  }
  0x5c   : > { %s368_s12 = sshll.u32 %s13755_s30, 4  ;;  %s381_s14 = sshll.u32 %s13756_s13, 4  ;;  %s369_s12 = int_to_ptr.vmem [resolvable:$true] %s368_s12  ;;  %s382_s14 = int_to_ptr.vmem [resolvable:$true] %s381_s14 }
  0x5d   : > { %s13550_s26 = scalar_lea.hbm %s15603_s7, 16384 }
  0x5e   : > { %p13551_p1 = scmp.ne.s32.totalorder %s15603_s7, %s13550_s26  ;;  %p13557_p12 = scmp.lt.u32.totalorder %s13550_s26, %s15603_s7 }
  0x60   : > { %p13553_p3 = pnand %p13551_p1, %p13878_p7 }
  0x62   : > { %p13554_p11 = pneg %p13553_p3 }
  0x64   : > { %p13559_p13 = pnand %p13557_p12, %p13554_p11 }
  0x66   : > { %13562 = shalt.err (!%p13559_p13)
}
  0x67   : > { %s13563_s29 = scalar_lea.vmem %s369_s12, 16384  ;;  %p13571_p6 = scmp.lt.s32.totalorder %s369_s12, %s369_s12 }
  0x68   : > { %p13564_p0 = scmp.ne.s32.totalorder %s369_s12, %s13563_s29  ;;  %p13572_p8 = scmp.lt.s32.totalorder %s13563_s29, %s13563_s29 }
  0x6a   : > { %p13566_p2 = pnand %p13564_p0, %p13878_p7  ;;  %p13573_p9 = por %p13572_p8, %p13571_p6 }
  0x6c   : > { %p13567_p4 = pneg %p13566_p2 }
  0x6e   : > { %p13574_p10 = pnand %p13573_p9, %p13567_p4 }
  0x70   : > { %13577 = shalt.err (!%p13574_p10)
}
  0x71   : > { %12423 = dma.hbm_to_vmem [thread:$0]  (!%p13862_p5), %s15603_s7, 16384, %s369_s12, [#allocation9], %s15612_s10, %s15612_s10, %s13754_s1  }
  0x72   : > { %s13578_s15 = scalar_lea.hbm %s15604_s8, 16384 }
  0x73   : > { %p13579_p1 = scmp.ne.s32.totalorder %s15604_s8, %s13578_s15  ;;  %p13585_p12 = scmp.lt.u32.totalorder %s13578_s15, %s15604_s8 }
  0x75   : > { %p13581_p3 = pnand %p13579_p1, %p13878_p7 }
  0x77   : > { %p13582_p11 = pneg %p13581_p3 }
  0x79   : > { %p13587_p13 = pnand %p13585_p12, %p13582_p11 }
  0x7b   : > { %13590 = shalt.err (!%p13587_p13)
}
  0x7c   : > { %s13591_s27 = scalar_lea.vmem %s382_s14, 16384  ;;  %p13599_p6 = scmp.lt.s32.totalorder %s382_s14, %s382_s14 }
  0x7d   : > { %p13592_p0 = scmp.ne.s32.totalorder %s382_s14, %s13591_s27  ;;  %p13600_p8 = scmp.lt.s32.totalorder %s13591_s27, %s13591_s27 }
  0x7f   : > { %p13594_p2 = pnand %p13592_p0, %p13878_p7  ;;  %p13601_p9 = por %p13600_p8, %p13599_p6 }
  0x81   : > { %p13595_p4 = pneg %p13594_p2 }
  0x83   : > { %p13602_p10 = pnand %p13601_p9, %p13595_p4 }
  0x85   : > { %13605 = shalt.err (!%p13602_p10)
}
  0x86   : > { %12426 = dma.hbm_to_vmem [thread:$0]  (!%p13862_p5), %s15604_s8, 16384, %s382_s14, [#allocation12], %s15612_s10, %s15612_s10, %s13754_s1  }
  0x87   : > { %s10427_s25 = sadd.s32 4294967294, %s13746_s20   ;;  %s13991_s16 = sadd.s32 1, %s13746_s20  }
  0x88   : > { %s41_s2 = sadd.s32 1, %s13742_s19  ;;  %s38_s11 = ssub.s32 %s13746_s20, %s13991_s16 }
  0x89   : > { %p48_p7 = scmp.ne.s32.totalorder %s13742_s19, %s13738_s18  ;;  %p39_p1 = scmp.eq.s32.totalorder %s38_s11, 0 }
  0x8a   : > { %p49_p3 = scmp.eq.s32.totalorder %s13746_s20, 0  ;;  %p54_p11 = scmp.ne.s32.totalorder %s13738_s18, %s13734_s17 }
  0x8b   : > { %p272_p12 = scmp.eq.s32.totalorder %s13847_s23, 3  ;;  %p15622_p0 = scmp.eq.s32.totalorder %s13847_s23, 0 }
  0x8c   : > { %s14003_s30 = scalar_select %p39_p1, %s13742_s19, %s41_s2  }
  0x8d   : > { %p50_p13 = por %p49_p3, %p48_p7  ;;  %p14007_p2 = por %p15622_p0, %p54_p11 }
  0x8e   : > { %p14011_p5 = por %p272_p12, %p48_p7  ;;  %p278_p4 = scmp.eq.s32.totalorder %s10427_s25, 3 }
  0x8f   : > { %p12443_p6 = scmp.lt.s32.totalorder %s13746_s20, 4  ;;  %s398_s15 = sand.u32 1, %s13742_s19  }
  0x90   : > { %s15624_s14 = scalar_select %p14011_p5, 1, 0 }
  0x91   : > { %p14017_p8 = por %p278_p4, %p54_p11  ;;  %s10435_s26 = sshll.u32 %s398_s15, 8 }
  0x92   : > { %s11357_s28 = sshll.u32 %s13746_s20, 12  ;;  %s402_s29 = scalar_lea.vmem [#allocation2], %s10435_s26 }
  0x93   : > { %s15625_s21 = scalar_select %p14017_p8, 1, 0 }
  0x94   : > { %s14025_s12 = scalar_lea.hbm %s15596_s0, %s11357_s28  ;;  %s410_s2 = sshll.u32 %s402_s29, 4  ;;  %s14031_s2 = int_to_ptr.vmem [resolvable:$true] %s410_s2 }
  0x95   : > { %p14027_p9 = pnand %p12443_p6, %p50_p13  ;;  %s14033_s11 = scalar_lea.sflag [#allocation3], %s398_s15 }
  0x96   : > { %s13606_s10 = scalar_lea.hbm %s14025_s12, 4096  ;;  %s13611_s22 = scalar_lea.hbm %s15596_s0, 16384 }
  0x97   : > { %p13607_p10 = scmp.ne.s32.totalorder %s14025_s12, %s13606_s10  ;;  %p13608_p7 = pneg %p14027_p9 }
  0x98   : > { %p13612_p11 = scmp.lt.u32.totalorder %s14025_s12, %s15596_s0  ;;  %p13613_p12 = scmp.lt.u32.totalorder %s13611_s22, %s13606_s10 }
  0x99   : > { %p13609_p1 = pnand %p13608_p7, %p13607_p10  ;;  %p13615_p0 = scmp.lt.u32.totalorder %s13606_s10, %s14025_s12 }
  0x9a   : > { %p13614_p13 = por %p13613_p12, %p13612_p11 }
  0x9b   : > { %p13610_p3 = pneg %p13609_p1 }
  0x9c   : > { %p13616_p4 = por %p13615_p0, %p13614_p13 }
  0x9e   : > { %p13617_p6 = pnand %p13616_p4, %p13610_p3 }
  0xa0   : > { %13620 = shalt.err (!%p13617_p6)
}
  0xa1   : > { %s13621_s15 = scalar_lea.vmem %s14031_s2, 4096  ;;  %s13757_s26 = smov [#allocation2]  }
  0xa2   : > { %p13622_p10 = scmp.ne.s32.totalorder %s14031_s2, %s13621_s15  ;;  %s13626_s28 = sshll.u32 %s13757_s26, 4  ;;  %s13627_s28 = int_to_ptr.vmem [resolvable:$false] %s13626_s28 }
  0xa3   : > { %s13628_s27 = scalar_lea.vmem %s13627_s28, 8192  ;;  %p13629_p5 = scmp.lt.s32.totalorder %s14031_s2, %s13627_s28 }
  0xa4   : > { %p13624_p1 = pnand %p13622_p10, %p13608_p7  ;;  %p13630_p11 = scmp.lt.s32.totalorder %s13628_s27, %s13621_s15 }
  0xa6   : > { %p13625_p8 = pneg %p13624_p1  ;;  %p13631_p12 = por %p13630_p11, %p13629_p5 }
  0xa8   : > { %p13632_p13 = pnand %p13631_p12, %p13625_p8 }
  0xaa   : > { %13635 = shalt.err (!%p13632_p13)
}
  0xab   : > { %s15627_s10 = smov 256   ;;  %p15628_p7 = scmp.ne.s32.totalorder %s15618_s24, 0 }
  0xac   : > { %12430 = dma.hbm_to_vmem [thread:$0]  (!%p14027_p9), %s14025_s12, 4096, %s14031_s2, %s14033_s11, %s15627_s10, %s15627_s10, %s13754_s1  }
  0xad   : > { %431 = sbr.rel (%p15628_p7) target bundleno = 2180 (0x884), region = 60  ;;  %s14067_s22 = sand.u32 (!%p15628_p7), 1, %s13738_s18  }
  0xae   : > { %s10440_s29 = sshll.u32 (!%p15628_p7), %s14067_s22, 8  ;;  %s434_s15 = scalar_lea.sflag (!%p15628_p7), [#allocation3], %s14067_s22 }
  0xaf   : > { %s14071_s26 = scalar_lea.vmem (!%p15628_p7), [#allocation2], %s10440_s29 }
  0xb4   : > { %13709 = dma.done.wait (%p14007_p2), %s434_s15, 4096  }
  0xb5   : > { %13711 = vsyncadd (%p14007_p2), %s434_s15, 4294963200  ;;  %p15629_p5 = scmp.eq.s32.totalorder %s13847_s23, 0 }
  0xb7   : > { %13713 = dma.done.wait (%p15629_p5), [#allocation6], 49152   ;;  %p15630_p8 = pmov %p15629_p5 }
  0xb8   : > { %p15631_p9 = pmov %p15629_p5 }
  0xb9   : > { %13715 = vsyncadd (%p15630_p8), [#allocation6], 4294918144 }
  0xba   : > { %13717 = dma.done.wait (%p15631_p9), [#allocation9], 32768   ;;  %p15632_p3 = pmov %p15629_p5 }
  0xbc   : > { %13719 = vsyncadd (%p15632_p3), [#allocation9], 4294934528  ;;  %p15633_p0 = pmov %p15632_p3 }
  0xbe   : > { %13721 = dma.done.wait (%p15633_p0), [#allocation12], 16384   ;;  %p15634_p4 = pmov %p15633_p0 }
  0xbf   : > { %v548_v0 = vld [vmem:[#allocation5] sm:$0xff]  ;;  %v549_v2 = vld [vmem:[#allocation5 + $0x8] sm:$0xff]  ;;  %s10447_s28 = sshll.u32 %s14067_s22, 7  ;;  %s13758_s24 = smov 64   ;;  %vm7219_vm0 = vcmask 523264  }
  0xc0   : > { %13723 = vsyncadd (%p15634_p4), [#allocation12], 4294950912  ;;  %v552_v1 = vld [vmem:[#allocation5 + $0x20] sm:$0xff]  ;;  %v553_v4 = vld [vmem:[#allocation5 + $0x28] sm:$0xff]  ;;  %s10448_s11 = sshll.u32 %s13847_s23, 4  ;;  %s15635_s10 = sld [smem:[#allocation22_spill]] }
  0xc1   : > { %v10483_v3 = vcombine.high %v548_v0, %v552_v1  ;;  %v10482_v5 = vcombine.low %v548_v0, %v552_v1  ;;  %v556_v6 = vld [vmem:[#allocation5 + $0x40] sm:$0xff]  ;;  %v10485_v8 = vcombine.high %v549_v2, %v553_v4  ;;  %v10484_v9 = vcombine.low %v549_v2, %v553_v4  ;;  %v557_v11 = vld [vmem:[#allocation5 + $0x48] sm:$0xff]  ;;  %p508_p2 = scmp.lt.s32.totalorder %s10448_s11, 63  ;;  %s11360_s2 = sshll.u32 %s13847_s23, 11 }
  0xc2   : > { %v560_v7 = vld [vmem:[#allocation5 + $0x60] sm:$0xff]  ;;  %v561_v12 = vld [vmem:[#allocation5 + $0x68] sm:$0xff]  ;;  %p15637_p10 = scmp.ne.s32.totalorder %s15624_s14, 0  ;;  %s13760_s15 = smov [#allocation14]  }
  0xc3   : > { %v10491_v10 = vcombine.high %v556_v6, %v560_v7  ;;  %v564_v13 = vld [vmem:[#allocation5 + $0x80] sm:$0xff]  ;;  %2286 = vmatprep.subr.bf16.mxu0 %v10483_v3  ;;  %v10493_v14 = vcombine.high %v557_v11, %v561_v12  ;;  %v565_v16 = vld [vmem:[#allocation5 + $0x88] sm:$0xff]  ;;  %2512 = vmatprep.subr.bf16.mxu1 %v10485_v8  ;;  %v10490_v18 = vcombine.low %v556_v6, %v560_v7  ;;  %s15645_s11 = smov (!%p508_p2, %s10448_s11), 63  ;;  %s13640_s1 = sshll.u32 %s13760_s15, 4  ;;  %s13641_s1 = int_to_ptr.vmem [resolvable:$false] %s13640_s1 }
  0xc4   : > { %v568_v15 = vld [vmem:[#allocation5 + $0xa0] sm:$0xff]  ;;  %v569_v17 = vld [vmem:[#allocation5 + $0xa8] sm:$0xff]  ;;  %2287 = vmatpush1.bf16.msra.mxu0 %v10482_v5  ;;  %2513 = vmatpush1.bf16.msra.mxu1 %v10484_v9  ;;  %v10492_v19 = vcombine.low %v557_v11, %v561_v12 }
  0xc5   : > { %2288 = vmatprep.subr.bf16.mxu0 %v10491_v10  ;;  %v10499_v20 = vcombine.high %v564_v13, %v568_v15  ;;  %2514 = vmatprep.subr.bf16.mxu1 %v10493_v14  ;;  %v10501_v21 = vcombine.high %v565_v16, %v569_v17  ;;  %v572_v22 = vld [vmem:[#allocation5 + $0xc0] sm:$0xff]  ;;  %v573_v24 = vld [vmem:[#allocation5 + $0xc8] sm:$0xff]  ;;  %v10498_v26 = vcombine.low %v564_v13, %v568_v15 }
  0xc6   : > { %v576_v23 = vld [vmem:[#allocation5 + $0xe0] sm:$0xff]  ;;  %v577_v25 = vld [vmem:[#allocation5 + $0xe8] sm:$0xff]  ;;  %v10500_v27 = vcombine.low %v565_v16, %v569_v17 }
  0xc7   : > { %v10507_v28 = vcombine.high %v572_v22, %v576_v23  ;;  %v10509_v29 = vcombine.high %v573_v24, %v577_v25  ;;  %v580_v30 = vld [vmem:[#allocation5 + $0x100] sm:$0xff]  ;;  %v581_v32 = vld [vmem:[#allocation5 + $0x108] sm:$0xff]  ;;  %v10506_v34 = vcombine.low %v572_v22, %v576_v23  ;;  %v10508_v35 = vcombine.low %v573_v24, %v577_v25 }
  0xc8   : > { %2289 = vmatpush1.bf16.msra.mxu0 %v10490_v18  ;;  %2515 = vmatpush1.bf16.msra.mxu1 %v10492_v19  ;;  %v584_v31 = vld [vmem:[#allocation5 + $0x120] sm:$0xff]  ;;  %v585_v33 = vld [vmem:[#allocation5 + $0x128] sm:$0xff] }
  0xc9   : > { %2290 = vmatprep.subr.bf16.mxu0 %v10499_v20  ;;  %2516 = vmatprep.subr.bf16.mxu1 %v10501_v21  ;;  %v10515_v36 = vcombine.high %v580_v30, %v584_v31  ;;  %v10517_v37 = vcombine.high %v581_v32, %v585_v33  ;;  %v588_v38 = vld [vmem:[#allocation5 + $0x140] sm:$0xff]  ;;  %v589_v40 = vld [vmem:[#allocation5 + $0x148] sm:$0xff]  ;;  %v10514_v42 = vcombine.low %v580_v30, %v584_v31 }
  0xca   : > { %v592_v39 = vld [vmem:[#allocation5 + $0x160] sm:$0xff]  ;;  %v593_v41 = vld [vmem:[#allocation5 + $0x168] sm:$0xff]  ;;  %v10516_v43 = vcombine.low %v581_v32, %v585_v33 }
  0xcb   : > { %v10523_v44 = vcombine.high %v588_v38, %v592_v39  ;;  %v10525_v45 = vcombine.high %v589_v40, %v593_v41  ;;  %v596_v46 = vld [vmem:[#allocation5 + $0x180] sm:$0xff]  ;;  %v597_v48 = vld [vmem:[#allocation5 + $0x188] sm:$0xff]  ;;  %v10522_v50 = vcombine.low %v588_v38, %v592_v39  ;;  %v10524_v51 = vcombine.low %v589_v40, %v593_v41 }
  0xcc   : > { %2291 = vmatpush1.bf16.msra.mxu0 %v10498_v26  ;;  %2517 = vmatpush1.bf16.msra.mxu1 %v10500_v27  ;;  %v600_v47 = vld [vmem:[#allocation5 + $0x1a0] sm:$0xff]  ;;  %v601_v49 = vld [vmem:[#allocation5 + $0x1a8] sm:$0xff] }
  0xcd   : > { %2292 = vmatprep.subr.bf16.mxu0 %v10507_v28  ;;  %2518 = vmatprep.subr.bf16.mxu1 %v10509_v29  ;;  %v10531_v52 = vcombine.high %v596_v46, %v600_v47  ;;  %v10533_v53 = vcombine.high %v597_v48, %v601_v49  ;;  %v604_v54 = vld [vmem:[#allocation5 + $0x1c0] sm:$0xff]  ;;  %v605_v57 = vld [vmem:[#allocation5 + $0x1c8] sm:$0xff]  ;;  %v10530_v59 = vcombine.low %v596_v46, %v600_v47 }
  0xce   : > { %v608_v55 = vld [vmem:[#allocation5 + $0x1e0] sm:$0xff]  ;;  %v609_v58 = vld [vmem:[#allocation5 + $0x1e8] sm:$0xff]  ;;  %v10532_v60 = vcombine.low %v597_v48, %v601_v49 }
  0xcf   : > { %v12497_v56 = vld [vmem:[%s14071_s26 + $0x4] ss:$16 sps:$4 sm:$0xff]   ;;  %v10539_v61 = vcombine.high %v604_v54, %v608_v55  ;;  %v10541_v62 = vcombine.high %v605_v57, %v609_v58  ;;  %v613_v1 = vld [vmem:[#allocation5 + $0x208] sm:$0xff]  ;;  %v10538_v3 = vcombine.low %v604_v54, %v608_v55  ;;  %v10540_v4 = vcombine.low %v605_v57, %v609_v58 }
  0xd0   : > { %2293 = vmatpush1.bf16.msra.mxu0 %v10506_v34  ;;  %2519 = vmatpush1.bf16.msra.mxu1 %v10508_v35  ;;  %v612_v63 = vld [vmem:[#allocation5 + $0x200] sm:$0xff]  ;;  %v617_v2 = vld [vmem:[#allocation5 + $0x228] sm:$0xff] }
  0xd1   : > { %2294 = vmatprep.subr.bf16.mxu0 %v10515_v36  ;;  %2520 = vmatprep.subr.bf16.mxu1 %v10517_v37  ;;  %v616_v0 = vld [vmem:[#allocation5 + $0x220] sm:$0xff]  ;;  %v10549_v6 = vcombine.high %v613_v1, %v617_v2  ;;  %v621_v9 = vld [vmem:[#allocation5 + $0x248] sm:$0xff]  ;;  %v10548_v12 = vcombine.low %v613_v1, %v617_v2 }
  0xd2   : > { %2318 = vmatprep.mubr.bf16.mxu0 %v12497_v56  ;;  %2544 = vmatprep.mubr.bf16.mxu1 %v12497_v56  ;;  %v10547_v5 = vcombine.high %v612_v63, %v616_v0  ;;  %v620_v7 = vld [vmem:[#allocation5 + $0x240] sm:$0xff]  ;;  %v625_v10 = vld [vmem:[#allocation5 + $0x268] sm:$0xff]  ;;  %v10546_v11 = vcombine.low %v612_v63, %v616_v0 }
  0xd3   : > { %v624_v8 = vld [vmem:[#allocation5 + $0x260] sm:$0xff]  ;;  %v10557_v14 = vcombine.high %v621_v9, %v625_v10  ;;  %v629_v17 = vld [vmem:[#allocation5 + $0x288] sm:$0xff]  ;;  %v10556_v20 = vcombine.low %v621_v9, %v625_v10 }
  0xd4   : > { %2295 = vmatpush1.bf16.msra.mxu0 %v10514_v42  ;;  %2521 = vmatpush1.bf16.msra.mxu1 %v10516_v43  ;;  %v10555_v13 = vcombine.high %v620_v7, %v624_v8  ;;  %v628_v15 = vld [vmem:[#allocation5 + $0x280] sm:$0xff]  ;;  %v633_v18 = vld [vmem:[#allocation5 + $0x2a8] sm:$0xff]  ;;  %v10554_v19 = vcombine.low %v620_v7, %v624_v8 }
  0xd5   : > { %2296 = vmatprep.subr.bf16.mxu0 %v10523_v44  ;;  %2522 = vmatprep.subr.bf16.mxu1 %v10525_v45  ;;  %v632_v16 = vld [vmem:[#allocation5 + $0x2a0] sm:$0xff]  ;;  %v10565_v22 = vcombine.high %v629_v17, %v633_v18  ;;  %v637_v25 = vld [vmem:[#allocation5 + $0x2c8] sm:$0xff]  ;;  %v10564_v28 = vcombine.low %v629_v17, %v633_v18 }
  0xd6   : > { %v10563_v21 = vcombine.high %v628_v15, %v632_v16  ;;  %v636_v23 = vld [vmem:[#allocation5 + $0x2c0] sm:$0xff]  ;;  %v641_v26 = vld [vmem:[#allocation5 + $0x2e8] sm:$0xff]  ;;  %v10562_v27 = vcombine.low %v628_v15, %v632_v16 }
  0xd7   : > { %v640_v24 = vld [vmem:[#allocation5 + $0x2e0] sm:$0xff]  ;;  %v10573_v30 = vcombine.high %v637_v25, %v641_v26  ;;  %v645_v33 = vld [vmem:[#allocation5 + $0x308] sm:$0xff]  ;;  %v10572_v36 = vcombine.low %v637_v25, %v641_v26 }
  0xd8   : > { %2297 = vmatpush1.bf16.msra.mxu0 %v10522_v50  ;;  %2523 = vmatpush1.bf16.msra.mxu1 %v10524_v51  ;;  %v10571_v29 = vcombine.high %v636_v23, %v640_v24  ;;  %v644_v31 = vld [vmem:[#allocation5 + $0x300] sm:$0xff]  ;;  %v649_v34 = vld [vmem:[#allocation5 + $0x328] sm:$0xff]  ;;  %v10570_v35 = vcombine.low %v636_v23, %v640_v24 }
  0xd9   : > { %2298 = vmatprep.subr.bf16.mxu0 %v10531_v52  ;;  %2524 = vmatprep.subr.bf16.mxu1 %v10533_v53  ;;  %v648_v32 = vld [vmem:[#allocation5 + $0x320] sm:$0xff]  ;;  %v10581_v38 = vcombine.high %v645_v33, %v649_v34  ;;  %v653_v41 = vld [vmem:[#allocation5 + $0x348] sm:$0xff]  ;;  %v10580_v44 = vcombine.low %v645_v33, %v649_v34 }
  0xda   : > { %v10579_v37 = vcombine.high %v644_v31, %v648_v32  ;;  %v652_v39 = vld [vmem:[#allocation5 + $0x340] sm:$0xff]  ;;  %v657_v42 = vld [vmem:[#allocation5 + $0x368] sm:$0xff]  ;;  %v10578_v43 = vcombine.low %v644_v31, %v648_v32 }
  0xdb   : > { %v656_v40 = vld [vmem:[#allocation5 + $0x360] sm:$0xff]  ;;  %v10589_v46 = vcombine.high %v653_v41, %v657_v42  ;;  %v661_v49 = vld [vmem:[#allocation5 + $0x388] sm:$0xff]  ;;  %v10588_v52 = vcombine.low %v653_v41, %v657_v42 }
  0xdc   : > { %2299 = vmatpush1.bf16.msra.mxu0 %v10530_v59  ;;  %2525 = vmatpush1.bf16.msra.mxu1 %v10532_v60  ;;  %v10587_v45 = vcombine.high %v652_v39, %v656_v40  ;;  %v660_v47 = vld [vmem:[#allocation5 + $0x380] sm:$0xff]  ;;  %v665_v50 = vld [vmem:[#allocation5 + $0x3a8] sm:$0xff]  ;;  %v10586_v51 = vcombine.low %v652_v39, %v656_v40 }
  0xdd   : > { %2300 = vmatprep.subr.bf16.mxu0 %v10539_v61  ;;  %2526 = vmatprep.subr.bf16.mxu1 %v10541_v62  ;;  %v664_v48 = vld [vmem:[#allocation5 + $0x3a0] sm:$0xff]  ;;  %v10597_v54 = vcombine.high %v661_v49, %v665_v50  ;;  %v669_v57 = vld [vmem:[#allocation5 + $0x3c8] sm:$0xff]  ;;  %v10596_v60 = vcombine.low %v661_v49, %v665_v50 }
  0xde   : > { %v10595_v53 = vcombine.high %v660_v47, %v664_v48  ;;  %v668_v55 = vld [vmem:[#allocation5 + $0x3c0] sm:$0xff]  ;;  %v673_v58 = vld [vmem:[#allocation5 + $0x3e8] sm:$0xff]  ;;  %v10594_v59 = vcombine.low %v660_v47, %v664_v48 }
  0xdf   : > { %v672_v56 = vld [vmem:[#allocation5 + $0x3e0] sm:$0xff]  ;;  %v10605_v62 = vcombine.high %v669_v57, %v673_v58  ;;  %v677_v1 = vld [vmem:[#allocation5 + $0x408] sm:$0xff] }
  0xe0   : > { %2301 = vmatpush1.bf16.msra.mxu0 %v10538_v3  ;;  %2527 = vmatpush1.bf16.msra.mxu1 %v10540_v4  ;;  %v10603_v61 = vcombine.high %v668_v55, %v672_v56  ;;  %v676_v63 = vld [vmem:[#allocation5 + $0x400] sm:$0xff]  ;;  %v681_v2 = vld [vmem:[#allocation5 + $0x428] sm:$0xff]  ;;  %v10602_v3 = vcombine.low %v668_v55, %v672_v56  ;;  %v10604_v4 = vcombine.low %v669_v57, %v673_v58 }
  0xe1   : > { %2302 = vmatprep.subr.bf16.mxu0 %v10547_v5  ;;  %2528 = vmatprep.subr.bf16.mxu1 %v10549_v6  ;;  %v680_v0 = vld [vmem:[#allocation5 + $0x420] sm:$0xff]  ;;  %v10613_v6 = vcombine.high %v677_v1, %v681_v2  ;;  %v685_v10 = vld [vmem:[#allocation5 + $0x448] sm:$0xff] }
  0xe2   : > { %v10611_v5 = vcombine.high %v676_v63, %v680_v0  ;;  %v684_v7 = vld [vmem:[#allocation5 + $0x440] sm:$0xff]  ;;  %v721_v47 = vld [vmem:[#allocation5 + $0x568] sm:$0xff] }
  0xe3   : > { %v688_v8 = vld [vmem:[#allocation5 + $0x460] sm:$0xff]  ;;  %v725_v55 = vld [vmem:[#allocation5 + $0x588] sm:$0xff] }
  0xe4   : > { %2303 = vmatpush1.bf16.msra.mxu0 %v10546_v11  ;;  %2529 = vmatpush1.bf16.msra.mxu1 %v10548_v12  ;;  %v12499_v9 = vld [vmem:[%s14071_s26] ss:$16 sps:$4 sm:$0xff]   ;;  %v689_v11 = vld [vmem:[#allocation5 + $0x468] sm:$0xff]  ;;  %v10610_v12 = vcombine.low %v676_v63, %v680_v0  ;;  %v12500_v16 = vld [vmem:[%s14071_s26 + $0x24] ss:$16 sps:$4 sm:$0xff]  }
  0xe5   : > { %2304 = vmatprep.subr.bf16.mxu0 %v10555_v13  ;;  %2530 = vmatprep.subr.bf16.mxu1 %v10557_v14  ;;  %v10612_v13 = vcombine.low %v677_v1, %v681_v2  ;;  %v10619_v14 = vcombine.high %v684_v7, %v688_v8  ;;  %v10621_v15 = vcombine.high %v685_v10, %v689_v11  ;;  %v692_v17 = vld [vmem:[#allocation5 + $0x480] sm:$0xff]  ;;  %v729_v56 = vld [vmem:[#allocation5 + $0x5a8] sm:$0xff] }
  0xe6   : > { %v696_v18 = vld [vmem:[#allocation5 + $0x4a0] sm:$0xff]  ;;  %v733_v0 = vld [vmem:[#allocation5 + $0x5c8] sm:$0xff] }
  0xe7   : > { %v10627_v23 = vcombine.high %v692_v17, %v696_v18  ;;  %v700_v25 = vld [vmem:[#allocation5 + $0x4c0] sm:$0xff]  ;;  %v737_v1 = vld [vmem:[#allocation5 + $0x5e8] sm:$0xff] }
  0xe8   : > { %2305 = vmatpush1.bf16.msra.mxu0 %v10554_v19  ;;  %2531 = vmatpush1.bf16.msra.mxu1 %v10556_v20  ;;  %v693_v19 = vld [vmem:[#allocation5 + $0x488] sm:$0xff]  ;;  %v704_v26 = vld [vmem:[#allocation5 + $0x4e0] sm:$0xff] }
  0xe9   : > { %2306 = vmatprep.subr.bf16.mxu0 %v10563_v21  ;;  %2532 = vmatprep.subr.bf16.mxu1 %v10565_v22  ;;  %v697_v20 = vld [vmem:[#allocation5 + $0x4a8] sm:$0xff]  ;;  %v10618_v21 = vcombine.low %v684_v7, %v688_v8  ;;  %v10620_v22 = vcombine.low %v685_v10, %v689_v11  ;;  %v10635_v32 = vcombine.high %v700_v25, %v704_v26  ;;  %v12503_v34 = vld [vmem:[%s14071_s26 + $0x44] ss:$16 sps:$4 sm:$0xff]   ;;  %v12508_v63 = vld [vmem:[%s14071_s26 + $0x60] ss:$16 sps:$4 sm:$0xff]  }
  0xea   : > { %v10629_v24 = vcombine.high %v693_v19, %v697_v20  ;;  %v10628_v31 = vcombine.low %v693_v19, %v697_v20  ;;  %v10634_v39 = vcombine.low %v700_v25, %v704_v26  ;;  %v740_v7 = vld [vmem:[#allocation5 + $0x600] sm:$0xff]  ;;  %v745_v10 = vld [vmem:[#allocation5 + $0x628] sm:$0xff] }
  0xeb   : > { %v744_v8 = vld [vmem:[#allocation5 + $0x620] sm:$0xff]  ;;  %v753_v19 = vld [vmem:[#allocation5 + $0x668] sm:$0xff] }
  0xec   : > { %2307 = vmatpush1.bf16.msra.mxu0 %v10562_v27  ;;  %2533 = vmatpush1.bf16.msra.mxu1 %v10564_v28  ;;  %v12502_v27 = vld [vmem:[%s14071_s26 + $0x20] ss:$16 sps:$4 sm:$0xff]   ;;  %v701_v28 = vld [vmem:[#allocation5 + $0x4c8] sm:$0xff]  ;;  %v10674_v20 = vcombine.low %v740_v7, %v744_v8 }
  0xed   : > { %2308 = vmatprep.subr.bf16.mxu0 %v10571_v29  ;;  %2534 = vmatprep.subr.bf16.mxu1 %v10573_v30  ;;  %v705_v29 = vld [vmem:[#allocation5 + $0x4e8] sm:$0xff]  ;;  %v10626_v30 = vcombine.low %v692_v17, %v696_v18  ;;  %v12511_v17 = vld [vmem:[%s14071_s26 + $0x80] ss:$16 sps:$4 sm:$0xff]  }
  0xee   : > { %v10637_v33 = vcombine.high %v701_v28, %v705_v29  ;;  %v10636_v40 = vcombine.low %v701_v28, %v705_v29  ;;  %v749_v18 = vld [vmem:[#allocation5 + $0x648] sm:$0xff]  ;;  %v760_v25 = vld [vmem:[#allocation5 + $0x6a0] sm:$0xff] }
  0xef   : > { %v757_v26 = vld [vmem:[#allocation5 + $0x688] sm:$0xff] }
  0xf0   : > { %2309 = vmatpush1.bf16.msra.mxu0 %v10570_v35  ;;  %2535 = vmatpush1.bf16.msra.mxu1 %v10572_v36  ;;  %v708_v35 = vld [vmem:[#allocation5 + $0x500] sm:$0xff]  ;;  %v761_v28 = vld [vmem:[#allocation5 + $0x6a8] sm:$0xff] }
  0xf1   : > { %2310 = vmatprep.subr.bf16.mxu0 %v10579_v37  ;;  %2536 = vmatprep.subr.bf16.mxu1 %v10581_v38  ;;  %v712_v36 = vld [vmem:[#allocation5 + $0x520] sm:$0xff]  ;;  %v709_v37 = vld [vmem:[#allocation5 + $0x508] sm:$0xff] }
  0xf2   : > { %v713_v38 = vld [vmem:[#allocation5 + $0x528] sm:$0xff]  ;;  %v10643_v41 = vcombine.high %v708_v35, %v712_v36  ;;  %v10642_v48 = vcombine.low %v708_v35, %v712_v36  ;;  %v10693_v36 = vcombine.high %v757_v26, %v761_v28 }
  0xf3   : > { %v10645_v42 = vcombine.high %v709_v37, %v713_v38  ;;  %v10644_v49 = vcombine.low %v709_v37, %v713_v38  ;;  %v765_v35 = vld [vmem:[#allocation5 + $0x6c8] sm:$0xff] }
  0xf4   : > { %2311 = vmatpush1.bf16.msra.mxu0 %v10578_v43  ;;  %2537 = vmatpush1.bf16.msra.mxu1 %v10580_v44  ;;  %v716_v43 = vld [vmem:[#allocation5 + $0x540] sm:$0xff]  ;;  %v769_v37 = vld [vmem:[#allocation5 + $0x6e8] sm:$0xff] }
  0xf5   : > { %2312 = vmatprep.subr.bf16.mxu0 %v10587_v45  ;;  %2538 = vmatprep.subr.bf16.mxu1 %v10589_v46  ;;  %v720_v44 = vld [vmem:[#allocation5 + $0x560] sm:$0xff]  ;;  %v717_v46 = vld [vmem:[#allocation5 + $0x548] sm:$0xff] }
  0xf6   : > { %v12505_v45 = vld [vmem:[%s14071_s26 + $0x40] ss:$16 sps:$4 sm:$0xff]   ;;  %v10651_v50 = vcombine.high %v716_v43, %v720_v44  ;;  %v10650_v57 = vcombine.low %v716_v43, %v720_v44  ;;  %v10652_v58 = vcombine.low %v717_v46, %v721_v47  ;;  %v773_v44 = vld [vmem:[#allocation5 + $0x708] sm:$0xff] }
  0xf7   : > { %v776_v43 = vld [vmem:[#allocation5 + $0x720] sm:$0xff] }
  0xf8   : > { %2313 = vmatpush1.bf16.msra.mxu0 %v10586_v51  ;;  %2539 = vmatpush1.bf16.msra.mxu1 %v10588_v52  ;;  %v10653_v51 = vcombine.high %v717_v46, %v721_v47  ;;  %v12506_v52 = vld [vmem:[%s14071_s26 + $0x64] ss:$16 sps:$4 sm:$0xff]   ;;  %v777_v46 = vld [vmem:[#allocation5 + $0x728] sm:$0xff] }
  0xf9   : > { %2314 = vmatprep.subr.bf16.mxu0 %v10595_v53  ;;  %2540 = vmatprep.subr.bf16.mxu1 %v10597_v54  ;;  %v724_v53 = vld [vmem:[#allocation5 + $0x580] sm:$0xff] }
  0xfa   : > { %v728_v54 = vld [vmem:[#allocation5 + $0x5a0] sm:$0xff] }
  0xfb   : > { %v10658_v2 = vcombine.low %v724_v53, %v728_v54 }
  0xfc   : > { %2315 = vmatpush1.bf16.msra.mxu0 %v10594_v59  ;;  %2541 = vmatpush1.bf16.msra.mxu1 %v10596_v60  ;;  %v10659_v59 = vcombine.high %v724_v53, %v728_v54  ;;  %v10661_v60 = vcombine.high %v725_v55, %v729_v56  ;;  %v781_v53 = vld [vmem:[#allocation5 + $0x748] sm:$0xff]  ;;  %v10709_v54 = vcombine.high %v773_v44, %v777_v46 }
  0xfd   : > { %2316 = vmatprep.subr.bf16.mxu0 %v10603_v61  ;;  %2542 = vmatprep.subr.bf16.mxu1 %v10605_v62  ;;  %v732_v61 = vld [vmem:[#allocation5 + $0x5c0] sm:$0xff] }
  0xfe   : > { %v736_v62 = vld [vmem:[#allocation5 + $0x5e0] sm:$0xff] }
  0xff   : > { %v10666_v11 = vcombine.low %v732_v61, %v736_v62 }
 0x100   : > { %2317 = vmatpush1.bf16.msra.mxu0 %v10602_v3  ;;  %2543 = vmatpush1.bf16.msra.mxu1 %v10604_v4  ;;  %v10660_v3 = vcombine.low %v725_v55, %v729_v56  ;;  %v10667_v4 = vcombine.high %v732_v61, %v736_v62  ;;  %v785_v55 = vld [vmem:[#allocation5 + $0x768] sm:$0xff]  ;;  %v792_v61 = vld [vmem:[#allocation5 + $0x7a0] sm:$0xff] }
 0x101   : > { %2399 = vmatprep.subr.bf16.mxu0 %v10611_v5  ;;  %2625 = vmatprep.subr.bf16.mxu1 %v10613_v6  ;;  %v10669_v5 = vcombine.high %v733_v0, %v737_v1  ;;  %v12509_v6 = vld [vmem:[%s14071_s26 + $0x84] ss:$16 sps:$4 sm:$0xff]   ;;  %v789_v62 = vld [vmem:[#allocation5 + $0x788] sm:$0xff] }
 0x103   : > { %2319 = vmatmul.mubr.bf16.vlgmr.msra.gmra.mrb[0].mxu0 %v12499_v9  ;;  %2545 = vmatmul.mubr.bf16.vlgmr.msra.gmra.mrb[0].mxu1 %v12499_v9  ;;  %v741_v9 = vld [vmem:[#allocation5 + $0x608] sm:$0xff] }
 0x104   : > { %2400 = vmatpush1.bf16.msra.mxu0 %v10610_v12  ;;  %2626 = vmatpush1.bf16.msra.mxu1 %v10612_v13  ;;  %v10668_v12 = vcombine.low %v733_v0, %v737_v1  ;;  %v10675_v13 = vcombine.high %v740_v7, %v744_v8  ;;  %v793_v0 = vld [vmem:[#allocation5 + $0x7a8] sm:$0xff] }
 0x105   : > { %2401 = vmatprep.subr.bf16.mxu0 %v10619_v14  ;;  %2627 = vmatprep.subr.bf16.mxu1 %v10621_v15  ;;  %v10677_v14 = vcombine.high %v741_v9, %v745_v10  ;;  %v748_v15 = vld [vmem:[#allocation5 + $0x640] sm:$0xff]  ;;  %v797_v7 = vld [vmem:[#allocation5 + $0x7c8] sm:$0xff]  ;;  %v10725_v8 = vcombine.high %v789_v62, %v793_v0 }
 0x106   : > { %2328 = vmatprep.mubr.bf16.mxu0 %v12500_v16  ;;  %2554 = vmatprep.mubr.bf16.mxu1 %v12500_v16  ;;  %v752_v16 = vld [vmem:[#allocation5 + $0x660] sm:$0xff] }
 0x107   : > { %v10682_v29 = vcombine.low %v748_v15, %v752_v16 }
 0x108   : > { %2402 = vmatpush1.bf16.msra.mxu0 %v10618_v21  ;;  %2628 = vmatpush1.bf16.msra.mxu1 %v10620_v22  ;;  %v12512_v21 = vld [vmem:[%s14071_s26 + $0xa4] ss:$16 sps:$4 sm:$0xff]   ;;  %v10676_v22 = vcombine.low %v741_v9, %v745_v10  ;;  %v801_v9 = vld [vmem:[#allocation5 + $0x7e8] sm:$0xff] }
 0x109   : > { %2403 = vmatprep.subr.bf16.mxu0 %v10627_v23  ;;  %2629 = vmatprep.subr.bf16.mxu1 %v10629_v24  ;;  %v10683_v23 = vcombine.high %v748_v15, %v752_v16  ;;  %v756_v24 = vld [vmem:[#allocation5 + $0x680] sm:$0xff]  ;;  %v554_v15 = vld [vmem:[#allocation5 + $0x30] sm:$0xff]  ;;  %v551_v16 = vld [vmem:[#allocation5 + $0x18] sm:$0xff] }
 0x10a   : > { %v10690_v38 = vcombine.low %v756_v24, %v760_v25 }
 0x10b   : > { %2329 = vmatmul.mubr.bf16.gmra.mrb[4].mxu0 %v12502_v27  ;;  %2555 = vmatmul.mubr.bf16.gmra.mrb[4].mxu1 %v12502_v27  ;;  %v10685_v27 = vcombine.high %v749_v18, %v753_v19 }
 0x10c   : > { %2404 = vmatpush1.bf16.msra.mxu0 %v10626_v30  ;;  %2630 = vmatpush1.bf16.msra.mxu1 %v10628_v31  ;;  %v10684_v30 = vcombine.low %v749_v18, %v753_v19  ;;  %v12514_v31 = vld [vmem:[%s14071_s26 + $0xa0] ss:$16 sps:$4 sm:$0xff]   ;;  %v555_v18 = vld [vmem:[#allocation5 + $0x38] sm:$0xff] }
 0x10d   : > { %2405 = vmatprep.subr.bf16.mxu0 %v10635_v32  ;;  %2631 = vmatprep.subr.bf16.mxu1 %v10637_v33  ;;  %v10691_v32 = vcombine.high %v756_v24, %v760_v25  ;;  %v764_v33 = vld [vmem:[#allocation5 + $0x6c0] sm:$0xff]  ;;  %v562_v24 = vld [vmem:[#allocation5 + $0x70] sm:$0xff]  ;;  %v559_v25 = vld [vmem:[#allocation5 + $0x58] sm:$0xff] }
 0x10e   : > { %2338 = vmatprep.mubr.bf16.mxu0 %v12503_v34  ;;  %2564 = vmatprep.mubr.bf16.mxu1 %v12503_v34  ;;  %v768_v34 = vld [vmem:[#allocation5 + $0x6e0] sm:$0xff] }
 0x10f   : > { %v10698_v47 = vcombine.low %v764_v33, %v768_v34 }
 0x110   : > { %2406 = vmatpush1.bf16.msra.mxu0 %v10634_v39  ;;  %2632 = vmatpush1.bf16.msra.mxu1 %v10636_v40  ;;  %v12515_v39 = vld [vmem:[%s14071_s26 + $0xc4] ss:$16 sps:$4 sm:$0xff]   ;;  %v10692_v40 = vcombine.low %v757_v26, %v761_v28  ;;  %v10489_v26 = vcombine.high %v551_v16, %v555_v18 }
 0x111   : > { %2407 = vmatprep.subr.bf16.mxu0 %v10643_v41  ;;  %2633 = vmatprep.subr.bf16.mxu1 %v10645_v42  ;;  %v10699_v41 = vcombine.high %v764_v33, %v768_v34  ;;  %v772_v42 = vld [vmem:[#allocation5 + $0x700] sm:$0xff]  ;;  %v567_v34 = vld [vmem:[#allocation5 + $0x98] sm:$0xff] }
 0x112   : > { %v10706_v56 = vcombine.low %v772_v42, %v776_v43 }
 0x113   : > { %2339 = vmatmul.mubr.bf16.gmra.mrb[8].mxu0 %v12505_v45  ;;  %2565 = vmatmul.mubr.bf16.gmra.mrb[8].mxu1 %v12505_v45  ;;  %v10701_v45 = vcombine.high %v765_v35, %v769_v37 }
 0x114   : > { %2408 = vmatpush1.bf16.msra.mxu0 %v10642_v48  ;;  %2634 = vmatpush1.bf16.msra.mxu1 %v10644_v49  ;;  %v10700_v48 = vcombine.low %v765_v35, %v769_v37  ;;  %v12517_v49 = vld [vmem:[%s14071_s26 + $0xc0] ss:$16 sps:$4 sm:$0xff]   ;;  %v571_v35 = vld [vmem:[#allocation5 + $0xb8] sm:$0xff] }
 0x115   : > { %2409 = vmatprep.subr.bf16.mxu0 %v10651_v50  ;;  %2635 = vmatprep.subr.bf16.mxu1 %v10653_v51  ;;  %v10707_v50 = vcombine.high %v772_v42, %v776_v43  ;;  %v780_v51 = vld [vmem:[#allocation5 + $0x740] sm:$0xff]  ;;  %v575_v43 = vld [vmem:[#allocation5 + $0xd8] sm:$0xff] }
 0x116   : > { %2348 = vmatprep.mubr.bf16.mxu0 %v12506_v52  ;;  %2574 = vmatprep.mubr.bf16.mxu1 %v12506_v52  ;;  %v784_v52 = vld [vmem:[#allocation5 + $0x760] sm:$0xff] }
 0x117   : > { %v10714_v1 = vcombine.low %v780_v51, %v784_v52 }
 0x118   : > { %2410 = vmatpush1.bf16.msra.mxu0 %v10650_v57  ;;  %2636 = vmatpush1.bf16.msra.mxu1 %v10652_v58  ;;  %v12518_v57 = vld [vmem:[%s14071_s26 + $0xe4] ss:$16 sps:$4 sm:$0xff]   ;;  %v10708_v58 = vcombine.low %v773_v44, %v777_v46  ;;  %v579_v44 = vld [vmem:[#allocation5 + $0xf8] sm:$0xff] }
 0x119   : > { %2411 = vmatprep.subr.bf16.mxu0 %v10659_v59  ;;  %2637 = vmatprep.subr.bf16.mxu1 %v10661_v60  ;;  %v10715_v59 = vcombine.high %v780_v51, %v784_v52  ;;  %v788_v60 = vld [vmem:[#allocation5 + $0x780] sm:$0xff]  ;;  %v583_v52 = vld [vmem:[#allocation5 + $0x118] sm:$0xff] }
 0x11a   : > { %v10722_v10 = vcombine.low %v788_v60, %v792_v61 }
 0x11b   : > { %2349 = vmatmul.mubr.bf16.gmra.mrb[12].mxu0 %v12508_v63  ;;  %2575 = vmatmul.mubr.bf16.gmra.mrb[12].mxu1 %v12508_v63  ;;  %v10717_v63 = vcombine.high %v781_v53, %v785_v55 }
 0x11c   : > { %2412 = vmatpush1.bf16.msra.mxu0 %v10658_v2  ;;  %2638 = vmatpush1.bf16.msra.mxu1 %v10660_v3  ;;  %v10716_v2 = vcombine.low %v781_v53, %v785_v55  ;;  %v12520_v3 = vld [vmem:[%s14071_s26 + $0xe0] ss:$16 sps:$4 sm:$0xff]   ;;  %v587_v53 = vld [vmem:[#allocation5 + $0x138] sm:$0xff] }
 0x11d   : > { %2413 = vmatprep.subr.bf16.mxu0 %v10667_v4  ;;  %2639 = vmatprep.subr.bf16.mxu1 %v10669_v5  ;;  %v10723_v4 = vcombine.high %v788_v60, %v792_v61  ;;  %v796_v5 = vld [vmem:[#allocation5 + $0x7c0] sm:$0xff]  ;;  %v591_v61 = vld [vmem:[#allocation5 + $0x158] sm:$0xff] }
 0x11e   : > { %2358 = vmatprep.mubr.bf16.mxu0 %v12509_v6  ;;  %2584 = vmatprep.mubr.bf16.mxu1 %v12509_v6  ;;  %v800_v6 = vld [vmem:[#allocation5 + $0x7e0] sm:$0xff] }
 0x11f   : > { %v10730_v19 = vcombine.low %v796_v5, %v800_v6 }
 0x120   : > { %2414 = vmatpush1.bf16.msra.mxu0 %v10666_v11  ;;  %2640 = vmatpush1.bf16.msra.mxu1 %v10668_v12  ;;  %v12523_v11 = vld [vmem:[%s14071_s26 + $0xc] ss:$16 sps:$4 sm:$0xff]   ;;  %v10724_v12 = vcombine.low %v789_v62, %v793_v0 }
 0x121   : > { %2415 = vmatprep.subr.bf16.mxu0 %v10675_v13  ;;  %2641 = vmatprep.subr.bf16.mxu1 %v10677_v14  ;;  %v10731_v13 = vcombine.high %v796_v5, %v800_v6  ;;  %v550_v14 = vld [vmem:[#allocation5 + $0x10] sm:$0xff]  ;;  %v595_v62 = vld [vmem:[#allocation5 + $0x178] sm:$0xff] }
 0x122   : > { %v10486_v28 = vcombine.low %v550_v14, %v554_v15  ;;  %v599_v6 = vld [vmem:[#allocation5 + $0x198] sm:$0xff] }
 0x123   : > { %2359 = vmatmul.mubr.bf16.gmra.mrb[16].mxu0 %v12511_v17  ;;  %2585 = vmatmul.mubr.bf16.gmra.mrb[16].mxu1 %v12511_v17  ;;  %v10733_v17 = vcombine.high %v797_v7, %v801_v9 }
 0x124   : > { %2416 = vmatpush1.bf16.msra.mxu0 %v10674_v20  ;;  %2642 = vmatpush1.bf16.msra.mxu1 %v10676_v22  ;;  %v10732_v20 = vcombine.low %v797_v7, %v801_v9  ;;  %v10487_v22 = vcombine.high %v550_v14, %v554_v15  ;;  %v603_v7 = vld [vmem:[#allocation5 + $0x1b8] sm:$0xff] }
 0x125   : > { %2417 = vmatprep.subr.bf16.mxu0 %v10683_v23  ;;  %2643 = vmatprep.subr.bf16.mxu1 %v10685_v27  ;;  %v558_v23 = vld [vmem:[#allocation5 + $0x50] sm:$0xff]  ;;  %v563_v27 = vld [vmem:[#allocation5 + $0x78] sm:$0xff] }
 0x126   : > { %2368 = vmatprep.mubr.bf16.mxu0 %v12512_v21  ;;  %2594 = vmatprep.mubr.bf16.mxu1 %v12512_v21  ;;  %v12521_v21 = vld [vmem:[%s14071_s26 + $0x8] ss:$16 sps:$4 sm:$0xff]   ;;  %v10495_v33 = vcombine.high %v558_v23, %v562_v24  ;;  %v10494_v37 = vcombine.low %v558_v23, %v562_v24 }
 0x127   : > { %v607_v15 = vld [vmem:[#allocation5 + $0x1d8] sm:$0xff] }
 0x128   : > { %2418 = vmatpush1.bf16.msra.mxu0 %v10682_v29  ;;  %2644 = vmatpush1.bf16.msra.mxu1 %v10684_v30  ;;  %v12524_v29 = vld [vmem:[%s14071_s26 + $0x2c] ss:$16 sps:$4 sm:$0xff]   ;;  %v566_v30 = vld [vmem:[#allocation5 + $0x90] sm:$0xff] }
 0x129   : > { %2419 = vmatprep.subr.bf16.mxu0 %v10691_v32  ;;  %2645 = vmatprep.subr.bf16.mxu1 %v10693_v36  ;;  %v10488_v32 = vcombine.low %v551_v16, %v555_v18  ;;  %v10497_v36 = vcombine.high %v559_v25, %v563_v27  ;;  %v611_v16 = vld [vmem:[#allocation5 + $0x1f8] sm:$0xff] }
 0x12a   : > { %v615_v24 = vld [vmem:[#allocation5 + $0x218] sm:$0xff] }
 0x12b   : > { %2369 = vmatmul.mubr.bf16.gmra.mrb[20].mxu0 %v12514_v31  ;;  %2595 = vmatmul.mubr.bf16.gmra.mrb[20].mxu1 %v12514_v31  ;;  %v570_v31 = vld [vmem:[#allocation5 + $0xb0] sm:$0xff] }
 0x12c   : > { %2420 = vmatpush1.bf16.msra.mxu0 %v10690_v38  ;;  %2646 = vmatpush1.bf16.msra.mxu1 %v10692_v40  ;;  %v574_v38 = vld [vmem:[#allocation5 + $0xd0] sm:$0xff]  ;;  %v10496_v40 = vcombine.low %v559_v25, %v563_v27  ;;  %v10503_v42 = vcombine.high %v566_v30, %v570_v31  ;;  %v10502_v46 = vcombine.low %v566_v30, %v570_v31  ;;  %v619_v25 = vld [vmem:[#allocation5 + $0x238] sm:$0xff] }
 0x12d   : > { %2421 = vmatprep.subr.bf16.mxu0 %v10699_v41  ;;  %2647 = vmatprep.subr.bf16.mxu1 %v10701_v45  ;;  %v12526_v41 = vld [vmem:[%s14071_s26 + $0x28] ss:$16 sps:$4 sm:$0xff]   ;;  %v10505_v45 = vcombine.high %v567_v34, %v571_v35  ;;  %v10544_v30 = vcombine.low %v607_v15, %v611_v16 }
 0x12e   : > { %2378 = vmatprep.mubr.bf16.mxu0 %v12515_v39  ;;  %2604 = vmatprep.mubr.bf16.mxu1 %v12515_v39  ;;  %v578_v39 = vld [vmem:[#allocation5 + $0xf0] sm:$0xff]  ;;  %v12535_v31 = vld [vmem:[%s14071_s26 + $0x88] ss:$16 sps:$4 sm:$0xff]  }
 0x12f   : > { %v10511_v51 = vcombine.high %v574_v38, %v578_v39  ;;  %v10510_v55 = vcombine.low %v574_v38, %v578_v39  ;;  %v630_v38 = vld [vmem:[#allocation5 + $0x290] sm:$0xff] }
 0x130   : > { %2422 = vmatpush1.bf16.msra.mxu0 %v10698_v47  ;;  %2648 = vmatpush1.bf16.msra.mxu1 %v10700_v48  ;;  %v12527_v47 = vld [vmem:[%s14071_s26 + $0x4c] ss:$16 sps:$4 sm:$0xff]   ;;  %v582_v48 = vld [vmem:[#allocation5 + $0x110] sm:$0xff] }
 0x131   : > { %2423 = vmatprep.subr.bf16.mxu0 %v10707_v50  ;;  %2649 = vmatprep.subr.bf16.mxu1 %v10709_v54  ;;  %v10504_v50 = vcombine.low %v567_v34, %v571_v35  ;;  %v10513_v54 = vcombine.high %v575_v43, %v579_v44  ;;  %v627_v34 = vld [vmem:[#allocation5 + $0x278] sm:$0xff]  ;;  %v10553_v35 = vcombine.high %v615_v24, %v619_v25  ;;  %v634_v39 = vld [vmem:[#allocation5 + $0x2b0] sm:$0xff] }
 0x133   : > { %2379 = vmatmul.mubr.bf16.gmra.mrb[24].mxu0 %v12517_v49  ;;  %2605 = vmatmul.mubr.bf16.gmra.mrb[24].mxu1 %v12517_v49  ;;  %v586_v49 = vld [vmem:[#allocation5 + $0x130] sm:$0xff] }
 0x134   : > { %2424 = vmatpush1.bf16.msra.mxu0 %v10706_v56  ;;  %2650 = vmatpush1.bf16.msra.mxu1 %v10708_v58  ;;  %v590_v56 = vld [vmem:[#allocation5 + $0x150] sm:$0xff]  ;;  %v10512_v58 = vcombine.low %v575_v43, %v579_v44  ;;  %v10519_v60 = vcombine.high %v582_v48, %v586_v49  ;;  %v10518_v0 = vcombine.low %v582_v48, %v586_v49  ;;  %v635_v43 = vld [vmem:[#allocation5 + $0x2b8] sm:$0xff] }
 0x135   : > { %2425 = vmatprep.subr.bf16.mxu0 %v10715_v59  ;;  %2651 = vmatprep.subr.bf16.mxu1 %v10717_v63  ;;  %v12529_v59 = vld [vmem:[%s14071_s26 + $0x48] ss:$16 sps:$4 sm:$0xff]   ;;  %v10521_v63 = vcombine.high %v583_v52, %v587_v53  ;;  %v10567_v48 = vcombine.high %v630_v38, %v634_v39  ;;  %v638_v49 = vld [vmem:[#allocation5 + $0x2d0] sm:$0xff] }
 0x136   : > { %2388 = vmatprep.mubr.bf16.mxu0 %v12518_v57  ;;  %2614 = vmatprep.mubr.bf16.mxu1 %v12518_v57  ;;  %v594_v57 = vld [vmem:[#allocation5 + $0x170] sm:$0xff] }
 0x137   : > { %v10527_v5 = vcombine.high %v590_v56, %v594_v57  ;;  %v10526_v9 = vcombine.low %v590_v56, %v594_v57  ;;  %v646_v56 = vld [vmem:[#allocation5 + $0x310] sm:$0xff] }
 0x138   : > { %2426 = vmatpush1.bf16.msra.mxu0 %v10714_v1  ;;  %2652 = vmatpush1.bf16.msra.mxu1 %v10716_v2  ;;  %v12530_v1 = vld [vmem:[%s14071_s26 + $0x6c] ss:$16 sps:$4 sm:$0xff]   ;;  %v598_v2 = vld [vmem:[#allocation5 + $0x190] sm:$0xff] }
 0x139   : > { %2427 = vmatprep.subr.bf16.mxu0 %v10723_v4  ;;  %2653 = vmatprep.subr.bf16.mxu1 %v10725_v8  ;;  %v10520_v4 = vcombine.low %v583_v52, %v587_v53  ;;  %v10529_v8 = vcombine.high %v591_v61, %v595_v62  ;;  %v639_v52 = vld [vmem:[#allocation5 + $0x2d8] sm:$0xff]  ;;  %v650_v57 = vld [vmem:[#allocation5 + $0x330] sm:$0xff] }
 0x13a   : > { %v643_v53 = vld [vmem:[#allocation5 + $0x2f8] sm:$0xff] }
 0x13b   : > { %2389 = vmatmul.mubr.bf16.gmra.mrb[28].mxu0 %v12520_v3  ;;  %2615 = vmatmul.mubr.bf16.gmra.mrb[28].mxu1 %v12520_v3  ;;  %v602_v3 = vld [vmem:[#allocation5 + $0x1b0] sm:$0xff] }
 0x13c   : > { %2428 = vmatpush1.bf16.msra.mxu0 %v10722_v10  ;;  %2654 = vmatpush1.bf16.msra.mxu1 %v10724_v12  ;;  %v606_v10 = vld [vmem:[#allocation5 + $0x1d0] sm:$0xff]  ;;  %v10528_v12 = vcombine.low %v591_v61, %v595_v62  ;;  %v10535_v14 = vcombine.high %v598_v2, %v602_v3  ;;  %v10534_v18 = vcombine.low %v598_v2, %v602_v3  ;;  %v651_v61 = vld [vmem:[#allocation5 + $0x338] sm:$0xff] }
 0x13d   : > { %2429 = vmatprep.subr.bf16.mxu0 %v10731_v13  ;;  %2655 = vmatprep.subr.bf16.mxu1 %v10733_v17  ;;  %v12532_v13 = vld [vmem:[%s14071_s26 + $0x68] ss:$16 sps:$4 sm:$0xff]   ;;  %v10537_v17 = vcombine.high %v599_v6, %v603_v7  ;;  %v10577_v62 = vcombine.high %v639_v52, %v643_v53  ;;  %v10583_v2 = vcombine.high %v646_v56, %v650_v57  ;;  %v654_v3 = vld [vmem:[#allocation5 + $0x350] sm:$0xff] }
 0x13e   : > { %2431 = vmatprep.mubr.bf16.mxu0 %v12523_v11  ;;  %2657 = vmatprep.mubr.bf16.mxu1 %v12523_v11  ;;  %v610_v11 = vld [vmem:[#allocation5 + $0x1f0] sm:$0xff] }
 0x13f   : > { %v10543_v23 = vcombine.high %v606_v10, %v610_v11  ;;  %v10542_v27 = vcombine.low %v606_v10, %v610_v11  ;;  %v662_v10 = vld [vmem:[#allocation5 + $0x390] sm:$0xff] }
 0x140   : > { %2430 = vmatpush1.bf16.msra.mxu0 %v10730_v19  ;;  %2656 = vmatpush1.bf16.msra.mxu1 %v10732_v20  ;;  %v12533_v19 = vld [vmem:[%s14071_s26 + $0x8c] ss:$16 sps:$4 sm:$0xff]   ;;  %v614_v20 = vld [vmem:[#allocation5 + $0x210] sm:$0xff] }
 0x141   : > { %2738 = vmatprep.subr.bf16.mxu0 %v10487_v22  ;;  %2964 = vmatprep.subr.bf16.mxu1 %v10489_v26  ;;  %v10536_v22 = vcombine.low %v599_v6, %v603_v7  ;;  %v10545_v26 = vcombine.high %v607_v15, %v611_v16  ;;  %v655_v6 = vld [vmem:[#allocation5 + $0x358] sm:$0xff]  ;;  %v666_v11 = vld [vmem:[#allocation5 + $0x3b0] sm:$0xff] }
 0x142   : > { %v659_v7 = vld [vmem:[#allocation5 + $0x378] sm:$0xff] }
 0x143   : > { %2432 = vmatmul.mubr.bf16.vlgmr.msra.gmra.mrb[0].mxu0 %v12521_v21  ;;  %2658 = vmatmul.mubr.bf16.vlgmr.msra.gmra.mrb[0].mxu1 %v12521_v21  ;;  %v618_v21 = vld [vmem:[#allocation5 + $0x230] sm:$0xff]  ;;  %v667_v15 = vld [vmem:[#allocation5 + $0x3b8] sm:$0xff]  ;;  %v10593_v16 = vcombine.high %v655_v6, %v659_v7 }
 0x144   : > { %2739 = vmatpush1.bf16.msra.mxu0 %v10486_v28  ;;  %2965 = vmatpush1.bf16.msra.mxu1 %v10488_v32  ;;  %v622_v28 = vld [vmem:[#allocation5 + $0x250] sm:$0xff]  ;;  %v10551_v32 = vcombine.high %v614_v20, %v618_v21 }
 0x145   : > { %2740 = vmatprep.subr.bf16.mxu0 %v10495_v33  ;;  %2966 = vmatprep.subr.bf16.mxu1 %v10497_v36  ;;  %v623_v33 = vld [vmem:[#allocation5 + $0x258] sm:$0xff]  ;;  %v10550_v36 = vcombine.low %v614_v20, %v618_v21  ;;  %v10599_v20 = vcombine.high %v662_v10, %v666_v11  ;;  %v670_v21 = vld [vmem:[#allocation5 + $0x3d0] sm:$0xff] }
 0x146   : > { %2441 = vmatprep.mubr.bf16.mxu0 %v12524_v29  ;;  %2667 = vmatprep.mubr.bf16.mxu1 %v12524_v29  ;;  %v626_v29 = vld [vmem:[#allocation5 + $0x270] sm:$0xff]  ;;  %v10561_v44 = vcombine.high %v623_v33, %v627_v34 }
 0x148   : > { %2741 = vmatpush1.bf16.msra.mxu0 %v10494_v37  ;;  %2967 = vmatpush1.bf16.msra.mxu1 %v10496_v40  ;;  %v12536_v37 = vld [vmem:[%s14071_s26 + $0xac] ss:$16 sps:$4 sm:$0xff]   ;;  %v10552_v40 = vcombine.low %v615_v24, %v619_v25 }
 0x149   : > { %2742 = vmatprep.subr.bf16.mxu0 %v10503_v42  ;;  %2968 = vmatprep.subr.bf16.mxu1 %v10505_v45  ;;  %v631_v42 = vld [vmem:[#allocation5 + $0x298] sm:$0xff]  ;;  %v10558_v45 = vcombine.low %v622_v28, %v626_v29 }
 0x14a   : > { %v671_v24 = vld [vmem:[#allocation5 + $0x3d8] sm:$0xff] }
 0x14b   : > { %2442 = vmatmul.mubr.bf16.gmra.mrb[4].mxu0 %v12526_v41  ;;  %2668 = vmatmul.mubr.bf16.gmra.mrb[4].mxu1 %v12526_v41  ;;  %v10559_v41 = vcombine.high %v622_v28, %v626_v29  ;;  %v675_v25 = vld [vmem:[#allocation5 + $0x3f8] sm:$0xff]  ;;  %v682_v28 = vld [vmem:[#allocation5 + $0x430] sm:$0xff] }
 0x14c   : > { %2743 = vmatpush1.bf16.msra.mxu0 %v10502_v46  ;;  %2969 = vmatpush1.bf16.msra.mxu1 %v10504_v50  ;;  %v10560_v46 = vcombine.low %v623_v33, %v627_v34  ;;  %v642_v50 = vld [vmem:[#allocation5 + $0x2f0] sm:$0xff]  ;;  %v10609_v33 = vcombine.high %v671_v24, %v675_v25 }
 0x14d   : > { %2744 = vmatprep.subr.bf16.mxu0 %v10511_v51  ;;  %2970 = vmatprep.subr.bf16.mxu1 %v10513_v54  ;;  %v10569_v51 = vcombine.high %v631_v42, %v635_v43  ;;  %v10566_v54 = vcombine.low %v630_v38, %v634_v39  ;;  %v686_v39 = vld [vmem:[#allocation5 + $0x450] sm:$0xff] }
 0x14e   : > { %2451 = vmatprep.mubr.bf16.mxu0 %v12527_v47  ;;  %2677 = vmatprep.mubr.bf16.mxu1 %v12527_v47  ;;  %v12538_v47 = vld [vmem:[%s14071_s26 + $0xa8] ss:$16 sps:$4 sm:$0xff]  }
 0x150   : > { %2745 = vmatpush1.bf16.msra.mxu0 %v10510_v55  ;;  %2971 = vmatpush1.bf16.msra.mxu1 %v10512_v58  ;;  %v12539_v55 = vld [vmem:[%s14071_s26 + $0xcc] ss:$16 sps:$4 sm:$0xff]   ;;  %v10568_v58 = vcombine.low %v631_v42, %v635_v43 }
 0x151   : > { %2746 = vmatprep.subr.bf16.mxu0 %v10519_v60  ;;  %2972 = vmatprep.subr.bf16.mxu1 %v10521_v63  ;;  %v647_v60 = vld [vmem:[#allocation5 + $0x318] sm:$0xff]  ;;  %v10574_v63 = vcombine.low %v638_v49, %v642_v50 }
 0x152   : > { %v691_v42 = vld [vmem:[#allocation5 + $0x478] sm:$0xff] }
 0x153   : > { %2452 = vmatmul.mubr.bf16.gmra.mrb[8].mxu0 %v12529_v59  ;;  %2678 = vmatmul.mubr.bf16.gmra.mrb[8].mxu1 %v12529_v59  ;;  %v10575_v59 = vcombine.high %v638_v49, %v642_v50  ;;  %v13434_v49 = vld [vmem:[%s14071_s26] ss:$16 sps:$4 sm:$0xff]   ;;  %v695_v50 = vld [vmem:[#allocation5 + $0x498] sm:$0xff] }
 0x154   : > { %2747 = vmatpush1.bf16.msra.mxu0 %v10518_v0  ;;  %2973 = vmatpush1.bf16.msra.mxu1 %v10520_v4  ;;  %v10576_v0 = vcombine.low %v639_v52, %v643_v53  ;;  %v658_v4 = vld [vmem:[#allocation5 + $0x370] sm:$0xff] }
 0x155   : > { %2748 = vmatprep.subr.bf16.mxu0 %v10527_v5  ;;  %2974 = vmatprep.subr.bf16.mxu1 %v10529_v8  ;;  %v10585_v5 = vcombine.high %v647_v60, %v651_v61  ;;  %v10582_v8 = vcombine.low %v646_v56, %v650_v57  ;;  %v702_v53 = vld [vmem:[#allocation5 + $0x4d0] sm:$0xff]  ;;  %v703_v57 = vld [vmem:[#allocation5 + $0x4d8] sm:$0xff] }
 0x156   : > { %2461 = vmatprep.mubr.bf16.mxu0 %v12530_v1  ;;  %2687 = vmatprep.mubr.bf16.mxu1 %v12530_v1  ;;  %v12541_v1 = vld [vmem:[%s14071_s26 + $0xc8] ss:$16 sps:$4 sm:$0xff]  }
 0x158   : > { %2749 = vmatpush1.bf16.msra.mxu0 %v10526_v9  ;;  %2975 = vmatpush1.bf16.msra.mxu1 %v10528_v12  ;;  %v12542_v9 = vld [vmem:[%s14071_s26 + $0xec] ss:$16 sps:$4 sm:$0xff]   ;;  %v10584_v12 = vcombine.low %v647_v60, %v651_v61 }
 0x159   : > { %2750 = vmatprep.subr.bf16.mxu0 %v10535_v14  ;;  %2976 = vmatprep.subr.bf16.mxu1 %v10537_v17  ;;  %v663_v14 = vld [vmem:[#allocation5 + $0x398] sm:$0xff]  ;;  %v10590_v17 = vcombine.low %v654_v3, %v658_v4 }
 0x15a   : > { %v10600_v29 = vcombine.low %v663_v14, %v667_v15 }
 0x15b   : > { %2462 = vmatmul.mubr.bf16.gmra.mrb[12].mxu0 %v12532_v13  ;;  %2688 = vmatmul.mubr.bf16.gmra.mrb[12].mxu1 %v12532_v13  ;;  %v10591_v13 = vcombine.high %v654_v3, %v658_v4  ;;  %v715_v3 = vld [vmem:[#allocation5 + $0x538] sm:$0xff] }
 0x15c   : > { %2751 = vmatpush1.bf16.msra.mxu0 %v10534_v18  ;;  %2977 = vmatpush1.bf16.msra.mxu1 %v10536_v22  ;;  %v10592_v18 = vcombine.low %v655_v6, %v659_v7  ;;  %v674_v22 = vld [vmem:[#allocation5 + $0x3f0] sm:$0xff] }
 0x15d   : > { %2752 = vmatprep.subr.bf16.mxu0 %v10543_v23  ;;  %2978 = vmatprep.subr.bf16.mxu1 %v10545_v26  ;;  %v10601_v23 = vcombine.high %v663_v14, %v667_v15  ;;  %v10598_v26 = vcombine.low %v662_v10, %v666_v11  ;;  %v10606_v34 = vcombine.low %v670_v21, %v674_v22  ;;  %v718_v7 = vld [vmem:[#allocation5 + $0x550] sm:$0xff]  ;;  %v719_v11 = vld [vmem:[#allocation5 + $0x558] sm:$0xff] }
 0x15e   : > { %2471 = vmatprep.mubr.bf16.mxu0 %v12533_v19  ;;  %2697 = vmatprep.mubr.bf16.mxu1 %v12533_v19  ;;  %v12544_v19 = vld [vmem:[%s14071_s26 + $0xe8] ss:$16 sps:$4 sm:$0xff]  }
 0x160   : > { %2753 = vmatpush1.bf16.msra.mxu0 %v10542_v27  ;;  %2979 = vmatpush1.bf16.msra.mxu1 %v10544_v30  ;;  %v678_v27 = vld [vmem:[#allocation5 + $0x410] sm:$0xff]  ;;  %v10607_v30 = vcombine.high %v670_v21, %v674_v22  ;;  %v731_v21 = vld [vmem:[#allocation5 + $0x5b8] sm:$0xff] }
 0x161   : > { %2754 = vmatprep.subr.bf16.mxu0 %v10551_v32  ;;  %2980 = vmatprep.subr.bf16.mxu1 %v10553_v35  ;;  %v683_v32 = vld [vmem:[#allocation5 + $0x438] sm:$0xff]  ;;  %v10608_v35 = vcombine.low %v671_v24, %v675_v25  ;;  %v10614_v43 = vcombine.low %v678_v27, %v682_v28  ;;  %v734_v25 = vld [vmem:[#allocation5 + $0x5d0] sm:$0xff] }
 0x163   : > { %2472 = vmatmul.mubr.bf16.gmra.mrb[16].mxu0 %v12535_v31  ;;  %2698 = vmatmul.mubr.bf16.gmra.mrb[16].mxu1 %v12535_v31  ;;  %v679_v31 = vld [vmem:[#allocation5 + $0x418] sm:$0xff] }
 0x164   : > { %2755 = vmatpush1.bf16.msra.mxu0 %v10550_v36  ;;  %2981 = vmatpush1.bf16.msra.mxu1 %v10552_v40  ;;  %v10615_v36 = vcombine.high %v678_v27, %v682_v28  ;;  %v10617_v38 = vcombine.high %v679_v31, %v683_v32  ;;  %v690_v40 = vld [vmem:[#allocation5 + $0x470] sm:$0xff] }
 0x165   : > { %2756 = vmatprep.subr.bf16.mxu0 %v10559_v41  ;;  %2982 = vmatprep.subr.bf16.mxu1 %v10561_v44  ;;  %v687_v41 = vld [vmem:[#allocation5 + $0x458] sm:$0xff]  ;;  %v10616_v44 = vcombine.low %v679_v31, %v683_v32  ;;  %v10622_v52 = vcombine.low %v686_v39, %v690_v40  ;;  %v13439_v31 = vld [vmem:[%s14071_s26 + $0x64] ss:$16 sps:$4 sm:$0xff]  }
 0x166   : > { %2481 = vmatprep.mubr.bf16.mxu0 %v12536_v37  ;;  %2707 = vmatprep.mubr.bf16.mxu1 %v12536_v37  ;;  %v13433_v37 = vld [vmem:[%s14071_s26 + $0x4] ss:$16 sps:$4 sm:$0xff]  }
 0x168   : > { %2757 = vmatpush1.bf16.msra.mxu0 %v10558_v45  ;;  %2983 = vmatpush1.bf16.msra.mxu1 %v10560_v46  ;;  %v10623_v45 = vcombine.high %v686_v39, %v690_v40  ;;  %v10625_v46 = vcombine.high %v687_v41, %v691_v42  ;;  %v747_v39 = vld [vmem:[#allocation5 + $0x638] sm:$0xff] }
 0x169   : > { %2758 = vmatprep.subr.bf16.mxu0 %v10567_v48  ;;  %2984 = vmatprep.subr.bf16.mxu1 %v10569_v51  ;;  %v698_v48 = vld [vmem:[#allocation5 + $0x4b0] sm:$0xff]  ;;  %v699_v51 = vld [vmem:[#allocation5 + $0x4b8] sm:$0xff] }
 0x16a   : > { %v10633_v60 = vcombine.high %v695_v50, %v699_v51 }
 0x16b   : > { %2482 = vmatmul.mubr.bf16.gmra.mrb[20].mxu0 %v12538_v47  ;;  %2708 = vmatmul.mubr.bf16.gmra.mrb[20].mxu1 %v12538_v47  ;;  %v694_v47 = vld [vmem:[#allocation5 + $0x490] sm:$0xff] }
 0x16c   : > { %2759 = vmatpush1.bf16.msra.mxu0 %v10566_v54  ;;  %2985 = vmatpush1.bf16.msra.mxu1 %v10568_v58  ;;  %v706_v54 = vld [vmem:[#allocation5 + $0x4f0] sm:$0xff]  ;;  %v10631_v56 = vcombine.high %v694_v47, %v698_v48  ;;  %v707_v58 = vld [vmem:[#allocation5 + $0x4f8] sm:$0xff]  ;;  %v10630_v61 = vcombine.low %v694_v47, %v698_v48 }
 0x16d   : > { %2760 = vmatprep.subr.bf16.mxu0 %v10575_v59  ;;  %2986 = vmatprep.subr.bf16.mxu1 %v10577_v62  ;;  %v13435_v59 = vld [vmem:[%s14071_s26 + $0x24] ss:$16 sps:$4 sm:$0xff]   ;;  %v10641_v4 = vcombine.high %v703_v57, %v707_v58  ;;  %v10638_v6 = vcombine.low %v702_v53, %v706_v54  ;;  %v751_v47 = vld [vmem:[#allocation5 + $0x658] sm:$0xff] }
 0x16e   : > { %2491 = vmatprep.mubr.bf16.mxu0 %v12539_v55  ;;  %2717 = vmatprep.mubr.bf16.mxu1 %v12539_v55  ;;  %v10624_v55 = vcombine.low %v687_v41, %v691_v42  ;;  %v710_v62 = vld [vmem:[#allocation5 + $0x510] sm:$0xff]  ;;  %v755_v48 = vld [vmem:[#allocation5 + $0x678] sm:$0xff] }
 0x16f   : > { %v13440_v41 = vld [vmem:[%s14071_s26 + $0x60] ss:$16 sps:$4 sm:$0xff]  }
 0x170   : > { %2761 = vmatpush1.bf16.msra.mxu0 %v10574_v63  ;;  %2987 = vmatpush1.bf16.msra.mxu1 %v10576_v0  ;;  %v714_v63 = vld [vmem:[#allocation5 + $0x530] sm:$0xff]  ;;  %v10632_v0 = vcombine.low %v695_v50, %v699_v51 }
 0x171   : > { %2762 = vmatprep.subr.bf16.mxu0 %v10583_v2  ;;  %2988 = vmatprep.subr.bf16.mxu1 %v10585_v5  ;;  %v711_v2 = vld [vmem:[#allocation5 + $0x518] sm:$0xff]  ;;  %v13436_v5 = vld [vmem:[%s14071_s26 + $0x20] ss:$16 sps:$4 sm:$0xff]   ;;  %v10647_v10 = vcombine.high %v710_v62, %v714_v63  ;;  %v10646_v15 = vcombine.low %v710_v62, %v714_v63  ;;  %v10688_v63 = vcombine.low %v751_v47, %v755_v48 }
 0x172   : > { %v10649_v14 = vcombine.high %v711_v2, %v715_v3  ;;  %v770_v62 = vld [vmem:[#allocation5 + $0x6f0] sm:$0xff] }
 0x173   : > { %2492 = vmatmul.mubr.bf16.gmra.mrb[24].mxu0 %v12541_v1  ;;  %2718 = vmatmul.mubr.bf16.gmra.mrb[24].mxu1 %v12541_v1  ;;  %v10639_v1 = vcombine.high %v702_v53, %v706_v54  ;;  %v758_v54 = vld [vmem:[#allocation5 + $0x690] sm:$0xff] }
 0x174   : > { %2763 = vmatpush1.bf16.msra.mxu0 %v10582_v8  ;;  %2989 = vmatpush1.bf16.msra.mxu1 %v10584_v12  ;;  %v722_v8 = vld [vmem:[#allocation5 + $0x570] sm:$0xff]  ;;  %v723_v12 = vld [vmem:[#allocation5 + $0x578] sm:$0xff] }
 0x175   : > { %2764 = vmatprep.subr.bf16.mxu0 %v10591_v13  ;;  %2990 = vmatprep.subr.bf16.mxu1 %v10593_v16  ;;  %v13437_v13 = vld [vmem:[%s14071_s26 + $0x44] ss:$16 sps:$4 sm:$0xff]   ;;  %v10657_v22 = vcombine.high %v719_v11, %v723_v12  ;;  %v10654_v24 = vcombine.low %v718_v7, %v722_v8  ;;  %v10656_v27 = vcombine.low %v719_v11, %v723_v12  ;;  %v13444_v11 = vld [vmem:[%s14071_s26 + $0xa0] ss:$16 sps:$4 sm:$0xff]   ;;  %v775_v12 = vld [vmem:[#allocation5 + $0x718] sm:$0xff] }
 0x176   : > { %2501 = vmatprep.mubr.bf16.mxu0 %v12542_v9  ;;  %2727 = vmatprep.mubr.bf16.mxu1 %v12542_v9  ;;  %v10640_v9 = vcombine.low %v703_v57, %v707_v58  ;;  %v726_v16 = vld [vmem:[#allocation5 + $0x590] sm:$0xff]  ;;  %v759_v58 = vld [vmem:[#allocation5 + $0x698] sm:$0xff] }
 0x177   : > { %v13442_v57 = vld [vmem:[%s14071_s26 + $0x80] ss:$16 sps:$4 sm:$0xff]  }
 0x178   : > { %2765 = vmatpush1.bf16.msra.mxu0 %v10590_v17  ;;  %2991 = vmatpush1.bf16.msra.mxu1 %v10592_v18  ;;  %v730_v17 = vld [vmem:[#allocation5 + $0x5b0] sm:$0xff]  ;;  %v10648_v18 = vcombine.low %v711_v2, %v715_v3  ;;  %v771_v2 = vld [vmem:[#allocation5 + $0x6f8] sm:$0xff] }
 0x179   : > { %2766 = vmatprep.subr.bf16.mxu0 %v10599_v20  ;;  %2992 = vmatprep.subr.bf16.mxu1 %v10601_v23  ;;  %v727_v20 = vld [vmem:[#allocation5 + $0x598] sm:$0xff]  ;;  %v13438_v23 = vld [vmem:[%s14071_s26 + $0x40] ss:$16 sps:$4 sm:$0xff]   ;;  %v10663_v28 = vcombine.high %v726_v16, %v730_v17  ;;  %v13443_v3 = vld [vmem:[%s14071_s26 + $0xa4] ss:$16 sps:$4 sm:$0xff]  }
 0x17a   : > { %v10665_v32 = vcombine.high %v727_v20, %v731_v21 }
 0x17b   : > { %2502 = vmatmul.mubr.bf16.gmra.mrb[28].mxu0 %v12544_v19  ;;  %2728 = vmatmul.mubr.bf16.gmra.mrb[28].mxu1 %v12544_v19  ;;  %v10655_v19 = vcombine.high %v718_v7, %v722_v8  ;;  %v774_v8 = vld [vmem:[#allocation5 + $0x710] sm:$0xff] }
 0x17c   : > { %2767 = vmatpush1.bf16.msra.mxu0 %v10598_v26  ;;  %2993 = vmatpush1.bf16.msra.mxu1 %v10600_v29  ;;  %v738_v26 = vld [vmem:[#allocation5 + $0x5f0] sm:$0xff]  ;;  %v735_v29 = vld [vmem:[#allocation5 + $0x5d8] sm:$0xff] }
 0x17d   : > { %2768 = vmatprep.subr.bf16.mxu0 %v10607_v30  ;;  %2994 = vmatprep.subr.bf16.mxu1 %v10609_v33  ;;  %v739_v30 = vld [vmem:[#allocation5 + $0x5f8] sm:$0xff]  ;;  %v10662_v33 = vcombine.low %v726_v16, %v730_v17  ;;  %v10670_v42 = vcombine.low %v734_v25, %v738_v26  ;;  %v786_v16 = vld [vmem:[#allocation5 + $0x770] sm:$0xff] }
 0x17e   : > { %2770 = vmatprep.mubr.bf16.mxu0 %v13433_v37  ;;  %2996 = vmatprep.mubr.bf16.mxu1 %v13433_v37  ;;  %v10671_v37 = vcombine.high %v734_v25, %v738_v26  ;;  %v10673_v40 = vcombine.high %v735_v29, %v739_v30  ;;  %v790_v26 = vld [vmem:[#allocation5 + $0x790] sm:$0xff] }
 0x180   : > { %2769 = vmatpush1.bf16.msra.mxu0 %v10606_v34  ;;  %2995 = vmatpush1.bf16.msra.mxu1 %v10608_v35  ;;  %v742_v34 = vld [vmem:[#allocation5 + $0x610] sm:$0xff] }
 0x181   : > { %2851 = vmatprep.subr.bf16.mxu0 %v10615_v36  ;;  %3077 = vmatprep.subr.bf16.mxu1 %v10617_v38  ;;  %v746_v35 = vld [vmem:[#allocation5 + $0x630] sm:$0xff]  ;;  %v10664_v36 = vcombine.low %v727_v20, %v731_v21  ;;  %v743_v38 = vld [vmem:[#allocation5 + $0x618] sm:$0xff] }
 0x182   : > { %v10681_v50 = vcombine.high %v743_v38, %v747_v39  ;;  %v10678_v51 = vcombine.low %v742_v34, %v746_v35  ;;  %v787_v20 = vld [vmem:[#allocation5 + $0x778] sm:$0xff]  ;;  %v13445_v21 = vld [vmem:[%s14071_s26 + $0xc4] ss:$16 sps:$4 sm:$0xff]  }
 0x183   : > { %2771 = vmatmul.mubr.bf16.vlgmr.msra.gmra.mrb[32].mxu0 %v13434_v49  ;;  %2997 = vmatmul.mubr.bf16.vlgmr.msra.gmra.mrb[32].mxu1 %v13434_v49  ;;  %v13441_v49 = vld [vmem:[%s14071_s26 + $0x84] ss:$16 sps:$4 sm:$0xff]  }
 0x184   : > { %2852 = vmatpush1.bf16.msra.mxu0 %v10614_v43  ;;  %3078 = vmatpush1.bf16.msra.mxu1 %v10616_v44  ;;  %v750_v43 = vld [vmem:[#allocation5 + $0x650] sm:$0xff] }
 0x185   : > { %2853 = vmatprep.subr.bf16.mxu0 %v10623_v45  ;;  %3079 = vmatprep.subr.bf16.mxu1 %v10625_v46  ;;  %v754_v44 = vld [vmem:[#allocation5 + $0x670] sm:$0xff]  ;;  %v10672_v45 = vcombine.low %v735_v29, %v739_v30  ;;  %v10679_v46 = vcombine.high %v742_v34, %v746_v35  ;;  %v791_v30 = vld [vmem:[#allocation5 + $0x798] sm:$0xff] }
 0x186   : > { %2780 = vmatprep.mubr.bf16.mxu0 %v13435_v59  ;;  %3006 = vmatprep.mubr.bf16.mxu1 %v13435_v59  ;;  %v10687_v53 = vcombine.high %v750_v43, %v754_v44  ;;  %v763_v59 = vld [vmem:[#allocation5 + $0x6b8] sm:$0xff]  ;;  %v13446_v29 = vld [vmem:[%s14071_s26 + $0xc0] ss:$16 sps:$4 sm:$0xff]  }
 0x187   : > { %v802_v34 = vld [vmem:[#allocation5 + $0x7f0] sm:$0xff] }
 0x188   : > { %2854 = vmatpush1.bf16.msra.mxu0 %v10622_v52  ;;  %3080 = vmatpush1.bf16.msra.mxu1 %v10624_v55  ;;  %v10680_v52 = vcombine.low %v743_v38, %v747_v39  ;;  %v762_v55 = vld [vmem:[#allocation5 + $0x6b0] sm:$0xff]  ;;  %v803_v38 = vld [vmem:[#allocation5 + $0x7f8] sm:$0xff] }
 0x189   : > { %2855 = vmatprep.subr.bf16.mxu0 %v10631_v56  ;;  %3081 = vmatprep.subr.bf16.mxu1 %v10633_v60  ;;  %v10689_v56 = vcombine.high %v751_v47, %v755_v48  ;;  %v10686_v60 = vcombine.low %v750_v43, %v754_v44  ;;  %v13447_v39 = vld [vmem:[%s14071_s26 + $0xe4] ss:$16 sps:$4 sm:$0xff]   ;;  %v12550_v48 = vld [vmem:[#allocation7 + $0xc] ss:$16 sps:$4 sm:$0xff]  }
 0x18b   : > { %2781 = vmatmul.mubr.bf16.gmra.mrb[36].mxu0 %v13436_v5  ;;  %3007 = vmatmul.mubr.bf16.gmra.mrb[36].mxu1 %v13436_v5  ;;  %v10694_v5 = vcombine.low %v758_v54, %v762_v55 }
 0x18c   : > { %2856 = vmatpush1.bf16.msra.mxu0 %v10630_v61  ;;  %3082 = vmatpush1.bf16.msra.mxu1 %v10632_v0  ;;  %v766_v61 = vld [vmem:[#allocation5 + $0x6d0] sm:$0xff]  ;;  %v10695_v0 = vcombine.high %v758_v54, %v762_v55  ;;  %v13450_v54 = vld [vmem:[%s14071_s26 + $0x8] ss:$16 sps:$4 sm:$0xff]  }
 0x18d   : > { %2857 = vmatprep.subr.bf16.mxu0 %v10639_v1  ;;  %3083 = vmatprep.subr.bf16.mxu1 %v10641_v4  ;;  %v767_v1 = vld [vmem:[#allocation5 + $0x6d8] sm:$0xff]  ;;  %v10697_v4 = vcombine.high %v759_v58, %v763_v59  ;;  %v10703_v7 = vcombine.high %v766_v61, %v770_v62  ;;  %v12551_v55 = vld [vmem:[#allocation7 + $0x20] ss:$16 sps:$4 sm:$0xff]  }
 0x18e   : > { %2790 = vmatprep.mubr.bf16.mxu0 %v13437_v13  ;;  %3016 = vmatprep.mubr.bf16.mxu1 %v13437_v13  ;;  %v779_v13 = vld [vmem:[#allocation5 + $0x738] sm:$0xff]  ;;  %v10704_v17 = vcombine.low %v767_v1, %v771_v2 }
 0x190   : > { %2858 = vmatpush1.bf16.msra.mxu0 %v10638_v6  ;;  %3084 = vmatpush1.bf16.msra.mxu1 %v10640_v9  ;;  %v10696_v6 = vcombine.low %v759_v58, %v763_v59  ;;  %v778_v9 = vld [vmem:[#allocation5 + $0x730] sm:$0xff]  ;;  %v12554_v58 = vld [vmem:[#allocation7 + $0x28] ss:$16 sps:$4 sm:$0xff]  }
 0x191   : > { %2859 = vmatprep.subr.bf16.mxu0 %v10647_v10  ;;  %3085 = vmatprep.subr.bf16.mxu1 %v10649_v14  ;;  %v10705_v10 = vcombine.high %v767_v1, %v771_v2  ;;  %v10702_v14 = vcombine.low %v766_v61, %v770_v62  ;;  %v12559_v59 = vld [vmem:[#allocation7 + $0x44] ss:$16 sps:$4 sm:$0xff]   ;;  %v12557_v61 = vld [vmem:[#allocation7 + $0x40] ss:$16 sps:$4 sm:$0xff]   ;;  %v12560_v62 = vld [vmem:[#allocation7 + $0x48] ss:$16 sps:$4 sm:$0xff]  }
 0x192   : > { %v12563_v1 = vld [vmem:[#allocation7 + $0x60] ss:$16 sps:$4 sm:$0xff]   ;;  %v12568_v2 = vld [vmem:[#allocation7 + $0x6c] ss:$16 sps:$4 sm:$0xff]  }
 0x193   : > { %2791 = vmatmul.mubr.bf16.gmra.mrb[40].mxu0 %v13438_v23  ;;  %3017 = vmatmul.mubr.bf16.gmra.mrb[40].mxu1 %v13438_v23  ;;  %v10710_v23 = vcombine.low %v774_v8, %v778_v9 }
 0x194   : > { %2860 = vmatpush1.bf16.msra.mxu0 %v10646_v15  ;;  %3086 = vmatpush1.bf16.msra.mxu1 %v10648_v18  ;;  %v782_v15 = vld [vmem:[#allocation5 + $0x750] sm:$0xff]  ;;  %v10711_v18 = vcombine.high %v774_v8, %v778_v9  ;;  %v12572_v8 = vld [vmem:[#allocation7 + $0x88] ss:$16 sps:$4 sm:$0xff]  }
 0x195   : > { %2861 = vmatprep.subr.bf16.mxu0 %v10655_v19  ;;  %3087 = vmatprep.subr.bf16.mxu1 %v10657_v22  ;;  %v783_v19 = vld [vmem:[#allocation5 + $0x758] sm:$0xff]  ;;  %v10713_v22 = vcombine.high %v775_v12, %v779_v13  ;;  %v10719_v25 = vcombine.high %v782_v15, %v786_v16  ;;  %v12577_v9 = vld [vmem:[#allocation7 + $0xa4] ss:$16 sps:$4 sm:$0xff]  }
 0x196   : > { %2800 = vmatprep.mubr.bf16.mxu0 %v13439_v31  ;;  %3026 = vmatprep.mubr.bf16.mxu1 %v13439_v31  ;;  %v795_v31 = vld [vmem:[#allocation5 + $0x7b8] sm:$0xff]  ;;  %v10720_v35 = vcombine.low %v783_v19, %v787_v20 }
 0x198   : > { %2862 = vmatpush1.bf16.msra.mxu0 %v10654_v24  ;;  %3088 = vmatpush1.bf16.msra.mxu1 %v10656_v27  ;;  %v10712_v24 = vcombine.low %v775_v12, %v779_v13  ;;  %v794_v27 = vld [vmem:[#allocation5 + $0x7b0] sm:$0xff]  ;;  %v12580_v12 = vld [vmem:[#allocation7 + $0xac] ss:$16 sps:$4 sm:$0xff]  }
 0x199   : > { %2863 = vmatprep.subr.bf16.mxu0 %v10663_v28  ;;  %3089 = vmatprep.subr.bf16.mxu1 %v10665_v32  ;;  %v10721_v28 = vcombine.high %v783_v19, %v787_v20  ;;  %v10718_v32 = vcombine.low %v782_v15, %v786_v16  ;;  %v13455_v13 = vld [vmem:[%s14071_s26 + $0x6c] ss:$16 sps:$4 sm:$0xff]   ;;  %v12583_v15 = vld [vmem:[#allocation7 + $0xc4] ss:$16 sps:$4 sm:$0xff]   ;;  %v13456_v20 = vld [vmem:[%s14071_s26 + $0x68] ss:$16 sps:$4 sm:$0xff]  }
 0x19a   : > { %v12586_v16 = vld [vmem:[#allocation7 + $0xcc] ss:$16 sps:$4 sm:$0xff]   ;;  %v12589_v19 = vld [vmem:[#allocation7 + $0xe4] ss:$16 sps:$4 sm:$0xff]  }
 0x19b   : > { %2801 = vmatmul.mubr.bf16.gmra.mrb[44].mxu0 %v13440_v41  ;;  %3027 = vmatmul.mubr.bf16.gmra.mrb[44].mxu1 %v13440_v41  ;;  %v10726_v41 = vcombine.low %v790_v26, %v794_v27 }
 0x19c   : > { %2864 = vmatpush1.bf16.msra.mxu0 %v10662_v33  ;;  %3090 = vmatpush1.bf16.msra.mxu1 %v10664_v36  ;;  %v798_v33 = vld [vmem:[#allocation5 + $0x7d0] sm:$0xff]  ;;  %v10727_v36 = vcombine.high %v790_v26, %v794_v27  ;;  %v12598_v26 = vld [vmem:[#allocation7 + $0x10c] ss:$16 sps:$4 sm:$0xff]  }
 0x19d   : > { %2865 = vmatprep.subr.bf16.mxu0 %v10671_v37  ;;  %3091 = vmatprep.subr.bf16.mxu1 %v10673_v40  ;;  %v799_v37 = vld [vmem:[#allocation5 + $0x7d8] sm:$0xff]  ;;  %v10729_v40 = vcombine.high %v791_v30, %v795_v31  ;;  %v10735_v43 = vcombine.high %v798_v33, %v802_v34  ;;  %v10734_v47 = vcombine.low %v798_v33, %v802_v34  ;;  %v12593_v27 = vld [vmem:[#allocation7 + $0x100] ss:$16 sps:$4 sm:$0xff]  }
 0x19e   : > { %2810 = vmatprep.mubr.bf16.mxu0 %v13441_v49  ;;  %3036 = vmatprep.mubr.bf16.mxu1 %v13441_v49  ;;  %v10737_v44 = vcombine.high %v799_v37, %v803_v38  ;;  %v10736_v49 = vcombine.low %v799_v37, %v803_v38  ;;  %v12599_v33 = vld [vmem:[#allocation7 + $0x120] ss:$16 sps:$4 sm:$0xff]   ;;  %v12602_v34 = vld [vmem:[#allocation7 + $0x128] ss:$16 sps:$4 sm:$0xff]  }
 0x19f   : > { %v12605_v37 = vld [vmem:[#allocation7 + $0x140] ss:$16 sps:$4 sm:$0xff]   ;;  %v12608_v38 = vld [vmem:[#allocation7 + $0x148] ss:$16 sps:$4 sm:$0xff]  }
 0x1a0   : > { %2866 = vmatpush1.bf16.msra.mxu0 %v10670_v42  ;;  %3092 = vmatpush1.bf16.msra.mxu1 %v10672_v45  ;;  %v10728_v42 = vcombine.low %v791_v30, %v795_v31  ;;  %v13448_v45 = vld [vmem:[%s14071_s26 + $0xe0] ss:$16 sps:$4 sm:$0xff]   ;;  %v12604_v30 = vld [vmem:[#allocation7 + $0x12c] ss:$16 sps:$4 sm:$0xff]   ;;  %v13458_v31 = vld [vmem:[%s14071_s26 + $0x88] ss:$16 sps:$4 sm:$0xff]  }
 0x1a1   : > { %2867 = vmatprep.subr.bf16.mxu0 %v10679_v46  ;;  %3093 = vmatprep.subr.bf16.mxu1 %v10681_v50  ;;  %v12547_v46 = vld [vmem:[#allocation7 + $0x4] ss:$16 sps:$4 sm:$0xff]   ;;  %v13449_v50 = vld [vmem:[%s14071_s26 + $0xc] ss:$16 sps:$4 sm:$0xff]  }
 0x1a3   : > { %2811 = vmatmul.mubr.bf16.gmra.mrb[48].mxu0 %v13442_v57  ;;  %3037 = vmatmul.mubr.bf16.gmra.mrb[48].mxu1 %v13442_v57  ;;  %v13451_v57 = vld [vmem:[%s14071_s26 + $0x2c] ss:$16 sps:$4 sm:$0xff]  }
 0x1a4   : > { %2868 = vmatpush1.bf16.msra.mxu0 %v10678_v51  ;;  %3094 = vmatpush1.bf16.msra.mxu1 %v10680_v52  ;;  %v12545_v51 = vld [vmem:[#allocation7] ss:$16 sps:$4 sm:$0xff]   ;;  %v12548_v52 = vld [vmem:[#allocation7 + $0x8] ss:$16 sps:$4 sm:$0xff]  }
 0x1a5   : > { %2869 = vmatprep.subr.bf16.mxu0 %v10687_v53  ;;  %3095 = vmatprep.subr.bf16.mxu1 %v10689_v56  ;;  %v12553_v53 = vld [vmem:[#allocation7 + $0x24] ss:$16 sps:$4 sm:$0xff]   ;;  %v12556_v56 = vld [vmem:[#allocation7 + $0x2c] ss:$16 sps:$4 sm:$0xff]  }
 0x1a6   : > { %2820 = vmatprep.mubr.bf16.mxu0 %v13443_v3  ;;  %3046 = vmatprep.mubr.bf16.mxu1 %v13443_v3  ;;  %v13453_v3 = vld [vmem:[%s14071_s26 + $0x4c] ss:$16 sps:$4 sm:$0xff]  }
 0x1a8   : > { %2870 = vmatpush1.bf16.msra.mxu0 %v10686_v60  ;;  %3096 = vmatpush1.bf16.msra.mxu1 %v10688_v63  ;;  %v12562_v60 = vld [vmem:[#allocation7 + $0x4c] ss:$16 sps:$4 sm:$0xff]   ;;  %v12565_v63 = vld [vmem:[#allocation7 + $0x64] ss:$16 sps:$4 sm:$0xff]  }
 0x1a9   : > { %2871 = vmatprep.subr.bf16.mxu0 %v10695_v0  ;;  %3097 = vmatprep.subr.bf16.mxu1 %v10697_v4  ;;  %v13452_v0 = vld [vmem:[%s14071_s26 + $0x28] ss:$16 sps:$4 sm:$0xff]  }
 0x1aa   : > { %v12566_v4 = vld [vmem:[#allocation7 + $0x68] ss:$16 sps:$4 sm:$0xff]  }
 0x1ab   : > { %2821 = vmatmul.mubr.bf16.gmra.mrb[52].mxu0 %v13444_v11  ;;  %3047 = vmatmul.mubr.bf16.gmra.mrb[52].mxu1 %v13444_v11  ;;  %v12575_v11 = vld [vmem:[#allocation7 + $0xa0] ss:$16 sps:$4 sm:$0xff]  }
 0x1ac   : > { %2872 = vmatpush1.bf16.msra.mxu0 %v10694_v5  ;;  %3098 = vmatpush1.bf16.msra.mxu1 %v10696_v6  ;;  %v12571_v5 = vld [vmem:[#allocation7 + $0x84] ss:$16 sps:$4 sm:$0xff]   ;;  %v12574_v6 = vld [vmem:[#allocation7 + $0x8c] ss:$16 sps:$4 sm:$0xff]  }
 0x1ad   : > { %2873 = vmatprep.subr.bf16.mxu0 %v10703_v7  ;;  %3099 = vmatprep.subr.bf16.mxu1 %v10705_v10  ;;  %v12569_v7 = vld [vmem:[#allocation7 + $0x80] ss:$16 sps:$4 sm:$0xff]   ;;  %v13454_v10 = vld [vmem:[%s14071_s26 + $0x48] ss:$16 sps:$4 sm:$0xff]  }
 0x1ae   : > { %2830 = vmatprep.mubr.bf16.mxu0 %v13445_v21  ;;  %3056 = vmatprep.mubr.bf16.mxu1 %v13445_v21  ;;  %v12587_v21 = vld [vmem:[#allocation7 + $0xe0] ss:$16 sps:$4 sm:$0xff]  }
 0x1b0   : > { %2874 = vmatpush1.bf16.msra.mxu0 %v10702_v14  ;;  %3100 = vmatpush1.bf16.msra.mxu1 %v10704_v17  ;;  %v12578_v14 = vld [vmem:[#allocation7 + $0xa8] ss:$16 sps:$4 sm:$0xff]   ;;  %v12581_v17 = vld [vmem:[#allocation7 + $0xc0] ss:$16 sps:$4 sm:$0xff]  }
 0x1b1   : > { %2875 = vmatprep.subr.bf16.mxu0 %v10711_v18  ;;  %3101 = vmatprep.subr.bf16.mxu1 %v10713_v22  ;;  %v12584_v18 = vld [vmem:[#allocation7 + $0xc8] ss:$16 sps:$4 sm:$0xff]   ;;  %v12592_v22 = vld [vmem:[#allocation7 + $0xec] ss:$16 sps:$4 sm:$0xff]  }
 0x1b3   : > { %2831 = vmatmul.mubr.bf16.gmra.mrb[56].mxu0 %v13446_v29  ;;  %3057 = vmatmul.mubr.bf16.gmra.mrb[56].mxu1 %v13446_v29  ;;  %v12601_v29 = vld [vmem:[#allocation7 + $0x124] ss:$16 sps:$4 sm:$0xff]  }
 0x1b4   : > { %2876 = vmatpush1.bf16.msra.mxu0 %v10710_v23  ;;  %3102 = vmatpush1.bf16.msra.mxu1 %v10712_v24  ;;  %v13457_v23 = vld [vmem:[%s14071_s26 + $0x8c] ss:$16 sps:$4 sm:$0xff]   ;;  %v12590_v24 = vld [vmem:[#allocation7 + $0xe8] ss:$16 sps:$4 sm:$0xff]  }
 0x1b5   : > { %2877 = vmatprep.subr.bf16.mxu0 %v10719_v25  ;;  %3103 = vmatprep.subr.bf16.mxu1 %v10721_v28  ;;  %v12595_v25 = vld [vmem:[#allocation7 + $0x104] ss:$16 sps:$4 sm:$0xff]   ;;  %v12596_v28 = vld [vmem:[#allocation7 + $0x108] ss:$16 sps:$4 sm:$0xff]  }
 0x1b6   : > { %2840 = vmatprep.mubr.bf16.mxu0 %v13447_v39  ;;  %3066 = vmatprep.mubr.bf16.mxu1 %v13447_v39  ;;  %v12613_v39 = vld [vmem:[#allocation7 + $0x164] ss:$16 sps:$4 sm:$0xff]  }
 0x1b8   : > { %2878 = vmatpush1.bf16.msra.mxu0 %v10718_v32  ;;  %3104 = vmatpush1.bf16.msra.mxu1 %v10720_v35  ;;  %v13459_v32 = vld [vmem:[%s14071_s26 + $0xac] ss:$16 sps:$4 sm:$0xff]   ;;  %v12607_v35 = vld [vmem:[#allocation7 + $0x144] ss:$16 sps:$4 sm:$0xff]  }
 0x1b9   : > { %2879 = vmatprep.subr.bf16.mxu0 %v10727_v36  ;;  %3105 = vmatprep.subr.bf16.mxu1 %v10729_v40  ;;  %v12610_v36 = vld [vmem:[#allocation7 + $0x14c] ss:$16 sps:$4 sm:$0xff]  }
 0x1ba   : > { %v12616_v40 = vld [vmem:[#allocation7 + $0x16c] ss:$16 sps:$4 sm:$0xff]  }
 0x1bb   : > { %2841 = vmatmul.mubr.bf16.gmra.mrb[60].mxu0 %v13448_v45  ;;  %3067 = vmatmul.mubr.bf16.gmra.mrb[60].mxu1 %v13448_v45  ;;  %v12619_v45 = vld [vmem:[#allocation7 + $0x184] ss:$16 sps:$4 sm:$0xff]  }
 0x1bc   : > { %2880 = vmatpush1.bf16.msra.mxu0 %v10726_v41  ;;  %3106 = vmatpush1.bf16.msra.mxu1 %v10728_v42  ;;  %v13460_v41 = vld [vmem:[%s14071_s26 + $0xa8] ss:$16 sps:$4 sm:$0xff]   ;;  %v13461_v42 = vld [vmem:[%s14071_s26 + $0xcc] ss:$16 sps:$4 sm:$0xff]  }
 0x1bd   : > { %2881 = vmatprep.subr.bf16.mxu0 %v10735_v43  ;;  %3107 = vmatprep.subr.bf16.mxu1 %v10737_v44  ;;  %v12611_v43 = vld [vmem:[#allocation7 + $0x160] ss:$16 sps:$4 sm:$0xff]   ;;  %v12614_v44 = vld [vmem:[#allocation7 + $0x168] ss:$16 sps:$4 sm:$0xff]  }
 0x1be   : > { %2883 = vmatprep.mubr.bf16.mxu0 %v13449_v50  ;;  %3109 = vmatprep.mubr.bf16.mxu1 %v13449_v50  ;;  %v12628_v50 = vld [vmem:[#allocation7 + $0x1ac] ss:$16 sps:$4 sm:$0xff]  }
 0x1c0   : > { %2882 = vmatpush1.bf16.msra.mxu0 %v10734_v47  ;;  %3108 = vmatpush1.bf16.msra.mxu1 %v10736_v49  ;;  %v12617_v47 = vld [vmem:[#allocation7 + $0x180] ss:$16 sps:$4 sm:$0xff]   ;;  %v12625_v49 = vld [vmem:[#allocation7 + $0x1a4] ss:$16 sps:$4 sm:$0xff]  }
 0x1c1   : > { %4172 = vmatprep.subr.bf16.mxu0 %v12547_v46  ;;  %4398 = vmatprep.subr.bf16.mxu1 %v12550_v48  ;;  %v12622_v46 = vld [vmem:[#allocation7 + $0x18c] ss:$16 sps:$4 sm:$0xff]   ;;  %v12620_v48 = vld [vmem:[#allocation7 + $0x188] ss:$16 sps:$4 sm:$0xff]  }
 0x1c3   : > { %2884 = vmatmul.mubr.bf16.vlgmr.msra.gmra.mrb[32].mxu0 %v13450_v54  ;;  %3110 = vmatmul.mubr.bf16.vlgmr.msra.gmra.mrb[32].mxu1 %v13450_v54  ;;  %v12626_v54 = vld [vmem:[#allocation7 + $0x1a8] ss:$16 sps:$4 sm:$0xff]  }
 0x1c4   : > { %2893 = vmatprep.mubr.bf16.mxu0 %v13451_v57  ;;  %3119 = vmatprep.mubr.bf16.mxu1 %v13451_v57  ;;  %v12629_v57 = vld [vmem:[#allocation7 + $0x1c0] ss:$16 sps:$4 sm:$0xff]  }
 0x1c5   : > { %4173 = vmatpush1.bf16.msra.mxu0 %v12545_v51  ;;  %4399 = vmatpush1.bf16.msra.mxu1 %v12548_v52  ;;  %v13462_v51 = vld [vmem:[%s14071_s26 + $0xc8] ss:$16 sps:$4 sm:$0xff]   ;;  %v13463_v52 = vld [vmem:[%s14071_s26 + $0xec] ss:$16 sps:$4 sm:$0xff]  }
 0x1c6   : > { %4174 = vmatprep.subr.bf16.mxu0 %v12553_v53  ;;  %4400 = vmatprep.subr.bf16.mxu1 %v12556_v56  ;;  %v12623_v53 = vld [vmem:[#allocation7 + $0x1a0] ss:$16 sps:$4 sm:$0xff]   ;;  %v12634_v56 = vld [vmem:[#allocation7 + $0x1cc] ss:$16 sps:$4 sm:$0xff]  }
 0x1c9   : > { %4175 = vmatpush1.bf16.msra.mxu0 %v12551_v55  ;;  %4401 = vmatpush1.bf16.msra.mxu1 %v12554_v58  ;;  %v12631_v55 = vld [vmem:[#allocation7 + $0x1c4] ss:$16 sps:$4 sm:$0xff]   ;;  %v12632_v58 = vld [vmem:[#allocation7 + $0x1c8] ss:$16 sps:$4 sm:$0xff]  }
 0x1ca   : > { %4176 = vmatprep.subr.bf16.mxu0 %v12559_v59  ;;  %4402 = vmatprep.subr.bf16.mxu1 %v12562_v60  ;;  %v12637_v59 = vld [vmem:[#allocation7 + $0x1e4] ss:$16 sps:$4 sm:$0xff]   ;;  %v12640_v60 = vld [vmem:[#allocation7 + $0x1ec] ss:$16 sps:$4 sm:$0xff]  }
 0x1cb   : > { %2894 = vmatmul.mubr.bf16.gmra.mrb[36].mxu0 %v13452_v0  ;;  %3120 = vmatmul.mubr.bf16.gmra.mrb[36].mxu1 %v13452_v0  ;;  %v12643_v0 = vld [vmem:[#allocation7 + $0x204] ss:$16 sps:$4 sm:$0xff]  }
 0x1cc   : > { %2903 = vmatprep.mubr.bf16.mxu0 %v13453_v3  ;;  %3129 = vmatprep.mubr.bf16.mxu1 %v13453_v3 }
 0x1cd   : > { %4177 = vmatpush1.bf16.msra.mxu0 %v12557_v61  ;;  %4403 = vmatpush1.bf16.msra.mxu1 %v12560_v62  ;;  %v13464_v61 = vld [vmem:[%s14071_s26 + $0xe8] ss:$16 sps:$4 sm:$0xff]   ;;  %v12635_v62 = vld [vmem:[#allocation7 + $0x1e0] ss:$16 sps:$4 sm:$0xff]   ;;  %s14885_s26 = scalar_lea.vmem [#allocation14], %s10447_s28  ;;  %s10449_s28 = sshll.u32 %s15645_s11, 3 }
 0x1ce   : > { %4178 = vmatprep.subr.bf16.mxu0 %v12565_v63  ;;  %4404 = vmatprep.subr.bf16.mxu1 %v12568_v2  ;;  %v12638_v63 = vld [vmem:[#allocation7 + $0x1e8] ss:$16 sps:$4 sm:$0xff]   ;;  %v806_v2 = vlaneseq  ;;  %s15025_s29 = scalar_lea.vmem %s15635_s10, %s10449_s28  ;;  %s10262_s25 = sshll.u32 %s14885_s26, 4  ;;  %s15374_s25 = int_to_ptr.vmem [resolvable:$true] %s10262_s25 }
 0x1cf   : > { %s10232_s10 = scalar_lea.sflag [#allocation15], %s14067_s22  ;;  %p13643_p12 = scmp.lt.s32.totalorder %s15374_s25, %s13641_s1 }
 0x1d0   : > { %v14153_v3 = vshrl.u32 %v806_v2, 7 }
 0x1d1   : > { %4179 = vmatpush1.bf16.msra.mxu0 %v12563_v1  ;;  %4405 = vmatpush1.bf16.msra.mxu1 %v12566_v4  ;;  %v12646_v1 = vld [vmem:[#allocation7 + $0x20c] ss:$16 sps:$4 sm:$0xff]   ;;  %v804_v4 = vld [vmem:[%s15605_s9] sm:$0xff] }
 0x1d2   : > { %4180 = vmatprep.subr.bf16.mxu0 %v12571_v5  ;;  %4406 = vmatprep.subr.bf16.mxu1 %v12574_v6  ;;  %v14159_v5 = vsub.s32 0, %v14153_v3  ;;  %v14162_v6 = vsub.s32 2, %v14153_v3 }
 0x1d3   : > { %2904 = vmatmul.mubr.bf16.gmra.mrb[40].mxu0 %v13454_v10  ;;  %3130 = vmatmul.mubr.bf16.gmra.mrb[40].mxu1 %v13454_v10 }
 0x1d4   : > { %2913 = vmatprep.mubr.bf16.mxu0 %v13455_v13  ;;  %3139 = vmatprep.mubr.bf16.mxu1 %v13455_v13  ;;  %v14174_v10 = vrot.slane %v804_v4, %v14162_v6 }
 0x1d5   : > { %4181 = vmatpush1.bf16.msra.mxu0 %v12569_v7  ;;  %4407 = vmatpush1.bf16.msra.mxu1 %v12572_v8  ;;  %v14165_v7 = vsub.s32 1, %v14153_v3  ;;  %v14168_v8 = vsub.s32 3, %v14153_v3 }
 0x1d6   : > { %4182 = vmatprep.subr.bf16.mxu0 %v12577_v9  ;;  %4408 = vmatprep.subr.bf16.mxu1 %v12580_v12  ;;  %v14171_v9 = vrot.slane %v804_v4, %v14159_v5 }
 0x1d7   : > { %v14180_v12 = vrot.slane %v804_v4, %v14168_v8 }
 0x1d9   : > { %4183 = vmatpush1.bf16.msra.mxu0 %v12575_v11  ;;  %4409 = vmatpush1.bf16.msra.mxu1 %v12578_v14  ;;  %v14177_v11 = vrot.slane %v804_v4, %v14165_v7  ;;  %v12658_v4 = vld [vmem:[#allocation7 + $0x24c] ss:$16 sps:$4 sm:$0xff]  }
 0x1da   : > { %4184 = vmatprep.subr.bf16.mxu0 %v12583_v15  ;;  %4410 = vmatprep.subr.bf16.mxu1 %v12586_v16 }
 0x1db   : > { %2914 = vmatmul.mubr.bf16.gmra.mrb[44].mxu0 %v13456_v20  ;;  %3140 = vmatmul.mubr.bf16.gmra.mrb[44].mxu1 %v13456_v20 }
 0x1dc   : > { %2923 = vmatprep.mubr.bf16.mxu0 %v13457_v23  ;;  %3149 = vmatprep.mubr.bf16.mxu1 %v13457_v23 }
 0x1dd   : > { %4185 = vmatpush1.bf16.msra.mxu0 %v12581_v17  ;;  %4411 = vmatpush1.bf16.msra.mxu1 %v12584_v18 }
 0x1de   : > { %4186 = vmatprep.subr.bf16.mxu0 %v12589_v19  ;;  %4412 = vmatprep.subr.bf16.mxu1 %v12592_v22 }
 0x1e1   : > { %4187 = vmatpush1.bf16.msra.mxu0 %v12587_v21  ;;  %4413 = vmatpush1.bf16.msra.mxu1 %v12590_v24 }
 0x1e2   : > { %4188 = vmatprep.subr.bf16.mxu0 %v12595_v25  ;;  %4414 = vmatprep.subr.bf16.mxu1 %v12598_v26 }
 0x1e3   : > { %2924 = vmatmul.mubr.bf16.gmra.mrb[48].mxu0 %v13458_v31  ;;  %3150 = vmatmul.mubr.bf16.gmra.mrb[48].mxu1 %v13458_v31 }
 0x1e4   : > { %2933 = vmatprep.mubr.bf16.mxu0 %v13459_v32  ;;  %3159 = vmatprep.mubr.bf16.mxu1 %v13459_v32 }
 0x1e5   : > { %4189 = vmatpush1.bf16.msra.mxu0 %v12593_v27  ;;  %4415 = vmatpush1.bf16.msra.mxu1 %v12596_v28 }
 0x1e6   : > { %4190 = vmatprep.subr.bf16.mxu0 %v12601_v29  ;;  %4416 = vmatprep.subr.bf16.mxu1 %v12604_v30 }
 0x1e9   : > { %4191 = vmatpush1.bf16.msra.mxu0 %v12599_v33  ;;  %4417 = vmatpush1.bf16.msra.mxu1 %v12602_v34 }
 0x1ea   : > { %4192 = vmatprep.subr.bf16.mxu0 %v12607_v35  ;;  %4418 = vmatprep.subr.bf16.mxu1 %v12610_v36  ;;  %v12641_v35 = vld [vmem:[#allocation7 + $0x200] ss:$16 sps:$4 sm:$0xff]  }
 0x1eb   : > { %2934 = vmatmul.mubr.bf16.gmra.mrb[52].mxu0 %v13460_v41  ;;  %3160 = vmatmul.mubr.bf16.gmra.mrb[52].mxu1 %v13460_v41 }
 0x1ec   : > { %2943 = vmatprep.mubr.bf16.mxu0 %v13461_v42  ;;  %3169 = vmatprep.mubr.bf16.mxu1 %v13461_v42 }
 0x1ed   : > { %4193 = vmatpush1.bf16.msra.mxu0 %v12605_v37  ;;  %4419 = vmatpush1.bf16.msra.mxu1 %v12608_v38  ;;  %v12644_v37 = vld [vmem:[#allocation7 + $0x208] ss:$16 sps:$4 sm:$0xff]  }
 0x1ee   : > { %4194 = vmatprep.subr.bf16.mxu0 %v12613_v39  ;;  %4420 = vmatprep.subr.bf16.mxu1 %v12616_v40 }
 0x1f1   : > { %4195 = vmatpush1.bf16.msra.mxu0 %v12611_v43  ;;  %4421 = vmatpush1.bf16.msra.mxu1 %v12614_v44  ;;  %v12649_v43 = vld [vmem:[#allocation7 + $0x224] ss:$16 sps:$4 sm:$0xff]   ;;  %v12652_v44 = vld [vmem:[#allocation7 + $0x22c] ss:$16 sps:$4 sm:$0xff]  }
 0x1f2   : > { %4196 = vmatprep.subr.bf16.mxu0 %v12619_v45  ;;  %4422 = vmatprep.subr.bf16.mxu1 %v12622_v46 }
 0x1f3   : > { %2944 = vmatmul.mubr.bf16.gmra.mrb[56].mxu0 %v13462_v51  ;;  %3170 = vmatmul.mubr.bf16.gmra.mrb[56].mxu1 %v13462_v51 }
 0x1f4   : > { %2953 = vmatprep.mubr.bf16.mxu0 %v13463_v52  ;;  %3179 = vmatprep.mubr.bf16.mxu1 %v13463_v52 }
 0x1f5   : > { %4197 = vmatpush1.bf16.msra.mxu0 %v12617_v47  ;;  %4423 = vmatpush1.bf16.msra.mxu1 %v12620_v48 }
 0x1f6   : > { %4198 = vmatprep.subr.bf16.mxu0 %v12625_v49  ;;  %4424 = vmatprep.subr.bf16.mxu1 %v12628_v50 }
 0x1f9   : > { %4199 = vmatpush1.bf16.msra.mxu0 %v12623_v53  ;;  %4425 = vmatpush1.bf16.msra.mxu1 %v12626_v54 }
 0x1fa   : > { %4200 = vmatprep.subr.bf16.mxu0 %v12631_v55  ;;  %4426 = vmatprep.subr.bf16.mxu1 %v12634_v56 }
 0x1fb   : > { %2954 = vmatmul.mubr.bf16.gmra.mrb[60].mxu0 %v13464_v61  ;;  %3180 = vmatmul.mubr.bf16.gmra.mrb[60].mxu1 %v13464_v61  ;;  %v12650_v61 = vld [vmem:[#allocation7 + $0x228] ss:$16 sps:$4 sm:$0xff]  }
 0x1fd   : > { %4201 = vmatpush1.bf16.msra.mxu0 %v12629_v57  ;;  %4427 = vmatpush1.bf16.msra.mxu1 %v12632_v58  ;;  %v12647_v57 = vld [vmem:[#allocation7 + $0x220] ss:$16 sps:$4 sm:$0xff]  }
 0x1fe   : > { %4202 = vmatprep.subr.bf16.mxu0 %v12637_v59  ;;  %4428 = vmatprep.subr.bf16.mxu1 %v12640_v60 }
 0x201   : > { %4203 = vmatpush1.bf16.msra.mxu0 %v12635_v62  ;;  %4429 = vmatpush1.bf16.msra.mxu1 %v12638_v63  ;;  %v12655_v62 = vld [vmem:[#allocation7 + $0x244] ss:$16 sps:$4 sm:$0xff]  }
 0x202   : > { %4285 = vmatprep.subr.bf16.mxu0 %v12643_v0  ;;  %4511 = vmatprep.subr.bf16.mxu1 %v12646_v1 }
 0x216   : > { %v2433_v13 = vpop.f32.mrb[0].mxu0  ;;  %v2659_v15 = vpop.f32.mrb[0].mxu1 }
 0x217   : > { %v11617_v14 = vadd.f32 %v2433_v13, %v14171_v9  ;;  %v2435_v16 = vpop.f32.mrb[1].mxu0  ;;  %v11649_v17 = vadd.f32 %v2659_v15, %v14174_v10  ;;  %v2661_v19 = vpop.f32.mrb[1].mxu1 }
 0x218   : > { %v11618_v18 = vadd.f32 %v2435_v16, %v14177_v11  ;;  %v2437_v20 = vpop.f32.mrb[2].mxu0  ;;  %v11650_v21 = vadd.f32 %v2661_v19, %v14180_v12  ;;  %v2663_v23 = vpop.f32.mrb[2].mxu1 }
 0x219   : > { %v11619_v22 = vadd.f32 %v2437_v20, %v14171_v9  ;;  %v2439_v24 = vpop.f32.mrb[3].mxu0  ;;  %v11651_v25 = vadd.f32 %v2663_v23, %v14174_v10  ;;  %v2665_v27 = vpop.f32.mrb[3].mxu1  ;;  %v3190_v28 = vmax.f32 %v11617_v14, 0.0  ;;  %v3192_v29 = vmax.f32 %v11649_v17, 0.0  ;;  %v12653_v14 = vld [vmem:[#allocation7 + $0x240] ss:$16 sps:$4 sm:$0xff]  }
 0x21a   : > { %v11620_v26 = vadd.f32 %v2439_v24, %v14177_v11  ;;  %v11652_v31 = vadd.f32 %v2665_v27, %v14180_v12  ;;  %v3191_v33 = vmax.f32 %v11618_v18, 0.0  ;;  %v3193_v38 = vmax.f32 %v11650_v21, 0.0  ;;  %v12656_v18 = vld [vmem:[#allocation7 + $0x248] ss:$16 sps:$4 sm:$0xff]   ;;  %v12661_v23 = vld [vmem:[#allocation7 + $0x264] ss:$16 sps:$4 sm:$0xff]  }
 0x21b   : > { %v3198_v30 = vmax.f32 %v11619_v22, 0.0  ;;  %v3200_v32 = vmax.f32 %v11651_v25, 0.0  ;;  %v12664_v24 = vld [vmem:[#allocation7 + $0x26c] ss:$16 sps:$4 sm:$0xff]  }
 0x21c   : > { %v3199_v34 = vmax.f32 %v11620_v26, 0.0  ;;  %v3201_v39 = vmax.f32 %v11652_v31, 0.0 }
 0x21d   : > { %v3318_v36 = vpack.c.bf16 %v3198_v30, %v3190_v28  ;;  %v14190_v40 = vpack.c.bf16 %v3200_v32, %v3192_v29 }
 0x21e   : > { %v2443_v41 = vpop.f32.mrb[4].mxu0  ;;  %v3319_v42 = vpack.c.bf16 %v3199_v34, %v3191_v33  ;;  %v2669_v46 = vpop.f32.mrb[4].mxu1  ;;  %v14193_v48 = vpack.c.bf16 %v3201_v39, %v3193_v38  ;;  %v12659_v38 = vld [vmem:[#allocation7 + $0x260] ss:$16 sps:$4 sm:$0xff]  }
 0x21f   : > { %v11621_v45 = vadd.f32 %v2443_v41, %v14171_v9  ;;  %v2445_v47 = vpop.f32.mrb[5].mxu0  ;;  %v11653_v49 = vadd.f32 %v2669_v46, %v14174_v10  ;;  %v2671_v51 = vpop.f32.mrb[5].mxu1 }
 0x220   : > { %v11622_v50 = vadd.f32 %v2445_v47, %v14177_v11  ;;  %v2447_v52 = vpop.f32.mrb[6].mxu0  ;;  %4204 = vmatprep.mubr.bf16.mxu0 %v3319_v42  ;;  %4430 = vmatprep.mubr.bf16.mxu1 %v3319_v42  ;;  %v11654_v53 = vadd.f32 %v2671_v51, %v14180_v12  ;;  %v2673_v55 = vpop.f32.mrb[6].mxu1 }
 0x221   : > { %v11623_v54 = vadd.f32 %v2447_v52, %v14171_v9  ;;  %v2449_v56 = vpop.f32.mrb[7].mxu0  ;;  %4205 = vmatmul.mubr.bf16.vlgmr.msra.gmra.mrb[64].mxu0 %v3318_v36  ;;  %4431 = vmatmul.mubr.bf16.vlgmr.msra.gmra.mrb[64].mxu1 %v3318_v36  ;;  %v11655_v58 = vadd.f32 %v2673_v55, %v14174_v10  ;;  %v2675_v60 = vpop.f32.mrb[7].mxu1  ;;  %v3206_v1 = vmax.f32 %v11621_v45, 0.0  ;;  %v3208_v15 = vmax.f32 %v11653_v49, 0.0  ;;  %v12665_v52 = vld [vmem:[#allocation7 + $0x280] ss:$16 sps:$4 sm:$0xff]  }
 0x222   : > { %v11624_v59 = vadd.f32 %v2449_v56, %v14177_v11  ;;  %4286 = vmatpush1.bf16.msra.mxu0 %v12641_v35  ;;  %4512 = vmatpush1.bf16.msra.mxu1 %v12644_v37  ;;  %v11656_v63 = vadd.f32 %v2675_v60, %v14180_v12  ;;  %v3207_v0 = vmax.f32 %v11622_v50, 0.0  ;;  %v3209_v19 = vmax.f32 %v11654_v53, 0.0  ;;  %v12670_v50 = vld [vmem:[#allocation7 + $0x28c] ss:$16 sps:$4 sm:$0xff]   ;;  %v12668_v56 = vld [vmem:[#allocation7 + $0x288] ss:$16 sps:$4 sm:$0xff]  }
 0x223   : > { %4287 = vmatprep.subr.bf16.mxu0 %v12649_v43  ;;  %4513 = vmatprep.subr.bf16.mxu1 %v12652_v44  ;;  %v3214_v2 = vmax.f32 %v11623_v54, 0.0  ;;  %v3216_v16 = vmax.f32 %v11655_v58, 0.0  ;;  %v12662_v43 = vld [vmem:[#allocation7 + $0x268] ss:$16 sps:$4 sm:$0xff]   ;;  %v12667_v44 = vld [vmem:[#allocation7 + $0x284] ss:$16 sps:$4 sm:$0xff]  }
 0x224   : > { %v3215_v13 = vmax.f32 %v11624_v59, 0.0  ;;  %v3217_v20 = vmax.f32 %v11656_v63, 0.0 }
 0x225   : > { %v3322_v17 = vpack.c.bf16 %v3214_v2, %v3206_v1  ;;  %v14202_v25 = vpack.c.bf16 %v3216_v16, %v3208_v15 }
 0x226   : > { %v2453_v21 = vpop.f32.mrb[8].mxu0  ;;  %4288 = vmatpush1.bf16.msra.mxu0 %v12647_v57  ;;  %4514 = vmatpush1.bf16.msra.mxu1 %v12650_v61  ;;  %v3323_v22 = vpack.c.bf16 %v3215_v13, %v3207_v0  ;;  %v2679_v27 = vpop.f32.mrb[8].mxu1  ;;  %v14205_v29 = vpack.c.bf16 %v3217_v20, %v3209_v19  ;;  %v12673_v61 = vld [vmem:[#allocation7 + $0x2a4] ss:$16 sps:$4 sm:$0xff]  }
 0x227   : > { %v11625_v26 = vadd.f32 %v2453_v21, %v14171_v9  ;;  %v2455_v28 = vpop.f32.mrb[9].mxu0  ;;  %4289 = vmatprep.subr.bf16.mxu0 %v12655_v62  ;;  %4515 = vmatprep.subr.bf16.mxu1 %v12658_v4  ;;  %v11657_v30 = vadd.f32 %v2679_v27, %v14174_v10  ;;  %v2681_v32 = vpop.f32.mrb[9].mxu1  ;;  %v12676_v62 = vld [vmem:[#allocation7 + $0x2ac] ss:$16 sps:$4 sm:$0xff]   ;;  %v12671_v21 = vld [vmem:[#allocation7 + $0x2a0] ss:$16 sps:$4 sm:$0xff]  }
 0x228   : > { %v11626_v31 = vadd.f32 %v2455_v28, %v14177_v11  ;;  %v2457_v33 = vpop.f32.mrb[10].mxu0  ;;  %4214 = vmatprep.mubr.bf16.mxu0 %v3323_v22  ;;  %4440 = vmatprep.mubr.bf16.mxu1 %v3323_v22  ;;  %v11658_v34 = vadd.f32 %v2681_v32, %v14180_v12  ;;  %v2683_v36 = vpop.f32.mrb[10].mxu1  ;;  %v12679_v27 = vld [vmem:[#allocation7 + $0x2c4] ss:$16 sps:$4 sm:$0xff]  }
 0x229   : > { %v11627_v35 = vadd.f32 %v2457_v33, %v14171_v9  ;;  %v2459_v37 = vpop.f32.mrb[11].mxu0  ;;  %4215 = vmatmul.mubr.bf16.gmra.mrb[68].mxu0 %v3322_v17  ;;  %4441 = vmatmul.mubr.bf16.gmra.mrb[68].mxu1 %v3322_v17  ;;  %v11659_v39 = vadd.f32 %v2683_v36, %v14174_v10  ;;  %v2685_v42 = vpop.f32.mrb[11].mxu1  ;;  %v3222_v47 = vmax.f32 %v11625_v26, 0.0  ;;  %v3224_v53 = vmax.f32 %v11657_v30, 0.0  ;;  %v12674_v26 = vld [vmem:[#allocation7 + $0x2a8] ss:$16 sps:$4 sm:$0xff]  }
 0x22a   : > { %v11628_v41 = vadd.f32 %v2459_v37, %v14177_v11  ;;  %4290 = vmatpush1.bf16.msra.mxu0 %v12653_v14  ;;  %4516 = vmatpush1.bf16.msra.mxu1 %v12656_v18  ;;  %v11660_v45 = vadd.f32 %v2685_v42, %v14180_v12  ;;  %v3223_v46 = vmax.f32 %v11626_v31, 0.0  ;;  %v3225_v57 = vmax.f32 %v11658_v34, 0.0  ;;  %v12682_v33 = vld [vmem:[#allocation7 + $0x2cc] ss:$16 sps:$4 sm:$0xff]  }
 0x22b   : > { %4291 = vmatprep.subr.bf16.mxu0 %v12661_v23  ;;  %4517 = vmatprep.subr.bf16.mxu1 %v12664_v24  ;;  %v3230_v49 = vmax.f32 %v11627_v35, 0.0  ;;  %v3232_v54 = vmax.f32 %v11659_v39, 0.0  ;;  %v12677_v35 = vld [vmem:[#allocation7 + $0x2c0] ss:$16 sps:$4 sm:$0xff]   ;;  %v12680_v39 = vld [vmem:[#allocation7 + $0x2c8] ss:$16 sps:$4 sm:$0xff]  }
 0x22c   : > { %v3231_v51 = vmax.f32 %v11628_v41, 0.0  ;;  %v3233_v58 = vmax.f32 %v11660_v45, 0.0  ;;  %v12685_v45 = vld [vmem:[#allocation7 + $0x2e4] ss:$16 sps:$4 sm:$0xff]  }
 0x22d   : > { %v3326_v55 = vpack.c.bf16 %v3230_v49, %v3222_v47  ;;  %v14214_v63 = vpack.c.bf16 %v3232_v54, %v3224_v53 }
 0x22e   : > { %v2463_v59 = vpop.f32.mrb[12].mxu0  ;;  %4292 = vmatpush1.bf16.msra.mxu0 %v12659_v38  ;;  %4518 = vmatpush1.bf16.msra.mxu1 %v12662_v43  ;;  %v3327_v60 = vpack.c.bf16 %v3231_v51, %v3223_v46  ;;  %v2689_v1 = vpop.f32.mrb[12].mxu1  ;;  %v14217_v4 = vpack.c.bf16 %v3233_v58, %v3225_v57  ;;  %v12688_v46 = vld [vmem:[#allocation7 + $0x2ec] ss:$16 sps:$4 sm:$0xff]  }
 0x22f   : > { %v11629_v0 = vadd.f32 %v2463_v59, %v14171_v9  ;;  %v2465_v2 = vpop.f32.mrb[13].mxu0  ;;  %4293 = vmatprep.subr.bf16.mxu0 %v12667_v44  ;;  %4519 = vmatprep.subr.bf16.mxu1 %v12670_v50  ;;  %v11661_v13 = vadd.f32 %v2689_v1, %v14174_v10  ;;  %v2691_v15 = vpop.f32.mrb[13].mxu1 }
 0x230   : > { %v11630_v14 = vadd.f32 %v2465_v2, %v14177_v11  ;;  %v2467_v16 = vpop.f32.mrb[14].mxu0  ;;  %4224 = vmatprep.mubr.bf16.mxu0 %v3327_v60  ;;  %4450 = vmatprep.mubr.bf16.mxu1 %v3327_v60  ;;  %v11662_v17 = vadd.f32 %v2691_v15, %v14180_v12  ;;  %v2693_v19 = vpop.f32.mrb[14].mxu1  ;;  %v12686_v2 = vld [vmem:[#allocation7 + $0x2e8] ss:$16 sps:$4 sm:$0xff]  }
 0x231   : > { %v11631_v18 = vadd.f32 %v2467_v16, %v14171_v9  ;;  %v2469_v20 = vpop.f32.mrb[15].mxu0  ;;  %4225 = vmatmul.mubr.bf16.gmra.mrb[72].mxu0 %v3326_v55  ;;  %4451 = vmatmul.mubr.bf16.gmra.mrb[72].mxu1 %v3326_v55  ;;  %v11663_v22 = vadd.f32 %v2693_v19, %v14174_v10  ;;  %v2695_v24 = vpop.f32.mrb[15].mxu1  ;;  %v3238_v31 = vmax.f32 %v11629_v0, 0.0  ;;  %v3240_v36 = vmax.f32 %v11661_v13, 0.0  ;;  %v12691_v13 = vld [vmem:[#allocation7 + $0x304] ss:$16 sps:$4 sm:$0xff]  }
 0x232   : > { %v11632_v23 = vadd.f32 %v2469_v20, %v14177_v11  ;;  %4294 = vmatpush1.bf16.msra.mxu0 %v12665_v52  ;;  %4520 = vmatpush1.bf16.msra.mxu1 %v12668_v56  ;;  %v11664_v28 = vadd.f32 %v2695_v24, %v14180_v12  ;;  %v3239_v30 = vmax.f32 %v11630_v14, 0.0  ;;  %v3241_v41 = vmax.f32 %v11662_v17, 0.0  ;;  %v12689_v20 = vld [vmem:[#allocation7 + $0x300] ss:$16 sps:$4 sm:$0xff]   ;;  %v12692_v24 = vld [vmem:[#allocation7 + $0x308] ss:$16 sps:$4 sm:$0xff]  }
 0x233   : > { %4295 = vmatprep.subr.bf16.mxu0 %v12673_v61  ;;  %4521 = vmatprep.subr.bf16.mxu1 %v12676_v62  ;;  %v3246_v32 = vmax.f32 %v11631_v18, 0.0  ;;  %v3248_v37 = vmax.f32 %v11663_v22, 0.0  ;;  %v12683_v61 = vld [vmem:[#allocation7 + $0x2e0] ss:$16 sps:$4 sm:$0xff]   ;;  %v12694_v18 = vld [vmem:[#allocation7 + $0x30c] ss:$16 sps:$4 sm:$0xff]  }
 0x234   : > { %v3247_v34 = vmax.f32 %v11632_v23, 0.0  ;;  %v3249_v42 = vmax.f32 %v11664_v28, 0.0 }
 0x235   : > { %v3330_v38 = vpack.c.bf16 %v3246_v32, %v3238_v31  ;;  %v14226_v47 = vpack.c.bf16 %v3248_v37, %v3240_v36  ;;  %v12697_v31 = vld [vmem:[#allocation7 + $0x324] ss:$16 sps:$4 sm:$0xff]   ;;  %v12700_v32 = vld [vmem:[#allocation7 + $0x32c] ss:$16 sps:$4 sm:$0xff]  }
 0x236   : > { %v2473_v43 = vpop.f32.mrb[16].mxu0  ;;  %4296 = vmatpush1.bf16.msra.mxu0 %v12671_v21  ;;  %4522 = vmatpush1.bf16.msra.mxu1 %v12674_v26  ;;  %v3331_v44 = vpack.c.bf16 %v3247_v34, %v3239_v30  ;;  %v2699_v50 = vpop.f32.mrb[16].mxu1  ;;  %v14229_v52 = vpack.c.bf16 %v3249_v42, %v3241_v41 }
 0x237   : > { %v11633_v49 = vadd.f32 %v2473_v43, %v14171_v9  ;;  %v2475_v51 = vpop.f32.mrb[17].mxu0  ;;  %4297 = vmatprep.subr.bf16.mxu0 %v12679_v27  ;;  %4523 = vmatprep.subr.bf16.mxu1 %v12682_v33  ;;  %v11665_v53 = vadd.f32 %v2699_v50, %v14174_v10  ;;  %v2701_v55 = vpop.f32.mrb[17].mxu1 }
 0x238   : > { %v11634_v54 = vadd.f32 %v2475_v51, %v14177_v11  ;;  %v2477_v56 = vpop.f32.mrb[18].mxu0  ;;  %4234 = vmatprep.mubr.bf16.mxu0 %v3331_v44  ;;  %4460 = vmatprep.mubr.bf16.mxu1 %v3331_v44  ;;  %v11666_v57 = vadd.f32 %v2701_v55, %v14180_v12  ;;  %v2703_v59 = vpop.f32.mrb[18].mxu1  ;;  %v12703_v55 = vld [vmem:[#allocation7 + $0x344] ss:$16 sps:$4 sm:$0xff]  }
 0x239   : > { %v11635_v58 = vadd.f32 %v2477_v56, %v14171_v9  ;;  %v2479_v60 = vpop.f32.mrb[19].mxu0  ;;  %4235 = vmatmul.mubr.bf16.gmra.mrb[76].mxu0 %v3330_v38  ;;  %4461 = vmatmul.mubr.bf16.gmra.mrb[76].mxu1 %v3330_v38  ;;  %v11667_v62 = vadd.f32 %v2703_v59, %v14174_v10  ;;  %v2705_v1 = vpop.f32.mrb[19].mxu1  ;;  %v3254_v16 = vmax.f32 %v11633_v49, 0.0  ;;  %v3256_v21 = vmax.f32 %v11665_v53, 0.0  ;;  %v12695_v49 = vld [vmem:[#allocation7 + $0x320] ss:$16 sps:$4 sm:$0xff]  }
 0x23a   : > { %v11636_v0 = vadd.f32 %v2479_v60, %v14177_v11  ;;  %4298 = vmatpush1.bf16.msra.mxu0 %v12677_v35  ;;  %4524 = vmatpush1.bf16.msra.mxu1 %v12680_v39  ;;  %v11668_v14 = vadd.f32 %v2705_v1, %v14180_v12  ;;  %v3255_v15 = vmax.f32 %v11634_v54, 0.0  ;;  %v3257_v26 = vmax.f32 %v11666_v57, 0.0  ;;  %v12698_v54 = vld [vmem:[#allocation7 + $0x328] ss:$16 sps:$4 sm:$0xff]   ;;  %v12706_v60 = vld [vmem:[#allocation7 + $0x34c] ss:$16 sps:$4 sm:$0xff]  }
 0x23b   : > { %4299 = vmatprep.subr.bf16.mxu0 %v12685_v45  ;;  %4525 = vmatprep.subr.bf16.mxu1 %v12688_v46  ;;  %v3262_v17 = vmax.f32 %v11635_v58, 0.0  ;;  %v3264_v22 = vmax.f32 %v11667_v62, 0.0  ;;  %v12701_v62 = vld [vmem:[#allocation7 + $0x340] ss:$16 sps:$4 sm:$0xff]  }
 0x23c   : > { %v3263_v19 = vmax.f32 %v11636_v0, 0.0  ;;  %v3265_v27 = vmax.f32 %v11668_v14, 0.0 }
 0x23d   : > { %v3334_v23 = vpack.c.bf16 %v3262_v17, %v3254_v16  ;;  %v14238_v33 = vpack.c.bf16 %v3264_v22, %v3256_v21 }
 0x23e   : > { %v2483_v28 = vpop.f32.mrb[20].mxu0  ;;  %4300 = vmatpush1.bf16.msra.mxu0 %v12683_v61  ;;  %4526 = vmatpush1.bf16.msra.mxu1 %v12686_v2  ;;  %v3335_v30 = vpack.c.bf16 %v3263_v19, %v3255_v15  ;;  %v2709_v35 = vpop.f32.mrb[20].mxu1  ;;  %v14241_v37 = vpack.c.bf16 %v3265_v27, %v3257_v26  ;;  %v12712_v19 = vld [vmem:[#allocation7 + $0x36c] ss:$16 sps:$4 sm:$0xff]  }
 0x23f   : > { %v11637_v34 = vadd.f32 %v2483_v28, %v14171_v9  ;;  %v2485_v36 = vpop.f32.mrb[21].mxu0  ;;  %4301 = vmatprep.subr.bf16.mxu0 %v12691_v13  ;;  %4527 = vmatprep.subr.bf16.mxu1 %v12694_v18  ;;  %v11669_v38 = vadd.f32 %v2709_v35, %v14174_v10  ;;  %v2711_v41 = vpop.f32.mrb[21].mxu1  ;;  %v12704_v13 = vld [vmem:[#allocation7 + $0x348] ss:$16 sps:$4 sm:$0xff]   ;;  %v12709_v18 = vld [vmem:[#allocation7 + $0x364] ss:$16 sps:$4 sm:$0xff]  }
 0x240   : > { %v11638_v39 = vadd.f32 %v2485_v36, %v14177_v11  ;;  %v2487_v42 = vpop.f32.mrb[22].mxu0  ;;  %4244 = vmatprep.mubr.bf16.mxu0 %v3335_v30  ;;  %4470 = vmatprep.mubr.bf16.mxu1 %v3335_v30  ;;  %v11670_v43 = vadd.f32 %v2711_v41, %v14180_v12  ;;  %v2713_v45 = vpop.f32.mrb[22].mxu1  ;;  %v12707_v36 = vld [vmem:[#allocation7 + $0x360] ss:$16 sps:$4 sm:$0xff]  }
 0x241   : > { %v11639_v44 = vadd.f32 %v2487_v42, %v14171_v9  ;;  %v2489_v46 = vpop.f32.mrb[23].mxu0  ;;  %4245 = vmatmul.mubr.bf16.gmra.mrb[80].mxu0 %v3334_v23  ;;  %4471 = vmatmul.mubr.bf16.gmra.mrb[80].mxu1 %v3334_v23  ;;  %v11671_v50 = vadd.f32 %v2713_v45, %v14174_v10  ;;  %v2715_v53 = vpop.f32.mrb[23].mxu1  ;;  %v3270_v58 = vmax.f32 %v11637_v34, 0.0  ;;  %v3272_v0 = vmax.f32 %v11669_v38, 0.0  ;;  %v12710_v42 = vld [vmem:[#allocation7 + $0x368] ss:$16 sps:$4 sm:$0xff]  }
 0x242   : > { %v11640_v51 = vadd.f32 %v2489_v46, %v14177_v11  ;;  %4302 = vmatpush1.bf16.msra.mxu0 %v12689_v20  ;;  %4528 = vmatpush1.bf16.msra.mxu1 %v12692_v24  ;;  %v11672_v56 = vadd.f32 %v2715_v53, %v14180_v12  ;;  %v3271_v57 = vmax.f32 %v11638_v39, 0.0  ;;  %v3273_v14 = vmax.f32 %v11670_v43, 0.0  ;;  %v12715_v43 = vld [vmem:[#allocation7 + $0x384] ss:$16 sps:$4 sm:$0xff]   ;;  %v12713_v53 = vld [vmem:[#allocation7 + $0x380] ss:$16 sps:$4 sm:$0xff]  }
 0x243   : > { %4303 = vmatprep.subr.bf16.mxu0 %v12697_v31  ;;  %4529 = vmatprep.subr.bf16.mxu1 %v12700_v32  ;;  %v3278_v59 = vmax.f32 %v11639_v44, 0.0  ;;  %v3280_v1 = vmax.f32 %v11671_v50, 0.0  ;;  %v12718_v50 = vld [vmem:[#allocation7 + $0x38c] ss:$16 sps:$4 sm:$0xff]  }
 0x244   : > { %v3279_v61 = vmax.f32 %v11640_v51, 0.0  ;;  %v3281_v15 = vmax.f32 %v11672_v56, 0.0 }
 0x245   : > { %v3338_v2 = vpack.c.bf16 %v3278_v59, %v3270_v58  ;;  %v14250_v20 = vpack.c.bf16 %v3280_v1, %v3272_v0  ;;  %v12724_v0 = vld [vmem:[#allocation7 + $0x3ac] ss:$16 sps:$4 sm:$0xff]  }
 0x246   : > { %v2493_v16 = vpop.f32.mrb[24].mxu0  ;;  %4304 = vmatpush1.bf16.msra.mxu0 %v12695_v49  ;;  %4530 = vmatpush1.bf16.msra.mxu1 %v12698_v54  ;;  %v3339_v17 = vpack.c.bf16 %v3279_v61, %v3271_v57  ;;  %v2719_v22 = vpop.f32.mrb[24].mxu1  ;;  %v14253_v24 = vpack.c.bf16 %v3281_v15, %v3273_v14  ;;  %v12716_v57 = vld [vmem:[#allocation7 + $0x388] ss:$16 sps:$4 sm:$0xff]  }
 0x247   : > { %v11641_v21 = vadd.f32 %v2493_v16, %v14171_v9  ;;  %v2495_v23 = vpop.f32.mrb[25].mxu0  ;;  %4305 = vmatprep.subr.bf16.mxu0 %v12703_v55  ;;  %4531 = vmatprep.subr.bf16.mxu1 %v12706_v60  ;;  %v11673_v26 = vadd.f32 %v2719_v22, %v14174_v10  ;;  %v2721_v28 = vpop.f32.mrb[25].mxu1 }
 0x248   : > { %v11642_v27 = vadd.f32 %v2495_v23, %v14177_v11  ;;  %v2497_v30 = vpop.f32.mrb[26].mxu0  ;;  %4254 = vmatprep.mubr.bf16.mxu0 %v3339_v17  ;;  %4480 = vmatprep.mubr.bf16.mxu1 %v3339_v17  ;;  %v11674_v31 = vadd.f32 %v2721_v28, %v14180_v12  ;;  %v2723_v34 = vpop.f32.mrb[26].mxu1 }
 0x249   : > { %v11643_v32 = vadd.f32 %v2497_v30, %v14171_v9  ;;  %v2499_v35 = vpop.f32.mrb[27].mxu0  ;;  %4255 = vmatmul.mubr.bf16.gmra.mrb[84].mxu0 %v3338_v2  ;;  %4481 = vmatmul.mubr.bf16.gmra.mrb[84].mxu1 %v3338_v2  ;;  %v11675_v38 = vadd.f32 %v2723_v34, %v14174_v10  ;;  %v2725_v41 = vpop.f32.mrb[27].mxu1  ;;  %v3286_v46 = vmax.f32 %v11641_v21, 0.0  ;;  %v3288_v54 = vmax.f32 %v11673_v26, 0.0  ;;  %v12727_v34 = vld [vmem:[#allocation7 + $0x3c4] ss:$16 sps:$4 sm:$0xff]  }
 0x24a   : > { %v11644_v39 = vadd.f32 %v2499_v35, %v14177_v11  ;;  %4306 = vmatpush1.bf16.msra.mxu0 %v12701_v62  ;;  %4532 = vmatpush1.bf16.msra.mxu1 %v12704_v13  ;;  %v11676_v44 = vadd.f32 %v2725_v41, %v14180_v12  ;;  %v3287_v45 = vmax.f32 %v11642_v27, 0.0  ;;  %v3289_v58 = vmax.f32 %v11674_v31, 0.0  ;;  %v12721_v62 = vld [vmem:[#allocation7 + $0x3a4] ss:$16 sps:$4 sm:$0xff]   ;;  %v12719_v27 = vld [vmem:[#allocation7 + $0x3a0] ss:$16 sps:$4 sm:$0xff]  }
 0x24b   : > { %4307 = vmatprep.subr.bf16.mxu0 %v12709_v18  ;;  %4533 = vmatprep.subr.bf16.mxu1 %v12712_v19  ;;  %v3294_v49 = vmax.f32 %v11643_v32, 0.0  ;;  %v3296_v55 = vmax.f32 %v11675_v38, 0.0  ;;  %v12722_v32 = vld [vmem:[#allocation7 + $0x3a8] ss:$16 sps:$4 sm:$0xff]  }
 0x24c   : > { %v3295_v51 = vmax.f32 %v11644_v39, 0.0  ;;  %v3297_v59 = vmax.f32 %v11676_v44, 0.0  ;;  %v12730_v39 = vld [vmem:[#allocation7 + $0x3cc] ss:$16 sps:$4 sm:$0xff]  }
 0x24d   : > { %v3342_v56 = vpack.c.bf16 %v3294_v49, %v3286_v46  ;;  %v14262_v1 = vpack.c.bf16 %v3296_v55, %v3288_v54  ;;  %v12731_v54 = vld [vmem:[#allocation7 + $0x3e0] ss:$16 sps:$4 sm:$0xff]   ;;  %v12734_v55 = vld [vmem:[#allocation7 + $0x3e8] ss:$16 sps:$4 sm:$0xff]  }
 0x24e   : > { %v2503_v60 = vpop.f32.mrb[28].mxu0  ;;  %4308 = vmatpush1.bf16.msra.mxu0 %v12707_v36  ;;  %4534 = vmatpush1.bf16.msra.mxu1 %v12710_v42  ;;  %v3343_v61 = vpack.c.bf16 %v3295_v51, %v3287_v45  ;;  %v2729_v13 = vpop.f32.mrb[28].mxu1  ;;  %v14265_v15 = vpack.c.bf16 %v3297_v59, %v3289_v58  ;;  %v12725_v42 = vld [vmem:[#allocation7 + $0x3c0] ss:$16 sps:$4 sm:$0xff]   ;;  %v12728_v45 = vld [vmem:[#allocation7 + $0x3c8] ss:$16 sps:$4 sm:$0xff]  }
 0x24f   : > { %v11645_v2 = vadd.f32 %v2503_v60, %v14171_v9  ;;  %v2505_v14 = vpop.f32.mrb[29].mxu0  ;;  %4309 = vmatprep.subr.bf16.mxu0 %v12715_v43  ;;  %4535 = vmatprep.subr.bf16.mxu1 %v12718_v50  ;;  %v11677_v16 = vadd.f32 %v2729_v13, %v14174_v10  ;;  %v2731_v18 = vpop.f32.mrb[29].mxu1  ;;  %v12733_v50 = vld [vmem:[#allocation7 + $0x3e4] ss:$16 sps:$4 sm:$0xff]   ;;  %v12736_v51 = vld [vmem:[#allocation7 + $0x3ec] ss:$16 sps:$4 sm:$0xff]  }
 0x250   : > { %v11646_v17 = vadd.f32 %v2505_v14, %v14177_v11  ;;  %v2507_v19 = vpop.f32.mrb[30].mxu0  ;;  %4264 = vmatprep.mubr.bf16.mxu0 %v3343_v61  ;;  %4490 = vmatprep.mubr.bf16.mxu1 %v3343_v61  ;;  %v11678_v21 = vadd.f32 %v2731_v18, %v14180_v12  ;;  %v2733_v23 = vpop.f32.mrb[30].mxu1  ;;  %v12737_v58 = vld [vmem:[#allocation8] ss:$16 sps:$4 sm:$0xff]   ;;  %v12740_v59 = vld [vmem:[#allocation8 + $0x8] ss:$16 sps:$4 sm:$0xff]  }
 0x251   : > { %v11647_v22 = vadd.f32 %v2507_v19, %v14171_v9  ;;  %v2509_v26 = vpop.f32.mrb[31].mxu0  ;;  %4265 = vmatmul.mubr.bf16.gmra.mrb[88].mxu0 %v3342_v56  ;;  %4491 = vmatmul.mubr.bf16.gmra.mrb[88].mxu1 %v3342_v56  ;;  %v11679_v28 = vadd.f32 %v2733_v23, %v14174_v10  ;;  %v2735_v31 = vpop.f32.mrb[31].mxu1  ;;  %v3302_v9 = vmax.f32 %v11645_v2, 0.0  ;;  %v3304_v43 = vmax.f32 %v11677_v16, 0.0  ;;  %v12739_v56 = vld [vmem:[#allocation8 + $0x4] ss:$16 sps:$4 sm:$0xff]  }
 0x252   : > { %v11648_v30 = vadd.f32 %v2509_v26, %v14177_v11  ;;  %4310 = vmatpush1.bf16.msra.mxu0 %v12713_v53  ;;  %4536 = vmatpush1.bf16.msra.mxu1 %v12716_v57  ;;  %v11680_v35 = vadd.f32 %v2735_v31, %v14180_v12  ;;  %v3303_v36 = vmax.f32 %v11646_v17, 0.0  ;;  %v3305_v11 = vmax.f32 %v11678_v21, 0.0  ;;  %v12742_v57 = vld [vmem:[#allocation8 + $0xc] ss:$16 sps:$4 sm:$0xff]   ;;  %v12745_v60 = vld [vmem:[#allocation8 + $0x24] ss:$16 sps:$4 sm:$0xff]  }
 0x253   : > { %4311 = vmatprep.subr.bf16.mxu0 %v12721_v62  ;;  %4537 = vmatprep.subr.bf16.mxu1 %v12724_v0  ;;  %v3310_v38 = vmax.f32 %v11647_v22, 0.0  ;;  %v3312_v44 = vmax.f32 %v11679_v28, 0.0  ;;  %v12748_v61 = vld [vmem:[#allocation8 + $0x2c] ss:$16 sps:$4 sm:$0xff]   ;;  %v12746_v62 = vld [vmem:[#allocation8 + $0x28] ss:$16 sps:$4 sm:$0xff]  }
 0x254   : > { %v3311_v41 = vmax.f32 %v11648_v30, 0.0  ;;  %v3313_v46 = vmax.f32 %v11680_v35, 0.0  ;;  %v12751_v0 = vld [vmem:[#allocation8 + $0x44] ss:$16 sps:$4 sm:$0xff]   ;;  %v12754_v2 = vld [vmem:[#allocation8 + $0x4c] ss:$16 sps:$4 sm:$0xff]  }
 0x255   : > { %v3346_v10 = vpack.c.bf16 %v3310_v38, %v3302_v9  ;;  %v14274_v12 = vpack.c.bf16 %v3312_v44, %v3304_v43  ;;  %v12749_v13 = vld [vmem:[#allocation8 + $0x40] ss:$16 sps:$4 sm:$0xff]   ;;  %v12752_v14 = vld [vmem:[#allocation8 + $0x48] ss:$16 sps:$4 sm:$0xff]   ;;  %v12757_v16 = vld [vmem:[#allocation8 + $0x64] ss:$16 sps:$4 sm:$0xff]  }
 0x256   : > { %4312 = vmatpush1.bf16.msra.mxu0 %v12719_v27  ;;  %4538 = vmatpush1.bf16.msra.mxu1 %v12722_v32  ;;  %v3347_v49 = vpack.c.bf16 %v3311_v41, %v3303_v36  ;;  %v14276_v53 = vpack.c.bf16 %v3313_v46, %v3305_v11  ;;  %v12758_v17 = vld [vmem:[#allocation8 + $0x68] ss:$16 sps:$4 sm:$0xff]   ;;  %v12763_v18 = vld [vmem:[#allocation8 + $0x84] ss:$16 sps:$4 sm:$0xff]   ;;  %v12766_v19 = vld [vmem:[#allocation8 + $0x8c] ss:$16 sps:$4 sm:$0xff]  }
 0x257   : > { %4313 = vmatprep.subr.bf16.mxu0 %v12727_v34  ;;  %4539 = vmatprep.subr.bf16.mxu1 %v12730_v39  ;;  %v12761_v21 = vld [vmem:[#allocation8 + $0x80] ss:$16 sps:$4 sm:$0xff]   ;;  %v12764_v22 = vld [vmem:[#allocation8 + $0x88] ss:$16 sps:$4 sm:$0xff]   ;;  %v12769_v23 = vld [vmem:[#allocation8 + $0xa4] ss:$16 sps:$4 sm:$0xff]  }
 0x258   : > { %4274 = vmatprep.mubr.bf16.mxu0 %v3347_v49  ;;  %4500 = vmatprep.mubr.bf16.mxu1 %v3347_v49  ;;  %v12770_v26 = vld [vmem:[#allocation8 + $0xa8] ss:$16 sps:$4 sm:$0xff]   ;;  %v12775_v27 = vld [vmem:[#allocation8 + $0xc4] ss:$16 sps:$4 sm:$0xff]   ;;  %v12778_v28 = vld [vmem:[#allocation8 + $0xcc] ss:$16 sps:$4 sm:$0xff]  }
 0x259   : > { %4275 = vmatmul.mubr.bf16.gmra.mrb[92].mxu0 %v3346_v10  ;;  %4501 = vmatmul.mubr.bf16.gmra.mrb[92].mxu1 %v3346_v10  ;;  %v12773_v30 = vld [vmem:[#allocation8 + $0xc0] ss:$16 sps:$4 sm:$0xff]   ;;  %v12776_v31 = vld [vmem:[#allocation8 + $0xc8] ss:$16 sps:$4 sm:$0xff]   ;;  %v12781_v32 = vld [vmem:[#allocation8 + $0xe4] ss:$16 sps:$4 sm:$0xff]  }
 0x25a   : > { %4314 = vmatpush1.bf16.msra.mxu0 %v12725_v42  ;;  %4317 = vmatprep.mubr.bf16.mxu0 %v14193_v48  ;;  %v12782_v34 = vld [vmem:[#allocation8 + $0xe8] ss:$16 sps:$4 sm:$0xff]   ;;  %v12787_v35 = vld [vmem:[#allocation8 + $0x104] ss:$16 sps:$4 sm:$0xff]   ;;  %v12790_v36 = vld [vmem:[#allocation8 + $0x10c] ss:$16 sps:$4 sm:$0xff]  }
 0x25b   : > { %4540 = vmatpush1.bf16.msra.mxu1 %v12728_v45  ;;  %4543 = vmatprep.mubr.bf16.mxu1 %v14193_v48  ;;  %v12743_v48 = vld [vmem:[#allocation8 + $0x20] ss:$16 sps:$4 sm:$0xff]   ;;  %v12788_v38 = vld [vmem:[#allocation8 + $0x108] ss:$16 sps:$4 sm:$0xff]   ;;  %v12793_v39 = vld [vmem:[#allocation8 + $0x124] ss:$16 sps:$4 sm:$0xff]  }
 0x25c   : > { %4315 = vmatprep.subr.bf16.mxu0 %v12733_v50  ;;  %4541 = vmatprep.subr.bf16.mxu1 %v12736_v51  ;;  %v12785_v9 = vld [vmem:[#allocation8 + $0x100] ss:$16 sps:$4 sm:$0xff]   ;;  %v12794_v41 = vld [vmem:[#allocation8 + $0x128] ss:$16 sps:$4 sm:$0xff]   ;;  %v12799_v42 = vld [vmem:[#allocation8 + $0x144] ss:$16 sps:$4 sm:$0xff]  }
 0x25d   : > { %v12802_v43 = vld [vmem:[#allocation8 + $0x14c] ss:$16 sps:$4 sm:$0xff]   ;;  %v12797_v44 = vld [vmem:[#allocation8 + $0x140] ss:$16 sps:$4 sm:$0xff]   ;;  %v12800_v10 = vld [vmem:[#allocation8 + $0x148] ss:$16 sps:$4 sm:$0xff]  }
 0x25e   : > { %4316 = vmatpush1.bf16.msra.mxu0 %v12731_v54  ;;  %v12805_v45 = vld [vmem:[#allocation8 + $0x164] ss:$16 sps:$4 sm:$0xff]   ;;  %v12806_v11 = vld [vmem:[#allocation8 + $0x168] ss:$16 sps:$4 sm:$0xff]   ;;  %v12814_v49 = vld [vmem:[#allocation8 + $0x18c] ss:$16 sps:$4 sm:$0xff]  }
 0x25f   : > { %4542 = vmatpush1.bf16.msra.mxu1 %v12734_v55  ;;  %5510 = vmatprep.subr.bf16.mxu0 %v12739_v56  ;;  %v12811_v46 = vld [vmem:[#allocation8 + $0x184] ss:$16 sps:$4 sm:$0xff]   ;;  %v12809_v50 = vld [vmem:[#allocation8 + $0x180] ss:$16 sps:$4 sm:$0xff]   ;;  %v824_v51 = vsub.s32 4, %v14153_v3  ;;  %v832_v55 = vsub.s32 6, %v14153_v3 }
 0x260   : > { %5736 = vmatprep.subr.bf16.mxu1 %v12742_v57  ;;  %v12812_v54 = vld [vmem:[#allocation8 + $0x188] ss:$16 sps:$4 sm:$0xff]   ;;  %v12820_v56 = vld [vmem:[#allocation8 + $0x1ac] ss:$16 sps:$4 sm:$0xff]   ;;  %v836_v57 = vsub.s32 7, %v14153_v3 }
 0x261   : > { %4318 = vmatmul.mubr.bf16.vlgmr.msra.gmra.mrb[64].mxu0 %v14190_v40 }
 0x262   : > { %4544 = vmatmul.mubr.bf16.vlgmr.msra.gmra.mrb[64].mxu1 %v14190_v40  ;;  %4327 = vmatprep.mubr.bf16.mxu0 %v14205_v29  ;;  %v12760_v40 = vld [vmem:[#allocation8 + $0x6c] ss:$16 sps:$4 sm:$0xff]  }
 0x263   : > { %4553 = vmatprep.mubr.bf16.mxu1 %v14205_v29  ;;  %5511 = vmatpush1.bf16.msra.mxu0 %v12737_v58  ;;  %v12755_v29 = vld [vmem:[#allocation8 + $0x60] ss:$16 sps:$4 sm:$0xff]  }
 0x264   : > { %5737 = vmatpush1.bf16.msra.mxu1 %v12740_v59  ;;  %5512 = vmatprep.subr.bf16.mxu0 %v12745_v60  ;;  %v12815_v58 = vld [vmem:[#allocation8 + $0x1a0] ss:$16 sps:$4 sm:$0xff]  }
 0x265   : > { %5738 = vmatprep.subr.bf16.mxu1 %v12748_v61  ;;  %v13465_v59 = vld [vmem:[%s15605_s9] sm:$0xff]  ;;  %v12818_v61 = vld [vmem:[#allocation8 + $0x1a8] ss:$16 sps:$4 sm:$0xff]  }
 0x266   : > { %v14315_v60 = vrot.slane %v13465_v59, %v824_v51 }
 0x267   : > { %5513 = vmatpush1.bf16.msra.mxu0 %v12743_v48  ;;  %v14317_v48 = vrot.slane %v13465_v59, %v832_v55 }
 0x268   : > { %5739 = vmatpush1.bf16.msra.mxu1 %v12746_v62  ;;  %5514 = vmatprep.subr.bf16.mxu0 %v12751_v0  ;;  %v14321_v62 = vrot.slane %v13465_v59, %v836_v57 }
 0x269   : > { %4328 = vmatmul.mubr.bf16.gmra.mrb[68].mxu0 %v14202_v25  ;;  %5740 = vmatprep.subr.bf16.mxu1 %v12754_v2 }
 0x26a   : > { %4554 = vmatmul.mubr.bf16.gmra.mrb[68].mxu1 %v14202_v25  ;;  %4337 = vmatprep.mubr.bf16.mxu0 %v14217_v4  ;;  %v12772_v25 = vld [vmem:[#allocation8 + $0xac] ss:$16 sps:$4 sm:$0xff]  }
 0x26b   : > { %4563 = vmatprep.mubr.bf16.mxu1 %v14217_v4  ;;  %5515 = vmatpush1.bf16.msra.mxu0 %v12749_v13  ;;  %v12767_v4 = vld [vmem:[#allocation8 + $0xa0] ss:$16 sps:$4 sm:$0xff]  }
 0x26c   : > { %5741 = vmatpush1.bf16.msra.mxu1 %v12752_v14  ;;  %5516 = vmatprep.subr.bf16.mxu0 %v12757_v16  ;;  %v12821_v16 = vld [vmem:[#allocation8 + $0x1c0] ss:$16 sps:$4 sm:$0xff]  }
 0x26d   : > { %5742 = vmatprep.subr.bf16.mxu1 %v12760_v40 }
 0x26f   : > { %5517 = vmatpush1.bf16.msra.mxu0 %v12755_v29 }
 0x270   : > { %5743 = vmatpush1.bf16.msra.mxu1 %v12758_v17  ;;  %5518 = vmatprep.subr.bf16.mxu0 %v12763_v18 }
 0x271   : > { %4338 = vmatmul.mubr.bf16.gmra.mrb[72].mxu0 %v14214_v63  ;;  %5744 = vmatprep.subr.bf16.mxu1 %v12766_v19  ;;  %v12824_v19 = vld [vmem:[#allocation8 + $0x1c8] ss:$16 sps:$4 sm:$0xff]  }
 0x272   : > { %4564 = vmatmul.mubr.bf16.gmra.mrb[72].mxu1 %v14214_v63  ;;  %4347 = vmatprep.mubr.bf16.mxu0 %v14229_v52  ;;  %v12784_v63 = vld [vmem:[#allocation8 + $0xec] ss:$16 sps:$4 sm:$0xff]  }
 0x273   : > { %4573 = vmatprep.mubr.bf16.mxu1 %v14229_v52  ;;  %5519 = vmatpush1.bf16.msra.mxu0 %v12761_v21  ;;  %v12779_v52 = vld [vmem:[#allocation8 + $0xe0] ss:$16 sps:$4 sm:$0xff]   ;;  %v12829_v21 = vld [vmem:[#allocation8 + $0x1e4] ss:$16 sps:$4 sm:$0xff]  }
 0x274   : > { %5745 = vmatpush1.bf16.msra.mxu1 %v12764_v22  ;;  %5520 = vmatprep.subr.bf16.mxu0 %v12769_v23 }
 0x275   : > { %5746 = vmatprep.subr.bf16.mxu1 %v12772_v25 }
 0x277   : > { %5521 = vmatpush1.bf16.msra.mxu0 %v12767_v4 }
 0x278   : > { %5747 = vmatpush1.bf16.msra.mxu1 %v12770_v26  ;;  %5522 = vmatprep.subr.bf16.mxu0 %v12775_v27  ;;  %v12832_v26 = vld [vmem:[#allocation8 + $0x1ec] ss:$16 sps:$4 sm:$0xff]  }
 0x279   : > { %4348 = vmatmul.mubr.bf16.gmra.mrb[76].mxu0 %v14226_v47  ;;  %5748 = vmatprep.subr.bf16.mxu1 %v12778_v28 }
 0x27a   : > { %4574 = vmatmul.mubr.bf16.gmra.mrb[76].mxu1 %v14226_v47  ;;  %4357 = vmatprep.mubr.bf16.mxu0 %v14241_v37  ;;  %v12796_v47 = vld [vmem:[#allocation8 + $0x12c] ss:$16 sps:$4 sm:$0xff]  }
 0x27b   : > { %4583 = vmatprep.mubr.bf16.mxu1 %v14241_v37  ;;  %5523 = vmatpush1.bf16.msra.mxu0 %v12773_v30  ;;  %v12791_v37 = vld [vmem:[#allocation8 + $0x120] ss:$16 sps:$4 sm:$0xff]  }
 0x27c   : > { %5749 = vmatpush1.bf16.msra.mxu1 %v12776_v31  ;;  %5524 = vmatprep.subr.bf16.mxu0 %v12781_v32 }
 0x27d   : > { %5750 = vmatprep.subr.bf16.mxu1 %v12784_v63 }
 0x27f   : > { %5525 = vmatpush1.bf16.msra.mxu0 %v12779_v52  ;;  %v12827_v52 = vld [vmem:[#allocation8 + $0x1e0] ss:$16 sps:$4 sm:$0xff]  }
 0x280   : > { %5751 = vmatpush1.bf16.msra.mxu1 %v12782_v34  ;;  %5526 = vmatprep.subr.bf16.mxu0 %v12787_v35 }
 0x281   : > { %4358 = vmatmul.mubr.bf16.gmra.mrb[80].mxu0 %v14238_v33  ;;  %5752 = vmatprep.subr.bf16.mxu1 %v12790_v36 }
 0x282   : > { %4584 = vmatmul.mubr.bf16.gmra.mrb[80].mxu1 %v14238_v33  ;;  %4367 = vmatprep.mubr.bf16.mxu0 %v14253_v24  ;;  %v12808_v33 = vld [vmem:[#allocation8 + $0x16c] ss:$16 sps:$4 sm:$0xff]  }
 0x283   : > { %4593 = vmatprep.mubr.bf16.mxu1 %v14253_v24  ;;  %5527 = vmatpush1.bf16.msra.mxu0 %v12785_v9  ;;  %v12803_v24 = vld [vmem:[#allocation8 + $0x160] ss:$16 sps:$4 sm:$0xff]  }
 0x284   : > { %5753 = vmatpush1.bf16.msra.mxu1 %v12788_v38  ;;  %5528 = vmatprep.subr.bf16.mxu0 %v12793_v39  ;;  %v12830_v38 = vld [vmem:[#allocation8 + $0x1e8] ss:$16 sps:$4 sm:$0xff]  }
 0x285   : > { %5754 = vmatprep.subr.bf16.mxu1 %v12796_v47 }
 0x287   : > { %5529 = vmatpush1.bf16.msra.mxu0 %v12791_v37 }
 0x288   : > { %5755 = vmatpush1.bf16.msra.mxu1 %v12794_v41  ;;  %5530 = vmatprep.subr.bf16.mxu0 %v12799_v42  ;;  %v12835_v41 = vld [vmem:[#allocation8 + $0x204] ss:$16 sps:$4 sm:$0xff]  }
 0x289   : > { %4368 = vmatmul.mubr.bf16.gmra.mrb[84].mxu0 %v14250_v20  ;;  %5756 = vmatprep.subr.bf16.mxu1 %v12802_v43 }
 0x28a   : > { %4594 = vmatmul.mubr.bf16.gmra.mrb[84].mxu1 %v14250_v20  ;;  %4377 = vmatprep.mubr.bf16.mxu0 %v14265_v15  ;;  %v12817_v20 = vld [vmem:[#allocation8 + $0x1a4] ss:$16 sps:$4 sm:$0xff]  }
 0x28b   : > { %4603 = vmatprep.mubr.bf16.mxu1 %v14265_v15  ;;  %5531 = vmatpush1.bf16.msra.mxu0 %v12797_v44  ;;  %v828_v15 = vsub.s32 5, %v14153_v3  ;;  %v12838_v44 = vld [vmem:[#allocation8 + $0x20c] ss:$16 sps:$4 sm:$0xff]  }
 0x28c   : > { %5757 = vmatpush1.bf16.msra.mxu1 %v12800_v10  ;;  %5532 = vmatprep.subr.bf16.mxu0 %v12805_v45 }
 0x28d   : > { %5758 = vmatprep.subr.bf16.mxu1 %v12808_v33  ;;  %v14319_v3 = vrot.slane %v13465_v59, %v828_v15 }
 0x28f   : > { %5533 = vmatpush1.bf16.msra.mxu0 %v12803_v24 }
 0x290   : > { %5759 = vmatpush1.bf16.msra.mxu1 %v12806_v11  ;;  %5534 = vmatprep.subr.bf16.mxu0 %v12811_v46  ;;  %v12833_v11 = vld [vmem:[#allocation8 + $0x200] ss:$16 sps:$4 sm:$0xff]  }
 0x291   : > { %4378 = vmatmul.mubr.bf16.gmra.mrb[88].mxu0 %v14262_v1  ;;  %5760 = vmatprep.subr.bf16.mxu1 %v12814_v49 }
 0x292   : > { %4604 = vmatmul.mubr.bf16.gmra.mrb[88].mxu1 %v14262_v1  ;;  %4387 = vmatprep.mubr.bf16.mxu0 %v14276_v53  ;;  %v12823_v1 = vld [vmem:[#allocation8 + $0x1c4] ss:$16 sps:$4 sm:$0xff]  }
 0x293   : > { %4613 = vmatprep.mubr.bf16.mxu1 %v14276_v53  ;;  %5535 = vmatpush1.bf16.msra.mxu0 %v12809_v50  ;;  %v12826_v53 = vld [vmem:[#allocation8 + $0x1cc] ss:$16 sps:$4 sm:$0xff]  }
 0x294   : > { %5761 = vmatpush1.bf16.msra.mxu1 %v12812_v54  ;;  %5536 = vmatprep.subr.bf16.mxu0 %v12817_v20  ;;  %v12836_v54 = vld [vmem:[#allocation8 + $0x208] ss:$16 sps:$4 sm:$0xff]   ;;  %v12841_v20 = vld [vmem:[#allocation8 + $0x224] ss:$16 sps:$4 sm:$0xff]  }
 0x295   : > { %5762 = vmatprep.subr.bf16.mxu1 %v12820_v56 }
 0x296   : > { %v2885_v0 = vpop.f32.mrb[32].mxu0  ;;  %v3111_v13 = vpop.f32.mrb[32].mxu1 }
 0x297   : > { %v11681_v2 = vadd.f32 %v2885_v0, %v14315_v60  ;;  %5537 = vmatpush1.bf16.msra.mxu0 %v12815_v58  ;;  %v2887_v14 = vpop.f32.mrb[33].mxu0  ;;  %v11713_v40 = vadd.f32 %v3111_v13, %v14317_v48  ;;  %v3113_v17 = vpop.f32.mrb[33].mxu1  ;;  %v12844_v58 = vld [vmem:[#allocation8 + $0x22c] ss:$16 sps:$4 sm:$0xff]   ;;  %v12839_v13 = vld [vmem:[#allocation8 + $0x220] ss:$16 sps:$4 sm:$0xff]  }
 0x298   : > { %5763 = vmatpush1.bf16.msra.mxu1 %v12818_v61  ;;  %v11682_v29 = vadd.f32 %v2887_v14, %v14319_v3  ;;  %v2889_v18 = vpop.f32.mrb[34].mxu0  ;;  %5538 = vmatprep.subr.bf16.mxu0 %v12823_v1  ;;  %v11714_v22 = vadd.f32 %v3113_v17, %v14321_v62  ;;  %v3115_v25 = vpop.f32.mrb[34].mxu1  ;;  %v12842_v17 = vld [vmem:[#allocation8 + $0x228] ss:$16 sps:$4 sm:$0xff]  }
 0x299   : > { %v11683_v23 = vadd.f32 %v2889_v18, %v14315_v60  ;;  %v2891_v4 = vpop.f32.mrb[35].mxu0  ;;  %4388 = vmatmul.mubr.bf16.gmra.mrb[92].mxu0 %v14274_v12  ;;  %5764 = vmatprep.subr.bf16.mxu1 %v12826_v53  ;;  %v11715_v27 = vadd.f32 %v3115_v25, %v14317_v48  ;;  %v3117_v30 = vpop.f32.mrb[35].mxu1  ;;  %v3194_v31 = vmax.f32 %v11681_v2, 0.0  ;;  %v3196_v34 = vmax.f32 %v11713_v40, 0.0 }
 0x29a   : > { %v11684_v28 = vadd.f32 %v2891_v4, %v14319_v3  ;;  %4614 = vmatmul.mubr.bf16.gmra.mrb[92].mxu1 %v14274_v12  ;;  %v11716_v63 = vadd.f32 %v3117_v30, %v14321_v62  ;;  %v3195_v35 = vmax.f32 %v11682_v29, 0.0  ;;  %v3197_v39 = vmax.f32 %v11714_v22, 0.0  ;;  %v12847_v22 = vld [vmem:[#allocation8 + $0x244] ss:$16 sps:$4 sm:$0xff]  }
 0x29b   : > { %v3202_v32 = vmax.f32 %v11683_v23, 0.0  ;;  %5539 = vmatpush1.bf16.msra.mxu0 %v12821_v16  ;;  %v3204_v36 = vmax.f32 %v11715_v27, 0.0 }
 0x29c   : > { %v3203_v9 = vmax.f32 %v11684_v28, 0.0  ;;  %5765 = vmatpush1.bf16.msra.mxu1 %v12824_v19  ;;  %5540 = vmatprep.subr.bf16.mxu0 %v12829_v21  ;;  %v3205_v37 = vmax.f32 %v11716_v63, 0.0 }
 0x29d   : > { %v3350_v47 = vpack.c.bf16 %v3202_v32, %v3194_v31  ;;  %5766 = vmatprep.subr.bf16.mxu1 %v12832_v26  ;;  %v14333_v42 = vpack.c.bf16 %v3204_v36, %v3196_v34  ;;  %v12850_v26 = vld [vmem:[#allocation8 + $0x24c] ss:$16 sps:$4 sm:$0xff]   ;;  %v12845_v32 = vld [vmem:[#allocation8 + $0x240] ss:$16 sps:$4 sm:$0xff]   ;;  %v12848_v36 = vld [vmem:[#allocation8 + $0x248] ss:$16 sps:$4 sm:$0xff]  }
 0x29e   : > { %v3351_v12 = vpack.c.bf16 %v3203_v9, %v3195_v35  ;;  %v2895_v43 = vpop.f32.mrb[36].mxu0  ;;  %v14335_v10 = vpack.c.bf16 %v3205_v37, %v3197_v39  ;;  %v3121_v33 = vpop.f32.mrb[36].mxu1  ;;  %v12853_v9 = vld [vmem:[#allocation8 + $0x264] ss:$16 sps:$4 sm:$0xff]  }
 0x29f   : > { %v11685_v45 = vadd.f32 %v2895_v43, %v14315_v60  ;;  %5541 = vmatpush1.bf16.msra.mxu0 %v12827_v52  ;;  %v2897_v24 = vpop.f32.mrb[37].mxu0  ;;  %v11717_v46 = vadd.f32 %v3121_v33, %v14317_v48  ;;  %v3123_v50 = vpop.f32.mrb[37].mxu1 }
 0x2a0   : > { %5767 = vmatpush1.bf16.msra.mxu1 %v12830_v38  ;;  %v11686_v49 = vadd.f32 %v2897_v24, %v14319_v3  ;;  %v2899_v51 = vpop.f32.mrb[38].mxu0  ;;  %5542 = vmatprep.mubr.bf16.mxu0 %v3351_v12  ;;  %v11718_v55 = vadd.f32 %v3123_v50, %v14321_v62  ;;  %v3125_v56 = vpop.f32.mrb[38].mxu1 }
 0x2a1   : > { %v11687_v15 = vadd.f32 %v2899_v51, %v14315_v60  ;;  %5768 = vmatprep.mubr.bf16.mxu1 %v3351_v12  ;;  %v2901_v57 = vpop.f32.mrb[39].mxu0  ;;  %5623 = vmatprep.subr.bf16.mxu0 %v12835_v41  ;;  %v11719_v59 = vadd.f32 %v3125_v56, %v14317_v48  ;;  %v3127_v1 = vpop.f32.mrb[39].mxu1  ;;  %v3210_v53 = vmax.f32 %v11685_v45, 0.0  ;;  %v3212_v14 = vmax.f32 %v11717_v46, 0.0  ;;  %v12856_v41 = vld [vmem:[#allocation8 + $0x26c] ss:$16 sps:$4 sm:$0xff]  }
 0x2a2   : > { %v11688_v61 = vadd.f32 %v2901_v57, %v14319_v3  ;;  %5543 = vmatmul.mubr.bf16.vlgmr.msra.gmra.mrb[96].mxu0 %v3350_v47  ;;  %5849 = vmatprep.subr.bf16.mxu1 %v12838_v44  ;;  %v11720_v2 = vadd.f32 %v3127_v1, %v14321_v62  ;;  %v3211_v16 = vmax.f32 %v11686_v49, 0.0  ;;  %v3213_v18 = vmax.f32 %v11718_v55, 0.0  ;;  %v12859_v56 = vld [vmem:[#allocation8 + $0x284] ss:$16 sps:$4 sm:$0xff]  }
 0x2a3   : > { %v3218_v0 = vmax.f32 %v11687_v15, 0.0  ;;  %5769 = vmatmul.mubr.bf16.vlgmr.msra.gmra.mrb[96].mxu1 %v3350_v47  ;;  %5624 = vmatpush1.bf16.msra.mxu0 %v12833_v11  ;;  %v3220_v40 = vmax.f32 %v11719_v59, 0.0  ;;  %v12851_v11 = vld [vmem:[#allocation8 + $0x260] ss:$16 sps:$4 sm:$0xff]  }
 0x2a4   : > { %v3219_v29 = vmax.f32 %v11688_v61, 0.0  ;;  %5850 = vmatpush1.bf16.msra.mxu1 %v12836_v54  ;;  %5625 = vmatprep.subr.bf16.mxu0 %v12841_v20  ;;  %v3221_v21 = vmax.f32 %v11720_v2, 0.0  ;;  %v12854_v54 = vld [vmem:[#allocation8 + $0x268] ss:$16 sps:$4 sm:$0xff]   ;;  %v12862_v61 = vld [vmem:[#allocation8 + $0x28c] ss:$16 sps:$4 sm:$0xff]  }
 0x2a5   : > { %v3354_v19 = vpack.c.bf16 %v3218_v0, %v3210_v53  ;;  %5851 = vmatprep.subr.bf16.mxu1 %v12844_v58  ;;  %v14345_v23 = vpack.c.bf16 %v3220_v40, %v3212_v14 }
 0x2a6   : > { %v3355_v25 = vpack.c.bf16 %v3219_v29, %v3211_v16  ;;  %v2905_v4 = vpop.f32.mrb[40].mxu0  ;;  %v14347_v27 = vpack.c.bf16 %v3221_v21, %v3213_v18  ;;  %v3131_v30 = vpop.f32.mrb[40].mxu1  ;;  %v12865_v18 = vld [vmem:[#allocation8 + $0x2a4] ss:$16 sps:$4 sm:$0xff]  }
 0x2a7   : > { %v11689_v28 = vadd.f32 %v2905_v4, %v14315_v60  ;;  %5626 = vmatpush1.bf16.msra.mxu0 %v12839_v13  ;;  %v2907_v31 = vpop.f32.mrb[41].mxu0  ;;  %v11721_v63 = vadd.f32 %v3131_v30, %v14317_v48  ;;  %v3133_v34 = vpop.f32.mrb[41].mxu1  ;;  %v12857_v13 = vld [vmem:[#allocation8 + $0x280] ss:$16 sps:$4 sm:$0xff]   ;;  %v12868_v4 = vld [vmem:[#allocation8 + $0x2ac] ss:$16 sps:$4 sm:$0xff]  }
 0x2a8   : > { %5852 = vmatpush1.bf16.msra.mxu1 %v12842_v17  ;;  %v11690_v52 = vadd.f32 %v2907_v31, %v14319_v3  ;;  %v2909_v35 = vpop.f32.mrb[42].mxu0  ;;  %5552 = vmatprep.mubr.bf16.mxu0 %v3355_v25  ;;  %v11722_v38 = vadd.f32 %v3133_v34, %v14321_v62  ;;  %v3135_v47 = vpop.f32.mrb[42].mxu1  ;;  %v12860_v17 = vld [vmem:[#allocation8 + $0x288] ss:$16 sps:$4 sm:$0xff]  }
 0x2a9   : > { %v11691_v39 = vadd.f32 %v2909_v35, %v14315_v60  ;;  %5778 = vmatprep.mubr.bf16.mxu1 %v3355_v25  ;;  %v2911_v37 = vpop.f32.mrb[43].mxu0  ;;  %5627 = vmatprep.subr.bf16.mxu0 %v12847_v22  ;;  %v11723_v12 = vadd.f32 %v3135_v47, %v14317_v48  ;;  %v3137_v44 = vpop.f32.mrb[43].mxu1  ;;  %v3226_v45 = vmax.f32 %v11689_v28, 0.0  ;;  %v3228_v46 = vmax.f32 %v11721_v63, 0.0 }
 0x2aa   : > { %v11692_v43 = vadd.f32 %v2911_v37, %v14319_v3  ;;  %5553 = vmatmul.mubr.bf16.gmra.mrb[100].mxu0 %v3354_v19  ;;  %5853 = vmatprep.subr.bf16.mxu1 %v12850_v26  ;;  %v11724_v24 = vadd.f32 %v3137_v44, %v14321_v62  ;;  %v3227_v49 = vmax.f32 %v11690_v52, 0.0  ;;  %v3229_v20 = vmax.f32 %v11722_v38, 0.0  ;;  %v12863_v52 = vld [vmem:[#allocation8 + $0x2a0] ss:$16 sps:$4 sm:$0xff]   ;;  %v12866_v38 = vld [vmem:[#allocation8 + $0x2a8] ss:$16 sps:$4 sm:$0xff]  }
 0x2ab   : > { %v3234_v33 = vmax.f32 %v11691_v39, 0.0  ;;  %5779 = vmatmul.mubr.bf16.gmra.mrb[100].mxu1 %v3354_v19  ;;  %5628 = vmatpush1.bf16.msra.mxu0 %v12845_v32  ;;  %v3236_v50 = vmax.f32 %v11723_v12, 0.0 }
 0x2ac   : > { %v3235_v51 = vmax.f32 %v11692_v43, 0.0  ;;  %5854 = vmatpush1.bf16.msra.mxu1 %v12848_v36  ;;  %5629 = vmatprep.subr.bf16.mxu0 %v12853_v9  ;;  %v3237_v15 = vmax.f32 %v11724_v24, 0.0 }
 0x2ad   : > { %v3358_v55 = vpack.c.bf16 %v3234_v33, %v3226_v45  ;;  %5855 = vmatprep.subr.bf16.mxu1 %v12856_v41  ;;  %v14357_v57 = vpack.c.bf16 %v3236_v50, %v3228_v46  ;;  %v12871_v41 = vld [vmem:[#allocation8 + $0x2c4] ss:$16 sps:$4 sm:$0xff]   ;;  %v12874_v45 = vld [vmem:[#allocation8 + $0x2cc] ss:$16 sps:$4 sm:$0xff]  }
 0x2ae   : > { %v3359_v58 = vpack.c.bf16 %v3235_v51, %v3227_v49  ;;  %v2915_v59 = vpop.f32.mrb[44].mxu0  ;;  %v14359_v1 = vpack.c.bf16 %v3237_v15, %v3229_v20  ;;  %v3141_v0 = vpop.f32.mrb[44].mxu1  ;;  %v12869_v49 = vld [vmem:[#allocation8 + $0x2c0] ss:$16 sps:$4 sm:$0xff]   ;;  %v12877_v15 = vld [vmem:[#allocation8 + $0x2e4] ss:$16 sps:$4 sm:$0xff]  }
 0x2af   : > { %v11693_v53 = vadd.f32 %v2915_v59, %v14315_v60  ;;  %5630 = vmatpush1.bf16.msra.mxu0 %v12851_v11  ;;  %v2917_v2 = vpop.f32.mrb[45].mxu0  ;;  %v11725_v14 = vadd.f32 %v3141_v0, %v14317_v48  ;;  %v3143_v40 = vpop.f32.mrb[45].mxu1 }
 0x2b0   : > { %5856 = vmatpush1.bf16.msra.mxu1 %v12854_v54  ;;  %v11694_v16 = vadd.f32 %v2917_v2, %v14319_v3  ;;  %v2919_v29 = vpop.f32.mrb[46].mxu0  ;;  %5562 = vmatprep.mubr.bf16.mxu0 %v3359_v58  ;;  %v11726_v19 = vadd.f32 %v3143_v40, %v14321_v62  ;;  %v3145_v22 = vpop.f32.mrb[46].mxu1 }
 0x2b1   : > { %v11695_v21 = vadd.f32 %v2919_v29, %v14315_v60  ;;  %5788 = vmatprep.mubr.bf16.mxu1 %v3359_v58  ;;  %v2921_v25 = vpop.f32.mrb[47].mxu0  ;;  %5631 = vmatprep.subr.bf16.mxu0 %v12859_v56  ;;  %v11727_v26 = vadd.f32 %v3145_v22, %v14317_v48  ;;  %v3147_v30 = vpop.f32.mrb[47].mxu1  ;;  %v3242_v31 = vmax.f32 %v11693_v53, 0.0  ;;  %v3244_v34 = vmax.f32 %v11725_v14, 0.0  ;;  %v12880_v53 = vld [vmem:[#allocation8 + $0x2ec] ss:$16 sps:$4 sm:$0xff]  }
 0x2b2   : > { %v11696_v28 = vadd.f32 %v2921_v25, %v14319_v3  ;;  %5563 = vmatmul.mubr.bf16.gmra.mrb[104].mxu0 %v3358_v55  ;;  %5857 = vmatprep.subr.bf16.mxu1 %v12862_v61  ;;  %v11728_v63 = vadd.f32 %v3147_v30, %v14321_v62  ;;  %v3243_v35 = vmax.f32 %v11694_v16, 0.0  ;;  %v3245_v39 = vmax.f32 %v11726_v19, 0.0  ;;  %v12875_v29 = vld [vmem:[#allocation8 + $0x2e0] ss:$16 sps:$4 sm:$0xff]   ;;  %v12878_v22 = vld [vmem:[#allocation8 + $0x2e8] ss:$16 sps:$4 sm:$0xff]  }
 0x2b3   : > { %v3250_v32 = vmax.f32 %v11695_v21, 0.0  ;;  %5789 = vmatmul.mubr.bf16.gmra.mrb[104].mxu1 %v3358_v55  ;;  %5632 = vmatpush1.bf16.msra.mxu0 %v12857_v13  ;;  %v3252_v36 = vmax.f32 %v11727_v26, 0.0  ;;  %v12872_v55 = vld [vmem:[#allocation8 + $0x2c8] ss:$16 sps:$4 sm:$0xff]  }
 0x2b4   : > { %v3251_v9 = vmax.f32 %v11696_v28, 0.0  ;;  %5858 = vmatpush1.bf16.msra.mxu1 %v12860_v17  ;;  %5633 = vmatprep.subr.bf16.mxu0 %v12865_v18  ;;  %v3253_v37 = vmax.f32 %v11728_v63, 0.0  ;;  %v12883_v28 = vld [vmem:[#allocation8 + $0x304] ss:$16 sps:$4 sm:$0xff]   ;;  %v12886_v63 = vld [vmem:[#allocation8 + $0x30c] ss:$16 sps:$4 sm:$0xff]  }
 0x2b5   : > { %v3362_v47 = vpack.c.bf16 %v3250_v32, %v3242_v31  ;;  %5859 = vmatprep.subr.bf16.mxu1 %v12868_v4  ;;  %v14369_v12 = vpack.c.bf16 %v3252_v36, %v3244_v34 }
 0x2b6   : > { %v3363_v43 = vpack.c.bf16 %v3251_v9, %v3243_v35  ;;  %v2925_v44 = vpop.f32.mrb[48].mxu0  ;;  %v14371_v33 = vpack.c.bf16 %v3253_v37, %v3245_v39  ;;  %v3151_v11 = vpop.f32.mrb[48].mxu1  ;;  %v12881_v9 = vld [vmem:[#allocation8 + $0x300] ss:$16 sps:$4 sm:$0xff]  }
 0x2b7   : > { %v11697_v24 = vadd.f32 %v2925_v44, %v14315_v60  ;;  %5634 = vmatpush1.bf16.msra.mxu0 %v12863_v52  ;;  %v2927_v46 = vpop.f32.mrb[49].mxu0  ;;  %v11729_v50 = vadd.f32 %v3151_v11, %v14317_v48  ;;  %v3153_v54 = vpop.f32.mrb[49].mxu1 }
 0x2b8   : > { %5860 = vmatpush1.bf16.msra.mxu1 %v12866_v38  ;;  %v11698_v51 = vadd.f32 %v2927_v46, %v14319_v3  ;;  %v2929_v20 = vpop.f32.mrb[50].mxu0  ;;  %5572 = vmatprep.mubr.bf16.mxu0 %v3363_v43  ;;  %v11730_v56 = vadd.f32 %v3153_v54, %v14321_v62  ;;  %v3155_v59 = vpop.f32.mrb[50].mxu1  ;;  %v12892_v46 = vld [vmem:[#allocation8 + $0x32c] ss:$16 sps:$4 sm:$0xff]  }
 0x2b9   : > { %v11699_v58 = vadd.f32 %v2929_v20, %v14315_v60  ;;  %5798 = vmatprep.mubr.bf16.mxu1 %v3363_v43  ;;  %v2931_v61 = vpop.f32.mrb[51].mxu0  ;;  %5635 = vmatprep.subr.bf16.mxu0 %v12871_v41  ;;  %v11731_v0 = vadd.f32 %v3155_v59, %v14317_v48  ;;  %v3157_v13 = vpop.f32.mrb[51].mxu1  ;;  %v3258_v14 = vmax.f32 %v11697_v24, 0.0  ;;  %v3260_v17 = vmax.f32 %v11729_v50, 0.0  ;;  %v12884_v41 = vld [vmem:[#allocation8 + $0x308] ss:$16 sps:$4 sm:$0xff]  }
 0x2ba   : > { %v11700_v2 = vadd.f32 %v2931_v61, %v14319_v3  ;;  %5573 = vmatmul.mubr.bf16.gmra.mrb[108].mxu0 %v3362_v47  ;;  %5861 = vmatprep.subr.bf16.mxu1 %v12874_v45  ;;  %v11732_v40 = vadd.f32 %v3157_v13, %v14321_v62  ;;  %v3259_v18 = vmax.f32 %v11698_v51, 0.0  ;;  %v3261_v25 = vmax.f32 %v11730_v56, 0.0  ;;  %v12889_v43 = vld [vmem:[#allocation8 + $0x324] ss:$16 sps:$4 sm:$0xff]  }
 0x2bb   : > { %v3266_v16 = vmax.f32 %v11699_v58, 0.0  ;;  %5799 = vmatmul.mubr.bf16.gmra.mrb[108].mxu1 %v3362_v47  ;;  %5636 = vmatpush1.bf16.msra.mxu0 %v12869_v49  ;;  %v3268_v19 = vmax.f32 %v11731_v0, 0.0 }
 0x2bc   : > { %v3267_v21 = vmax.f32 %v11700_v2, 0.0  ;;  %5862 = vmatpush1.bf16.msra.mxu1 %v12872_v55  ;;  %5637 = vmatprep.subr.bf16.mxu0 %v12877_v15  ;;  %v3269_v26 = vmax.f32 %v11732_v40, 0.0  ;;  %v12887_v15 = vld [vmem:[#allocation8 + $0x320] ss:$16 sps:$4 sm:$0xff]  }
 0x2bd   : > { %v3366_v4 = vpack.c.bf16 %v3266_v16, %v3258_v14  ;;  %5863 = vmatprep.subr.bf16.mxu1 %v12880_v53  ;;  %v14381_v30 = vpack.c.bf16 %v3268_v19, %v3260_v17  ;;  %v12890_v53 = vld [vmem:[#allocation8 + $0x328] ss:$16 sps:$4 sm:$0xff]   ;;  %v12895_v14 = vld [vmem:[#allocation8 + $0x344] ss:$16 sps:$4 sm:$0xff]   ;;  %v12898_v17 = vld [vmem:[#allocation8 + $0x34c] ss:$16 sps:$4 sm:$0xff]  }
 0x2be   : > { %v3367_v31 = vpack.c.bf16 %v3267_v21, %v3259_v18  ;;  %v2935_v32 = vpop.f32.mrb[52].mxu0  ;;  %v14383_v52 = vpack.c.bf16 %v3269_v26, %v3261_v25  ;;  %v3161_v35 = vpop.f32.mrb[52].mxu1  ;;  %v12893_v25 = vld [vmem:[#allocation8 + $0x340] ss:$16 sps:$4 sm:$0xff]  }
 0x2bf   : > { %v11701_v34 = vadd.f32 %v2935_v32, %v14315_v60  ;;  %5638 = vmatpush1.bf16.msra.mxu0 %v12875_v29  ;;  %v2937_v36 = vpop.f32.mrb[53].mxu0  ;;  %v11733_v38 = vadd.f32 %v3161_v35, %v14317_v48  ;;  %v3163_v47 = vpop.f32.mrb[53].mxu1  ;;  %v12896_v32 = vld [vmem:[#allocation8 + $0x348] ss:$16 sps:$4 sm:$0xff]  }
 0x2c0   : > { %5864 = vmatpush1.bf16.msra.mxu1 %v12878_v22  ;;  %v11702_v39 = vadd.f32 %v2937_v36, %v14319_v3  ;;  %v2939_v37 = vpop.f32.mrb[54].mxu0  ;;  %5582 = vmatprep.mubr.bf16.mxu0 %v3367_v31  ;;  %v11734_v44 = vadd.f32 %v3163_v47, %v14321_v62  ;;  %v3165_v24 = vpop.f32.mrb[54].mxu1 }
 0x2c1   : > { %v11703_v45 = vadd.f32 %v2939_v37, %v14315_v60  ;;  %5808 = vmatprep.mubr.bf16.mxu1 %v3367_v31  ;;  %v2941_v11 = vpop.f32.mrb[55].mxu0  ;;  %5639 = vmatprep.subr.bf16.mxu0 %v12883_v28  ;;  %v11735_v49 = vadd.f32 %v3165_v24, %v14317_v48  ;;  %v3167_v51 = vpop.f32.mrb[55].mxu1  ;;  %v3274_v54 = vmax.f32 %v11701_v34, 0.0  ;;  %v3276_v56 = vmax.f32 %v11733_v38, 0.0  ;;  %v12904_v38 = vld [vmem:[#allocation8 + $0x36c] ss:$16 sps:$4 sm:$0xff]  }
 0x2c2   : > { %v11704_v50 = vadd.f32 %v2941_v11, %v14319_v3  ;;  %5583 = vmatmul.mubr.bf16.gmra.mrb[112].mxu0 %v3366_v4  ;;  %5865 = vmatprep.subr.bf16.mxu1 %v12886_v63  ;;  %v11736_v55 = vadd.f32 %v3167_v51, %v14321_v62  ;;  %v3275_v58 = vmax.f32 %v11702_v39, 0.0  ;;  %v3277_v0 = vmax.f32 %v11734_v44, 0.0  ;;  %v12901_v63 = vld [vmem:[#allocation8 + $0x364] ss:$16 sps:$4 sm:$0xff]  }
 0x2c3   : > { %v3282_v20 = vmax.f32 %v11703_v45, 0.0  ;;  %5809 = vmatmul.mubr.bf16.gmra.mrb[112].mxu1 %v3366_v4  ;;  %5640 = vmatpush1.bf16.msra.mxu0 %v12881_v9  ;;  %v3284_v59 = vmax.f32 %v11735_v49, 0.0  ;;  %v12899_v45 = vld [vmem:[#allocation8 + $0x360] ss:$16 sps:$4 sm:$0xff]  }
 0x2c4   : > { %v3283_v61 = vmax.f32 %v11704_v50, 0.0  ;;  %5866 = vmatpush1.bf16.msra.mxu1 %v12884_v41  ;;  %5641 = vmatprep.subr.bf16.mxu0 %v12889_v43  ;;  %v3285_v13 = vmax.f32 %v11736_v55, 0.0  ;;  %v12902_v50 = vld [vmem:[#allocation8 + $0x368] ss:$16 sps:$4 sm:$0xff]   ;;  %v12907_v55 = vld [vmem:[#allocation8 + $0x384] ss:$16 sps:$4 sm:$0xff]  }
 0x2c5   : > { %v3370_v2 = vpack.c.bf16 %v3282_v20, %v3274_v54  ;;  %5867 = vmatprep.subr.bf16.mxu1 %v12892_v46  ;;  %v14393_v16 = vpack.c.bf16 %v3284_v59, %v3276_v56  ;;  %v12910_v59 = vld [vmem:[#allocation8 + $0x38c] ss:$16 sps:$4 sm:$0xff]  }
 0x2c6   : > { %v3371_v40 = vpack.c.bf16 %v3283_v61, %v3275_v58  ;;  %v2945_v29 = vpop.f32.mrb[56].mxu0  ;;  %v14395_v18 = vpack.c.bf16 %v3285_v13, %v3277_v0  ;;  %v3171_v21 = vpop.f32.mrb[56].mxu1  ;;  %v12905_v13 = vld [vmem:[#allocation8 + $0x380] ss:$16 sps:$4 sm:$0xff]  }
 0x2c7   : > { %v11705_v19 = vadd.f32 %v2945_v29, %v14315_v60  ;;  %5642 = vmatpush1.bf16.msra.mxu0 %v12887_v15  ;;  %v2947_v22 = vpop.f32.mrb[57].mxu0  ;;  %v11737_v4 = vadd.f32 %v3171_v21, %v14317_v48  ;;  %v3173_v28 = vpop.f32.mrb[57].mxu1  ;;  %v12913_v21 = vld [vmem:[#allocation8 + $0x3a4] ss:$16 sps:$4 sm:$0xff]  }
 0x2c8   : > { %5868 = vmatpush1.bf16.msra.mxu1 %v12890_v53  ;;  %v11706_v26 = vadd.f32 %v2947_v22, %v14319_v3  ;;  %v2949_v31 = vpop.f32.mrb[58].mxu0  ;;  %5592 = vmatprep.mubr.bf16.mxu0 %v3371_v40  ;;  %v11738_v34 = vadd.f32 %v3173_v28, %v14321_v62  ;;  %v3175_v36 = vpop.f32.mrb[58].mxu1  ;;  %v12916_v28 = vld [vmem:[#allocation8 + $0x3ac] ss:$16 sps:$4 sm:$0xff]  }
 0x2c9   : > { %v11707_v35 = vadd.f32 %v2949_v31, %v14315_v60  ;;  %5818 = vmatprep.mubr.bf16.mxu1 %v3371_v40  ;;  %v2951_v9 = vpop.f32.mrb[59].mxu0  ;;  %5643 = vmatprep.subr.bf16.mxu0 %v12895_v14  ;;  %v11739_v39 = vadd.f32 %v3175_v36, %v14317_v48  ;;  %v3177_v37 = vpop.f32.mrb[59].mxu1  ;;  %v3290_v41 = vmax.f32 %v11705_v19, 0.0  ;;  %v3292_v24 = vmax.f32 %v11737_v4, 0.0  ;;  %v12908_v19 = vld [vmem:[#allocation8 + $0x388] ss:$16 sps:$4 sm:$0xff]  }
 0x2ca   : > { %v11708_v47 = vadd.f32 %v2951_v9, %v14319_v3  ;;  %5593 = vmatmul.mubr.bf16.gmra.mrb[116].mxu0 %v3370_v2  ;;  %5869 = vmatprep.subr.bf16.mxu1 %v12898_v17  ;;  %v11740_v44 = vadd.f32 %v3177_v37, %v14321_v62  ;;  %v3291_v11 = vmax.f32 %v11706_v26, 0.0  ;;  %v3293_v51 = vmax.f32 %v11738_v34, 0.0  ;;  %v12911_v9 = vld [vmem:[#allocation8 + $0x3a0] ss:$16 sps:$4 sm:$0xff]   ;;  %v12914_v37 = vld [vmem:[#allocation8 + $0x3a8] ss:$16 sps:$4 sm:$0xff]  }
 0x2cb   : > { %v3298_v43 = vmax.f32 %v11707_v35, 0.0  ;;  %5819 = vmatmul.mubr.bf16.gmra.mrb[116].mxu1 %v3370_v2  ;;  %5644 = vmatpush1.bf16.msra.mxu0 %v12893_v25  ;;  %v3300_v46 = vmax.f32 %v11739_v39, 0.0 }
 0x2cc   : > { %v3299_v49 = vmax.f32 %v11708_v47, 0.0  ;;  %5870 = vmatpush1.bf16.msra.mxu1 %v12896_v32  ;;  %5645 = vmatprep.subr.bf16.mxu0 %v12901_v63  ;;  %v3301_v20 = vmax.f32 %v11740_v44, 0.0 }
 0x2cd   : > { %v3374_v54 = vpack.c.bf16 %v3298_v43, %v3290_v41  ;;  %5871 = vmatprep.subr.bf16.mxu1 %v12904_v38  ;;  %v14405_v15 = vpack.c.bf16 %v3300_v46, %v3292_v24  ;;  %v12919_v43 = vld [vmem:[#allocation8 + $0x3c4] ss:$16 sps:$4 sm:$0xff]   ;;  %v12922_v24 = vld [vmem:[#allocation8 + $0x3cc] ss:$16 sps:$4 sm:$0xff]   ;;  %v12920_v46 = vld [vmem:[#allocation8 + $0x3c8] ss:$16 sps:$4 sm:$0xff]  }
 0x2ce   : > { %v3375_v56 = vpack.c.bf16 %v3299_v49, %v3291_v11  ;;  %v2955_v58 = vpop.f32.mrb[60].mxu0  ;;  %v14407_v61 = vpack.c.bf16 %v3301_v20, %v3293_v51  ;;  %v3181_v0 = vpop.f32.mrb[60].mxu1  ;;  %v12917_v11 = vld [vmem:[#allocation8 + $0x3c0] ss:$16 sps:$4 sm:$0xff]   ;;  %v12925_v49 = vld [vmem:[#allocation8 + $0x3e4] ss:$16 sps:$4 sm:$0xff]  }
 0x2cf   : > { %v11709_v53 = vadd.f32 %v2955_v58, %v14315_v60  ;;  %5646 = vmatpush1.bf16.msra.mxu0 %v12899_v45  ;;  %v2957_v2 = vpop.f32.mrb[61].mxu0  ;;  %v11741_v14 = vadd.f32 %v3181_v0, %v14317_v48  ;;  %v3183_v29 = vpop.f32.mrb[61].mxu1  ;;  %v12923_v51 = vld [vmem:[#allocation8 + $0x3e0] ss:$16 sps:$4 sm:$0xff]   ;;  %v12936_v0 = vld [vmem:[%s15601_s5 + $0x88] sm:$0xff]  }
 0x2d0   : > { %5872 = vmatpush1.bf16.msra.mxu1 %v12902_v50  ;;  %v11710_v40 = vadd.f32 %v2957_v2, %v14319_v3  ;;  %v2959_v17 = vpop.f32.mrb[62].mxu0  ;;  %5602 = vmatprep.mubr.bf16.mxu0 %v3375_v56  ;;  %v11742_v22 = vadd.f32 %v3183_v29, %v14321_v62  ;;  %v3185_v4 = vpop.f32.mrb[62].mxu1  ;;  %v12928_v50 = vld [vmem:[#allocation8 + $0x3ec] ss:$16 sps:$4 sm:$0xff]   ;;  %v12929_v20 = vld [vmem:[%s15601_s5 + $0x40] sm:$0xff]   ;;  %v12937_v2 = vld [vmem:[%s15601_s5 + $0x50] sm:$0xff]  }
 0x2d1   : > { %v11711_v25 = vadd.f32 %v2959_v17, %v14315_v60  ;;  %5828 = vmatprep.mubr.bf16.mxu1 %v3375_v56  ;;  %v2961_v26 = vpop.f32.mrb[63].mxu0  ;;  %5647 = vmatprep.subr.bf16.mxu0 %v12907_v55  ;;  %v11743_v31 = vadd.f32 %v3185_v4, %v14317_v48  ;;  %v3187_v63 = vpop.f32.mrb[63].mxu1  ;;  %v3306_v34 = vmax.f32 %v11709_v53, 0.0  ;;  %v3308_v60 = vmax.f32 %v11741_v14, 0.0  ;;  %v12930_v55 = vld [vmem:[%s15601_s5 + $0xc0] sm:$0xff]   ;;  %v12935_v53 = vld [vmem:[%s15601_s5 + $0x8] sm:$0xff]  }
 0x2d2   : > { %v11712_v32 = vadd.f32 %v2961_v26, %v14319_v3  ;;  %5603 = vmatmul.mubr.bf16.gmra.mrb[120].mxu0 %v3374_v54  ;;  %5873 = vmatprep.subr.bf16.mxu1 %v12910_v59  ;;  %v11744_v36 = vadd.f32 %v3187_v63, %v14321_v62  ;;  %v3307_v38 = vmax.f32 %v11710_v40, 0.0  ;;  %v3309_v48 = vmax.f32 %v11742_v22, 0.0  ;;  %v12931_v56 = vld [vmem:[%s15601_s5] sm:$0xff]   ;;  %v12934_v59 = vld [vmem:[%s15601_s5 + $0xc8] sm:$0xff]   ;;  %v12941_v14 = vld [vmem:[%s15601_s5 + $0x58] sm:$0xff]  }
 0x2d3   : > { %v3314_v35 = vmax.f32 %v11711_v25, 0.0  ;;  %5829 = vmatmul.mubr.bf16.gmra.mrb[120].mxu1 %v3374_v54  ;;  %5648 = vmatpush1.bf16.msra.mxu0 %v12905_v13  ;;  %v3316_v39 = vmax.f32 %v11743_v31, 0.0  ;;  %v12926_v54 = vld [vmem:[#allocation8 + $0x3e8] ss:$16 sps:$4 sm:$0xff]   ;;  %v12932_v58 = vld [vmem:[%s15601_s5 + $0x80] sm:$0xff]   ;;  %v12940_v13 = vld [vmem:[%s15601_s5 + $0x90] sm:$0xff]  }
 0x2d4   : > { %v3315_v47 = vmax.f32 %v11712_v32, 0.0  ;;  %5874 = vmatpush1.bf16.msra.mxu1 %v12908_v19  ;;  %5649 = vmatprep.subr.bf16.mxu0 %v12913_v21  ;;  %v3317_v3 = vmax.f32 %v11744_v36, 0.0  ;;  %v12942_v40 = vld [vmem:[%s15601_s5 + $0xd8] sm:$0xff]   ;;  %v12945_v19 = vld [vmem:[%s15601_s5 + $0x60] sm:$0xff]   ;;  %v12949_v22 = vld [vmem:[%s15601_s5 + $0x68] sm:$0xff]  }
 0x2d5   : > { %v3378_v41 = vpack.c.bf16 %v3314_v35, %v3306_v34  ;;  %5875 = vmatprep.subr.bf16.mxu1 %v12916_v28  ;;  %v14417_v44 = vpack.c.bf16 %v3316_v39, %v3308_v60  ;;  %v12943_v29 = vld [vmem:[%s15601_s5 + $0x18] sm:$0xff]   ;;  %v12948_v21 = vld [vmem:[%s15601_s5 + $0xa0] sm:$0xff]   ;;  %v12950_v25 = vld [vmem:[%s15601_s5 + $0xe8] sm:$0xff]  }
 0x2d6   : > { %v3379_v45 = vpack.c.bf16 %v3315_v47, %v3307_v38  ;;  %v14419_v62 = vpack.c.bf16 %v3317_v3, %v3309_v48  ;;  %v12944_v17 = vld [vmem:[%s15601_s5 + $0x98] sm:$0xff]   ;;  %v12951_v4 = vld [vmem:[%s15601_s5 + $0x28] sm:$0xff]   ;;  %v12953_v28 = vld [vmem:[%s15601_s5 + $0x70] sm:$0xff]  }
 0x2d7   : > { %5650 = vmatpush1.bf16.msra.mxu0 %v12911_v9  ;;  %v12952_v26 = vld [vmem:[%s15601_s5 + $0xa8] sm:$0xff]   ;;  %v12956_v31 = vld [vmem:[%s15601_s5 + $0xb0] sm:$0xff]   ;;  %v12957_v32 = vld [vmem:[%s15601_s5 + $0x78] sm:$0xff]  }
 0x2d8   : > { %5876 = vmatpush1.bf16.msra.mxu1 %v12914_v37  ;;  %5612 = vmatprep.mubr.bf16.mxu0 %v3379_v45  ;;  %v12958_v63 = vld [vmem:[%s15601_s5 + $0xf8] sm:$0xff]   ;;  %v12961_v36 = vld [vmem:[%s15601_s5 + $0x140] sm:$0xff]  }
 0x2d9   : > { %5838 = vmatprep.mubr.bf16.mxu1 %v3379_v45  ;;  %5651 = vmatprep.subr.bf16.mxu0 %v12919_v43  ;;  %v12959_v34 = vld [vmem:[%s15601_s5 + $0x38] sm:$0xff]  }
 0x2da   : > { %5613 = vmatmul.mubr.bf16.gmra.mrb[124].mxu0 %v3378_v41  ;;  %5877 = vmatprep.subr.bf16.mxu1 %v12922_v24  ;;  %v12960_v35 = vld [vmem:[%s15601_s5 + $0xb8] sm:$0xff]  }
 0x2db   : > { %5839 = vmatmul.mubr.bf16.gmra.mrb[124].mxu1 %v3378_v41  ;;  %5652 = vmatpush1.bf16.msra.mxu0 %v12917_v11 }
 0x2dc   : > { %5655 = vmatprep.mubr.bf16.mxu0 %v14335_v10  ;;  %5878 = vmatpush1.bf16.msra.mxu1 %v12920_v46 }
 0x2dd   : > { %5881 = vmatprep.mubr.bf16.mxu1 %v14335_v10  ;;  %5653 = vmatprep.subr.bf16.mxu0 %v12925_v49  ;;  %v12933_v10 = vld [vmem:[%s15601_s5 + $0x48] sm:$0xff]  }
 0x2de   : > { %5879 = vmatprep.subr.bf16.mxu1 %v12928_v50 }
 0x2df   : > { %5654 = vmatpush1.bf16.msra.mxu0 %v12923_v51 }
 0x2e0   : > { %5880 = vmatpush1.bf16.msra.mxu1 %v12926_v54  ;;  %11361 = vmatprep.subr.bf16.mxu0 %v12929_v20 }
 0x2e1   : > { %11425 = vmatprep.subr.bf16.mxu1 %v12930_v55 }
 0x2e2   : > { %5656 = vmatmul.mubr.bf16.vlgmr.msra.gmra.mrb[96].mxu0 %v14333_v42 }
 0x2e3   : > { %5882 = vmatmul.mubr.bf16.vlgmr.msra.gmra.mrb[96].mxu1 %v14333_v42  ;;  %5665 = vmatprep.mubr.bf16.mxu0 %v14347_v27  ;;  %v12938_v42 = vld [vmem:[%s15601_s5 + $0xd0] sm:$0xff]  }
 0x2e4   : > { %5891 = vmatprep.mubr.bf16.mxu1 %v14347_v27  ;;  %11362 = vmatpush3.bf16.msra.mxu0 %v12931_v56  ;;  %v12939_v27 = vld [vmem:[%s15601_s5 + $0x10] sm:$0xff]  }
 0x2e5   : > { %11426 = vmatpush3.bf16.msra.mxu1 %v12932_v58  ;;  %11363 = vmatprep.subr.bf16.mxu0 %v12933_v10 }
 0x2e6   : > { %11427 = vmatprep.subr.bf16.mxu1 %v12934_v59 }
 0x2e8   : > { %11364 = vmatpush3.bf16.msra.mxu0 %v12935_v53 }
 0x2e9   : > { %11428 = vmatpush3.bf16.msra.mxu1 %v12936_v0  ;;  %11365 = vmatprep.subr.bf16.mxu0 %v12937_v2  ;;  %v12962_v0 = vld [vmem:[%s15601_s5 + $0x100] sm:$0xff]  }
 0x2ea   : > { %5666 = vmatmul.mubr.bf16.gmra.mrb[100].mxu0 %v14345_v23  ;;  %11429 = vmatprep.subr.bf16.mxu1 %v12938_v42 }
 0x2eb   : > { %5892 = vmatmul.mubr.bf16.gmra.mrb[100].mxu1 %v14345_v23  ;;  %5675 = vmatprep.mubr.bf16.mxu0 %v14359_v1  ;;  %v12946_v23 = vld [vmem:[%s15601_s5 + $0xe0] sm:$0xff]  }
 0x2ec   : > { %5901 = vmatprep.mubr.bf16.mxu1 %v14359_v1  ;;  %11366 = vmatpush3.bf16.msra.mxu0 %v12939_v27  ;;  %v12947_v1 = vld [vmem:[%s15601_s5 + $0x20] sm:$0xff]  }
 0x2ed   : > { %11430 = vmatpush3.bf16.msra.mxu1 %v12940_v13  ;;  %11367 = vmatprep.subr.bf16.mxu0 %v12941_v14  ;;  %v12964_v14 = vld [vmem:[%s15601_s5 + $0x180] sm:$0xff]  }
 0x2ee   : > { %11431 = vmatprep.subr.bf16.mxu1 %v12942_v40  ;;  %v12965_v40 = vld [vmem:[%s15601_s5 + $0x148] sm:$0xff]  }
 0x2f0   : > { %11368 = vmatpush3.bf16.msra.mxu0 %v12943_v29 }
 0x2f1   : > { %11432 = vmatpush3.bf16.msra.mxu1 %v12944_v17  ;;  %11369 = vmatprep.subr.bf16.mxu0 %v12945_v19 }
 0x2f2   : > { %5676 = vmatmul.mubr.bf16.gmra.mrb[104].mxu0 %v14357_v57  ;;  %11433 = vmatprep.subr.bf16.mxu1 %v12946_v23 }
 0x2f3   : > { %5902 = vmatmul.mubr.bf16.gmra.mrb[104].mxu1 %v14357_v57  ;;  %5685 = vmatprep.mubr.bf16.mxu0 %v14371_v33  ;;  %v12954_v57 = vld [vmem:[%s15601_s5 + $0xf0] sm:$0xff]  }
 0x2f4   : > { %5911 = vmatprep.mubr.bf16.mxu1 %v14371_v33  ;;  %11370 = vmatpush3.bf16.msra.mxu0 %v12947_v1  ;;  %v12955_v33 = vld [vmem:[%s15601_s5 + $0x30] sm:$0xff]   ;;  %v12967_v1 = vld [vmem:[%s15601_s5 + $0x1c8] sm:$0xff]  }
 0x2f5   : > { %11434 = vmatpush3.bf16.msra.mxu1 %v12948_v21  ;;  %11371 = vmatprep.subr.bf16.mxu0 %v12949_v22 }
 0x2f6   : > { %11435 = vmatprep.subr.bf16.mxu1 %v12950_v25 }
 0x2f8   : > { %11372 = vmatpush3.bf16.msra.mxu0 %v12951_v4 }
 0x2f9   : > { %11436 = vmatpush3.bf16.msra.mxu1 %v12952_v26  ;;  %11373 = vmatprep.subr.bf16.mxu0 %v12953_v28 }
 0x2fa   : > { %5686 = vmatmul.mubr.bf16.gmra.mrb[108].mxu0 %v14369_v12  ;;  %11437 = vmatprep.subr.bf16.mxu1 %v12954_v57 }
 0x2fb   : > { %5912 = vmatmul.mubr.bf16.gmra.mrb[108].mxu1 %v14369_v12  ;;  %5695 = vmatprep.mubr.bf16.mxu0 %v14383_v52  ;;  %v12963_v12 = vld [vmem:[%s15601_s5 + $0x1c0] sm:$0xff]  }
 0x2fc   : > { %5921 = vmatprep.mubr.bf16.mxu1 %v14383_v52  ;;  %11374 = vmatpush3.bf16.msra.mxu0 %v12955_v33  ;;  %v12966_v33 = vld [vmem:[%s15601_s5 + $0x108] sm:$0xff]  }
 0x2fd   : > { %11438 = vmatpush3.bf16.msra.mxu1 %v12956_v31  ;;  %11375 = vmatprep.subr.bf16.mxu0 %v12957_v32 }
 0x2fe   : > { %11439 = vmatprep.subr.bf16.mxu1 %v12958_v63 }
 0x300   : > { %11376 = vmatpush3.bf16.msra.mxu0 %v12959_v34  ;;  %v12968_v34 = vld [vmem:[%s15601_s5 + $0x188] sm:$0xff]  }
 0x301   : > { %11440 = vmatpush3.bf16.msra.mxu1 %v12960_v35  ;;  %11489 = vmatprep.subr.bf16.mxu0 %v12961_v36  ;;  %v12969_v35 = vld [vmem:[%s15601_s5 + $0x150] sm:$0xff]  }
 0x302   : > { %5696 = vmatmul.mubr.bf16.gmra.mrb[112].mxu0 %v14381_v30  ;;  %11553 = vmatprep.subr.bf16.mxu1 %v12963_v12 }
 0x303   : > { %5922 = vmatmul.mubr.bf16.gmra.mrb[112].mxu1 %v14381_v30  ;;  %5705 = vmatprep.mubr.bf16.mxu0 %v14395_v18  ;;  %v3510_v30 = vld [vmem:[%s15605_s9 + $0x8] sm:$0xf] }
 0x304   : > { %5931 = vmatprep.mubr.bf16.mxu1 %v14395_v18  ;;  %v14559_v52 = vrot.slane %v3510_v30, %v14159_v5  ;;  %v14565_v18 = vrot.slane %v3510_v30, %v14165_v7 }
 0x30a   : > { %5706 = vmatmul.mubr.bf16.gmra.mrb[116].mxu0 %v14393_v16 }
 0x30b   : > { %5932 = vmatmul.mubr.bf16.gmra.mrb[116].mxu1 %v14393_v16  ;;  %5715 = vmatprep.mubr.bf16.mxu0 %v14407_v61  ;;  %v14562_v16 = vrot.slane %v3510_v30, %v14162_v6 }
 0x30c   : > { %5941 = vmatprep.mubr.bf16.mxu1 %v14407_v61 }
 0x312   : > { %5716 = vmatmul.mubr.bf16.gmra.mrb[120].mxu0 %v14405_v15 }
 0x313   : > { %5942 = vmatmul.mubr.bf16.gmra.mrb[120].mxu1 %v14405_v15  ;;  %5725 = vmatprep.mubr.bf16.mxu0 %v14419_v62  ;;  %v14568_v15 = vrot.slane %v3510_v30, %v14168_v8 }
 0x314   : > { %5951 = vmatprep.mubr.bf16.mxu1 %v14419_v62 }
 0x31a   : > { %5726 = vmatmul.mubr.bf16.gmra.mrb[124].mxu0 %v14417_v44 }
 0x31b   : > { %5952 = vmatmul.mubr.bf16.gmra.mrb[124].mxu1 %v14417_v44 }
 0x334   : > { %v4319_v61 = vpop.f32.mrb[64].mxu0 }
 0x335   : > { %v11745_v9 = vadd.f32 %v4319_v61, %v14559_v52  ;;  %v4545_v60 = vpop.f32.mrb[64].mxu1  ;;  %v4321_v38 = vpop.f32.mrb[65].mxu0 }
 0x336   : > { %v11777_v39 = vadd.f32 %v4545_v60, %v14562_v16  ;;  %v11746_v47 = vadd.f32 %v4321_v38, %v14565_v18  ;;  %v4547_v37 = vpop.f32.mrb[65].mxu1  ;;  %v4323_v48 = vpop.f32.mrb[66].mxu0 }
 0x337   : > { %v11778_v41 = vadd.f32 %v4547_v37, %v14568_v15  ;;  %v11747_v3 = vadd.f32 %v4323_v48, %v14559_v52  ;;  %v4549_v43 = vpop.f32.mrb[66].mxu1  ;;  %v4325_v44 = vpop.f32.mrb[67].mxu0  ;;  %v4624_v11 = vmax.f32 %v11745_v9, 0.0  ;;  %v12971_v9 = vld [vmem:[%s15601_s5 + $0x1d0] sm:$0xff]  }
 0x338   : > { %v11779_v45 = vadd.f32 %v4549_v43, %v14562_v16  ;;  %v11748_v24 = vadd.f32 %v4325_v44, %v14565_v18  ;;  %v4551_v62 = vpop.f32.mrb[67].mxu1  ;;  %v4626_v50 = vmax.f32 %v11777_v39, 0.0  ;;  %v4625_v51 = vmax.f32 %v11746_v47, 0.0 }
 0x339   : > { %v4628_v46 = vmax.f32 %v11747_v3, 0.0  ;;  %v11780_v49 = vadd.f32 %v4551_v62, %v14568_v15  ;;  %v4627_v55 = vmax.f32 %v11778_v41, 0.0  ;;  %v12970_v41 = vld [vmem:[%s15601_s5 + $0x110] sm:$0xff]   ;;  %v12973_v62 = vld [vmem:[%s15601_s5 + $0x158] sm:$0xff]  }
 0x33a   : > { %v4630_v54 = vmax.f32 %v11779_v45, 0.0  ;;  %v4629_v20 = vmax.f32 %v11748_v24, 0.0  ;;  %v12972_v24 = vld [vmem:[%s15601_s5 + $0x190] sm:$0xff]  }
 0x33b   : > { %v4688_v56 = vpack.c.bf16 %v4628_v46, %v4624_v11  ;;  %v4631_v58 = vmax.f32 %v11780_v49, 0.0 }
 0x33c   : > { %v4690_v10 = vpack.c.bf16 %v4630_v54, %v4626_v50  ;;  %v4689_v59 = vpack.c.bf16 %v4629_v20, %v4625_v51  ;;  %v4329_v53 = vpop.f32.mrb[68].mxu0  ;;  %v12975_v51 = vld [vmem:[%s15601_s5 + $0x1d8] sm:$0xff]  }
 0x33d   : > { %v4691_v2 = vpack.c.bf16 %v4631_v58, %v4627_v55  ;;  %v11749_v42 = vadd.f32 %v4329_v53, %v14559_v52  ;;  %v4555_v27 = vpop.f32.mrb[68].mxu1  ;;  %v4331_v13 = vpop.f32.mrb[69].mxu0  ;;  %v12974_v53 = vld [vmem:[%s15601_s5 + $0x118] sm:$0xff]  }
 0x33e   : > { %v11781_v29 = vadd.f32 %v4555_v27, %v14562_v16  ;;  %v11750_v17 = vadd.f32 %v4331_v13, %v14565_v18  ;;  %v4557_v19 = vpop.f32.mrb[69].mxu1  ;;  %v4333_v23 = vpop.f32.mrb[70].mxu0  ;;  %6609 = vmatprep.mubr.bf16.mxu0 %v4689_v59  ;;  %v12976_v27 = vld [vmem:[%s15601_s5 + $0x198] sm:$0xff]   ;;  %v12977_v13 = vld [vmem:[%s15601_s5 + $0x160] sm:$0xff]  }
 0x33f   : > { %v11782_v21 = vadd.f32 %v4557_v19, %v14568_v15  ;;  %v11751_v22 = vadd.f32 %v4333_v23, %v14559_v52  ;;  %v4559_v25 = vpop.f32.mrb[70].mxu1  ;;  %6706 = vmatprep.mubr.bf16.mxu1 %v4691_v2  ;;  %v4335_v4 = vpop.f32.mrb[71].mxu0  ;;  %6610 = vmatmul.mubr.bf16.vlgmr.msra.gmra.mrb[128].mxu0 %v4688_v56  ;;  %v4632_v31 = vmax.f32 %v11749_v42, 0.0  ;;  %v12979_v19 = vld [vmem:[%s15601_s5 + $0x1e0] sm:$0xff]  }
 0x340   : > { %v11783_v26 = vadd.f32 %v4559_v25, %v14562_v16  ;;  %v11752_v28 = vadd.f32 %v4335_v4, %v14565_v18  ;;  %v4561_v57 = vpop.f32.mrb[71].mxu1  ;;  %6707 = vmatmul.mubr.bf16.vlgmr.msra.gmra.mrb[128].mxu1 %v4690_v10  ;;  %11490 = vmatpush3.bf16.msra.mxu0 %v12962_v0  ;;  %v4634_v36 = vmax.f32 %v11781_v29, 0.0  ;;  %v4633_v12 = vmax.f32 %v11750_v17, 0.0 }
 0x341   : > { %v4636_v32 = vmax.f32 %v11751_v22, 0.0  ;;  %v11784_v63 = vadd.f32 %v4561_v57, %v14568_v15  ;;  %11554 = vmatpush3.bf16.msra.mxu1 %v12964_v14  ;;  %11491 = vmatprep.subr.bf16.mxu0 %v12965_v40  ;;  %v4635_v60 = vmax.f32 %v11782_v21, 0.0 }
 0x342   : > { %v4638_v30 = vmax.f32 %v11783_v26, 0.0  ;;  %v4637_v61 = vmax.f32 %v11752_v28, 0.0  ;;  %11555 = vmatprep.subr.bf16.mxu1 %v12967_v1  ;;  %v12978_v26 = vld [vmem:[%s15601_s5 + $0x120] sm:$0xff]  }
 0x343   : > { %v4692_v38 = vpack.c.bf16 %v4636_v32, %v4632_v31  ;;  %v4639_v39 = vmax.f32 %v11784_v63, 0.0  ;;  %v12980_v32 = vld [vmem:[%s15601_s5 + $0x1a0] sm:$0xff]   ;;  %v12981_v63 = vld [vmem:[%s15601_s5 + $0x168] sm:$0xff]  }
 0x344   : > { %v4694_v47 = vpack.c.bf16 %v4638_v30, %v4634_v36  ;;  %v4693_v37 = vpack.c.bf16 %v4637_v61, %v4633_v12  ;;  %v4339_v48 = vpop.f32.mrb[72].mxu0  ;;  %11492 = vmatpush3.bf16.msra.mxu0 %v12966_v33  ;;  %v12983_v30 = vld [vmem:[%s15601_s5 + $0x1e8] sm:$0xff]  }
 0x345   : > { %v4695_v3 = vpack.c.bf16 %v4639_v39, %v4635_v60  ;;  %v11753_v43 = vadd.f32 %v4339_v48, %v14559_v52  ;;  %v4565_v44 = vpop.f32.mrb[72].mxu1  ;;  %v4341_v45 = vpop.f32.mrb[73].mxu0  ;;  %11556 = vmatpush3.bf16.msra.mxu1 %v12968_v34  ;;  %11493 = vmatprep.subr.bf16.mxu0 %v12969_v35  ;;  %v12982_v48 = vld [vmem:[%s15601_s5 + $0x128] sm:$0xff]  }
 0x346   : > { %v11785_v11 = vadd.f32 %v4565_v44, %v14562_v16  ;;  %v11754_v46 = vadd.f32 %v4341_v45, %v14565_v18  ;;  %v4567_v49 = vpop.f32.mrb[73].mxu1  ;;  %v4343_v50 = vpop.f32.mrb[74].mxu0  ;;  %6617 = vmatprep.mubr.bf16.mxu0 %v4693_v37  ;;  %11557 = vmatprep.subr.bf16.mxu1 %v12971_v9  ;;  %v12984_v44 = vld [vmem:[%s15601_s5 + $0x1a8] sm:$0xff]   ;;  %v12985_v45 = vld [vmem:[%s15601_s5 + $0x170] sm:$0xff]  }
 0x347   : > { %v11786_v54 = vadd.f32 %v4567_v49, %v14568_v15  ;;  %v11755_v20 = vadd.f32 %v4343_v50, %v14559_v52  ;;  %v4569_v55 = vpop.f32.mrb[74].mxu1  ;;  %6714 = vmatprep.mubr.bf16.mxu1 %v4695_v3  ;;  %v4345_v56 = vpop.f32.mrb[75].mxu0  ;;  %6618 = vmatmul.mubr.bf16.gmra.mrb[132].mxu0 %v4692_v38  ;;  %v4640_v0 = vmax.f32 %v11753_v43, 0.0  ;;  %v12987_v49 = vld [vmem:[%s15601_s5 + $0x1f0] sm:$0xff]  }
 0x348   : > { %v11787_v58 = vadd.f32 %v4569_v55, %v14562_v16  ;;  %v11756_v10 = vadd.f32 %v4345_v56, %v14565_v18  ;;  %v4571_v59 = vpop.f32.mrb[75].mxu1  ;;  %6715 = vmatmul.mubr.bf16.gmra.mrb[132].mxu1 %v4694_v47  ;;  %11494 = vmatpush3.bf16.msra.mxu0 %v12970_v41  ;;  %v4642_v14 = vmax.f32 %v11785_v11, 0.0  ;;  %v4641_v40 = vmax.f32 %v11754_v46, 0.0 }
 0x349   : > { %v4644_v2 = vmax.f32 %v11755_v20, 0.0  ;;  %v11788_v42 = vadd.f32 %v4571_v59, %v14568_v15  ;;  %11558 = vmatpush3.bf16.msra.mxu1 %v12972_v24  ;;  %11495 = vmatprep.subr.bf16.mxu0 %v12973_v62  ;;  %v4643_v23 = vmax.f32 %v11786_v54, 0.0 }
 0x34a   : > { %v4646_v29 = vmax.f32 %v11787_v58, 0.0  ;;  %v4645_v17 = vmax.f32 %v11756_v10, 0.0  ;;  %11559 = vmatprep.subr.bf16.mxu1 %v12975_v51  ;;  %v12986_v58 = vld [vmem:[%s15601_s5 + $0x130] sm:$0xff]  }
 0x34b   : > { %v4696_v1 = vpack.c.bf16 %v4644_v2, %v4640_v0  ;;  %v4647_v21 = vmax.f32 %v11788_v42, 0.0  ;;  %v12988_v2 = vld [vmem:[%s15601_s5 + $0x1b0] sm:$0xff]   ;;  %v12989_v42 = vld [vmem:[%s15601_s5 + $0x178] sm:$0xff]  }
 0x34c   : > { %v4698_v22 = vpack.c.bf16 %v4646_v29, %v4642_v14  ;;  %v4697_v25 = vpack.c.bf16 %v4645_v17, %v4641_v40  ;;  %v4349_v4 = vpop.f32.mrb[76].mxu0  ;;  %11496 = vmatpush3.bf16.msra.mxu0 %v12974_v53  ;;  %v12991_v29 = vld [vmem:[%s15601_s5 + $0x1f8] sm:$0xff]  }
 0x34d   : > { %v4699_v28 = vpack.c.bf16 %v4647_v21, %v4643_v23  ;;  %v11757_v57 = vadd.f32 %v4349_v4, %v14559_v52  ;;  %v4575_v33 = vpop.f32.mrb[76].mxu1  ;;  %v4351_v31 = vpop.f32.mrb[77].mxu0  ;;  %11560 = vmatpush3.bf16.msra.mxu1 %v12976_v27  ;;  %11497 = vmatprep.subr.bf16.mxu0 %v12977_v13  ;;  %v12990_v4 = vld [vmem:[%s15601_s5 + $0x138] sm:$0xff]  }
 0x34e   : > { %v11789_v34 = vadd.f32 %v4575_v33, %v14562_v16  ;;  %v11758_v35 = vadd.f32 %v4351_v31, %v14565_v18  ;;  %v4577_v36 = vpop.f32.mrb[77].mxu1  ;;  %v4353_v12 = vpop.f32.mrb[78].mxu0  ;;  %6625 = vmatprep.mubr.bf16.mxu0 %v4697_v25  ;;  %11561 = vmatprep.subr.bf16.mxu1 %v12979_v19  ;;  %v12992_v33 = vld [vmem:[%s15601_s5 + $0x1b8] sm:$0xff]  }
 0x34f   : > { %v11790_v61 = vadd.f32 %v4577_v36, %v14568_v15  ;;  %v11759_v9 = vadd.f32 %v4353_v12, %v14559_v52  ;;  %v4579_v60 = vpop.f32.mrb[78].mxu1  ;;  %6722 = vmatprep.mubr.bf16.mxu1 %v4699_v28  ;;  %v4355_v38 = vpop.f32.mrb[79].mxu0  ;;  %6626 = vmatmul.mubr.bf16.gmra.mrb[136].mxu0 %v4696_v1  ;;  %v4648_v41 = vmax.f32 %v11757_v57, 0.0 }
 0x350   : > { %v11791_v39 = vadd.f32 %v4579_v60, %v14562_v16  ;;  %v11760_v47 = vadd.f32 %v4355_v38, %v14565_v18  ;;  %v4581_v37 = vpop.f32.mrb[79].mxu1  ;;  %6723 = vmatmul.mubr.bf16.gmra.mrb[136].mxu1 %v4698_v22  ;;  %11498 = vmatpush3.bf16.msra.mxu0 %v12978_v26  ;;  %v4650_v24 = vmax.f32 %v11789_v34, 0.0  ;;  %v4649_v62 = vmax.f32 %v11758_v35, 0.0 }
 0x351   : > { %v4652_v3 = vmax.f32 %v11759_v9, 0.0  ;;  %v11792_v43 = vadd.f32 %v4581_v37, %v14568_v15  ;;  %11562 = vmatpush3.bf16.msra.mxu1 %v12980_v32  ;;  %11499 = vmatprep.subr.bf16.mxu0 %v12981_v63  ;;  %v4651_v50 = vmax.f32 %v11790_v61, 0.0 }
 0x352   : > { %v4654_v11 = vmax.f32 %v11791_v39, 0.0  ;;  %v4653_v46 = vmax.f32 %v11760_v47, 0.0  ;;  %11563 = vmatprep.subr.bf16.mxu1 %v12983_v30 }
 0x353   : > { %v4700_v51 = vpack.c.bf16 %v4652_v3, %v4648_v41  ;;  %v4655_v54 = vmax.f32 %v11792_v43, 0.0 }
 0x354   : > { %v4702_v20 = vpack.c.bf16 %v4654_v11, %v4650_v24  ;;  %v4701_v55 = vpack.c.bf16 %v4653_v46, %v4649_v62  ;;  %v4359_v56 = vpop.f32.mrb[80].mxu0  ;;  %11500 = vmatpush3.bf16.msra.mxu0 %v12982_v48 }
 0x355   : > { %v4703_v10 = vpack.c.bf16 %v4655_v54, %v4651_v50  ;;  %v11761_v59 = vadd.f32 %v4359_v56, %v14559_v52  ;;  %v4585_v53 = vpop.f32.mrb[80].mxu1  ;;  %v4361_v0 = vpop.f32.mrb[81].mxu0  ;;  %11564 = vmatpush3.bf16.msra.mxu1 %v12984_v44  ;;  %11501 = vmatprep.subr.bf16.mxu0 %v12985_v45 }
 0x356   : > { %v11793_v27 = vadd.f32 %v4585_v53, %v14562_v16  ;;  %v11762_v13 = vadd.f32 %v4361_v0, %v14565_v18  ;;  %v4587_v14 = vpop.f32.mrb[81].mxu1  ;;  %v4363_v40 = vpop.f32.mrb[82].mxu0  ;;  %6633 = vmatprep.mubr.bf16.mxu0 %v4701_v55  ;;  %11565 = vmatprep.subr.bf16.mxu1 %v12987_v49 }
 0x357   : > { %v11794_v17 = vadd.f32 %v4587_v14, %v14568_v15  ;;  %v11763_v19 = vadd.f32 %v4363_v40, %v14559_v52  ;;  %v4589_v23 = vpop.f32.mrb[82].mxu1  ;;  %6730 = vmatprep.mubr.bf16.mxu1 %v4703_v10  ;;  %v4365_v1 = vpop.f32.mrb[83].mxu0  ;;  %6634 = vmatmul.mubr.bf16.gmra.mrb[140].mxu0 %v4700_v51  ;;  %v4656_v26 = vmax.f32 %v11761_v59, 0.0 }
 0x358   : > { %v11795_v21 = vadd.f32 %v4589_v23, %v14562_v16  ;;  %v11764_v22 = vadd.f32 %v4365_v1, %v14565_v18  ;;  %v4591_v25 = vpop.f32.mrb[83].mxu1  ;;  %6731 = vmatmul.mubr.bf16.gmra.mrb[140].mxu1 %v4702_v20  ;;  %11502 = vmatpush3.bf16.msra.mxu0 %v12986_v58  ;;  %v4658_v31 = vmax.f32 %v11793_v27, 0.0  ;;  %v4657_v32 = vmax.f32 %v11762_v13, 0.0 }
 0x359   : > { %v4660_v28 = vmax.f32 %v11763_v19, 0.0  ;;  %v11796_v57 = vadd.f32 %v4591_v25, %v14568_v15  ;;  %11566 = vmatpush3.bf16.msra.mxu1 %v12988_v2  ;;  %11503 = vmatprep.subr.bf16.mxu0 %v12989_v42  ;;  %v4659_v35 = vmax.f32 %v11794_v17, 0.0 }
 0x35a   : > { %v4662_v63 = vmax.f32 %v11795_v21, 0.0  ;;  %v4661_v34 = vmax.f32 %v11764_v22, 0.0  ;;  %11567 = vmatprep.subr.bf16.mxu1 %v12991_v29 }
 0x35b   : > { %v4704_v36 = vpack.c.bf16 %v4660_v28, %v4656_v26  ;;  %v4663_v12 = vmax.f32 %v11796_v57, 0.0 }
 0x35c   : > { %v4706_v30 = vpack.c.bf16 %v4662_v63, %v4658_v31  ;;  %v4705_v61 = vpack.c.bf16 %v4661_v34, %v4657_v32  ;;  %v4369_v9 = vpop.f32.mrb[84].mxu0  ;;  %11504 = vmatpush3.bf16.msra.mxu0 %v12990_v4 }
 0x35d   : > { %v4707_v60 = vpack.c.bf16 %v4663_v12, %v4659_v35  ;;  %v11765_v38 = vadd.f32 %v4369_v9, %v14559_v52  ;;  %v4595_v39 = vpop.f32.mrb[84].mxu1  ;;  %v4371_v47 = vpop.f32.mrb[85].mxu0  ;;  %11568 = vmatpush3.bf16.msra.mxu1 %v12992_v33 }
 0x35e   : > { %v11797_v37 = vadd.f32 %v4595_v39, %v14562_v16  ;;  %v11766_v48 = vadd.f32 %v4371_v47, %v14565_v18  ;;  %v4597_v41 = vpop.f32.mrb[85].mxu1  ;;  %v4373_v3 = vpop.f32.mrb[86].mxu0  ;;  %6641 = vmatprep.mubr.bf16.mxu0 %v4705_v61 }
 0x35f   : > { %v11798_v43 = vadd.f32 %v4597_v41, %v14568_v15  ;;  %v11767_v44 = vadd.f32 %v4373_v3, %v14559_v52  ;;  %v4599_v45 = vpop.f32.mrb[86].mxu1  ;;  %6738 = vmatprep.mubr.bf16.mxu1 %v4707_v60  ;;  %v4375_v24 = vpop.f32.mrb[87].mxu0  ;;  %6642 = vmatmul.mubr.bf16.gmra.mrb[144].mxu0 %v4704_v36  ;;  %v4664_v49 = vmax.f32 %v11765_v38, 0.0 }
 0x360   : > { %v11799_v62 = vadd.f32 %v4599_v45, %v14562_v16  ;;  %v11768_v11 = vadd.f32 %v4375_v24, %v14565_v18  ;;  %v4601_v46 = vpop.f32.mrb[87].mxu1  ;;  %6739 = vmatmul.mubr.bf16.gmra.mrb[144].mxu1 %v4706_v30  ;;  %v4666_v54 = vmax.f32 %v11797_v37, 0.0  ;;  %v4665_v20 = vmax.f32 %v11766_v48, 0.0 }
 0x361   : > { %v4668_v50 = vmax.f32 %v11767_v44, 0.0  ;;  %v11800_v51 = vadd.f32 %v4601_v46, %v14568_v15  ;;  %v4667_v58 = vmax.f32 %v11798_v43, 0.0 }
 0x362   : > { %v4670_v55 = vmax.f32 %v11799_v62, 0.0  ;;  %v4669_v56 = vmax.f32 %v11768_v11, 0.0 }
 0x363   : > { %v4708_v10 = vpack.c.bf16 %v4668_v50, %v4664_v49  ;;  %v4671_v59 = vmax.f32 %v11800_v51, 0.0 }
 0x364   : > { %v4710_v53 = vpack.c.bf16 %v4670_v55, %v4666_v54  ;;  %v4709_v0 = vpack.c.bf16 %v4669_v56, %v4665_v20  ;;  %v4379_v2 = vpop.f32.mrb[88].mxu0 }
 0x365   : > { %v4711_v42 = vpack.c.bf16 %v4671_v59, %v4667_v58  ;;  %v11769_v27 = vadd.f32 %v4379_v2, %v14559_v52  ;;  %v4605_v13 = vpop.f32.mrb[88].mxu1  ;;  %v4381_v14 = vpop.f32.mrb[89].mxu0 }
 0x366   : > { %v11801_v40 = vadd.f32 %v4605_v13, %v14562_v16  ;;  %v11770_v29 = vadd.f32 %v4381_v14, %v14565_v18  ;;  %v4607_v17 = vpop.f32.mrb[89].mxu1  ;;  %v4383_v19 = vpop.f32.mrb[90].mxu0  ;;  %6649 = vmatprep.mubr.bf16.mxu0 %v4709_v0 }
 0x367   : > { %v11802_v23 = vadd.f32 %v4607_v17, %v14568_v15  ;;  %v11771_v1 = vadd.f32 %v4383_v19, %v14559_v52  ;;  %v4609_v21 = vpop.f32.mrb[90].mxu1  ;;  %6746 = vmatprep.mubr.bf16.mxu1 %v4711_v42  ;;  %v4385_v22 = vpop.f32.mrb[91].mxu0  ;;  %6650 = vmatmul.mubr.bf16.gmra.mrb[148].mxu0 %v4708_v10  ;;  %v4672_v28 = vmax.f32 %v11769_v27, 0.0 }
 0x368   : > { %v11803_v25 = vadd.f32 %v4609_v21, %v14562_v16  ;;  %v11772_v4 = vadd.f32 %v4385_v22, %v14565_v18  ;;  %v4611_v26 = vpop.f32.mrb[91].mxu1  ;;  %6747 = vmatmul.mubr.bf16.gmra.mrb[148].mxu1 %v4710_v53  ;;  %v4674_v31 = vmax.f32 %v11801_v40, 0.0  ;;  %v4673_v32 = vmax.f32 %v11770_v29, 0.0 }
 0x369   : > { %v4676_v57 = vmax.f32 %v11771_v1, 0.0  ;;  %v11804_v33 = vadd.f32 %v4611_v26, %v14568_v15  ;;  %v4675_v35 = vmax.f32 %v11802_v23, 0.0 }
 0x36a   : > { %v4678_v63 = vmax.f32 %v11803_v25, 0.0  ;;  %v4677_v34 = vmax.f32 %v11772_v4, 0.0 }
 0x36b   : > { %v4712_v36 = vpack.c.bf16 %v4676_v57, %v4672_v28  ;;  %v4679_v12 = vmax.f32 %v11804_v33, 0.0 }
 0x36c   : > { %v4714_v30 = vpack.c.bf16 %v4678_v63, %v4674_v31  ;;  %v4713_v61 = vpack.c.bf16 %v4677_v34, %v4673_v32  ;;  %v4389_v9 = vpop.f32.mrb[92].mxu0 }
 0x36d   : > { %v4715_v60 = vpack.c.bf16 %v4679_v12, %v4675_v35  ;;  %v11773_v38 = vadd.f32 %v4389_v9, %v14559_v52  ;;  %v4615_v39 = vpop.f32.mrb[92].mxu1  ;;  %v4391_v47 = vpop.f32.mrb[93].mxu0 }
 0x36e   : > { %v11805_v37 = vadd.f32 %v4615_v39, %v14562_v16  ;;  %v11774_v48 = vadd.f32 %v4391_v47, %v14565_v18  ;;  %v4617_v41 = vpop.f32.mrb[93].mxu1  ;;  %v4393_v3 = vpop.f32.mrb[94].mxu0  ;;  %6657 = vmatprep.mubr.bf16.mxu0 %v4713_v61 }
 0x36f   : > { %v11806_v43 = vadd.f32 %v4617_v41, %v14568_v15  ;;  %v11775_v44 = vadd.f32 %v4393_v3, %v14559_v52  ;;  %v4619_v45 = vpop.f32.mrb[94].mxu1  ;;  %6754 = vmatprep.mubr.bf16.mxu1 %v4715_v60  ;;  %v4395_v24 = vpop.f32.mrb[95].mxu0  ;;  %6658 = vmatmul.mubr.bf16.gmra.mrb[152].mxu0 %v4712_v36  ;;  %v4680_v49 = vmax.f32 %v11773_v38, 0.0 }
 0x370   : > { %v11807_v62 = vadd.f32 %v4619_v45, %v14562_v16  ;;  %v11776_v11 = vadd.f32 %v4395_v24, %v14565_v18  ;;  %v4621_v46 = vpop.f32.mrb[95].mxu1  ;;  %6755 = vmatmul.mubr.bf16.gmra.mrb[152].mxu1 %v4714_v30  ;;  %v4682_v54 = vmax.f32 %v11805_v37, 0.0  ;;  %v4681_v20 = vmax.f32 %v11774_v48, 0.0  ;;  %v4848_v16 = vld [vmem:[%s15605_s9 + $0xc] sm:$0xf] }
 0x371   : > { %v4684_v50 = vmax.f32 %v11775_v44, 0.0  ;;  %v11808_v51 = vadd.f32 %v4621_v46, %v14568_v15  ;;  %v4683_v58 = vmax.f32 %v11806_v43, 0.0  ;;  %v14728_v18 = vrot.slane %v4848_v16, %v14159_v5 }
 0x372   : > { %v4686_v55 = vmax.f32 %v11807_v62, 0.0  ;;  %v4685_v56 = vmax.f32 %v11776_v11, 0.0  ;;  %v14731_v15 = vrot.slane %v4848_v16, %v14162_v6  ;;  %v14734_v2 = vrot.slane %v4848_v16, %v14165_v7 }
 0x373   : > { %v4716_v52 = vpack.c.bf16 %v4684_v50, %v4680_v49  ;;  %v4687_v10 = vmax.f32 %v11808_v51, 0.0  ;;  %v14737_v42 = vrot.slane %v4848_v16, %v14168_v8 }
 0x374   : > { %v4718_v59 = vpack.c.bf16 %v4686_v55, %v4682_v54  ;;  %v4717_v53 = vpack.c.bf16 %v4685_v56, %v4681_v20 }
 0x375   : > { %v4719_v0 = vpack.c.bf16 %v4687_v10, %v4683_v58 }
 0x376   : > { %6665 = vmatprep.mubr.bf16.mxu0 %v4717_v53 }
 0x377   : > { %6762 = vmatprep.mubr.bf16.mxu1 %v4719_v0  ;;  %6666 = vmatmul.mubr.bf16.gmra.mrb[156].mxu0 %v4716_v52 }
 0x378   : > { %6763 = vmatmul.mubr.bf16.gmra.mrb[156].mxu1 %v4718_v59 }
 0x3b5   : > { %v5657_v27 = vpop.f32.mrb[96].mxu0 }
 0x3b6   : > { %v11809_v13 = vadd.f32 %v5657_v27, %v14728_v18  ;;  %v5883_v14 = vpop.f32.mrb[96].mxu1  ;;  %v5659_v40 = vpop.f32.mrb[97].mxu0 }
 0x3b7   : > { %v11841_v29 = vadd.f32 %v5883_v14, %v14731_v15  ;;  %v11810_v17 = vadd.f32 %v5659_v40, %v14734_v2  ;;  %v5885_v19 = vpop.f32.mrb[97].mxu1  ;;  %v5661_v23 = vpop.f32.mrb[98].mxu0 }
 0x3b8   : > { %v11842_v1 = vadd.f32 %v5885_v19, %v14737_v42  ;;  %v11811_v21 = vadd.f32 %v5661_v23, %v14728_v18  ;;  %v5887_v22 = vpop.f32.mrb[98].mxu1  ;;  %v5663_v25 = vpop.f32.mrb[99].mxu0  ;;  %v5962_v57 = vmax.f32 %v11809_v13, 0.0 }
 0x3b9   : > { %v11843_v4 = vadd.f32 %v5887_v22, %v14731_v15  ;;  %v11812_v26 = vadd.f32 %v5663_v25, %v14734_v2  ;;  %v5889_v28 = vpop.f32.mrb[99].mxu1  ;;  %v5964_v32 = vmax.f32 %v11841_v29, 0.0  ;;  %v5963_v63 = vmax.f32 %v11810_v17, 0.0 }
 0x3ba   : > { %v5966_v33 = vmax.f32 %v11811_v21, 0.0  ;;  %v11844_v31 = vadd.f32 %v5889_v28, %v14737_v42  ;;  %v5965_v36 = vmax.f32 %v11842_v1, 0.0 }
 0x3bb   : > { %v5968_v34 = vmax.f32 %v11843_v4, 0.0  ;;  %v5967_v35 = vmax.f32 %v11812_v26, 0.0 }
 0x3bc   : > { %v6026_v12 = vpack.c.bf16 %v5966_v33, %v5962_v57  ;;  %v5969_v30 = vmax.f32 %v11844_v31, 0.0 }
 0x3bd   : > { %v6028_v61 = vpack.c.bf16 %v5968_v34, %v5964_v32  ;;  %v6027_v9 = vpack.c.bf16 %v5967_v35, %v5963_v63  ;;  %v5667_v60 = vpop.f32.mrb[100].mxu0 }
 0x3be   : > { %v6029_v38 = vpack.c.bf16 %v5969_v30, %v5965_v36  ;;  %v11813_v39 = vadd.f32 %v5667_v60, %v14728_v18  ;;  %v5893_v47 = vpop.f32.mrb[100].mxu1  ;;  %v5669_v37 = vpop.f32.mrb[101].mxu0 }
 0x3bf   : > { %v11845_v48 = vadd.f32 %v5893_v47, %v14731_v15  ;;  %v11814_v41 = vadd.f32 %v5669_v37, %v14734_v2  ;;  %v5895_v3 = vpop.f32.mrb[101].mxu1  ;;  %v5671_v43 = vpop.f32.mrb[102].mxu0  ;;  %6803 = vmatprep.mubr.bf16.mxu0 %v6027_v9 }
 0x3c0   : > { %v11846_v44 = vadd.f32 %v5895_v3, %v14737_v42  ;;  %v11815_v45 = vadd.f32 %v5671_v43, %v14728_v18  ;;  %v5897_v24 = vpop.f32.mrb[102].mxu1  ;;  %6900 = vmatprep.mubr.bf16.mxu1 %v6029_v38  ;;  %v5673_v62 = vpop.f32.mrb[103].mxu0  ;;  %6804 = vmatmul.mubr.bf16.vlgmr.msra.gmra.mrb[160].mxu0 %v6026_v12  ;;  %v5970_v50 = vmax.f32 %v11813_v39, 0.0 }
 0x3c1   : > { %v11847_v11 = vadd.f32 %v5897_v24, %v14731_v15  ;;  %v11816_v46 = vadd.f32 %v5673_v62, %v14734_v2  ;;  %v5899_v49 = vpop.f32.mrb[103].mxu1  ;;  %6901 = vmatmul.mubr.bf16.vlgmr.msra.gmra.mrb[160].mxu1 %v6028_v61  ;;  %v5972_v20 = vmax.f32 %v11845_v48, 0.0  ;;  %v5971_v55 = vmax.f32 %v11814_v41, 0.0 }
 0x3c2   : > { %v5974_v51 = vmax.f32 %v11815_v45, 0.0  ;;  %v11848_v54 = vadd.f32 %v5899_v49, %v14737_v42  ;;  %v5973_v52 = vmax.f32 %v11846_v44, 0.0 }
 0x3c3   : > { %v5976_v56 = vmax.f32 %v11847_v11, 0.0  ;;  %v5975_v58 = vmax.f32 %v11816_v46, 0.0 }
 0x3c4   : > { %v6030_v10 = vpack.c.bf16 %v5974_v51, %v5970_v50  ;;  %v5977_v59 = vmax.f32 %v11848_v54, 0.0 }
 0x3c5   : > { %v6032_v53 = vpack.c.bf16 %v5976_v56, %v5972_v20  ;;  %v6031_v0 = vpack.c.bf16 %v5975_v58, %v5971_v55  ;;  %v5677_v16 = vpop.f32.mrb[104].mxu0 }
 0x3c6   : > { %v6033_v27 = vpack.c.bf16 %v5977_v59, %v5973_v52  ;;  %v11817_v13 = vadd.f32 %v5677_v16, %v14728_v18  ;;  %v5903_v14 = vpop.f32.mrb[104].mxu1  ;;  %v5679_v40 = vpop.f32.mrb[105].mxu0 }
 0x3c7   : > { %v11849_v29 = vadd.f32 %v5903_v14, %v14731_v15  ;;  %v11818_v17 = vadd.f32 %v5679_v40, %v14734_v2  ;;  %v5905_v19 = vpop.f32.mrb[105].mxu1  ;;  %v5681_v23 = vpop.f32.mrb[106].mxu0  ;;  %6811 = vmatprep.mubr.bf16.mxu0 %v6031_v0 }
 0x3c8   : > { %v11850_v1 = vadd.f32 %v5905_v19, %v14737_v42  ;;  %v11819_v21 = vadd.f32 %v5681_v23, %v14728_v18  ;;  %v5907_v22 = vpop.f32.mrb[106].mxu1  ;;  %6908 = vmatprep.mubr.bf16.mxu1 %v6033_v27  ;;  %v5683_v25 = vpop.f32.mrb[107].mxu0  ;;  %6812 = vmatmul.mubr.bf16.gmra.mrb[164].mxu0 %v6030_v10  ;;  %v5978_v57 = vmax.f32 %v11817_v13, 0.0 }
 0x3c9   : > { %v11851_v4 = vadd.f32 %v5907_v22, %v14731_v15  ;;  %v11820_v26 = vadd.f32 %v5683_v25, %v14734_v2  ;;  %v5909_v28 = vpop.f32.mrb[107].mxu1  ;;  %6909 = vmatmul.mubr.bf16.gmra.mrb[164].mxu1 %v6032_v53  ;;  %v5980_v32 = vmax.f32 %v11849_v29, 0.0  ;;  %v5979_v63 = vmax.f32 %v11818_v17, 0.0 }
 0x3ca   : > { %v5982_v33 = vmax.f32 %v11819_v21, 0.0  ;;  %v11852_v31 = vadd.f32 %v5909_v28, %v14737_v42  ;;  %v5981_v36 = vmax.f32 %v11850_v1, 0.0 }
 0x3cb   : > { %v5984_v34 = vmax.f32 %v11851_v4, 0.0  ;;  %v5983_v35 = vmax.f32 %v11820_v26, 0.0 }
 0x3cc   : > { %v6034_v12 = vpack.c.bf16 %v5982_v33, %v5978_v57  ;;  %v5985_v30 = vmax.f32 %v11852_v31, 0.0 }
 0x3cd   : > { %v6036_v61 = vpack.c.bf16 %v5984_v34, %v5980_v32  ;;  %v6035_v9 = vpack.c.bf16 %v5983_v35, %v5979_v63  ;;  %v5687_v60 = vpop.f32.mrb[108].mxu0 }
 0x3ce   : > { %v6037_v38 = vpack.c.bf16 %v5985_v30, %v5981_v36  ;;  %v11821_v39 = vadd.f32 %v5687_v60, %v14728_v18  ;;  %v5913_v47 = vpop.f32.mrb[108].mxu1  ;;  %v5689_v37 = vpop.f32.mrb[109].mxu0 }
 0x3cf   : > { %v11853_v48 = vadd.f32 %v5913_v47, %v14731_v15  ;;  %v11822_v41 = vadd.f32 %v5689_v37, %v14734_v2  ;;  %v5915_v3 = vpop.f32.mrb[109].mxu1  ;;  %v5691_v43 = vpop.f32.mrb[110].mxu0  ;;  %6819 = vmatprep.mubr.bf16.mxu0 %v6035_v9 }
 0x3d0   : > { %v11854_v44 = vadd.f32 %v5915_v3, %v14737_v42  ;;  %v11823_v45 = vadd.f32 %v5691_v43, %v14728_v18  ;;  %v5917_v24 = vpop.f32.mrb[110].mxu1  ;;  %6916 = vmatprep.mubr.bf16.mxu1 %v6037_v38  ;;  %v5693_v62 = vpop.f32.mrb[111].mxu0  ;;  %6820 = vmatmul.mubr.bf16.gmra.mrb[168].mxu0 %v6034_v12  ;;  %v5986_v50 = vmax.f32 %v11821_v39, 0.0 }
 0x3d1   : > { %v11855_v11 = vadd.f32 %v5917_v24, %v14731_v15  ;;  %v11824_v46 = vadd.f32 %v5693_v62, %v14734_v2  ;;  %v5919_v49 = vpop.f32.mrb[111].mxu1  ;;  %6917 = vmatmul.mubr.bf16.gmra.mrb[168].mxu1 %v6036_v61  ;;  %v5988_v20 = vmax.f32 %v11853_v48, 0.0  ;;  %v5987_v55 = vmax.f32 %v11822_v41, 0.0 }
 0x3d2   : > { %v5990_v51 = vmax.f32 %v11823_v45, 0.0  ;;  %v11856_v54 = vadd.f32 %v5919_v49, %v14737_v42  ;;  %v5989_v52 = vmax.f32 %v11854_v44, 0.0 }
 0x3d3   : > { %v5992_v56 = vmax.f32 %v11855_v11, 0.0  ;;  %v5991_v58 = vmax.f32 %v11824_v46, 0.0 }
 0x3d4   : > { %v6038_v10 = vpack.c.bf16 %v5990_v51, %v5986_v50  ;;  %v5993_v59 = vmax.f32 %v11856_v54, 0.0 }
 0x3d5   : > { %v6040_v53 = vpack.c.bf16 %v5992_v56, %v5988_v20  ;;  %v6039_v0 = vpack.c.bf16 %v5991_v58, %v5987_v55  ;;  %v5697_v16 = vpop.f32.mrb[112].mxu0 }
 0x3d6   : > { %v6041_v27 = vpack.c.bf16 %v5993_v59, %v5989_v52  ;;  %v11825_v13 = vadd.f32 %v5697_v16, %v14728_v18  ;;  %v5923_v14 = vpop.f32.mrb[112].mxu1  ;;  %v5699_v40 = vpop.f32.mrb[113].mxu0 }
 0x3d7   : > { %v11857_v29 = vadd.f32 %v5923_v14, %v14731_v15  ;;  %v11826_v17 = vadd.f32 %v5699_v40, %v14734_v2  ;;  %v5925_v19 = vpop.f32.mrb[113].mxu1  ;;  %v5701_v23 = vpop.f32.mrb[114].mxu0  ;;  %6827 = vmatprep.mubr.bf16.mxu0 %v6039_v0 }
 0x3d8   : > { %v11858_v1 = vadd.f32 %v5925_v19, %v14737_v42  ;;  %v11827_v21 = vadd.f32 %v5701_v23, %v14728_v18  ;;  %v5927_v22 = vpop.f32.mrb[114].mxu1  ;;  %6924 = vmatprep.mubr.bf16.mxu1 %v6041_v27  ;;  %v5703_v25 = vpop.f32.mrb[115].mxu0  ;;  %6828 = vmatmul.mubr.bf16.gmra.mrb[172].mxu0 %v6038_v10  ;;  %v5994_v57 = vmax.f32 %v11825_v13, 0.0 }
 0x3d9   : > { %v11859_v4 = vadd.f32 %v5927_v22, %v14731_v15  ;;  %v11828_v26 = vadd.f32 %v5703_v25, %v14734_v2  ;;  %v5929_v28 = vpop.f32.mrb[115].mxu1  ;;  %6925 = vmatmul.mubr.bf16.gmra.mrb[172].mxu1 %v6040_v53  ;;  %v5996_v32 = vmax.f32 %v11857_v29, 0.0  ;;  %v5995_v63 = vmax.f32 %v11826_v17, 0.0 }
 0x3da   : > { %v5998_v33 = vmax.f32 %v11827_v21, 0.0  ;;  %v11860_v31 = vadd.f32 %v5929_v28, %v14737_v42  ;;  %v5997_v36 = vmax.f32 %v11858_v1, 0.0 }
 0x3db   : > { %v6000_v34 = vmax.f32 %v11859_v4, 0.0  ;;  %v5999_v35 = vmax.f32 %v11828_v26, 0.0 }
 0x3dc   : > { %v6042_v12 = vpack.c.bf16 %v5998_v33, %v5994_v57  ;;  %v6001_v30 = vmax.f32 %v11860_v31, 0.0 }
 0x3dd   : > { %v6044_v61 = vpack.c.bf16 %v6000_v34, %v5996_v32  ;;  %v6043_v9 = vpack.c.bf16 %v5999_v35, %v5995_v63  ;;  %v5707_v60 = vpop.f32.mrb[116].mxu0 }
 0x3de   : > { %v6045_v38 = vpack.c.bf16 %v6001_v30, %v5997_v36  ;;  %v11829_v39 = vadd.f32 %v5707_v60, %v14728_v18  ;;  %v5933_v47 = vpop.f32.mrb[116].mxu1  ;;  %v5709_v37 = vpop.f32.mrb[117].mxu0 }
 0x3df   : > { %v11861_v48 = vadd.f32 %v5933_v47, %v14731_v15  ;;  %v11830_v41 = vadd.f32 %v5709_v37, %v14734_v2  ;;  %v5935_v3 = vpop.f32.mrb[117].mxu1  ;;  %v5711_v43 = vpop.f32.mrb[118].mxu0  ;;  %6835 = vmatprep.mubr.bf16.mxu0 %v6043_v9 }
 0x3e0   : > { %v11862_v44 = vadd.f32 %v5935_v3, %v14737_v42  ;;  %v11831_v45 = vadd.f32 %v5711_v43, %v14728_v18  ;;  %v5937_v24 = vpop.f32.mrb[118].mxu1  ;;  %6932 = vmatprep.mubr.bf16.mxu1 %v6045_v38  ;;  %v5713_v62 = vpop.f32.mrb[119].mxu0  ;;  %6836 = vmatmul.mubr.bf16.gmra.mrb[176].mxu0 %v6042_v12  ;;  %v6002_v50 = vmax.f32 %v11829_v39, 0.0 }
 0x3e1   : > { %v11863_v11 = vadd.f32 %v5937_v24, %v14731_v15  ;;  %v11832_v46 = vadd.f32 %v5713_v62, %v14734_v2  ;;  %v5939_v49 = vpop.f32.mrb[119].mxu1  ;;  %6933 = vmatmul.mubr.bf16.gmra.mrb[176].mxu1 %v6044_v61  ;;  %v6004_v20 = vmax.f32 %v11861_v48, 0.0  ;;  %v6003_v55 = vmax.f32 %v11830_v41, 0.0 }
 0x3e2   : > { %v6006_v51 = vmax.f32 %v11831_v45, 0.0  ;;  %v11864_v54 = vadd.f32 %v5939_v49, %v14737_v42  ;;  %v6005_v52 = vmax.f32 %v11862_v44, 0.0 }
 0x3e3   : > { %v6008_v56 = vmax.f32 %v11863_v11, 0.0  ;;  %v6007_v58 = vmax.f32 %v11832_v46, 0.0 }
 0x3e4   : > { %v6046_v10 = vpack.c.bf16 %v6006_v51, %v6002_v50  ;;  %v6009_v59 = vmax.f32 %v11864_v54, 0.0 }
 0x3e5   : > { %v6048_v53 = vpack.c.bf16 %v6008_v56, %v6004_v20  ;;  %v6047_v0 = vpack.c.bf16 %v6007_v58, %v6003_v55  ;;  %v5717_v16 = vpop.f32.mrb[120].mxu0 }
 0x3e6   : > { %v6049_v27 = vpack.c.bf16 %v6009_v59, %v6005_v52  ;;  %v11833_v13 = vadd.f32 %v5717_v16, %v14728_v18  ;;  %v5943_v14 = vpop.f32.mrb[120].mxu1  ;;  %v5719_v40 = vpop.f32.mrb[121].mxu0 }
 0x3e7   : > { %v11865_v29 = vadd.f32 %v5943_v14, %v14731_v15  ;;  %v11834_v17 = vadd.f32 %v5719_v40, %v14734_v2  ;;  %v5945_v19 = vpop.f32.mrb[121].mxu1  ;;  %v5721_v23 = vpop.f32.mrb[122].mxu0  ;;  %6843 = vmatprep.mubr.bf16.mxu0 %v6047_v0 }
 0x3e8   : > { %v11866_v1 = vadd.f32 %v5945_v19, %v14737_v42  ;;  %v11835_v21 = vadd.f32 %v5721_v23, %v14728_v18  ;;  %v5947_v22 = vpop.f32.mrb[122].mxu1  ;;  %6940 = vmatprep.mubr.bf16.mxu1 %v6049_v27  ;;  %v5723_v25 = vpop.f32.mrb[123].mxu0  ;;  %6844 = vmatmul.mubr.bf16.gmra.mrb[180].mxu0 %v6046_v10  ;;  %v6010_v57 = vmax.f32 %v11833_v13, 0.0 }
 0x3e9   : > { %v11867_v4 = vadd.f32 %v5947_v22, %v14731_v15  ;;  %v11836_v26 = vadd.f32 %v5723_v25, %v14734_v2  ;;  %v5949_v28 = vpop.f32.mrb[123].mxu1  ;;  %6941 = vmatmul.mubr.bf16.gmra.mrb[180].mxu1 %v6048_v53  ;;  %v6012_v32 = vmax.f32 %v11865_v29, 0.0  ;;  %v6011_v63 = vmax.f32 %v11834_v17, 0.0 }
 0x3ea   : > { %v6014_v33 = vmax.f32 %v11835_v21, 0.0  ;;  %v11868_v31 = vadd.f32 %v5949_v28, %v14737_v42  ;;  %v6013_v36 = vmax.f32 %v11866_v1, 0.0 }
 0x3eb   : > { %v6016_v34 = vmax.f32 %v11867_v4, 0.0  ;;  %v6015_v35 = vmax.f32 %v11836_v26, 0.0 }
 0x3ec   : > { %v6050_v12 = vpack.c.bf16 %v6014_v33, %v6010_v57  ;;  %v6017_v30 = vmax.f32 %v11868_v31, 0.0 }
 0x3ed   : > { %v6052_v61 = vpack.c.bf16 %v6016_v34, %v6012_v32  ;;  %v6051_v9 = vpack.c.bf16 %v6015_v35, %v6011_v63  ;;  %v5727_v60 = vpop.f32.mrb[124].mxu0 }
 0x3ee   : > { %v6053_v38 = vpack.c.bf16 %v6017_v30, %v6013_v36  ;;  %v11837_v39 = vadd.f32 %v5727_v60, %v14728_v18  ;;  %v5953_v47 = vpop.f32.mrb[124].mxu1  ;;  %v5729_v37 = vpop.f32.mrb[125].mxu0 }
 0x3ef   : > { %v11869_v48 = vadd.f32 %v5953_v47, %v14731_v15  ;;  %v11838_v41 = vadd.f32 %v5729_v37, %v14734_v2  ;;  %v5955_v3 = vpop.f32.mrb[125].mxu1  ;;  %v5731_v43 = vpop.f32.mrb[126].mxu0  ;;  %6851 = vmatprep.mubr.bf16.mxu0 %v6051_v9 }
 0x3f0   : > { %v11870_v44 = vadd.f32 %v5955_v3, %v14737_v42  ;;  %v11839_v45 = vadd.f32 %v5731_v43, %v14728_v18  ;;  %v5957_v24 = vpop.f32.mrb[126].mxu1  ;;  %6948 = vmatprep.mubr.bf16.mxu1 %v6053_v38  ;;  %v5733_v62 = vpop.f32.mrb[127].mxu0  ;;  %6852 = vmatmul.mubr.bf16.gmra.mrb[184].mxu0 %v6050_v12  ;;  %v6018_v50 = vmax.f32 %v11837_v39, 0.0 }
 0x3f1   : > { %v11871_v11 = vadd.f32 %v5957_v24, %v14731_v15  ;;  %v11840_v46 = vadd.f32 %v5733_v62, %v14734_v2  ;;  %v5959_v49 = vpop.f32.mrb[127].mxu1  ;;  %6949 = vmatmul.mubr.bf16.gmra.mrb[184].mxu1 %v6052_v61  ;;  %v6020_v20 = vmax.f32 %v11869_v48, 0.0  ;;  %v6019_v55 = vmax.f32 %v11838_v41, 0.0 }
 0x3f2   : > { %v6022_v51 = vmax.f32 %v11839_v45, 0.0  ;;  %v11872_v54 = vadd.f32 %v5959_v49, %v14737_v42  ;;  %v6021_v52 = vmax.f32 %v11870_v44, 0.0  ;;  %v14806_v42 = vld [vmem:[%s15605_s9 + $0x10] ss:$0 sm:$0xff] }
 0x3f3   : > { %v6024_v56 = vmax.f32 %v11871_v11, 0.0  ;;  %v6023_v58 = vmax.f32 %v11840_v46, 0.0 }
 0x3f4   : > { %v6054_v18 = vpack.c.bf16 %v6022_v51, %v6018_v50  ;;  %v6025_v10 = vmax.f32 %v11872_v54, 0.0 }
 0x3f5   : > { %v6056_v59 = vpack.c.bf16 %v6024_v56, %v6020_v20  ;;  %v6055_v53 = vpack.c.bf16 %v6023_v58, %v6019_v55 }
 0x3f6   : > { %v6057_v0 = vpack.c.bf16 %v6025_v10, %v6021_v52 }
 0x3f7   : > { %6859 = vmatprep.mubr.bf16.mxu0 %v6055_v53 }
 0x3f8   : > { %6956 = vmatprep.mubr.bf16.mxu1 %v6057_v0  ;;  %6860 = vmatmul.mubr.bf16.gmra.mrb[188].mxu0 %v6054_v18 }
 0x3f9   : > { %6957 = vmatmul.mubr.bf16.gmra.mrb[188].mxu1 %v6056_v59 }
 0x412   : > { %v11377_v15 = vpop.f32.mrb[128].mxu0 }
 0x413   : > { %v11441_v2 = vpop.f32.mrb[128].mxu1  ;;  %v11378_v16 = vpop.f32.mrb[129].mxu0 }
 0x414   : > { %v11379_v27 = vadd.f32 %v11378_v16, %v11377_v15  ;;  %v11442_v13 = vpop.f32.mrb[129].mxu1  ;;  %v11380_v14 = vpop.f32.mrb[130].mxu0 }
 0x415   : > { %v11443_v40 = vadd.f32 %v11442_v13, %v11441_v2  ;;  %v11444_v29 = vpop.f32.mrb[130].mxu1  ;;  %v11381_v17 = vpop.f32.mrb[131].mxu0 }
 0x416   : > { %v6612_v19 = vadd.f32 %v11379_v27, %v14806_v42  ;;  %v11382_v23 = vadd.f32 %v11381_v17, %v11380_v14  ;;  %v11445_v1 = vpop.f32.mrb[131].mxu1 }
 0x417   : > { %v11446_v21 = vadd.f32 %v11445_v1, %v11444_v29 }
 0x418   : > { %v14809_v22 = vadd.f32 %v11443_v40, %v6612_v19  ;;  %v6615_v25 = vadd.f32 %v11382_v23, %v14806_v42 }
 0x41a   : > { %v14812_v4 = vadd.f32 %v11446_v21, %v6615_v25  ;;  %v11383_v26 = vpop.f32.mrb[132].mxu0 }
 0x41b   : > { %v11447_v28 = vpop.f32.mrb[132].mxu1  ;;  %v11384_v57 = vpop.f32.mrb[133].mxu0 }
 0x41c   : > { %v11385_v33 = vadd.f32 %v11384_v57, %v11383_v26  ;;  %v11448_v31 = vpop.f32.mrb[133].mxu1  ;;  %v11386_v32 = vpop.f32.mrb[134].mxu0 }
 0x41d   : > { %v11449_v63 = vadd.f32 %v11448_v31, %v11447_v28  ;;  %v11450_v34 = vpop.f32.mrb[134].mxu1  ;;  %v11387_v35 = vpop.f32.mrb[135].mxu0 }
 0x41e   : > { %v6620_v36 = vadd.f32 %v11385_v33, %v14806_v42  ;;  %v11388_v12 = vadd.f32 %v11387_v35, %v11386_v32  ;;  %v11451_v30 = vpop.f32.mrb[135].mxu1 }
 0x41f   : > { %v11452_v61 = vadd.f32 %v11451_v30, %v11450_v34 }
 0x420   : > { %v14815_v9 = vadd.f32 %v11449_v63, %v6620_v36  ;;  %v6623_v60 = vadd.f32 %v11388_v12, %v14806_v42 }
 0x422   : > { %v14818_v38 = vadd.f32 %v11452_v61, %v6623_v60  ;;  %v11389_v39 = vpop.f32.mrb[136].mxu0 }
 0x423   : > { %v11453_v47 = vpop.f32.mrb[136].mxu1  ;;  %v11390_v37 = vpop.f32.mrb[137].mxu0 }
 0x424   : > { %v11391_v48 = vadd.f32 %v11390_v37, %v11389_v39  ;;  %v11454_v41 = vpop.f32.mrb[137].mxu1  ;;  %v11392_v3 = vpop.f32.mrb[138].mxu0 }
 0x425   : > { %v11455_v43 = vadd.f32 %v11454_v41, %v11453_v47  ;;  %v11456_v44 = vpop.f32.mrb[138].mxu1  ;;  %v11393_v45 = vpop.f32.mrb[139].mxu0 }
 0x426   : > { %v6628_v24 = vadd.f32 %v11391_v48, %v14806_v42  ;;  %v11394_v62 = vadd.f32 %v11393_v45, %v11392_v3  ;;  %v11457_v11 = vpop.f32.mrb[139].mxu1 }
 0x427   : > { %v11458_v46 = vadd.f32 %v11457_v11, %v11456_v44 }
 0x428   : > { %v14821_v49 = vadd.f32 %v11455_v43, %v6628_v24  ;;  %v6631_v50 = vadd.f32 %v11394_v62, %v14806_v42 }
 0x42a   : > { %v14824_v51 = vadd.f32 %v11458_v46, %v6631_v50  ;;  %v11395_v54 = vpop.f32.mrb[140].mxu0 }
 0x42b   : > { %v11459_v20 = vpop.f32.mrb[140].mxu1  ;;  %v11396_v55 = vpop.f32.mrb[141].mxu0 }
 0x42c   : > { %v11397_v56 = vadd.f32 %v11396_v55, %v11395_v54  ;;  %v11460_v58 = vpop.f32.mrb[141].mxu1  ;;  %v11398_v52 = vpop.f32.mrb[142].mxu0 }
 0x42d   : > { %v11461_v18 = vadd.f32 %v11460_v58, %v11459_v20  ;;  %v11462_v10 = vpop.f32.mrb[142].mxu1  ;;  %v11399_v59 = vpop.f32.mrb[143].mxu0 }
 0x42e   : > { %v6636_v53 = vadd.f32 %v11397_v56, %v14806_v42  ;;  %v11400_v0 = vadd.f32 %v11399_v59, %v11398_v52  ;;  %v11463_v15 = vpop.f32.mrb[143].mxu1 }
 0x42f   : > { %v11464_v2 = vadd.f32 %v11463_v15, %v11462_v10 }
 0x430   : > { %v14827_v16 = vadd.f32 %v11461_v18, %v6636_v53  ;;  %v6639_v27 = vadd.f32 %v11400_v0, %v14806_v42 }
 0x432   : > { %v14830_v13 = vadd.f32 %v11464_v2, %v6639_v27  ;;  %v11401_v14 = vpop.f32.mrb[144].mxu0 }
 0x433   : > { %v11465_v40 = vpop.f32.mrb[144].mxu1  ;;  %v11402_v29 = vpop.f32.mrb[145].mxu0 }
 0x434   : > { %v11403_v17 = vadd.f32 %v11402_v29, %v11401_v14  ;;  %v11466_v19 = vpop.f32.mrb[145].mxu1  ;;  %v11404_v23 = vpop.f32.mrb[146].mxu0 }
 0x435   : > { %v11467_v1 = vadd.f32 %v11466_v19, %v11465_v40  ;;  %v11468_v21 = vpop.f32.mrb[146].mxu1  ;;  %v11405_v25 = vpop.f32.mrb[147].mxu0 }
 0x436   : > { %v6644_v26 = vadd.f32 %v11403_v17, %v14806_v42  ;;  %v11406_v28 = vadd.f32 %v11405_v25, %v11404_v23  ;;  %v11469_v57 = vpop.f32.mrb[147].mxu1 }
 0x437   : > { %v11470_v33 = vadd.f32 %v11469_v57, %v11468_v21 }
 0x438   : > { %v14833_v31 = vadd.f32 %v11467_v1, %v6644_v26  ;;  %v6647_v32 = vadd.f32 %v11406_v28, %v14806_v42 }
 0x43a   : > { %v14836_v63 = vadd.f32 %v11470_v33, %v6647_v32  ;;  %v11407_v34 = vpop.f32.mrb[148].mxu0  ;;  %v12993_v32 = vld [vmem:[%s15602_s6] ss:$16 sps:$4 sm:$0xff]  }
 0x43b   : > { %v11471_v35 = vpop.f32.mrb[148].mxu1  ;;  %v11408_v36 = vpop.f32.mrb[149].mxu0 }
 0x43c   : > { %v11409_v12 = vadd.f32 %v11408_v36, %v11407_v34  ;;  %v11472_v30 = vpop.f32.mrb[149].mxu1  ;;  %v11410_v61 = vpop.f32.mrb[150].mxu0  ;;  %v12995_v34 = vld [vmem:[%s15602_s6 + $0x4] ss:$16 sps:$4 sm:$0xff]  }
 0x43d   : > { %v11473_v60 = vadd.f32 %v11472_v30, %v11471_v35  ;;  %v11474_v39 = vpop.f32.mrb[150].mxu1  ;;  %v11411_v47 = vpop.f32.mrb[151].mxu0  ;;  %v12998_v35 = vld [vmem:[%s15602_s6 + $0x24] ss:$16 sps:$4 sm:$0xff]   ;;  %7244 = vmatprep.subr.bf16.mxu0 %v12995_v34  ;;  %v13002_v34 = vld [vmem:[%s15602_s6 + $0x60] ss:$16 sps:$4 sm:$0xff]  }
 0x43e   : > { %v6652_v37 = vadd.f32 %v11409_v12, %v14806_v42  ;;  %v11412_v48 = vadd.f32 %v11411_v47, %v11410_v61  ;;  %v11475_v41 = vpop.f32.mrb[151].mxu1  ;;  %7245 = vmatpush1.bf16.msra.mxu0 %v12993_v32  ;;  %v13001_v36 = vld [vmem:[%s15602_s6 + $0x44] ss:$16 sps:$4 sm:$0xff]   ;;  %v12999_v12 = vld [vmem:[%s15602_s6 + $0x40] ss:$16 sps:$4 sm:$0xff]  }
 0x43f   : > { %v11476_v3 = vadd.f32 %v11475_v41, %v11474_v39  ;;  %7246 = vmatprep.subr.bf16.mxu0 %v12998_v35  ;;  %v13014_v35 = vld [vmem:[%s15602_s6 + $0x68] ss:$16 sps:$4 sm:$0xff]  }
 0x440   : > { %v14839_v43 = vadd.f32 %v11473_v60, %v6652_v37  ;;  %v6655_v44 = vadd.f32 %v11412_v48, %v14806_v42 }
 0x442   : > { %v14842_v45 = vadd.f32 %v11476_v3, %v6655_v44  ;;  %v11413_v24 = vpop.f32.mrb[152].mxu0 }
 0x443   : > { %v11477_v62 = vpop.f32.mrb[152].mxu1  ;;  %v11414_v11 = vpop.f32.mrb[153].mxu0 }
 0x444   : > { %v11415_v46 = vadd.f32 %v11414_v11, %v11413_v24  ;;  %v11478_v50 = vpop.f32.mrb[153].mxu1  ;;  %v11416_v54 = vpop.f32.mrb[154].mxu0  ;;  %v13007_v11 = vld [vmem:[%s15602_s6 + $0xc] ss:$16 sps:$4 sm:$0xff]  }
 0x445   : > { %v11479_v20 = vadd.f32 %v11478_v50, %v11477_v62  ;;  %v11480_v55 = vpop.f32.mrb[154].mxu1  ;;  %v11417_v56 = vpop.f32.mrb[155].mxu0  ;;  %v13005_v50 = vld [vmem:[%s15602_s6 + $0x8] ss:$16 sps:$4 sm:$0xff]   ;;  %7357 = vmatprep.subr.bf16.mxu1 %v13007_v11 }
 0x446   : > { %v6660_v58 = vadd.f32 %v11415_v46, %v14806_v42  ;;  %v11418_v52 = vadd.f32 %v11417_v56, %v11416_v54  ;;  %v11481_v18 = vpop.f32.mrb[155].mxu1  ;;  %7358 = vmatpush1.bf16.msra.mxu1 %v13005_v50  ;;  %v13010_v56 = vld [vmem:[%s15602_s6 + $0x2c] ss:$16 sps:$4 sm:$0xff]  }
 0x447   : > { %v11482_v10 = vadd.f32 %v11481_v18, %v11480_v55  ;;  %7359 = vmatprep.subr.bf16.mxu1 %v13010_v56 }
 0x448   : > { %v14845_v59 = vadd.f32 %v11479_v20, %v6660_v58  ;;  %v6663_v53 = vadd.f32 %v11418_v52, %v14806_v42  ;;  %v13008_v52 = vld [vmem:[%s15602_s6 + $0x28] ss:$16 sps:$4 sm:$0xff]  }
 0x44a   : > { %v14848_v0 = vadd.f32 %v11482_v10, %v6663_v53  ;;  %v11419_v15 = vpop.f32.mrb[156].mxu0  ;;  %7360 = vmatpush1.bf16.msra.mxu1 %v13008_v52 }
 0x44b   : > { %v11483_v2 = vpop.f32.mrb[156].mxu1  ;;  %v11420_v27 = vpop.f32.mrb[157].mxu0 }
 0x44c   : > { %v11421_v14 = vadd.f32 %v11420_v27, %v11419_v15  ;;  %v11484_v40 = vpop.f32.mrb[157].mxu1  ;;  %v11422_v29 = vpop.f32.mrb[158].mxu0 }
 0x44d   : > { %v11485_v17 = vadd.f32 %v11484_v40, %v11483_v2  ;;  %v11486_v19 = vpop.f32.mrb[158].mxu1  ;;  %v11423_v23 = vpop.f32.mrb[159].mxu0 }
 0x44e   : > { %v6668_v1 = vadd.f32 %v11421_v14, %v14806_v42  ;;  %v11424_v21 = vadd.f32 %v11423_v23, %v11422_v29  ;;  %v11487_v25 = vpop.f32.mrb[159].mxu1  ;;  %v13011_v23 = vld [vmem:[%s15602_s6 + $0x48] ss:$16 sps:$4 sm:$0xff]  }
 0x44f   : > { %v11488_v26 = vadd.f32 %v11487_v25, %v11486_v19 }
 0x450   : > { %v14851_v28 = vadd.f32 %v11485_v17, %v6668_v1  ;;  %v6671_v57 = vadd.f32 %v11424_v21, %v14806_v42  ;;  %v12996_v42 = vld [vmem:[%s15602_s6 + $0x20] ss:$16 sps:$4 sm:$0xff]   ;;  %v13013_v17 = vld [vmem:[%s15602_s6 + $0x4c] ss:$16 sps:$4 sm:$0xff]  }
 0x451   : > { %7247 = vmatpush1.bf16.msra.mxu0 %v12996_v42  ;;  %7361 = vmatprep.subr.bf16.mxu1 %v13013_v17 }
 0x452   : > { %v14854_v33 = vadd.f32 %v11488_v26, %v6671_v57  ;;  %7248 = vmatprep.subr.bf16.mxu0 %v13001_v36  ;;  %7362 = vmatpush1.bf16.msra.mxu1 %v13011_v23  ;;  %v13004_v26 = vld [vmem:[%s15602_s6 + $0x64] ss:$16 sps:$4 sm:$0xff]   ;;  %v13016_v57 = vld [vmem:[%s15602_s6 + $0x6c] ss:$16 sps:$4 sm:$0xff]  }
 0x453   : > { %7363 = vmatprep.subr.bf16.mxu1 %v13016_v57 }
 0x455   : > { %7249 = vmatpush1.bf16.msra.mxu0 %v12999_v12 }
 0x456   : > { %7250 = vmatprep.subr.bf16.mxu0 %v13004_v26  ;;  %7364 = vmatpush1.bf16.msra.mxu1 %v13014_v35 }
 0x459   : > { %7251 = vmatpush1.bf16.msra.mxu0 %v13002_v34 }
 0x493   : > { %v11505_v30 = vpop.f32.mrb[160].mxu0 }
 0x494   : > { %v11569_v61 = vpop.f32.mrb[160].mxu1  ;;  %v11506_v60 = vpop.f32.mrb[161].mxu0 }
 0x495   : > { %v11507_v39 = vadd.f32 %v11506_v60, %v11505_v30  ;;  %v11570_v47 = vpop.f32.mrb[161].mxu1  ;;  %v11508_v37 = vpop.f32.mrb[162].mxu0 }
 0x496   : > { %v11571_v48 = vadd.f32 %v11570_v47, %v11569_v61  ;;  %v11572_v41 = vpop.f32.mrb[162].mxu1  ;;  %v11509_v3 = vpop.f32.mrb[163].mxu0 }
 0x497   : > { %v6806_v44 = vadd.f32 %v11507_v39, %v14809_v22  ;;  %v11510_v24 = vadd.f32 %v11509_v3, %v11508_v37  ;;  %v11573_v62 = vpop.f32.mrb[163].mxu1 }
 0x498   : > { %v11574_v46 = vadd.f32 %v11573_v62, %v11572_v41  ;;  %v13759_v41 = vmov 0  }
 0x499   : > { %v14882_v54 = vadd.f32 %v11571_v48, %v6806_v44  ;;  %v6809_v20 = vadd.f32 %v11510_v24, %v14812_v4  ;;  %7276 = vmatprep.mubr.bf16.mxu0 %v13759_v41  ;;  %7389 = vmatprep.mubr.bf16.mxu1 %v13759_v41 }
 0x49b   : > { %10210 = vst [vmem:[%s14885_s26] sm:$0xff] %v14882_v54  ;;  %v14889_v22 = vadd.f32 %v11574_v46, %v6809_v20  ;;  %v11511_v55 = vpop.f32.mrb[164].mxu0  ;;  %6965 = vrot.lane.b32.xlu0 %v14882_v54, %s13758_s24 }
 0x49c   : > { %v11575_v4 = vpop.f32.mrb[164].mxu1  ;;  %v11512_v58 = vpop.f32.mrb[165].mxu0 }
 0x49d   : > { %10211 = vst [vmem:[%s14885_s26 + $0x8] sm:$0xff] %v14889_v22  ;;  %v11513_v18 = vadd.f32 %v11512_v58, %v11511_v55  ;;  %v11576_v10 = vpop.f32.mrb[165].mxu1  ;;  %v11514_v53 = vpop.f32.mrb[166].mxu0 }
 0x49e   : > { %v11577_v15 = vadd.f32 %v11576_v10, %v11575_v4  ;;  %v11578_v2 = vpop.f32.mrb[166].mxu1  ;;  %v11515_v27 = vpop.f32.mrb[167].mxu0 }
 0x49f   : > { %v6814_v14 = vadd.f32 %v11513_v18, %v14815_v9  ;;  %v11516_v40 = vadd.f32 %v11515_v27, %v11514_v53  ;;  %v11579_v29 = vpop.f32.mrb[167].mxu1  ;;  %6967 = vrot.lane.b32.xlu0 %v14889_v22, %s13758_s24 }
 0x4a0   : > { %v11580_v19 = vadd.f32 %v11579_v29, %v11578_v2 }
 0x4a1   : > { %v14910_v1 = vadd.f32 %v11577_v15, %v6814_v14  ;;  %v6817_v21 = vadd.f32 %v11516_v40, %v14818_v38 }
 0x4a3   : > { %10212 = vst [vmem:[%s14885_s26 + $0x10] sm:$0xff] %v14910_v1  ;;  %v14915_v9 = vadd.f32 %v11580_v19, %v6817_v21  ;;  %v11517_v25 = vpop.f32.mrb[168].mxu0  ;;  %6969 = vrot.lane.b32.xlu1 %v14910_v1, %s13758_s24 }
 0x4a4   : > { %v11581_v32 = vpop.f32.mrb[168].mxu1  ;;  %v11518_v38 = vpop.f32.mrb[169].mxu0 }
 0x4a5   : > { %10213 = vst [vmem:[%s14885_s26 + $0x18] sm:$0xff] %v14915_v9  ;;  %v11519_v42 = vadd.f32 %v11518_v38, %v11517_v25  ;;  %v11582_v36 = vpop.f32.mrb[169].mxu1  ;;  %v11520_v12 = vpop.f32.mrb[170].mxu0 }
 0x4a6   : > { %v11583_v30 = vadd.f32 %v11582_v36, %v11581_v32  ;;  %v11584_v61 = vpop.f32.mrb[170].mxu1  ;;  %v11521_v60 = vpop.f32.mrb[171].mxu0 }
 0x4a7   : > { %v6822_v39 = vadd.f32 %v11519_v42, %v14821_v49  ;;  %v11522_v47 = vadd.f32 %v11521_v60, %v11520_v12  ;;  %v11585_v37 = vpop.f32.mrb[171].mxu1  ;;  %6971 = vrot.lane.b32.xlu1 %v14915_v9, %s13758_s24 }
 0x4a8   : > { %v11586_v48 = vadd.f32 %v11585_v37, %v11584_v61 }
 0x4a9   : > { %v14938_v3 = vadd.f32 %v11583_v30, %v6822_v39  ;;  %v6825_v44 = vadd.f32 %v11522_v47, %v14824_v51 }
 0x4ab   : > { %10214 = vst [vmem:[%s14885_s26 + $0x20] sm:$0xff] %v14938_v3  ;;  %v14943_v24 = vadd.f32 %v11586_v48, %v6825_v44  ;;  %v11523_v49 = vpop.f32.mrb[172].mxu0  ;;  %6973 = vrot.lane.b32.xlu0 %v14938_v3, %s13758_s24 }
 0x4ac   : > { %v11587_v62 = vpop.f32.mrb[172].mxu1  ;;  %v11524_v11 = vpop.f32.mrb[173].mxu0 }
 0x4ad   : > { %10215 = vst [vmem:[%s14885_s26 + $0x28] sm:$0xff] %v14943_v24  ;;  %v11525_v46 = vadd.f32 %v11524_v11, %v11523_v49  ;;  %v11588_v50 = vpop.f32.mrb[173].mxu1  ;;  %v11526_v20 = vpop.f32.mrb[174].mxu0  ;;  %6975 = vrot.lane.b32.xlu1 %v14943_v24, %s13758_s24 }
 0x4ae   : > { %v11589_v51 = vadd.f32 %v11588_v50, %v11587_v62  ;;  %v11590_v55 = vpop.f32.mrb[174].mxu1  ;;  %v11527_v56 = vpop.f32.mrb[175].mxu0 }
 0x4af   : > { %v6830_v4 = vadd.f32 %v11525_v46, %v14827_v16  ;;  %v11528_v58 = vadd.f32 %v11527_v56, %v11526_v20  ;;  %v11591_v52 = vpop.f32.mrb[175].mxu1 }
 0x4b0   : > { %v11592_v18 = vadd.f32 %v11591_v52, %v11590_v55 }
 0x4b1   : > { %v14952_v10 = vadd.f32 %v11589_v51, %v6830_v4  ;;  %v6833_v53 = vadd.f32 %v11528_v58, %v14830_v13 }
 0x4b3   : > { %10216 = vst [vmem:[%s14885_s26 + $0x30] sm:$0xff] %v14952_v10  ;;  %v14957_v15 = vadd.f32 %v11592_v18, %v6833_v53  ;;  %v11529_v2 = vpop.f32.mrb[176].mxu0  ;;  %6977 = vrot.lane.b32.xlu0 %v14952_v10, %s13758_s24 }
 0x4b4   : > { %v11593_v27 = vpop.f32.mrb[176].mxu1  ;;  %v11530_v14 = vpop.f32.mrb[177].mxu0 }
 0x4b5   : > { %10217 = vst [vmem:[%s14885_s26 + $0x38] sm:$0xff] %v14957_v15  ;;  %v11531_v16 = vadd.f32 %v11530_v14, %v11529_v2  ;;  %v11594_v40 = vpop.f32.mrb[177].mxu1  ;;  %v11532_v29 = vpop.f32.mrb[178].mxu0  ;;  %6979 = vrot.lane.b32.xlu1 %v14957_v15, %s13758_s24 }
 0x4b6   : > { %v11595_v13 = vadd.f32 %v11594_v40, %v11593_v27  ;;  %v11596_v17 = vpop.f32.mrb[178].mxu1  ;;  %v11533_v19 = vpop.f32.mrb[179].mxu0 }
 0x4b7   : > { %v6838_v23 = vadd.f32 %v11531_v16, %v14833_v31  ;;  %v11534_v21 = vadd.f32 %v11533_v19, %v11532_v29  ;;  %v11597_v25 = vpop.f32.mrb[179].mxu1 }
 0x4b8   : > { %v11598_v26 = vadd.f32 %v11597_v25, %v11596_v17 }
 0x4b9   : > { %v14966_v57 = vadd.f32 %v11595_v13, %v6838_v23  ;;  %v6841_v32 = vadd.f32 %v11534_v21, %v14836_v63 }
 0x4bb   : > { %10218 = vst [vmem:[%s14885_s26 + $0x40] sm:$0xff] %v14966_v57  ;;  %v14971_v38 = vadd.f32 %v11598_v26, %v6841_v32  ;;  %v11535_v34 = vpop.f32.mrb[180].mxu0  ;;  %6981 = vrot.lane.b32.xlu0 %v14966_v57, %s13758_s24 }
 0x4bc   : > { %v11599_v35 = vpop.f32.mrb[180].mxu1  ;;  %v11536_v42 = vpop.f32.mrb[181].mxu0 }
 0x4bd   : > { %10219 = vst [vmem:[%s14885_s26 + $0x48] sm:$0xff] %v14971_v38  ;;  %v11537_v31 = vadd.f32 %v11536_v42, %v11535_v34  ;;  %v11600_v36 = vpop.f32.mrb[181].mxu1  ;;  %v11538_v12 = vpop.f32.mrb[182].mxu0  ;;  %6983 = vrot.lane.b32.xlu1 %v14971_v38, %s13758_s24 }
 0x4be   : > { %v11601_v63 = vadd.f32 %v11600_v36, %v11599_v35  ;;  %v11602_v30 = vpop.f32.mrb[182].mxu1  ;;  %v11539_v61 = vpop.f32.mrb[183].mxu0  ;;  %v13022_v35 = vld [vmem:[#allocation10 + $0xc] ss:$16 sps:$4 sm:$0xff]  }
 0x4bf   : > { %v6846_v60 = vadd.f32 %v11537_v31, %v14839_v43  ;;  %v11540_v39 = vadd.f32 %v11539_v61, %v11538_v12  ;;  %v11603_v47 = vpop.f32.mrb[183].mxu1  ;;  %8582 = vmatprep.subr.bf16.mxu1 %v13022_v35 }
 0x4c0   : > { %v11604_v37 = vadd.f32 %v11603_v47, %v11602_v30 }
 0x4c1   : > { %v14980_v48 = vadd.f32 %v11601_v63, %v6846_v60  ;;  %v6849_v44 = vadd.f32 %v11540_v39, %v14842_v45 }
 0x4c3   : > { %10220 = vst [vmem:[%s14885_s26 + $0x50] sm:$0xff] %v14980_v48  ;;  %v14985_v49 = vadd.f32 %v11604_v37, %v6849_v44  ;;  %v11541_v62 = vpop.f32.mrb[184].mxu0  ;;  %6985 = vrot.lane.b32.xlu0 %v14980_v48, %s13758_s24  ;;  %v7045_v44 = vld [vmem:[%s15025_s29] sm:$0xff] }
 0x4c4   : > { %v11605_v11 = vpop.f32.mrb[184].mxu1  ;;  %v11542_v46 = vpop.f32.mrb[185].mxu0 }
 0x4c5   : > { %10221 = vst [vmem:[%s14885_s26 + $0x58] sm:$0xff] %v14985_v49  ;;  %v11543_v43 = vadd.f32 %v11542_v46, %v11541_v62  ;;  %v11606_v50 = vpop.f32.mrb[185].mxu1  ;;  %v11544_v20 = vpop.f32.mrb[186].mxu0  ;;  %6987 = vrot.lane.b32.xlu1 %v14985_v49, %s13758_s24  ;;  %v7046_v46 = vld [vmem:[%s15025_s29 + $0x8] sm:$0xff] }
 0x4c6   : > { %v11607_v45 = vadd.f32 %v11606_v50, %v11605_v11  ;;  %v11608_v51 = vpop.f32.mrb[186].mxu1  ;;  %v11545_v55 = vpop.f32.mrb[187].mxu0 }
 0x4c7   : > { %v6854_v56 = vadd.f32 %v11543_v43, %v14845_v59  ;;  %v11546_v4 = vadd.f32 %v11545_v55, %v11544_v20  ;;  %v11609_v58 = vpop.f32.mrb[187].mxu1 }
 0x4c8   : > { %v11610_v52 = vadd.f32 %v11609_v58, %v11608_v51 }
 0x4c9   : > { %v14994_v18 = vadd.f32 %v11607_v45, %v6854_v56  ;;  %v6857_v53 = vadd.f32 %v11546_v4, %v14848_v0 }
 0x4cb   : > { %10222 = vst [vmem:[%s14885_s26 + $0x60] sm:$0xff] %v14994_v18  ;;  %v14999_v2 = vadd.f32 %v11610_v52, %v6857_v53  ;;  %v11547_v27 = vpop.f32.mrb[188].mxu0  ;;  %6989 = vrot.lane.b32.xlu0 %v14994_v18, %s13758_s24 }
 0x4cc   : > { %v11611_v14 = vpop.f32.mrb[188].mxu1  ;;  %v11548_v16 = vpop.f32.mrb[189].mxu0 }
 0x4cd   : > { %10223 = vst [vmem:[%s14885_s26 + $0x68] sm:$0xff] %v14999_v2  ;;  %v11549_v59 = vadd.f32 %v11548_v16, %v11547_v27  ;;  %v11612_v40 = vpop.f32.mrb[189].mxu1  ;;  %v11550_v29 = vpop.f32.mrb[190].mxu0  ;;  %6991 = vrot.lane.b32.xlu1 %v14999_v2, %s13758_s24  ;;  %v7047_v27 = vld [vmem:[%s15025_s29 + $0x10] sm:$0xff] }
 0x4ce   : > { %v11613_v0 = vadd.f32 %v11612_v40, %v11611_v14  ;;  %v11614_v13 = vpop.f32.mrb[190].mxu1  ;;  %v11551_v17 = vpop.f32.mrb[191].mxu0  ;;  %v13020_v40 = vld [vmem:[#allocation10 + $0x8] ss:$16 sps:$4 sm:$0xff]  }
 0x4cf   : > { %v6862_v19 = vadd.f32 %v11549_v59, %v14851_v28  ;;  %v11552_v23 = vadd.f32 %v11551_v17, %v11550_v29  ;;  %v11615_v21 = vpop.f32.mrb[191].mxu1  ;;  %v13019_v28 = vld [vmem:[#allocation10 + $0x4] ss:$16 sps:$4 sm:$0xff]   ;;  %v13017_v59 = vld [vmem:[#allocation10] ss:$16 sps:$4 sm:$0xff]  }
 0x4d0   : > { %v11616_v25 = vadd.f32 %v11615_v21, %v11614_v13  ;;  %8356 = vmatprep.subr.bf16.mxu0 %v13019_v28  ;;  %v13025_v13 = vld [vmem:[#allocation10 + $0x24] ss:$16 sps:$4 sm:$0xff]   ;;  %v13028_v17 = vld [vmem:[#allocation10 + $0x2c] ss:$16 sps:$4 sm:$0xff]   ;;  %v13026_v28 = vld [vmem:[#allocation10 + $0x28] ss:$16 sps:$4 sm:$0xff]  }
 0x4d1   : > { %v15008_v26 = vadd.f32 %v11613_v0, %v6862_v19  ;;  %v6865_v32 = vadd.f32 %v11552_v23, %v14854_v33  ;;  %v7048_v0 = vld [vmem:[%s15025_s29 + $0x18] sm:$0xff] }
 0x4d3   : > { %10224 = vst [vmem:[%s14885_s26 + $0x70] sm:$0xff] %v15008_v26  ;;  %v15013_v34 = vadd.f32 %v11616_v25, %v6865_v32  ;;  %6993 = vrot.lane.b32.xlu0 %v15008_v26, %s13758_s24  ;;  %v13023_v32 = vld [vmem:[#allocation10 + $0x20] ss:$16 sps:$4 sm:$0xff]  }
 0x4d5   : > { %10225 = vst [vmem:[%s14885_s26 + $0x78] sm:$0xff] %v15013_v34  ;;  %6995 = vrot.lane.b32.xlu1 %v15013_v34, %s13758_s24  ;;  %s15636_s24 = sld [smem:[#allocation25_spill]]  ;;  %s13642_s26 = scalar_lea.vmem %s13641_s1, 4096 }
 0x4db   : > { %s15372_s27 = scalar_lea.hbm %s15636_s24, %s11360_s2 }
 0x50d   : > { %v6966_v42 = vpop.permute.xlu0 %6965 }
 0x50e   : > { %v6997_v33 = vmul.f32 0.5, %v6966_v42  ;;  %v13031_v42 = vld [vmem:[#allocation10 + $0x44] ss:$16 sps:$4 sm:$0xff]  }
 0x510   : > { %v7013_v31 = vmul.f32 1.442695, %v6997_v33  ;;  %v13034_v33 = vld [vmem:[#allocation10 + $0x4c] ss:$16 sps:$4 sm:$0xff]  }
 0x511   : > { %v6968_v36 = vpop.permute.xlu0 %6967 }
 0x512   : > { %13401 = vpow2.f32 %v7013_v31  ;;  %v6998_v12 = vmul.f32 0.5, %v6968_v36 }
 0x514   : > { %v7015_v63 = vmul.f32 1.442695, %v6998_v12 }
 0x515   : > { %v6970_v30 = vpop.permute.xlu1 %6969 }
 0x516   : > { %13403 = vpow2.f32 %v7015_v63  ;;  %v6999_v61 = vmul.f32 0.5, %v6970_v30  ;;  %v7049_v63 = vld [vmem:[%s15025_s29 + $0x20] sm:$0xff]  ;;  %v7050_v30 = vld [vmem:[%s15025_s29 + $0x28] sm:$0xff] }
 0x518   : > { %v7017_v60 = vmul.f32 1.442695, %v6999_v61 }
 0x519   : > { %v6972_v39 = vpop.permute.xlu1 %6971 }
 0x51a   : > { %13405 = vpow2.f32 %v7017_v60  ;;  %v7000_v47 = vmul.f32 0.5, %v6972_v39  ;;  %v13029_v39 = vld [vmem:[#allocation10 + $0x40] ss:$16 sps:$4 sm:$0xff]  }
 0x51c   : > { %v13402_v37 = vpop.eup %13401  ;;  %v7019_v62 = vmul.f32 1.442695, %v7000_v47  ;;  %v13032_v47 = vld [vmem:[#allocation10 + $0x48] ss:$16 sps:$4 sm:$0xff]  }
 0x51d   : > { %v6974_v11 = vpop.permute.xlu0 %6973  ;;  %v7061_v50 = vmul.f32 %v13402_v37, %v7045_v44 }
 0x51e   : > { %13407 = vpow2.f32 %v7019_v62  ;;  %v7001_v43 = vmul.f32 0.5, %v6974_v11  ;;  %v13037_v62 = vld [vmem:[#allocation10 + $0x64] ss:$16 sps:$4 sm:$0xff]   ;;  %v13040_v11 = vld [vmem:[#allocation10 + $0x6c] ss:$16 sps:$4 sm:$0xff]  }
 0x51f   : > { %v6976_v20 = vpop.permute.xlu1 %6975  ;;  %v7077_v58 = vadd.f32 %v7061_v50, %v14882_v54 }
 0x520   : > { %v13404_v45 = vpop.eup %13403  ;;  %v7021_v51 = vmul.f32 1.442695, %v7001_v43  ;;  %v7002_v55 = vmul.f32 0.5, %v6976_v20 }
 0x521   : > { %v7062_v56 = vmul.f32 %v13404_v45, %v7046_v46  ;;  %v13035_v45 = vld [vmem:[#allocation10 + $0x60] ss:$16 sps:$4 sm:$0xff]  }
 0x522   : > { %13409 = vpow2.f32 %v7021_v51  ;;  %v7023_v4 = vmul.f32 1.442695, %v7002_v55  ;;  %v13038_v51 = vld [vmem:[#allocation10 + $0x68] ss:$16 sps:$4 sm:$0xff]  }
 0x523   : > { %v7078_v52 = vadd.f32 %v7062_v56, %v14889_v22  ;;  %v13043_v56 = vld [vmem:[#allocation10 + $0x84] ss:$16 sps:$4 sm:$0xff]  }
 0x524   : > { %v13406_v53 = vpop.eup %13405  ;;  %13411 = vpow2.f32 %v7023_v4  ;;  %v13046_v4 = vld [vmem:[#allocation10 + $0x8c] ss:$16 sps:$4 sm:$0xff]  }
 0x525   : > { %v7093_v14 = vpack.c.bf16 %v7078_v52, %v7077_v58  ;;  %v6978_v16 = vpop.permute.xlu0 %6977  ;;  %v7063_v54 = vmul.f32 %v13406_v53, %v7047_v27  ;;  %v7051_v53 = vld [vmem:[%s15025_s29 + $0x30] sm:$0xff]  ;;  %v7052_v27 = vld [vmem:[%s15025_s29 + $0x38] sm:$0xff] }
 0x526   : > { %v7003_v29 = vmul.f32 0.5, %v6978_v16 }
 0x527   : > { %v6980_v19 = vpop.permute.xlu1 %6979  ;;  %11075 = vmatmul.mubr.msk.bf16.vlgmr.msra.gmra.mrb[192].mxu0 %vm7219_vm0, %v7093_v14  ;;  %11083 = vmatmul.mubr.msk.bf16.vlgmr.msra.gmra.mrb[192].mxu1 %vm7219_vm0, %v7093_v14  ;;  %v7079_v31 = vadd.f32 %v7063_v54, %v14910_v1 }
 0x528   : > { %v13408_v23 = vpop.eup %13407  ;;  %v7025_v22 = vmul.f32 1.442695, %v7003_v29  ;;  %v7004_v21 = vmul.f32 0.5, %v6980_v19  ;;  %7286 = vmatprep.mubr.bf16.mxu0 %v13759_v41  ;;  %7399 = vmatprep.mubr.bf16.mxu1 %v13759_v41 }
 0x529   : > { %v7064_v25 = vmul.f32 %v13408_v23, %v7048_v0  ;;  %8357 = vmatpush1.bf16.msra.mxu0 %v13017_v59  ;;  %8583 = vmatpush1.bf16.msra.mxu1 %v13020_v40  ;;  %v13044_v59 = vld [vmem:[#allocation10 + $0x88] ss:$16 sps:$4 sm:$0xff]   ;;  %v13049_v0 = vld [vmem:[#allocation10 + $0xa4] ss:$16 sps:$4 sm:$0xff]  }
 0x52a   : > { %13413 = vpow2.f32 %v7025_v22  ;;  %v7027_v35 = vmul.f32 1.442695, %v7004_v21  ;;  %8358 = vmatprep.subr.bf16.mxu0 %v13025_v13  ;;  %8584 = vmatprep.subr.bf16.mxu1 %v13028_v17  ;;  %v13052_v13 = vld [vmem:[#allocation10 + $0xac] ss:$16 sps:$4 sm:$0xff]   ;;  %v13047_v21 = vld [vmem:[#allocation10 + $0xa0] ss:$16 sps:$4 sm:$0xff]  }
 0x52b   : > { %v7080_v36 = vadd.f32 %v7064_v25, %v14915_v9  ;;  %v13050_v25 = vld [vmem:[#allocation10 + $0xa8] ss:$16 sps:$4 sm:$0xff]  }
 0x52c   : > { %v13410_v12 = vpop.eup %13409  ;;  %13415 = vpow2.f32 %v7027_v35  ;;  %v13058_v35 = vld [vmem:[#allocation10 + $0xcc] ss:$16 sps:$4 sm:$0xff]  }
 0x52d   : > { %v6982_v61 = vpop.permute.xlu0 %6981  ;;  %v7094_v60 = vpack.c.bf16 %v7080_v36, %v7079_v31  ;;  %8359 = vmatpush1.bf16.msra.mxu0 %v13023_v32  ;;  %8585 = vmatpush1.bf16.msra.mxu1 %v13026_v28  ;;  %v7065_v1 = vmul.f32 %v13410_v12, %v7049_v63  ;;  %v13055_v28 = vld [vmem:[#allocation10 + $0xc4] ss:$16 sps:$4 sm:$0xff]   ;;  %v7054_v36 = vld [vmem:[%s15025_s29 + $0x48] sm:$0xff] }
 0x52e   : > { %v13412_v37 = vpop.eup %13411  ;;  %v7005_v44 = vmul.f32 0.5, %v6982_v61  ;;  %8360 = vmatprep.subr.bf16.mxu0 %v13031_v42  ;;  %8586 = vmatprep.subr.bf16.mxu1 %v13034_v33  ;;  %v7053_v31 = vld [vmem:[%s15025_s29 + $0x40] sm:$0xff] }
 0x52f   : > { %v6984_v46 = vpop.permute.xlu1 %6983  ;;  %11076 = vmatmul.mubr.msk.bf16.gmra.mrb[196].mxu0 %vm7219_vm0, %v7094_v60  ;;  %11084 = vmatmul.mubr.msk.bf16.gmra.mrb[196].mxu1 %vm7219_vm0, %v7094_v60  ;;  %v7066_v9 = vmul.f32 %v13412_v37, %v7050_v30  ;;  %v7081_v58 = vadd.f32 %v7065_v1, %v14938_v3  ;;  %v13056_v30 = vld [vmem:[#allocation10 + $0xc8] ss:$16 sps:$4 sm:$0xff]   ;;  %v13059_v1 = vld [vmem:[#allocation10 + $0xe0] ss:$16 sps:$4 sm:$0xff]  }
 0x530   : > { %v7029_v43 = vmul.f32 1.442695, %v7005_v44  ;;  %v7006_v50 = vmul.f32 0.5, %v6984_v46  ;;  %7296 = vmatprep.mubr.bf16.mxu0 %v13759_v41  ;;  %7409 = vmatprep.mubr.bf16.mxu1 %v13759_v41 }
 0x531   : > { %v7082_v20 = vadd.f32 %v7066_v9, %v14943_v24  ;;  %8361 = vmatpush1.bf16.msra.mxu0 %v13029_v39  ;;  %8587 = vmatpush1.bf16.msra.mxu1 %v13032_v47  ;;  %v13041_v24 = vld [vmem:[#allocation10 + $0x80] ss:$16 sps:$4 sm:$0xff]   ;;  %v13061_v39 = vld [vmem:[#allocation10 + $0xe4] ss:$16 sps:$4 sm:$0xff]   ;;  %v13064_v47 = vld [vmem:[#allocation10 + $0xec] ss:$16 sps:$4 sm:$0xff]  }
 0x532   : > { %13417 = vpow2.f32 %v7029_v43  ;;  %v7031_v55 = vmul.f32 1.442695, %v7006_v50  ;;  %8362 = vmatprep.subr.bf16.mxu0 %v13037_v62  ;;  %8588 = vmatprep.subr.bf16.mxu1 %v13040_v11  ;;  %v13062_v9 = vld [vmem:[#allocation10 + $0xe8] ss:$16 sps:$4 sm:$0xff]   ;;  %v13067_v50 = vld [vmem:[#allocation10 + $0x104] ss:$16 sps:$4 sm:$0xff]  }
 0x533   : > { %v7095_v16 = vpack.c.bf16 %v7082_v20, %v7081_v58  ;;  %v13070_v20 = vld [vmem:[#allocation10 + $0x10c] ss:$16 sps:$4 sm:$0xff]  }
 0x534   : > { %v13414_v52 = vpop.eup %13413  ;;  %13419 = vpow2.f32 %v7031_v55  ;;  %v7055_v55 = vld [vmem:[%s15025_s29 + $0x50] sm:$0xff] }
 0x535   : > { %v6986_v14 = vpop.permute.xlu0 %6985  ;;  %8363 = vmatpush1.bf16.msra.mxu0 %v13035_v45  ;;  %8589 = vmatpush1.bf16.msra.mxu1 %v13038_v51  ;;  %v7067_v3 = vmul.f32 %v13414_v52, %v7051_v53  ;;  %v13068_v52 = vld [vmem:[#allocation10 + $0x108] ss:$16 sps:$4 sm:$0xff]  }
 0x536   : > { %v13416_v40 = vpop.eup %13415  ;;  %v7007_v29 = vmul.f32 0.5, %v6986_v14  ;;  %8364 = vmatprep.subr.bf16.mxu0 %v13043_v56  ;;  %8590 = vmatprep.subr.bf16.mxu1 %v13046_v4  ;;  %v7056_v56 = vld [vmem:[%s15025_s29 + $0x58] sm:$0xff]  ;;  %v13073_v14 = vld [vmem:[#allocation10 + $0x124] ss:$16 sps:$4 sm:$0xff]  }
 0x537   : > { %v6988_v17 = vpop.permute.xlu1 %6987  ;;  %11077 = vmatmul.mubr.msk.bf16.gmra.mrb[200].mxu0 %vm7219_vm0, %v7095_v16  ;;  %11085 = vmatmul.mubr.msk.bf16.gmra.mrb[200].mxu1 %vm7219_vm0, %v7095_v16  ;;  %v7068_v19 = vmul.f32 %v13416_v40, %v7052_v27  ;;  %v7083_v42 = vadd.f32 %v7067_v3, %v14952_v10  ;;  %v13076_v16 = vld [vmem:[#allocation10 + $0x12c] ss:$16 sps:$4 sm:$0xff]  }
 0x538   : > { %v7033_v54 = vmul.f32 1.442695, %v7007_v29  ;;  %v7008_v23 = vmul.f32 0.5, %v6988_v17  ;;  %7306 = vmatprep.mubr.bf16.mxu0 %v13759_v41  ;;  %7419 = vmatprep.mubr.bf16.mxu1 %v13759_v41  ;;  %v13074_v17 = vld [vmem:[#allocation10 + $0x128] ss:$16 sps:$4 sm:$0xff]  }
 0x539   : > { %v7084_v22 = vadd.f32 %v7068_v19, %v14957_v15  ;;  %8365 = vmatpush1.bf16.msra.mxu0 %v13041_v24  ;;  %8591 = vmatpush1.bf16.msra.mxu1 %v13044_v59  ;;  %v13053_v15 = vld [vmem:[#allocation10 + $0xc0] ss:$16 sps:$4 sm:$0xff]   ;;  %v13079_v19 = vld [vmem:[#allocation10 + $0x144] ss:$16 sps:$4 sm:$0xff]  }
 0x53a   : > { %13421 = vpow2.f32 %v7033_v54  ;;  %v7035_v32 = vmul.f32 1.442695, %v7008_v23  ;;  %8366 = vmatprep.subr.bf16.mxu0 %v13049_v0  ;;  %8592 = vmatprep.subr.bf16.mxu1 %v13052_v13  ;;  %v13071_v13 = vld [vmem:[#allocation10 + $0x120] ss:$16 sps:$4 sm:$0xff]   ;;  %v13082_v54 = vld [vmem:[#allocation10 + $0x14c] ss:$16 sps:$4 sm:$0xff]  }
 0x53b   : > { %v7096_v63 = vpack.c.bf16 %v7084_v22, %v7083_v42  ;;  %v13085_v42 = vld [vmem:[#allocation10 + $0x164] ss:$16 sps:$4 sm:$0xff]  }
 0x53c   : > { %v13418_v33 = vpop.eup %13417  ;;  %13423 = vpow2.f32 %v7035_v32 }
 0x53d   : > { %v6990_v12 = vpop.permute.xlu0 %6989  ;;  %8367 = vmatpush1.bf16.msra.mxu0 %v13047_v21  ;;  %8593 = vmatpush1.bf16.msra.mxu1 %v13050_v25  ;;  %v7069_v10 = vmul.f32 %v13418_v33, %v7053_v31  ;;  %v7057_v21 = vld [vmem:[%s15025_s29 + $0x60] sm:$0xff]  ;;  %v7058_v25 = vld [vmem:[%s15025_s29 + $0x68] sm:$0xff] }
 0x53e   : > { %v13420_v61 = vpop.eup %13419  ;;  %v7009_v60 = vmul.f32 0.5, %v6990_v12  ;;  %8368 = vmatprep.subr.bf16.mxu0 %v13055_v28  ;;  %8594 = vmatprep.subr.bf16.mxu1 %v13058_v35  ;;  %v13080_v28 = vld [vmem:[#allocation10 + $0x148] ss:$16 sps:$4 sm:$0xff]   ;;  %v13088_v33 = vld [vmem:[#allocation10 + $0x16c] ss:$16 sps:$4 sm:$0xff]  }
 0x53f   : > { %v6992_v37 = vpop.permute.xlu1 %6991  ;;  %11078 = vmatmul.mubr.msk.bf16.gmra.mrb[204].mxu0 %vm7219_vm0, %v7096_v63  ;;  %11086 = vmatmul.mubr.msk.bf16.gmra.mrb[204].mxu1 %vm7219_vm0, %v7096_v63  ;;  %v7070_v44 = vmul.f32 %v13420_v61, %v7054_v36  ;;  %v7085_v45 = vadd.f32 %v7069_v10, %v14966_v57  ;;  %v13083_v12 = vld [vmem:[#allocation10 + $0x160] ss:$16 sps:$4 sm:$0xff]   ;;  %v13086_v63 = vld [vmem:[#allocation10 + $0x168] ss:$16 sps:$4 sm:$0xff]  }
 0x540   : > { %v7037_v62 = vmul.f32 1.442695, %v7009_v60  ;;  %v7010_v11 = vmul.f32 0.5, %v6992_v37  ;;  %7316 = vmatprep.mubr.bf16.mxu0 %v13759_v41  ;;  %7429 = vmatprep.mubr.bf16.mxu1 %v13759_v41  ;;  %v13089_v10 = vld [vmem:[#allocation10 + $0x180] ss:$16 sps:$4 sm:$0xff]  }
 0x541   : > { %v7086_v46 = vadd.f32 %v7070_v44, %v14971_v38  ;;  %8369 = vmatpush1.bf16.msra.mxu0 %v13053_v15  ;;  %8595 = vmatpush1.bf16.msra.mxu1 %v13056_v30  ;;  %v13065_v38 = vld [vmem:[#allocation10 + $0x100] ss:$16 sps:$4 sm:$0xff]   ;;  %v13091_v15 = vld [vmem:[#allocation10 + $0x184] ss:$16 sps:$4 sm:$0xff]   ;;  %v13094_v30 = vld [vmem:[#allocation10 + $0x18c] ss:$16 sps:$4 sm:$0xff]  }
 0x542   : > { %13425 = vpow2.f32 %v7037_v62  ;;  %v7039_v43 = vmul.f32 1.442695, %v7010_v11  ;;  %8370 = vmatprep.subr.bf16.mxu0 %v13061_v39  ;;  %8596 = vmatprep.subr.bf16.mxu1 %v13064_v47  ;;  %v7059_v39 = vld [vmem:[%s15025_s29 + $0x70] sm:$0xff]  ;;  %v7060_v47 = vld [vmem:[%s15025_s29 + $0x78] sm:$0xff]  ;;  %s13636_s29 = scalar_lea.vmem %s15374_s25, 2048 }
 0x543   : > { %v7097_v58 = vpack.c.bf16 %v7086_v46, %v7085_v45  ;;  %v13092_v44 = vld [vmem:[#allocation10 + $0x188] ss:$16 sps:$4 sm:$0xff]   ;;  %v13100_v11 = vld [vmem:[#allocation10 + $0x1ac] ss:$16 sps:$4 sm:$0xff]   ;;  %v13103_v45 = vld [vmem:[#allocation10 + $0x1c4] ss:$16 sps:$4 sm:$0xff]   ;;  %p13637_p6 = scmp.ne.s32.totalorder %s15374_s25, %s13636_s29  ;;  %p13644_p13 = scmp.lt.s32.totalorder %s13642_s26, %s13636_s29 }
 0x544   : > { %v13422_v51 = vpop.eup %13421  ;;  %13427 = vpow2.f32 %v7039_v43  ;;  %v13098_v43 = vld [vmem:[#allocation10 + $0x1a8] ss:$16 sps:$4 sm:$0xff]  }
 0x545   : > { %v6994_v4 = vpop.permute.xlu0 %6993  ;;  %8371 = vmatpush1.bf16.msra.mxu0 %v13059_v1  ;;  %8597 = vmatpush1.bf16.msra.mxu1 %v13062_v9  ;;  %v7071_v57 = vmul.f32 %v13422_v51, %v7055_v55  ;;  %v13095_v9 = vld [vmem:[#allocation10 + $0x1a0] ss:$16 sps:$4 sm:$0xff]   ;;  %v13106_v51 = vld [vmem:[#allocation10 + $0x1cc] ss:$16 sps:$4 sm:$0xff]   ;;  %v13104_v55 = vld [vmem:[#allocation10 + $0x1c8] ss:$16 sps:$4 sm:$0xff]   ;;  %p13638_p1 = pnand %p13637_p6, %p15637_p10  ;;  %p13645_p7 = por %p13644_p13, %p13643_p12 }
 0x546   : > { %v13424_v53 = vpop.eup %13423  ;;  %v7011_v27 = vmul.f32 0.5, %v6994_v4  ;;  %8372 = vmatprep.subr.bf16.mxu0 %v13067_v50  ;;  %8598 = vmatprep.subr.bf16.mxu1 %v13070_v20  ;;  %v13107_v4 = vld [vmem:[#allocation10 + $0x1e0] ss:$16 sps:$4 sm:$0xff]  }
 0x547   : > { %v6996_v24 = vpop.permute.xlu1 %6995  ;;  %11079 = vmatmul.mubr.msk.bf16.gmra.mrb[208].mxu0 %vm7219_vm0, %v7097_v58  ;;  %11087 = vmatmul.mubr.msk.bf16.gmra.mrb[208].mxu1 %vm7219_vm0, %v7097_v58  ;;  %v7072_v59 = vmul.f32 %v13424_v53, %v7056_v56  ;;  %v7087_v23 = vadd.f32 %v7071_v57, %v14980_v48  ;;  %v13112_v56 = vld [vmem:[#allocation10 + $0x1ec] ss:$16 sps:$4 sm:$0xff]   ;;  %v13110_v58 = vld [vmem:[#allocation10 + $0x1e8] ss:$16 sps:$4 sm:$0xff]   ;;  %p13639_p11 = pneg %p13638_p1 }
 0x548   : > { %v7041_v40 = vmul.f32 1.442695, %v7011_v27  ;;  %v7012_v29 = vmul.f32 0.5, %v6996_v24  ;;  %7326 = vmatprep.mubr.bf16.mxu0 %v13759_v41  ;;  %7439 = vmatprep.mubr.bf16.mxu1 %v13759_v41 }
 0x549   : > { %v7088_v0 = vadd.f32 %v7072_v59, %v14985_v49  ;;  %8373 = vmatpush1.bf16.msra.mxu0 %v13065_v38  ;;  %8599 = vmatpush1.bf16.msra.mxu1 %v13068_v52  ;;  %v13077_v49 = vld [vmem:[#allocation10 + $0x140] ss:$16 sps:$4 sm:$0xff]   ;;  %v13118_v38 = vld [vmem:[#allocation10 + $0x20c] ss:$16 sps:$4 sm:$0xff]   ;;  %p13646_p5 = pnand %p13645_p7, %p13639_p11 }
 0x54a   : > { %13429 = vpow2.f32 %v7041_v40  ;;  %v7043_v3 = vmul.f32 1.442695, %v7012_v29  ;;  %8374 = vmatprep.subr.bf16.mxu0 %v13073_v14  ;;  %8600 = vmatprep.subr.bf16.mxu1 %v13076_v16  ;;  %v7117_v52 = vld [vmem:[%s15605_s9 + $0x11] sm:$0xf] }
 0x54b   : > { %v7098_v32 = vpack.c.bf16 %v7088_v0, %v7087_v23  ;;  %v15093_v53 = vrot.slane %v7117_v52, %v14159_v5  ;;  %v15096_v27 = vrot.slane %v7117_v52, %v14162_v6  ;;  %v15099_v14 = vrot.slane %v7117_v52, %v14165_v7 }
 0x54c   : > { %v13426_v22 = vpop.eup %13425  ;;  %13431 = vpow2.f32 %v7043_v3  ;;  %v15102_v16 = vrot.slane %v7117_v52, %v14168_v8  ;;  %v13130_v52 = vld [vmem:[#allocation10 + $0x24c] ss:$16 sps:$4 sm:$0xff]  }
 0x54d   : > { %8375 = vmatpush1.bf16.msra.mxu0 %v13071_v13  ;;  %8601 = vmatpush1.bf16.msra.mxu1 %v13074_v17  ;;  %v7073_v48 = vmul.f32 %v13426_v22, %v7057_v21 }
 0x54e   : > { %v13428_v35 = vpop.eup %13427  ;;  %8376 = vmatprep.subr.bf16.mxu0 %v13079_v19  ;;  %8602 = vmatprep.subr.bf16.mxu1 %v13082_v54 }
 0x54f   : > { %11080 = vmatmul.mubr.msk.bf16.gmra.mrb[212].mxu0 %vm7219_vm0, %v7098_v32  ;;  %11088 = vmatmul.mubr.msk.bf16.gmra.mrb[212].mxu1 %vm7219_vm0, %v7098_v32  ;;  %v7074_v31 = vmul.f32 %v13428_v35, %v7058_v25  ;;  %v7089_v61 = vadd.f32 %v7073_v48, %v14994_v18 }
 0x550   : > { %7336 = vmatprep.mubr.bf16.mxu0 %v13759_v41  ;;  %7449 = vmatprep.mubr.bf16.mxu1 %v13759_v41 }
 0x551   : > { %v7090_v36 = vadd.f32 %v7074_v31, %v14999_v2  ;;  %8377 = vmatpush1.bf16.msra.mxu0 %v13077_v49  ;;  %8603 = vmatpush1.bf16.msra.mxu1 %v13080_v28  ;;  %v13097_v2 = vld [vmem:[#allocation10 + $0x1a4] ss:$16 sps:$4 sm:$0xff]  }
 0x552   : > { %8378 = vmatprep.subr.bf16.mxu0 %v13085_v42  ;;  %8604 = vmatprep.subr.bf16.mxu1 %v13088_v33 }
 0x553   : > { %v7099_v37 = vpack.c.bf16 %v7090_v36, %v7089_v61 }
 0x554   : > { %v13430_v60 = vpop.eup %13429 }
 0x555   : > { %8379 = vmatpush1.bf16.msra.mxu0 %v13083_v12  ;;  %8605 = vmatpush1.bf16.msra.mxu1 %v13086_v63  ;;  %v7075_v46 = vmul.f32 %v13430_v60, %v7059_v39  ;;  %v13113_v39 = vld [vmem:[#allocation10 + $0x200] ss:$16 sps:$4 sm:$0xff]  }
 0x556   : > { %v13432_v62 = vpop.eup %13431  ;;  %8380 = vmatprep.subr.bf16.mxu0 %v13091_v15  ;;  %8606 = vmatprep.subr.bf16.mxu1 %v13094_v30 }
 0x557   : > { %11081 = vmatmul.mubr.msk.bf16.gmra.mrb[216].mxu0 %vm7219_vm0, %v7099_v37  ;;  %11089 = vmatmul.mubr.msk.bf16.gmra.mrb[216].mxu1 %vm7219_vm0, %v7099_v37  ;;  %v7076_v1 = vmul.f32 %v13432_v62, %v7060_v47  ;;  %v7091_v50 = vadd.f32 %v7075_v46, %v15008_v26  ;;  %v13115_v26 = vld [vmem:[#allocation10 + $0x204] ss:$16 sps:$4 sm:$0xff]   ;;  %v13116_v47 = vld [vmem:[#allocation10 + $0x208] ss:$16 sps:$4 sm:$0xff]  }
 0x558   : > { %7346 = vmatprep.mubr.bf16.mxu0 %v13759_v41  ;;  %7459 = vmatprep.mubr.bf16.mxu1 %v13759_v41  ;;  %v13101_v41 = vld [vmem:[#allocation10 + $0x1c0] ss:$16 sps:$4 sm:$0xff]  }
 0x559   : > { %v7092_v18 = vadd.f32 %v7076_v1, %v15013_v34  ;;  %8381 = vmatpush1.bf16.msra.mxu0 %v13089_v10  ;;  %8607 = vmatpush1.bf16.msra.mxu1 %v13092_v44  ;;  %v13109_v34 = vld [vmem:[#allocation10 + $0x1e4] ss:$16 sps:$4 sm:$0xff]  }
 0x55a   : > { %8382 = vmatprep.subr.bf16.mxu0 %v13097_v2  ;;  %8608 = vmatprep.subr.bf16.mxu1 %v13100_v11  ;;  %v13121_v2 = vld [vmem:[#allocation10 + $0x224] ss:$16 sps:$4 sm:$0xff]   ;;  %v13124_v11 = vld [vmem:[#allocation10 + $0x22c] ss:$16 sps:$4 sm:$0xff]  }
 0x55b   : > { %v7100_v20 = vpack.c.bf16 %v7092_v18, %v7091_v50 }
 0x55d   : > { %8383 = vmatpush1.bf16.msra.mxu0 %v13095_v9  ;;  %8609 = vmatpush1.bf16.msra.mxu1 %v13098_v43 }
 0x55e   : > { %8384 = vmatprep.subr.bf16.mxu0 %v13103_v45  ;;  %8610 = vmatprep.subr.bf16.mxu1 %v13106_v51 }
 0x55f   : > { %11082 = vmatmul.mubr.msk.bf16.gmra.mrb[220].mxu0 %vm7219_vm0, %v7100_v20  ;;  %11090 = vmatmul.mubr.msk.bf16.gmra.mrb[220].mxu1 %vm7219_vm0, %v7100_v20 }
 0x561   : > { %8385 = vmatpush1.bf16.msra.mxu0 %v13101_v41  ;;  %8611 = vmatpush1.bf16.msra.mxu1 %v13104_v55  ;;  %v13119_v55 = vld [vmem:[#allocation10 + $0x220] ss:$16 sps:$4 sm:$0xff]  }
 0x562   : > { %8386 = vmatprep.subr.bf16.mxu0 %v13109_v34  ;;  %8612 = vmatprep.subr.bf16.mxu1 %v13112_v56  ;;  %v13122_v34 = vld [vmem:[#allocation10 + $0x228] ss:$16 sps:$4 sm:$0xff]   ;;  %v13127_v56 = vld [vmem:[#allocation10 + $0x244] ss:$16 sps:$4 sm:$0xff]  }
 0x565   : > { %8387 = vmatpush1.bf16.msra.mxu0 %v13107_v4  ;;  %8613 = vmatpush1.bf16.msra.mxu1 %v13110_v58 }
 0x566   : > { %8469 = vmatprep.subr.bf16.mxu0 %v13115_v26  ;;  %8695 = vmatprep.subr.bf16.mxu1 %v13118_v38 }
 0x5fa   : > { %v7278_v24 = vpop.f32.mrb[192].mxu0  ;;  %v7391_v57 = vpop.f32.mrb[192].mxu1 }
 0x5fb   : > { %v7279_v59 = vadd.f32 %v7278_v24, %v15093_v53  ;;  %v7392_v40 = vadd.f32 %v7391_v57, %v15096_v27  ;;  %v7280_v29 = vpop.f32.mrb[193].mxu0  ;;  %v7393_v0 = vpop.f32.mrb[193].mxu1 }
 0x5fc   : > { %v7281_v13 = vadd.f32 %v7280_v29, %v15099_v14  ;;  %v7394_v17 = vadd.f32 %v7393_v0, %v15102_v16  ;;  %v7282_v3 = vpop.f32.mrb[194].mxu0  ;;  %v7395_v19 = vpop.f32.mrb[194].mxu1 }
 0x5fd   : > { %v7283_v54 = vadd.f32 %v7282_v3, %v15093_v53  ;;  %v7396_v23 = vadd.f32 %v7395_v19, %v15096_v27  ;;  %v7284_v22 = vpop.f32.mrb[195].mxu0  ;;  %v7397_v21 = vpop.f32.mrb[195].mxu1  ;;  %v7470_v49 = vmax.f32 %v7279_v59, 0.0  ;;  %v7472_v28 = vmax.f32 %v7392_v40, 0.0 }
 0x5fe   : > { %v7285_v25 = vadd.f32 %v7284_v22, %v15099_v14  ;;  %v7398_v32 = vadd.f32 %v7397_v21, %v15102_v16  ;;  %v7471_v33 = vmax.f32 %v7281_v13, 0.0  ;;  %v7473_v48 = vmax.f32 %v7394_v17, 0.0 }
 0x5ff   : > { %v7474_v35 = vmax.f32 %v7283_v54, 0.0  ;;  %v7476_v42 = vmax.f32 %v7396_v23, 0.0  ;;  %v13125_v54 = vld [vmem:[#allocation10 + $0x240] ss:$16 sps:$4 sm:$0xff]   ;;  %v13128_v23 = vld [vmem:[#allocation10 + $0x248] ss:$16 sps:$4 sm:$0xff]  }
 0x600   : > { %v7475_v31 = vmax.f32 %v7285_v25, 0.0  ;;  %v7477_v36 = vmax.f32 %v7398_v32, 0.0 }
 0x601   : > { %v7534_v12 = vpack.c.bf16 %v7474_v35, %v7470_v49  ;;  %v15112_v63 = vpack.c.bf16 %v7476_v42, %v7472_v28  ;;  %v13133_v49 = vld [vmem:[#allocation10 + $0x264] ss:$16 sps:$4 sm:$0xff]   ;;  %v13136_v28 = vld [vmem:[#allocation10 + $0x26c] ss:$16 sps:$4 sm:$0xff]  }
 0x602   : > { %v7535_v15 = vpack.c.bf16 %v7475_v31, %v7471_v33  ;;  %v15114_v30 = vpack.c.bf16 %v7477_v36, %v7473_v48  ;;  %v7288_v61 = vpop.f32.mrb[196].mxu0  ;;  %v7401_v60 = vpop.f32.mrb[196].mxu1 }
 0x603   : > { %v7289_v37 = vadd.f32 %v7288_v61, %v15093_v53  ;;  %v7402_v10 = vadd.f32 %v7401_v60, %v15096_v27  ;;  %v7290_v44 = vpop.f32.mrb[197].mxu0  ;;  %v7403_v62 = vpop.f32.mrb[197].mxu1 }
 0x604   : > { %v7291_v46 = vadd.f32 %v7290_v44, %v15099_v14  ;;  %v7404_v1 = vadd.f32 %v7403_v62, %v15102_v16  ;;  %v7292_v18 = vpop.f32.mrb[198].mxu0  ;;  %v7405_v9 = vpop.f32.mrb[198].mxu1  ;;  %8388 = vmatprep.mubr.bf16.mxu0 %v7535_v15  ;;  %8614 = vmatprep.mubr.bf16.mxu1 %v7535_v15 }
 0x605   : > { %v7293_v43 = vadd.f32 %v7292_v18, %v15093_v53  ;;  %v7406_v50 = vadd.f32 %v7405_v9, %v15096_v27  ;;  %v7294_v20 = vpop.f32.mrb[199].mxu0  ;;  %v7407_v45 = vpop.f32.mrb[199].mxu1  ;;  %8389 = vmatmul.mubr.bf16.vlgmr.msra.gmra.mrb[224].mxu0 %v7534_v12  ;;  %8615 = vmatmul.mubr.bf16.vlgmr.msra.gmra.mrb[224].mxu1 %v7534_v12  ;;  %v7478_v4 = vmax.f32 %v7289_v37, 0.0  ;;  %v7480_v58 = vmax.f32 %v7402_v10, 0.0  ;;  %v13139_v37 = vld [vmem:[#allocation10 + $0x284] ss:$16 sps:$4 sm:$0xff]  }
 0x606   : > { %v7295_v51 = vadd.f32 %v7294_v20, %v15099_v14  ;;  %v7408_v41 = vadd.f32 %v7407_v45, %v15102_v16  ;;  %8470 = vmatpush1.bf16.msra.mxu0 %v13113_v39  ;;  %8696 = vmatpush1.bf16.msra.mxu1 %v13116_v47  ;;  %v7479_v24 = vmax.f32 %v7291_v46, 0.0  ;;  %v7481_v57 = vmax.f32 %v7404_v1, 0.0  ;;  %v13131_v39 = vld [vmem:[#allocation10 + $0x260] ss:$16 sps:$4 sm:$0xff]   ;;  %v13134_v47 = vld [vmem:[#allocation10 + $0x268] ss:$16 sps:$4 sm:$0xff]  }
 0x607   : > { %v7482_v26 = vmax.f32 %v7293_v43, 0.0  ;;  %v7484_v38 = vmax.f32 %v7406_v50, 0.0  ;;  %8471 = vmatprep.subr.bf16.mxu0 %v13121_v2  ;;  %8697 = vmatprep.subr.bf16.mxu1 %v13124_v11  ;;  %v13142_v11 = vld [vmem:[#allocation10 + $0x28c] ss:$16 sps:$4 sm:$0xff]  }
 0x608   : > { %v7483_v59 = vmax.f32 %v7295_v51, 0.0  ;;  %v7485_v40 = vmax.f32 %v7408_v41, 0.0 }
 0x609   : > { %v7538_v29 = vpack.c.bf16 %v7482_v26, %v7478_v4  ;;  %v15124_v0 = vpack.c.bf16 %v7484_v38, %v7480_v58  ;;  %v13145_v38 = vld [vmem:[#allocation10 + $0x2a4] ss:$16 sps:$4 sm:$0xff]  }
 0x60a   : > { %v7539_v13 = vpack.c.bf16 %v7483_v59, %v7479_v24  ;;  %v15126_v17 = vpack.c.bf16 %v7485_v40, %v7481_v57  ;;  %v7298_v3 = vpop.f32.mrb[200].mxu0  ;;  %v7411_v19 = vpop.f32.mrb[200].mxu1  ;;  %8472 = vmatpush1.bf16.msra.mxu0 %v13119_v55  ;;  %8698 = vmatpush1.bf16.msra.mxu1 %v13122_v34  ;;  %v13137_v55 = vld [vmem:[#allocation10 + $0x280] ss:$16 sps:$4 sm:$0xff]   ;;  %v13140_v34 = vld [vmem:[#allocation10 + $0x288] ss:$16 sps:$4 sm:$0xff]  }
 0x60b   : > { %v7299_v22 = vadd.f32 %v7298_v3, %v15093_v53  ;;  %v7412_v21 = vadd.f32 %v7411_v19, %v15096_v27  ;;  %v7300_v25 = vpop.f32.mrb[201].mxu0  ;;  %v7413_v32 = vpop.f32.mrb[201].mxu1  ;;  %8473 = vmatprep.subr.bf16.mxu0 %v13127_v56  ;;  %8699 = vmatprep.subr.bf16.mxu1 %v13130_v52  ;;  %v13148_v52 = vld [vmem:[#allocation10 + $0x2ac] ss:$16 sps:$4 sm:$0xff]  }
 0x60c   : > { %v7301_v35 = vadd.f32 %v7300_v25, %v15099_v14  ;;  %v7414_v42 = vadd.f32 %v7413_v32, %v15102_v16  ;;  %v7302_v33 = vpop.f32.mrb[202].mxu0  ;;  %v7415_v48 = vpop.f32.mrb[202].mxu1  ;;  %8398 = vmatprep.mubr.bf16.mxu0 %v7539_v13  ;;  %8624 = vmatprep.mubr.bf16.mxu1 %v7539_v13  ;;  %v13151_v25 = vld [vmem:[#allocation10 + $0x2c4] ss:$16 sps:$4 sm:$0xff]  }
 0x60d   : > { %v7303_v31 = vadd.f32 %v7302_v33, %v15093_v53  ;;  %v7416_v36 = vadd.f32 %v7415_v48, %v15096_v27  ;;  %v7304_v12 = vpop.f32.mrb[203].mxu0  ;;  %v7417_v15 = vpop.f32.mrb[203].mxu1  ;;  %8399 = vmatmul.mubr.bf16.gmra.mrb[228].mxu0 %v7538_v29  ;;  %8625 = vmatmul.mubr.bf16.gmra.mrb[228].mxu1 %v7538_v29  ;;  %v7486_v10 = vmax.f32 %v7299_v22, 0.0  ;;  %v7488_v44 = vmax.f32 %v7412_v21, 0.0  ;;  %v13143_v22 = vld [vmem:[#allocation10 + $0x2a0] ss:$16 sps:$4 sm:$0xff]  }
 0x60e   : > { %v7305_v61 = vadd.f32 %v7304_v12, %v15099_v14  ;;  %v7418_v60 = vadd.f32 %v7417_v15, %v15102_v16  ;;  %8474 = vmatpush1.bf16.msra.mxu0 %v13125_v54  ;;  %8700 = vmatpush1.bf16.msra.mxu1 %v13128_v23  ;;  %v7487_v46 = vmax.f32 %v7301_v35, 0.0  ;;  %v7489_v1 = vmax.f32 %v7414_v42, 0.0  ;;  %v13146_v21 = vld [vmem:[#allocation10 + $0x2a8] ss:$16 sps:$4 sm:$0xff]   ;;  %v13154_v42 = vld [vmem:[#allocation10 + $0x2cc] ss:$16 sps:$4 sm:$0xff]  }
 0x60f   : > { %v7490_v62 = vmax.f32 %v7303_v31, 0.0  ;;  %v7492_v2 = vmax.f32 %v7416_v36, 0.0  ;;  %8475 = vmatprep.subr.bf16.mxu0 %v13133_v49  ;;  %8701 = vmatprep.subr.bf16.mxu1 %v13136_v28 }
 0x610   : > { %v7491_v18 = vmax.f32 %v7305_v61, 0.0  ;;  %v7493_v9 = vmax.f32 %v7418_v60, 0.0 }
 0x611   : > { %v7542_v43 = vpack.c.bf16 %v7490_v62, %v7486_v10  ;;  %v15136_v50 = vpack.c.bf16 %v7492_v2, %v7488_v44  ;;  %v13152_v10 = vld [vmem:[#allocation10 + $0x2c8] ss:$16 sps:$4 sm:$0xff]  }
 0x612   : > { %v7543_v20 = vpack.c.bf16 %v7491_v18, %v7487_v46  ;;  %v15138_v45 = vpack.c.bf16 %v7493_v9, %v7489_v1  ;;  %v7308_v51 = vpop.f32.mrb[204].mxu0  ;;  %v7421_v41 = vpop.f32.mrb[204].mxu1  ;;  %8476 = vmatpush1.bf16.msra.mxu0 %v13131_v39  ;;  %8702 = vmatpush1.bf16.msra.mxu1 %v13134_v47  ;;  %v13157_v46 = vld [vmem:[#allocation10 + $0x2e4] ss:$16 sps:$4 sm:$0xff]   ;;  %v13160_v1 = vld [vmem:[#allocation10 + $0x2ec] ss:$16 sps:$4 sm:$0xff]  }
 0x613   : > { %v7309_v56 = vadd.f32 %v7308_v51, %v15093_v53  ;;  %v7422_v4 = vadd.f32 %v7421_v41, %v15096_v27  ;;  %v7310_v58 = vpop.f32.mrb[205].mxu0  ;;  %v7423_v26 = vpop.f32.mrb[205].mxu1  ;;  %8477 = vmatprep.subr.bf16.mxu0 %v13139_v37  ;;  %8703 = vmatprep.subr.bf16.mxu1 %v13142_v11  ;;  %v13149_v37 = vld [vmem:[#allocation10 + $0x2c0] ss:$16 sps:$4 sm:$0xff]  }
 0x614   : > { %v7311_v24 = vadd.f32 %v7310_v58, %v15099_v14  ;;  %v7424_v57 = vadd.f32 %v7423_v26, %v15102_v16  ;;  %v7312_v59 = vpop.f32.mrb[206].mxu0  ;;  %v7425_v40 = vpop.f32.mrb[206].mxu1  ;;  %8408 = vmatprep.mubr.bf16.mxu0 %v7543_v20  ;;  %8634 = vmatprep.mubr.bf16.mxu1 %v7543_v20  ;;  %v13155_v58 = vld [vmem:[#allocation10 + $0x2e0] ss:$16 sps:$4 sm:$0xff]   ;;  %v13158_v26 = vld [vmem:[#allocation10 + $0x2e8] ss:$16 sps:$4 sm:$0xff]  }
 0x615   : > { %v7313_v29 = vadd.f32 %v7312_v59, %v15093_v53  ;;  %v7426_v13 = vadd.f32 %v7425_v40, %v15096_v27  ;;  %v7314_v3 = vpop.f32.mrb[207].mxu0  ;;  %v7427_v19 = vpop.f32.mrb[207].mxu1  ;;  %8409 = vmatmul.mubr.bf16.gmra.mrb[232].mxu0 %v7542_v43  ;;  %8635 = vmatmul.mubr.bf16.gmra.mrb[232].mxu1 %v7542_v43  ;;  %v7494_v32 = vmax.f32 %v7309_v56, 0.0  ;;  %v7496_v49 = vmax.f32 %v7422_v4, 0.0  ;;  %v13166_v40 = vld [vmem:[#allocation10 + $0x30c] ss:$16 sps:$4 sm:$0xff]  }
 0x616   : > { %v7315_v54 = vadd.f32 %v7314_v3, %v15099_v14  ;;  %v7428_v23 = vadd.f32 %v7427_v19, %v15102_v16  ;;  %8478 = vmatpush1.bf16.msra.mxu0 %v13137_v55  ;;  %8704 = vmatpush1.bf16.msra.mxu1 %v13140_v34  ;;  %v7495_v33 = vmax.f32 %v7311_v24, 0.0  ;;  %v7497_v48 = vmax.f32 %v7424_v57, 0.0 }
 0x617   : > { %v7498_v28 = vmax.f32 %v7313_v29, 0.0  ;;  %v7500_v35 = vmax.f32 %v7426_v13, 0.0  ;;  %8479 = vmatprep.subr.bf16.mxu0 %v13145_v38  ;;  %8705 = vmatprep.subr.bf16.mxu1 %v13148_v52  ;;  %v13163_v38 = vld [vmem:[#allocation10 + $0x304] ss:$16 sps:$4 sm:$0xff]  }
 0x618   : > { %v7499_v31 = vmax.f32 %v7315_v54, 0.0  ;;  %v7501_v36 = vmax.f32 %v7428_v23, 0.0 }
 0x619   : > { %v7546_v12 = vpack.c.bf16 %v7498_v28, %v7494_v32  ;;  %v15148_v15 = vpack.c.bf16 %v7500_v35, %v7496_v49  ;;  %v13161_v49 = vld [vmem:[#allocation10 + $0x300] ss:$16 sps:$4 sm:$0xff]   ;;  %v13164_v28 = vld [vmem:[#allocation10 + $0x308] ss:$16 sps:$4 sm:$0xff]  }
 0x61a   : > { %v7547_v61 = vpack.c.bf16 %v7499_v31, %v7495_v33  ;;  %v15150_v60 = vpack.c.bf16 %v7501_v36, %v7497_v48  ;;  %v7318_v39 = vpop.f32.mrb[208].mxu0  ;;  %v7431_v47 = vpop.f32.mrb[208].mxu1  ;;  %8480 = vmatpush1.bf16.msra.mxu0 %v13143_v22  ;;  %8706 = vmatpush1.bf16.msra.mxu1 %v13146_v21  ;;  %v13169_v31 = vld [vmem:[#allocation10 + $0x324] ss:$16 sps:$4 sm:$0xff]   ;;  %v13172_v36 = vld [vmem:[#allocation10 + $0x32c] ss:$16 sps:$4 sm:$0xff]  }
 0x61b   : > { %v7319_v44 = vadd.f32 %v7318_v39, %v15093_v53  ;;  %v7432_v62 = vadd.f32 %v7431_v47, %v15096_v27  ;;  %v7320_v2 = vpop.f32.mrb[209].mxu0  ;;  %v7433_v11 = vpop.f32.mrb[209].mxu1  ;;  %8481 = vmatprep.subr.bf16.mxu0 %v13151_v25  ;;  %8707 = vmatprep.subr.bf16.mxu1 %v13154_v42 }
 0x61c   : > { %v7321_v18 = vadd.f32 %v7320_v2, %v15099_v14  ;;  %v7434_v9 = vadd.f32 %v7433_v11, %v15102_v16  ;;  %v7322_v43 = vpop.f32.mrb[210].mxu0  ;;  %v7435_v20 = vpop.f32.mrb[210].mxu1  ;;  %8418 = vmatprep.mubr.bf16.mxu0 %v7547_v61  ;;  %8644 = vmatprep.mubr.bf16.mxu1 %v7547_v61 }
 0x61d   : > { %v7323_v51 = vadd.f32 %v7322_v43, %v15093_v53  ;;  %v7436_v41 = vadd.f32 %v7435_v20, %v15096_v27  ;;  %v7324_v55 = vpop.f32.mrb[211].mxu0  ;;  %v7437_v34 = vpop.f32.mrb[211].mxu1  ;;  %8419 = vmatmul.mubr.bf16.gmra.mrb[236].mxu0 %v7546_v12  ;;  %8645 = vmatmul.mubr.bf16.gmra.mrb[236].mxu1 %v7546_v12  ;;  %v7502_v52 = vmax.f32 %v7319_v44, 0.0  ;;  %v7504_v24 = vmax.f32 %v7432_v62, 0.0 }
 0x61e   : > { %v7325_v56 = vadd.f32 %v7324_v55, %v15099_v14  ;;  %v7438_v4 = vadd.f32 %v7437_v34, %v15102_v16  ;;  %8482 = vmatpush1.bf16.msra.mxu0 %v13149_v37  ;;  %8708 = vmatpush1.bf16.msra.mxu1 %v13152_v10  ;;  %v7503_v29 = vmax.f32 %v7321_v18, 0.0  ;;  %v7505_v13 = vmax.f32 %v7434_v9, 0.0  ;;  %v13175_v18 = vld [vmem:[#allocation10 + $0x344] ss:$16 sps:$4 sm:$0xff]  }
 0x61f   : > { %v7506_v57 = vmax.f32 %v7323_v51, 0.0  ;;  %v7508_v59 = vmax.f32 %v7436_v41, 0.0  ;;  %8483 = vmatprep.subr.bf16.mxu0 %v13157_v46  ;;  %8709 = vmatprep.subr.bf16.mxu1 %v13160_v1  ;;  %v13167_v46 = vld [vmem:[#allocation10 + $0x320] ss:$16 sps:$4 sm:$0xff]   ;;  %v13170_v1 = vld [vmem:[#allocation10 + $0x328] ss:$16 sps:$4 sm:$0xff]  }
 0x620   : > { %v7507_v3 = vmax.f32 %v7325_v56, 0.0  ;;  %v7509_v19 = vmax.f32 %v7438_v4, 0.0  ;;  %v13178_v41 = vld [vmem:[#allocation10 + $0x34c] ss:$16 sps:$4 sm:$0xff]  }
 0x621   : > { %v7550_v54 = vpack.c.bf16 %v7506_v57, %v7502_v52  ;;  %v15160_v23 = vpack.c.bf16 %v7508_v59, %v7504_v24  ;;  %v13173_v59 = vld [vmem:[#allocation10 + $0x340] ss:$16 sps:$4 sm:$0xff]  }
 0x622   : > { %v7551_v22 = vpack.c.bf16 %v7507_v3, %v7503_v29  ;;  %v15162_v21 = vpack.c.bf16 %v7509_v19, %v7505_v13  ;;  %v7328_v25 = vpop.f32.mrb[212].mxu0  ;;  %v7441_v32 = vpop.f32.mrb[212].mxu1  ;;  %8484 = vmatpush1.bf16.msra.mxu0 %v13155_v58  ;;  %8710 = vmatpush1.bf16.msra.mxu1 %v13158_v26 }
 0x623   : > { %v7329_v35 = vadd.f32 %v7328_v25, %v15093_v53  ;;  %v7442_v42 = vadd.f32 %v7441_v32, %v15096_v27  ;;  %v7330_v33 = vpop.f32.mrb[213].mxu0  ;;  %v7443_v48 = vpop.f32.mrb[213].mxu1  ;;  %8485 = vmatprep.subr.bf16.mxu0 %v13163_v38  ;;  %8711 = vmatprep.subr.bf16.mxu1 %v13166_v40  ;;  %v13176_v40 = vld [vmem:[#allocation10 + $0x348] ss:$16 sps:$4 sm:$0xff]  }
 0x624   : > { %v7331_v12 = vadd.f32 %v7330_v33, %v15099_v14  ;;  %v7444_v61 = vadd.f32 %v7443_v48, %v15102_v16  ;;  %v7332_v39 = vpop.f32.mrb[214].mxu0  ;;  %v7445_v47 = vpop.f32.mrb[214].mxu1  ;;  %8428 = vmatprep.mubr.bf16.mxu0 %v7551_v22  ;;  %8654 = vmatprep.mubr.bf16.mxu1 %v7551_v22  ;;  %v13184_v22 = vld [vmem:[#allocation10 + $0x36c] ss:$16 sps:$4 sm:$0xff]  }
 0x625   : > { %v7333_v37 = vadd.f32 %v7332_v39, %v15093_v53  ;;  %v7446_v10 = vadd.f32 %v7445_v47, %v15096_v27  ;;  %v7334_v44 = vpop.f32.mrb[215].mxu0  ;;  %v7447_v62 = vpop.f32.mrb[215].mxu1  ;;  %8429 = vmatmul.mubr.bf16.gmra.mrb[240].mxu0 %v7550_v54  ;;  %8655 = vmatmul.mubr.bf16.gmra.mrb[240].mxu1 %v7550_v54  ;;  %v7510_v9 = vmax.f32 %v7329_v35, 0.0  ;;  %v7512_v43 = vmax.f32 %v7442_v42, 0.0  ;;  %v13181_v54 = vld [vmem:[#allocation10 + $0x364] ss:$16 sps:$4 sm:$0xff]  }
 0x626   : > { %v7335_v2 = vadd.f32 %v7334_v44, %v15099_v14  ;;  %v7448_v11 = vadd.f32 %v7447_v62, %v15102_v16  ;;  %8486 = vmatpush1.bf16.msra.mxu0 %v13161_v49  ;;  %8712 = vmatpush1.bf16.msra.mxu1 %v13164_v28  ;;  %v7511_v55 = vmax.f32 %v7331_v12, 0.0  ;;  %v7513_v34 = vmax.f32 %v7444_v61, 0.0  ;;  %v13179_v12 = vld [vmem:[#allocation10 + $0x360] ss:$16 sps:$4 sm:$0xff]   ;;  %v13182_v61 = vld [vmem:[#allocation10 + $0x368] ss:$16 sps:$4 sm:$0xff]  }
 0x627   : > { %v7514_v20 = vmax.f32 %v7333_v37, 0.0  ;;  %v7516_v51 = vmax.f32 %v7446_v10, 0.0  ;;  %8487 = vmatprep.subr.bf16.mxu0 %v13169_v31  ;;  %8713 = vmatprep.subr.bf16.mxu1 %v13172_v36  ;;  %v13187_v39 = vld [vmem:[#allocation10 + $0x384] ss:$16 sps:$4 sm:$0xff]   ;;  %v13190_v62 = vld [vmem:[#allocation10 + $0x38c] ss:$16 sps:$4 sm:$0xff]  }
 0x628   : > { %v7515_v56 = vmax.f32 %v7335_v2, 0.0  ;;  %v7517_v4 = vmax.f32 %v7448_v11, 0.0 }
 0x629   : > { %v7554_v58 = vpack.c.bf16 %v7514_v20, %v7510_v9  ;;  %v15172_v26 = vpack.c.bf16 %v7516_v51, %v7512_v43 }
 0x62a   : > { %v7555_v38 = vpack.c.bf16 %v7515_v56, %v7511_v55  ;;  %v15174_v52 = vpack.c.bf16 %v7517_v4, %v7513_v34  ;;  %v7338_v24 = vpop.f32.mrb[216].mxu0  ;;  %v7451_v57 = vpop.f32.mrb[216].mxu1  ;;  %8488 = vmatpush1.bf16.msra.mxu0 %v13167_v46  ;;  %8714 = vmatpush1.bf16.msra.mxu1 %v13170_v1  ;;  %v13185_v55 = vld [vmem:[#allocation10 + $0x380] ss:$16 sps:$4 sm:$0xff]   ;;  %v13188_v34 = vld [vmem:[#allocation10 + $0x388] ss:$16 sps:$4 sm:$0xff]  }
 0x62b   : > { %v7339_v29 = vadd.f32 %v7338_v24, %v15093_v53  ;;  %v7452_v13 = vadd.f32 %v7451_v57, %v15096_v27  ;;  %v7340_v3 = vpop.f32.mrb[217].mxu0  ;;  %v7453_v19 = vpop.f32.mrb[217].mxu1  ;;  %8489 = vmatprep.subr.bf16.mxu0 %v13175_v18  ;;  %8715 = vmatprep.subr.bf16.mxu1 %v13178_v41  ;;  %v13193_v24 = vld [vmem:[#allocation10 + $0x3a4] ss:$16 sps:$4 sm:$0xff]   ;;  %v13196_v57 = vld [vmem:[#allocation10 + $0x3ac] ss:$16 sps:$4 sm:$0xff]  }
 0x62c   : > { %v7341_v25 = vadd.f32 %v7340_v3, %v15099_v14  ;;  %v7454_v32 = vadd.f32 %v7453_v19, %v15102_v16  ;;  %v7342_v49 = vpop.f32.mrb[218].mxu0  ;;  %v7455_v28 = vpop.f32.mrb[218].mxu1  ;;  %8438 = vmatprep.mubr.bf16.mxu0 %v7555_v38  ;;  %8664 = vmatprep.mubr.bf16.mxu1 %v7555_v38 }
 0x62d   : > { %v7343_v35 = vadd.f32 %v7342_v49, %v15093_v53  ;;  %v7456_v42 = vadd.f32 %v7455_v28, %v15096_v27  ;;  %v7344_v33 = vpop.f32.mrb[219].mxu0  ;;  %v7457_v48 = vpop.f32.mrb[219].mxu1  ;;  %8439 = vmatmul.mubr.bf16.gmra.mrb[244].mxu0 %v7554_v58  ;;  %8665 = vmatmul.mubr.bf16.gmra.mrb[244].mxu1 %v7554_v58  ;;  %v7518_v47 = vmax.f32 %v7339_v29, 0.0  ;;  %v7520_v37 = vmax.f32 %v7452_v13, 0.0  ;;  %v13191_v49 = vld [vmem:[#allocation10 + $0x3a0] ss:$16 sps:$4 sm:$0xff]  }
 0x62e   : > { %v7345_v31 = vadd.f32 %v7344_v33, %v15099_v14  ;;  %v7458_v36 = vadd.f32 %v7457_v48, %v15102_v16  ;;  %8490 = vmatpush1.bf16.msra.mxu0 %v13173_v59  ;;  %8716 = vmatpush1.bf16.msra.mxu1 %v13176_v40  ;;  %v7519_v2 = vmax.f32 %v7341_v25, 0.0  ;;  %v7521_v11 = vmax.f32 %v7454_v32, 0.0  ;;  %v13194_v28 = vld [vmem:[#allocation10 + $0x3a8] ss:$16 sps:$4 sm:$0xff]  }
 0x62f   : > { %v7522_v10 = vmax.f32 %v7343_v35, 0.0  ;;  %v7524_v44 = vmax.f32 %v7456_v42, 0.0  ;;  %8491 = vmatprep.subr.bf16.mxu0 %v13181_v54  ;;  %8717 = vmatprep.subr.bf16.mxu1 %v13184_v22  ;;  %v13199_v35 = vld [vmem:[#allocation10 + $0x3c4] ss:$16 sps:$4 sm:$0xff]  }
 0x630   : > { %v7523_v46 = vmax.f32 %v7345_v31, 0.0  ;;  %v7525_v1 = vmax.f32 %v7458_v36, 0.0 }
 0x631   : > { %v7558_v18 = vpack.c.bf16 %v7522_v10, %v7518_v47  ;;  %v15184_v9 = vpack.c.bf16 %v7524_v44, %v7520_v37  ;;  %v13197_v37 = vld [vmem:[#allocation10 + $0x3c0] ss:$16 sps:$4 sm:$0xff]   ;;  %v13200_v10 = vld [vmem:[#allocation10 + $0x3c8] ss:$16 sps:$4 sm:$0xff]   ;;  %v13205_v44 = vld [vmem:[#allocation10 + $0x3e4] ss:$16 sps:$4 sm:$0xff]  }
 0x632   : > { %v7559_v43 = vpack.c.bf16 %v7523_v46, %v7519_v2  ;;  %v15186_v20 = vpack.c.bf16 %v7525_v1, %v7521_v11  ;;  %v7348_v51 = vpop.f32.mrb[220].mxu0  ;;  %v7461_v41 = vpop.f32.mrb[220].mxu1  ;;  %8492 = vmatpush1.bf16.msra.mxu0 %v13179_v12  ;;  %8718 = vmatpush1.bf16.msra.mxu1 %v13182_v61  ;;  %v13203_v2 = vld [vmem:[#allocation10 + $0x3e0] ss:$16 sps:$4 sm:$0xff]   ;;  %v13206_v11 = vld [vmem:[#allocation10 + $0x3e8] ss:$16 sps:$4 sm:$0xff]  }
 0x633   : > { %v7349_v56 = vadd.f32 %v7348_v51, %v15093_v53  ;;  %v7462_v4 = vadd.f32 %v7461_v41, %v15096_v27  ;;  %v7350_v58 = vpop.f32.mrb[221].mxu0  ;;  %v7463_v38 = vpop.f32.mrb[221].mxu1  ;;  %8493 = vmatprep.subr.bf16.mxu0 %v13187_v39  ;;  %8719 = vmatprep.subr.bf16.mxu1 %v13190_v62  ;;  %v13208_v62 = vld [vmem:[#allocation10 + $0x3ec] ss:$16 sps:$4 sm:$0xff]   ;;  %v13211_v46 = vld [vmem:[#allocation11 + $0x4] ss:$16 sps:$4 sm:$0xff]  }
 0x634   : > { %v7351_v59 = vadd.f32 %v7350_v58, %v15099_v14  ;;  %v7464_v40 = vadd.f32 %v7463_v38, %v15102_v16  ;;  %v7352_v29 = vpop.f32.mrb[222].mxu0  ;;  %v7465_v13 = vpop.f32.mrb[222].mxu1  ;;  %8448 = vmatprep.mubr.bf16.mxu0 %v7559_v43  ;;  %8674 = vmatprep.mubr.bf16.mxu1 %v7559_v43  ;;  %v13214_v1 = vld [vmem:[#allocation11 + $0xc] ss:$16 sps:$4 sm:$0xff]   ;;  %v13212_v43 = vld [vmem:[#allocation11 + $0x8] ss:$16 sps:$4 sm:$0xff]  }
 0x635   : > { %v7353_v3 = vadd.f32 %v7352_v29, %v15093_v53  ;;  %v7466_v19 = vadd.f32 %v7465_v13, %v15096_v27  ;;  %v7354_v54 = vpop.f32.mrb[223].mxu0  ;;  %v7467_v22 = vpop.f32.mrb[223].mxu1  ;;  %8449 = vmatmul.mubr.bf16.gmra.mrb[248].mxu0 %v7558_v18  ;;  %8675 = vmatmul.mubr.bf16.gmra.mrb[248].mxu1 %v7558_v18  ;;  %v7526_v42 = vmax.f32 %v7349_v56, 0.0  ;;  %v7528_v33 = vmax.f32 %v7462_v4, 0.0  ;;  %v13202_v53 = vld [vmem:[#allocation10 + $0x3cc] ss:$16 sps:$4 sm:$0xff]  }
 0x636   : > { %v7355_v25 = vadd.f32 %v7354_v54, %v15099_v14  ;;  %v7468_v32 = vadd.f32 %v7467_v22, %v15102_v16  ;;  %8494 = vmatpush1.bf16.msra.mxu0 %v13185_v55  ;;  %8720 = vmatpush1.bf16.msra.mxu1 %v13188_v34  ;;  %v7527_v27 = vmax.f32 %v7351_v59, 0.0  ;;  %v7529_v36 = vmax.f32 %v7464_v40, 0.0  ;;  %v13209_v18 = vld [vmem:[#allocation11] ss:$16 sps:$4 sm:$0xff]   ;;  %v13217_v51 = vld [vmem:[#allocation11 + $0x24] ss:$16 sps:$4 sm:$0xff]  }
 0x637   : > { %v7530_v48 = vmax.f32 %v7353_v3, 0.0  ;;  %v7532_v31 = vmax.f32 %v7466_v19, 0.0  ;;  %8495 = vmatprep.subr.bf16.mxu0 %v13193_v24  ;;  %8721 = vmatprep.subr.bf16.mxu1 %v13196_v57  ;;  %v13220_v41 = vld [vmem:[#allocation11 + $0x2c] ss:$16 sps:$4 sm:$0xff]   ;;  %v13218_v55 = vld [vmem:[#allocation11 + $0x28] ss:$16 sps:$4 sm:$0xff]  }
 0x638   : > { %v7531_v12 = vmax.f32 %v7355_v25, 0.0  ;;  %v7533_v61 = vmax.f32 %v7468_v32, 0.0  ;;  %v13223_v34 = vld [vmem:[#allocation11 + $0x44] ss:$16 sps:$4 sm:$0xff]   ;;  %v13226_v56 = vld [vmem:[#allocation11 + $0x4c] ss:$16 sps:$4 sm:$0xff]  }
 0x639   : > { %v7562_v39 = vpack.c.bf16 %v7530_v48, %v7526_v42  ;;  %v15196_v14 = vpack.c.bf16 %v7532_v31, %v7528_v33  ;;  %v13221_v4 = vld [vmem:[#allocation11 + $0x40] ss:$16 sps:$4 sm:$0xff]   ;;  %v13224_v58 = vld [vmem:[#allocation11 + $0x48] ss:$16 sps:$4 sm:$0xff]   ;;  %v13229_v38 = vld [vmem:[#allocation11 + $0x64] ss:$16 sps:$4 sm:$0xff]  }
 0x63a   : > { %v7563_v16 = vpack.c.bf16 %v7531_v12, %v7527_v27  ;;  %v15198_v47 = vpack.c.bf16 %v7533_v61, %v7529_v36  ;;  %8496 = vmatpush1.bf16.msra.mxu0 %v13191_v49  ;;  %8722 = vmatpush1.bf16.msra.mxu1 %v13194_v28  ;;  %v13230_v24 = vld [vmem:[#allocation11 + $0x68] ss:$16 sps:$4 sm:$0xff]   ;;  %v13235_v57 = vld [vmem:[#allocation11 + $0x84] ss:$16 sps:$4 sm:$0xff]   ;;  %v13238_v59 = vld [vmem:[#allocation11 + $0x8c] ss:$16 sps:$4 sm:$0xff]  }
 0x63b   : > { %8497 = vmatprep.subr.bf16.mxu0 %v13199_v35  ;;  %8723 = vmatprep.subr.bf16.mxu1 %v13202_v53  ;;  %v13233_v40 = vld [vmem:[#allocation11 + $0x80] ss:$16 sps:$4 sm:$0xff]   ;;  %v13236_v29 = vld [vmem:[#allocation11 + $0x88] ss:$16 sps:$4 sm:$0xff]   ;;  %v13241_v13 = vld [vmem:[#allocation11 + $0xa4] ss:$16 sps:$4 sm:$0xff]  }
 0x63c   : > { %8458 = vmatprep.mubr.bf16.mxu0 %v7563_v16  ;;  %8684 = vmatprep.mubr.bf16.mxu1 %v7563_v16  ;;  %v13242_v3 = vld [vmem:[#allocation11 + $0xa8] ss:$16 sps:$4 sm:$0xff]   ;;  %v13247_v19 = vld [vmem:[#allocation11 + $0xc4] ss:$16 sps:$4 sm:$0xff]   ;;  %v13250_v54 = vld [vmem:[#allocation11 + $0xcc] ss:$16 sps:$4 sm:$0xff]  }
 0x63d   : > { %8459 = vmatmul.mubr.bf16.gmra.mrb[252].mxu0 %v7562_v39  ;;  %8685 = vmatmul.mubr.bf16.gmra.mrb[252].mxu1 %v7562_v39  ;;  %v13245_v22 = vld [vmem:[#allocation11 + $0xc0] ss:$16 sps:$4 sm:$0xff]   ;;  %v13248_v25 = vld [vmem:[#allocation11 + $0xc8] ss:$16 sps:$4 sm:$0xff]   ;;  %v13253_v32 = vld [vmem:[#allocation11 + $0xe4] ss:$16 sps:$4 sm:$0xff]  }
 0x63e   : > { %8498 = vmatpush1.bf16.msra.mxu0 %v13197_v37  ;;  %8501 = vmatprep.mubr.bf16.mxu0 %v15114_v30  ;;  %v13254_v49 = vld [vmem:[#allocation11 + $0xe8] ss:$16 sps:$4 sm:$0xff]   ;;  %v13259_v28 = vld [vmem:[#allocation11 + $0x104] ss:$16 sps:$4 sm:$0xff]   ;;  %v13262_v35 = vld [vmem:[#allocation11 + $0x10c] ss:$16 sps:$4 sm:$0xff]  }
 0x63f   : > { %8724 = vmatpush1.bf16.msra.mxu1 %v13200_v10  ;;  %8727 = vmatprep.mubr.bf16.mxu1 %v15114_v30  ;;  %v13215_v30 = vld [vmem:[#allocation11 + $0x20] ss:$16 sps:$4 sm:$0xff]   ;;  %v13260_v33 = vld [vmem:[#allocation11 + $0x108] ss:$16 sps:$4 sm:$0xff]   ;;  %v13265_v48 = vld [vmem:[#allocation11 + $0x124] ss:$16 sps:$4 sm:$0xff]  }
 0x640   : > { %8499 = vmatprep.subr.bf16.mxu0 %v13205_v44  ;;  %8725 = vmatprep.subr.bf16.mxu1 %v13208_v62  ;;  %v13257_v42 = vld [vmem:[#allocation11 + $0x100] ss:$16 sps:$4 sm:$0xff]   ;;  %v13266_v31 = vld [vmem:[#allocation11 + $0x128] ss:$16 sps:$4 sm:$0xff]   ;;  %v13271_v53 = vld [vmem:[#allocation11 + $0x144] ss:$16 sps:$4 sm:$0xff]  }
 0x641   : > { %v13274_v27 = vld [vmem:[#allocation11 + $0x14c] ss:$16 sps:$4 sm:$0xff]   ;;  %v13269_v36 = vld [vmem:[#allocation11 + $0x140] ss:$16 sps:$4 sm:$0xff]   ;;  %v13272_v12 = vld [vmem:[#allocation11 + $0x148] ss:$16 sps:$4 sm:$0xff]  }
 0x642   : > { %8500 = vmatpush1.bf16.msra.mxu0 %v13203_v2  ;;  %v13277_v61 = vld [vmem:[#allocation11 + $0x164] ss:$16 sps:$4 sm:$0xff]   ;;  %v13278_v39 = vld [vmem:[#allocation11 + $0x168] ss:$16 sps:$4 sm:$0xff]   ;;  %v13286_v37 = vld [vmem:[#allocation11 + $0x18c] ss:$16 sps:$4 sm:$0xff]  }
 0x643   : > { %8726 = vmatpush1.bf16.msra.mxu1 %v13206_v11  ;;  %9694 = vmatprep.subr.bf16.mxu0 %v13211_v46  ;;  %v13283_v16 = vld [vmem:[#allocation11 + $0x184] ss:$16 sps:$4 sm:$0xff]   ;;  %v13281_v10 = vld [vmem:[#allocation11 + $0x180] ss:$16 sps:$4 sm:$0xff]   ;;  %v13284_v44 = vld [vmem:[#allocation11 + $0x188] ss:$16 sps:$4 sm:$0xff]  }
 0x644   : > { %9920 = vmatprep.subr.bf16.mxu1 %v13214_v1  ;;  %v13289_v62 = vld [vmem:[#allocation11 + $0x1a4] ss:$16 sps:$4 sm:$0xff]   ;;  %v13290_v2 = vld [vmem:[#allocation11 + $0x1a8] ss:$16 sps:$4 sm:$0xff]   ;;  %v13298_v46 = vld [vmem:[#allocation11 + $0x1cc] ss:$16 sps:$4 sm:$0xff]  }
 0x645   : > { %8502 = vmatmul.mubr.bf16.vlgmr.msra.gmra.mrb[224].mxu0 %v15112_v63  ;;  %v13295_v11 = vld [vmem:[#allocation11 + $0x1c4] ss:$16 sps:$4 sm:$0xff]   ;;  %v13293_v1 = vld [vmem:[#allocation11 + $0x1c0] ss:$16 sps:$4 sm:$0xff]  }
 0x646   : > { %8728 = vmatmul.mubr.bf16.vlgmr.msra.gmra.mrb[224].mxu1 %v15112_v63  ;;  %8511 = vmatprep.mubr.bf16.mxu0 %v15126_v17  ;;  %v13232_v63 = vld [vmem:[#allocation11 + $0x6c] ss:$16 sps:$4 sm:$0xff]  }
 0x647   : > { %8737 = vmatprep.mubr.bf16.mxu1 %v15126_v17  ;;  %9695 = vmatpush1.bf16.msra.mxu0 %v13209_v18  ;;  %v13227_v17 = vld [vmem:[#allocation11 + $0x60] ss:$16 sps:$4 sm:$0xff]   ;;  %v13304_v18 = vld [vmem:[#allocation11 + $0x1ec] ss:$16 sps:$4 sm:$0xff]  }
 0x648   : > { %9921 = vmatpush1.bf16.msra.mxu1 %v13212_v43  ;;  %9696 = vmatprep.subr.bf16.mxu0 %v13217_v51  ;;  %v13299_v43 = vld [vmem:[#allocation11 + $0x1e0] ss:$16 sps:$4 sm:$0xff]   ;;  %v13302_v51 = vld [vmem:[#allocation11 + $0x1e8] ss:$16 sps:$4 sm:$0xff]  }
 0x649   : > { %9922 = vmatprep.subr.bf16.mxu1 %v13220_v41  ;;  %v13307_v41 = vld [vmem:[#allocation11 + $0x204] ss:$16 sps:$4 sm:$0xff]  }
 0x64b   : > { %9697 = vmatpush1.bf16.msra.mxu0 %v13215_v30  ;;  %v13310_v30 = vld [vmem:[#allocation11 + $0x20c] ss:$16 sps:$4 sm:$0xff]  }
 0x64c   : > { %9923 = vmatpush1.bf16.msra.mxu1 %v13218_v55  ;;  %9698 = vmatprep.subr.bf16.mxu0 %v13223_v34 }
 0x64d   : > { %8512 = vmatmul.mubr.bf16.gmra.mrb[228].mxu0 %v15124_v0  ;;  %9924 = vmatprep.subr.bf16.mxu1 %v13226_v56 }
 0x64e   : > { %8738 = vmatmul.mubr.bf16.gmra.mrb[228].mxu1 %v15124_v0  ;;  %8521 = vmatprep.mubr.bf16.mxu0 %v15138_v45  ;;  %v13244_v0 = vld [vmem:[#allocation11 + $0xac] ss:$16 sps:$4 sm:$0xff]  }
 0x64f   : > { %8747 = vmatprep.mubr.bf16.mxu1 %v15138_v45  ;;  %9699 = vmatpush1.bf16.msra.mxu0 %v13221_v4  ;;  %v13239_v45 = vld [vmem:[#allocation11 + $0xa0] ss:$16 sps:$4 sm:$0xff]  }
 0x650   : > { %9925 = vmatpush1.bf16.msra.mxu1 %v13224_v58  ;;  %9700 = vmatprep.subr.bf16.mxu0 %v13229_v38 }
 0x651   : > { %9926 = vmatprep.subr.bf16.mxu1 %v13232_v63 }
 0x653   : > { %9701 = vmatpush1.bf16.msra.mxu0 %v13227_v17 }
 0x654   : > { %9927 = vmatpush1.bf16.msra.mxu1 %v13230_v24  ;;  %9702 = vmatprep.subr.bf16.mxu0 %v13235_v57 }
 0x655   : > { %8522 = vmatmul.mubr.bf16.gmra.mrb[232].mxu0 %v15136_v50  ;;  %9928 = vmatprep.subr.bf16.mxu1 %v13238_v59 }
 0x656   : > { %8748 = vmatmul.mubr.bf16.gmra.mrb[232].mxu1 %v15136_v50  ;;  %8531 = vmatprep.mubr.bf16.mxu0 %v15150_v60  ;;  %v13256_v50 = vld [vmem:[#allocation11 + $0xec] ss:$16 sps:$4 sm:$0xff]  }
 0x657   : > { %8757 = vmatprep.mubr.bf16.mxu1 %v15150_v60  ;;  %9703 = vmatpush1.bf16.msra.mxu0 %v13233_v40  ;;  %v13251_v60 = vld [vmem:[#allocation11 + $0xe0] ss:$16 sps:$4 sm:$0xff]  }
 0x658   : > { %9929 = vmatpush1.bf16.msra.mxu1 %v13236_v29  ;;  %9704 = vmatprep.subr.bf16.mxu0 %v13241_v13 }
 0x659   : > { %9930 = vmatprep.subr.bf16.mxu1 %v13244_v0 }
 0x65b   : > { %9705 = vmatpush1.bf16.msra.mxu0 %v13239_v45 }
 0x65c   : > { %9931 = vmatpush1.bf16.msra.mxu1 %v13242_v3  ;;  %9706 = vmatprep.subr.bf16.mxu0 %v13247_v19 }
 0x65d   : > { %8532 = vmatmul.mubr.bf16.gmra.mrb[236].mxu0 %v15148_v15  ;;  %9932 = vmatprep.subr.bf16.mxu1 %v13250_v54 }
 0x65e   : > { %8758 = vmatmul.mubr.bf16.gmra.mrb[236].mxu1 %v15148_v15  ;;  %8541 = vmatprep.mubr.bf16.mxu0 %v15162_v21  ;;  %v13268_v15 = vld [vmem:[#allocation11 + $0x12c] ss:$16 sps:$4 sm:$0xff]  }
 0x65f   : > { %8767 = vmatprep.mubr.bf16.mxu1 %v15162_v21  ;;  %9707 = vmatpush1.bf16.msra.mxu0 %v13245_v22  ;;  %v13263_v21 = vld [vmem:[#allocation11 + $0x120] ss:$16 sps:$4 sm:$0xff]  }
 0x660   : > { %9933 = vmatpush1.bf16.msra.mxu1 %v13248_v25  ;;  %9708 = vmatprep.subr.bf16.mxu0 %v13253_v32 }
 0x661   : > { %9934 = vmatprep.subr.bf16.mxu1 %v13256_v50 }
 0x663   : > { %9709 = vmatpush1.bf16.msra.mxu0 %v13251_v60 }
 0x664   : > { %9935 = vmatpush1.bf16.msra.mxu1 %v13254_v49  ;;  %9710 = vmatprep.subr.bf16.mxu0 %v13259_v28 }
 0x665   : > { %8542 = vmatmul.mubr.bf16.gmra.mrb[240].mxu0 %v15160_v23  ;;  %9936 = vmatprep.subr.bf16.mxu1 %v13262_v35 }
 0x666   : > { %8768 = vmatmul.mubr.bf16.gmra.mrb[240].mxu1 %v15160_v23  ;;  %8551 = vmatprep.mubr.bf16.mxu0 %v15174_v52  ;;  %v13280_v23 = vld [vmem:[#allocation11 + $0x16c] ss:$16 sps:$4 sm:$0xff]  }
 0x667   : > { %8777 = vmatprep.mubr.bf16.mxu1 %v15174_v52  ;;  %9711 = vmatpush1.bf16.msra.mxu0 %v13257_v42  ;;  %v13275_v52 = vld [vmem:[#allocation11 + $0x160] ss:$16 sps:$4 sm:$0xff]  }
 0x668   : > { %9937 = vmatpush1.bf16.msra.mxu1 %v13260_v33  ;;  %9712 = vmatprep.subr.bf16.mxu0 %v13265_v48 }
 0x669   : > { %9938 = vmatprep.subr.bf16.mxu1 %v13268_v15 }
 0x66b   : > { %9713 = vmatpush1.bf16.msra.mxu0 %v13263_v21 }
 0x66c   : > { %9939 = vmatpush1.bf16.msra.mxu1 %v13266_v31  ;;  %9714 = vmatprep.subr.bf16.mxu0 %v13271_v53  ;;  %v13305_v31 = vld [vmem:[#allocation11 + $0x200] ss:$16 sps:$4 sm:$0xff]   ;;  %v13308_v53 = vld [vmem:[#allocation11 + $0x208] ss:$16 sps:$4 sm:$0xff]  }
 0x66d   : > { %8552 = vmatmul.mubr.bf16.gmra.mrb[244].mxu0 %v15172_v26  ;;  %9940 = vmatprep.subr.bf16.mxu1 %v13274_v27 }
 0x66e   : > { %8778 = vmatmul.mubr.bf16.gmra.mrb[244].mxu1 %v15172_v26  ;;  %8561 = vmatprep.mubr.bf16.mxu0 %v15186_v20  ;;  %v13292_v26 = vld [vmem:[#allocation11 + $0x1ac] ss:$16 sps:$4 sm:$0xff]  }
 0x66f   : > { %8787 = vmatprep.mubr.bf16.mxu1 %v15186_v20  ;;  %9715 = vmatpush1.bf16.msra.mxu0 %v13269_v36  ;;  %v13287_v20 = vld [vmem:[#allocation11 + $0x1a0] ss:$16 sps:$4 sm:$0xff]  }
 0x670   : > { %9941 = vmatpush1.bf16.msra.mxu1 %v13272_v12  ;;  %9716 = vmatprep.subr.bf16.mxu0 %v13277_v61 }
 0x671   : > { %9942 = vmatprep.subr.bf16.mxu1 %v13280_v23  ;;  %v13313_v23 = vld [vmem:[#allocation11 + $0x224] ss:$16 sps:$4 sm:$0xff]  }
 0x673   : > { %9717 = vmatpush1.bf16.msra.mxu0 %v13275_v52  ;;  %v13316_v52 = vld [vmem:[#allocation11 + $0x22c] ss:$16 sps:$4 sm:$0xff]  }
 0x674   : > { %9943 = vmatpush1.bf16.msra.mxu1 %v13278_v39  ;;  %9718 = vmatprep.subr.bf16.mxu0 %v13283_v16 }
 0x675   : > { %8562 = vmatmul.mubr.bf16.gmra.mrb[248].mxu0 %v15184_v9  ;;  %9944 = vmatprep.subr.bf16.mxu1 %v13286_v37 }
 0x676   : > { %8788 = vmatmul.mubr.bf16.gmra.mrb[248].mxu1 %v15184_v9  ;;  %8571 = vmatprep.mubr.bf16.mxu0 %v15198_v47  ;;  %v13296_v9 = vld [vmem:[#allocation11 + $0x1c8] ss:$16 sps:$4 sm:$0xff]  }
 0x677   : > { %8797 = vmatprep.mubr.bf16.mxu1 %v15198_v47  ;;  %9719 = vmatpush1.bf16.msra.mxu0 %v13281_v10  ;;  %v13301_v47 = vld [vmem:[#allocation11 + $0x1e4] ss:$16 sps:$4 sm:$0xff]  }
 0x678   : > { %9945 = vmatpush1.bf16.msra.mxu1 %v13284_v44  ;;  %9720 = vmatprep.subr.bf16.mxu0 %v13289_v62 }
 0x679   : > { %9946 = vmatprep.subr.bf16.mxu1 %v13292_v26 }
 0x67b   : > { %9721 = vmatpush1.bf16.msra.mxu0 %v13287_v20 }
 0x67c   : > { %9947 = vmatpush1.bf16.msra.mxu1 %v13290_v2  ;;  %9722 = vmatprep.subr.bf16.mxu0 %v13295_v11 }
 0x67d   : > { %8572 = vmatmul.mubr.bf16.gmra.mrb[252].mxu0 %v15196_v14  ;;  %9948 = vmatprep.subr.bf16.mxu1 %v13298_v46 }
 0x67e   : > { %8798 = vmatmul.mubr.bf16.gmra.mrb[252].mxu1 %v15196_v14  ;;  %v7694_v14 = vld [vmem:[%s15605_s9 + $0x15] sm:$0xf] }
 0x67f   : > { %9723 = vmatpush1.bf16.msra.mxu0 %v13293_v1  ;;  %v15236_v55 = vrot.slane %v7694_v14, %v14159_v5  ;;  %v15239_v34 = vrot.slane %v7694_v14, %v14162_v6  ;;  %v15242_v56 = vrot.slane %v7694_v14, %v14165_v7  ;;  %v15245_v4 = vrot.slane %v7694_v14, %v14168_v8  ;;  %v13311_v1 = vld [vmem:[#allocation11 + $0x220] ss:$16 sps:$4 sm:$0xff]  }
 0x680   : > { %9949 = vmatpush1.bf16.msra.mxu1 %v13296_v9  ;;  %9724 = vmatprep.subr.bf16.mxu0 %v13301_v47  ;;  %v13314_v9 = vld [vmem:[#allocation11 + $0x228] ss:$16 sps:$4 sm:$0xff]  }
 0x681   : > { %9950 = vmatprep.subr.bf16.mxu1 %v13304_v18 }
 0x683   : > { %9725 = vmatpush1.bf16.msra.mxu0 %v13299_v43 }
 0x684   : > { %9951 = vmatpush1.bf16.msra.mxu1 %v13302_v51  ;;  %9807 = vmatprep.subr.bf16.mxu0 %v13307_v41  ;;  %v13319_v51 = vld [vmem:[#allocation11 + $0x244] ss:$16 sps:$4 sm:$0xff]   ;;  %v13322_v41 = vld [vmem:[#allocation11 + $0x24c] ss:$16 sps:$4 sm:$0xff]  }
 0x685   : > { %10033 = vmatprep.subr.bf16.mxu1 %v13310_v30 }
 0x718   : > { %v8503_v58 = vpop.f32.mrb[224].mxu0 }
 0x719   : > { %v11873_v38 = vadd.f32 %v8503_v58, %v15236_v55  ;;  %v8729_v63 = vpop.f32.mrb[224].mxu1  ;;  %v8505_v17 = vpop.f32.mrb[225].mxu0 }
 0x71a   : > { %v11905_v24 = vadd.f32 %v8729_v63, %v15239_v34  ;;  %v11874_v57 = vadd.f32 %v8505_v17, %v15242_v56  ;;  %v8731_v59 = vpop.f32.mrb[225].mxu1  ;;  %v8507_v40 = vpop.f32.mrb[226].mxu0 }
 0x71b   : > { %v11906_v29 = vadd.f32 %v8731_v59, %v15245_v4  ;;  %v11875_v13 = vadd.f32 %v8507_v40, %v15236_v55  ;;  %v8733_v0 = vpop.f32.mrb[226].mxu1  ;;  %v8509_v45 = vpop.f32.mrb[227].mxu0  ;;  %v8808_v22 = vmax.f32 %v11873_v38, 0.0 }
 0x71c   : > { %v11907_v3 = vadd.f32 %v8733_v0, %v15239_v34  ;;  %v11876_v19 = vadd.f32 %v8509_v45, %v15242_v56  ;;  %v8735_v54 = vpop.f32.mrb[227].mxu1  ;;  %v8810_v50 = vmax.f32 %v11905_v24, 0.0  ;;  %v8809_v60 = vmax.f32 %v11874_v57, 0.0 }
 0x71d   : > { %v8812_v25 = vmax.f32 %v11875_v13, 0.0  ;;  %v11908_v32 = vadd.f32 %v8735_v54, %v15245_v4  ;;  %v8811_v35 = vmax.f32 %v11906_v29, 0.0  ;;  %v13317_v29 = vld [vmem:[#allocation11 + $0x240] ss:$16 sps:$4 sm:$0xff]   ;;  %v13320_v13 = vld [vmem:[#allocation11 + $0x248] ss:$16 sps:$4 sm:$0xff]  }
 0x71e   : > { %v8814_v49 = vmax.f32 %v11907_v3, 0.0  ;;  %v8813_v28 = vmax.f32 %v11876_v19, 0.0  ;;  %v13325_v54 = vld [vmem:[#allocation11 + $0x264] ss:$16 sps:$4 sm:$0xff]  }
 0x71f   : > { %v8872_v42 = vpack.c.bf16 %v8812_v25, %v8808_v22  ;;  %v8815_v33 = vmax.f32 %v11908_v32, 0.0  ;;  %v13328_v22 = vld [vmem:[#allocation11 + $0x26c] ss:$16 sps:$4 sm:$0xff]  }
 0x720   : > { %v15255_v48 = vpack.c.bf16 %v8814_v49, %v8810_v50  ;;  %v8873_v15 = vpack.c.bf16 %v8813_v28, %v8809_v60  ;;  %v8513_v21 = vpop.f32.mrb[228].mxu0 }
 0x721   : > { %v15257_v27 = vpack.c.bf16 %v8815_v33, %v8811_v35  ;;  %v11877_v36 = vadd.f32 %v8513_v21, %v15236_v55  ;;  %v8739_v12 = vpop.f32.mrb[228].mxu1  ;;  %v8515_v61 = vpop.f32.mrb[229].mxu0 }
 0x722   : > { %v11909_v39 = vadd.f32 %v8739_v12, %v15239_v34  ;;  %v11878_v16 = vadd.f32 %v8515_v61, %v15242_v56  ;;  %v8741_v37 = vpop.f32.mrb[229].mxu1  ;;  %v8517_v10 = vpop.f32.mrb[230].mxu0  ;;  %9726 = vmatprep.mubr.bf16.mxu0 %v8873_v15  ;;  %9952 = vmatprep.mubr.bf16.mxu1 %v8873_v15 }
 0x723   : > { %v11910_v44 = vadd.f32 %v8741_v37, %v15245_v4  ;;  %v11879_v62 = vadd.f32 %v8517_v10, %v15236_v55  ;;  %v8743_v26 = vpop.f32.mrb[230].mxu1  ;;  %v8519_v20 = vpop.f32.mrb[231].mxu0  ;;  %9727 = vmatmul.mubr.bf16.vlgmr.msra.gmra.mrb[0].mxu0 %v8872_v42  ;;  %9953 = vmatmul.mubr.bf16.vlgmr.msra.gmra.mrb[0].mxu1 %v8872_v42  ;;  %v8816_v47 = vmax.f32 %v11877_v36, 0.0 }
 0x724   : > { %v11911_v2 = vadd.f32 %v8743_v26, %v15239_v34  ;;  %v11880_v11 = vadd.f32 %v8519_v20, %v15242_v56  ;;  %v8745_v46 = vpop.f32.mrb[231].mxu1  ;;  %9808 = vmatpush1.bf16.msra.mxu0 %v13305_v31  ;;  %10034 = vmatpush1.bf16.msra.mxu1 %v13308_v53  ;;  %v8818_v30 = vmax.f32 %v11909_v39, 0.0  ;;  %v8817_v14 = vmax.f32 %v11878_v16, 0.0  ;;  %v13323_v31 = vld [vmem:[#allocation11 + $0x260] ss:$16 sps:$4 sm:$0xff]  }
 0x725   : > { %v8820_v18 = vmax.f32 %v11879_v62, 0.0  ;;  %v11912_v43 = vadd.f32 %v8745_v46, %v15245_v4  ;;  %9809 = vmatprep.subr.bf16.mxu0 %v13313_v23  ;;  %10035 = vmatprep.subr.bf16.mxu1 %v13316_v52  ;;  %v8819_v63 = vmax.f32 %v11910_v44, 0.0  ;;  %v13326_v53 = vld [vmem:[#allocation11 + $0x268] ss:$16 sps:$4 sm:$0xff]   ;;  %v13331_v23 = vld [vmem:[#allocation11 + $0x284] ss:$16 sps:$4 sm:$0xff]  }
 0x726   : > { %v8822_v58 = vmax.f32 %v11911_v2, 0.0  ;;  %v8821_v38 = vmax.f32 %v11880_v11, 0.0  ;;  %v13334_v52 = vld [vmem:[#allocation11 + $0x28c] ss:$16 sps:$4 sm:$0xff]   ;;  %v13329_v46 = vld [vmem:[#allocation11 + $0x280] ss:$16 sps:$4 sm:$0xff]  }
 0x727   : > { %v8876_v17 = vpack.c.bf16 %v8820_v18, %v8816_v47  ;;  %v8823_v24 = vmax.f32 %v11912_v43, 0.0 }
 0x728   : > { %v15267_v57 = vpack.c.bf16 %v8822_v58, %v8818_v30  ;;  %v8877_v59 = vpack.c.bf16 %v8821_v38, %v8817_v14  ;;  %v8523_v40 = vpop.f32.mrb[232].mxu0  ;;  %9810 = vmatpush1.bf16.msra.mxu0 %v13311_v1  ;;  %10036 = vmatpush1.bf16.msra.mxu1 %v13314_v9  ;;  %v13332_v1 = vld [vmem:[#allocation11 + $0x288] ss:$16 sps:$4 sm:$0xff]  }
 0x729   : > { %v15269_v0 = vpack.c.bf16 %v8823_v24, %v8819_v63  ;;  %v11881_v45 = vadd.f32 %v8523_v40, %v15236_v55  ;;  %v8749_v3 = vpop.f32.mrb[232].mxu1  ;;  %v8525_v19 = vpop.f32.mrb[233].mxu0  ;;  %9811 = vmatprep.subr.bf16.mxu0 %v13319_v51  ;;  %10037 = vmatprep.subr.bf16.mxu1 %v13322_v41  ;;  %v13337_v51 = vld [vmem:[#allocation11 + $0x2a4] ss:$16 sps:$4 sm:$0xff]   ;;  %v13340_v41 = vld [vmem:[#allocation11 + $0x2ac] ss:$16 sps:$4 sm:$0xff]  }
 0x72a   : > { %v11913_v25 = vadd.f32 %v8749_v3, %v15239_v34  ;;  %v11882_v32 = vadd.f32 %v8525_v19, %v15242_v56  ;;  %v8751_v50 = vpop.f32.mrb[233].mxu1  ;;  %v8527_v60 = vpop.f32.mrb[234].mxu0  ;;  %9736 = vmatprep.mubr.bf16.mxu0 %v8877_v59  ;;  %9962 = vmatprep.mubr.bf16.mxu1 %v8877_v59  ;;  %v13338_v3 = vld [vmem:[#allocation11 + $0x2a8] ss:$16 sps:$4 sm:$0xff]  }
 0x72b   : > { %v11914_v49 = vadd.f32 %v8751_v50, %v15245_v4  ;;  %v11883_v28 = vadd.f32 %v8527_v60, %v15236_v55  ;;  %v8753_v35 = vpop.f32.mrb[234].mxu1  ;;  %v8529_v42 = vpop.f32.mrb[235].mxu0  ;;  %9737 = vmatmul.mubr.bf16.gmra.mrb[4].mxu0 %v8876_v17  ;;  %9963 = vmatmul.mubr.bf16.gmra.mrb[4].mxu1 %v8876_v17  ;;  %v8824_v36 = vmax.f32 %v11881_v45, 0.0  ;;  %v13335_v45 = vld [vmem:[#allocation11 + $0x2a0] ss:$16 sps:$4 sm:$0xff]  }
 0x72c   : > { %v11915_v33 = vadd.f32 %v8753_v35, %v15239_v34  ;;  %v11884_v15 = vadd.f32 %v8529_v42, %v15242_v56  ;;  %v8755_v21 = vpop.f32.mrb[235].mxu1  ;;  %9812 = vmatpush1.bf16.msra.mxu0 %v13317_v29  ;;  %10038 = vmatpush1.bf16.msra.mxu1 %v13320_v13  ;;  %v8826_v39 = vmax.f32 %v11913_v25, 0.0  ;;  %v8825_v16 = vmax.f32 %v11882_v32, 0.0  ;;  %v13343_v25 = vld [vmem:[#allocation11 + $0x2c4] ss:$16 sps:$4 sm:$0xff]  }
 0x72d   : > { %v8828_v12 = vmax.f32 %v11883_v28, 0.0  ;;  %v11916_v61 = vadd.f32 %v8755_v21, %v15245_v4  ;;  %9813 = vmatprep.subr.bf16.mxu0 %v13325_v54  ;;  %10039 = vmatprep.subr.bf16.mxu1 %v13328_v22  ;;  %v8827_v44 = vmax.f32 %v11914_v49, 0.0  ;;  %v13346_v32 = vld [vmem:[#allocation11 + $0x2cc] ss:$16 sps:$4 sm:$0xff]  }
 0x72e   : > { %v8830_v37 = vmax.f32 %v11915_v33, 0.0  ;;  %v8829_v10 = vmax.f32 %v11884_v15, 0.0 }
 0x72f   : > { %v8880_v62 = vpack.c.bf16 %v8828_v12, %v8824_v36  ;;  %v8831_v26 = vmax.f32 %v11916_v61, 0.0  ;;  %v13344_v36 = vld [vmem:[#allocation11 + $0x2c8] ss:$16 sps:$4 sm:$0xff]  }
 0x730   : > { %v15279_v20 = vpack.c.bf16 %v8830_v37, %v8826_v39  ;;  %v8881_v2 = vpack.c.bf16 %v8829_v10, %v8825_v16  ;;  %v8533_v11 = vpop.f32.mrb[236].mxu0  ;;  %9814 = vmatpush1.bf16.msra.mxu0 %v13323_v31  ;;  %10040 = vmatpush1.bf16.msra.mxu1 %v13326_v53  ;;  %v13341_v53 = vld [vmem:[#allocation11 + $0x2c0] ss:$16 sps:$4 sm:$0xff]   ;;  %v13349_v39 = vld [vmem:[#allocation11 + $0x2e4] ss:$16 sps:$4 sm:$0xff]  }
 0x731   : > { %v15281_v9 = vpack.c.bf16 %v8831_v26, %v8827_v44  ;;  %v11885_v47 = vadd.f32 %v8533_v11, %v15236_v55  ;;  %v8759_v18 = vpop.f32.mrb[236].mxu1  ;;  %v8535_v43 = vpop.f32.mrb[237].mxu0  ;;  %9815 = vmatprep.subr.bf16.mxu0 %v13331_v23  ;;  %10041 = vmatprep.subr.bf16.mxu1 %v13334_v52  ;;  %v13352_v16 = vld [vmem:[#allocation11 + $0x2ec] ss:$16 sps:$4 sm:$0xff]  }
 0x732   : > { %v11917_v30 = vadd.f32 %v8759_v18, %v15239_v34  ;;  %v11886_v14 = vadd.f32 %v8535_v43, %v15242_v56  ;;  %v8761_v58 = vpop.f32.mrb[237].mxu1  ;;  %v8537_v38 = vpop.f32.mrb[238].mxu0  ;;  %9746 = vmatprep.mubr.bf16.mxu0 %v8881_v2  ;;  %9972 = vmatprep.mubr.bf16.mxu1 %v8881_v2  ;;  %v13347_v43 = vld [vmem:[#allocation11 + $0x2e0] ss:$16 sps:$4 sm:$0xff]  }
 0x733   : > { %v11918_v63 = vadd.f32 %v8761_v58, %v15245_v4  ;;  %v11887_v17 = vadd.f32 %v8537_v38, %v15236_v55  ;;  %v8763_v24 = vpop.f32.mrb[238].mxu1  ;;  %v8539_v59 = vpop.f32.mrb[239].mxu0  ;;  %9747 = vmatmul.mubr.bf16.gmra.mrb[8].mxu0 %v8880_v62  ;;  %9973 = vmatmul.mubr.bf16.gmra.mrb[8].mxu1 %v8880_v62  ;;  %v8832_v19 = vmax.f32 %v11885_v47, 0.0  ;;  %v13355_v58 = vld [vmem:[#allocation11 + $0x304] ss:$16 sps:$4 sm:$0xff]  }
 0x734   : > { %v11919_v40 = vadd.f32 %v8763_v24, %v15239_v34  ;;  %v11888_v29 = vadd.f32 %v8539_v59, %v15242_v56  ;;  %v8765_v13 = vpop.f32.mrb[239].mxu1  ;;  %9816 = vmatpush1.bf16.msra.mxu0 %v13329_v46  ;;  %10042 = vmatpush1.bf16.msra.mxu1 %v13332_v1  ;;  %v8834_v50 = vmax.f32 %v11917_v30, 0.0  ;;  %v8833_v60 = vmax.f32 %v11886_v14, 0.0  ;;  %v13358_v38 = vld [vmem:[#allocation11 + $0x30c] ss:$16 sps:$4 sm:$0xff]  }
 0x735   : > { %v8836_v54 = vmax.f32 %v11887_v17, 0.0  ;;  %v11920_v22 = vadd.f32 %v8765_v13, %v15245_v4  ;;  %9817 = vmatprep.subr.bf16.mxu0 %v13337_v51  ;;  %10043 = vmatprep.subr.bf16.mxu1 %v13340_v41  ;;  %v8835_v35 = vmax.f32 %v11918_v63, 0.0  ;;  %v13350_v51 = vld [vmem:[#allocation11 + $0x2e8] ss:$16 sps:$4 sm:$0xff]  }
 0x736   : > { %v8838_v49 = vmax.f32 %v11919_v40, 0.0  ;;  %v8837_v28 = vmax.f32 %v11888_v29, 0.0 }
 0x737   : > { %v8884_v42 = vpack.c.bf16 %v8836_v54, %v8832_v19  ;;  %v8839_v33 = vmax.f32 %v11920_v22, 0.0  ;;  %v13353_v54 = vld [vmem:[#allocation11 + $0x300] ss:$16 sps:$4 sm:$0xff]   ;;  %v13356_v22 = vld [vmem:[#allocation11 + $0x308] ss:$16 sps:$4 sm:$0xff]  }
 0x738   : > { %v15291_v15 = vpack.c.bf16 %v8838_v49, %v8834_v50  ;;  %v8885_v21 = vpack.c.bf16 %v8837_v28, %v8833_v60  ;;  %v8543_v31 = vpop.f32.mrb[240].mxu0  ;;  %9818 = vmatpush1.bf16.msra.mxu0 %v13335_v45  ;;  %10044 = vmatpush1.bf16.msra.mxu1 %v13338_v3  ;;  %v13361_v49 = vld [vmem:[#allocation11 + $0x324] ss:$16 sps:$4 sm:$0xff]   ;;  %v13364_v28 = vld [vmem:[#allocation11 + $0x32c] ss:$16 sps:$4 sm:$0xff]  }
 0x739   : > { %v15293_v12 = vpack.c.bf16 %v8839_v33, %v8835_v35  ;;  %v11889_v61 = vadd.f32 %v8543_v31, %v15236_v55  ;;  %v8769_v23 = vpop.f32.mrb[240].mxu1  ;;  %v8545_v52 = vpop.f32.mrb[241].mxu0  ;;  %9819 = vmatprep.subr.bf16.mxu0 %v13343_v25  ;;  %10045 = vmatprep.subr.bf16.mxu1 %v13346_v32 }
 0x73a   : > { %v11921_v37 = vadd.f32 %v8769_v23, %v15239_v34  ;;  %v11890_v10 = vadd.f32 %v8545_v52, %v15242_v56  ;;  %v8771_v44 = vpop.f32.mrb[241].mxu1  ;;  %v8547_v62 = vpop.f32.mrb[242].mxu0  ;;  %9756 = vmatprep.mubr.bf16.mxu0 %v8885_v21  ;;  %9982 = vmatprep.mubr.bf16.mxu1 %v8885_v21 }
 0x73b   : > { %v11922_v26 = vadd.f32 %v8771_v44, %v15245_v4  ;;  %v11891_v2 = vadd.f32 %v8547_v62, %v15236_v55  ;;  %v8773_v11 = vpop.f32.mrb[242].mxu1  ;;  %v8549_v46 = vpop.f32.mrb[243].mxu0  ;;  %9757 = vmatmul.mubr.bf16.gmra.mrb[12].mxu0 %v8884_v42  ;;  %9983 = vmatmul.mubr.bf16.gmra.mrb[12].mxu1 %v8884_v42  ;;  %v8840_v41 = vmax.f32 %v11889_v61, 0.0 }
 0x73c   : > { %v11923_v1 = vadd.f32 %v8773_v11, %v15239_v34  ;;  %v11892_v47 = vadd.f32 %v8549_v46, %v15242_v56  ;;  %v8775_v18 = vpop.f32.mrb[243].mxu1  ;;  %9820 = vmatpush1.bf16.msra.mxu0 %v13341_v53  ;;  %10046 = vmatpush1.bf16.msra.mxu1 %v13344_v36  ;;  %v8842_v63 = vmax.f32 %v11921_v37, 0.0  ;;  %v8841_v17 = vmax.f32 %v11890_v10, 0.0  ;;  %v13362_v37 = vld [vmem:[#allocation11 + $0x328] ss:$16 sps:$4 sm:$0xff]  }
 0x73d   : > { %v8844_v30 = vmax.f32 %v11891_v2, 0.0  ;;  %v11924_v14 = vadd.f32 %v8775_v18, %v15245_v4  ;;  %9821 = vmatprep.subr.bf16.mxu0 %v13349_v39  ;;  %10047 = vmatprep.subr.bf16.mxu1 %v13352_v16  ;;  %v8843_v40 = vmax.f32 %v11922_v26, 0.0  ;;  %v13359_v16 = vld [vmem:[#allocation11 + $0x320] ss:$16 sps:$4 sm:$0xff]   ;;  %v13367_v26 = vld [vmem:[#allocation11 + $0x344] ss:$16 sps:$4 sm:$0xff]  }
 0x73e   : > { %v8846_v24 = vmax.f32 %v11923_v1, 0.0  ;;  %v8845_v59 = vmax.f32 %v11892_v47, 0.0  ;;  %v13370_v2 = vld [vmem:[#allocation11 + $0x34c] ss:$16 sps:$4 sm:$0xff]  }
 0x73f   : > { %v8888_v29 = vpack.c.bf16 %v8844_v30, %v8840_v41  ;;  %v8847_v13 = vmax.f32 %v11924_v14, 0.0 }
 0x740   : > { %v15303_v45 = vpack.c.bf16 %v8846_v24, %v8842_v63  ;;  %v8889_v3 = vpack.c.bf16 %v8845_v59, %v8841_v17  ;;  %v8553_v19 = vpop.f32.mrb[244].mxu0  ;;  %9822 = vmatpush1.bf16.msra.mxu0 %v13347_v43  ;;  %10048 = vmatpush1.bf16.msra.mxu1 %v13350_v51 }
 0x741   : > { %v15305_v25 = vpack.c.bf16 %v8847_v13, %v8843_v40  ;;  %v11893_v32 = vadd.f32 %v8553_v19, %v15236_v55  ;;  %v8779_v50 = vpop.f32.mrb[244].mxu1  ;;  %v8555_v60 = vpop.f32.mrb[245].mxu0  ;;  %9823 = vmatprep.subr.bf16.mxu0 %v13355_v58  ;;  %10049 = vmatprep.subr.bf16.mxu1 %v13358_v38  ;;  %v13365_v58 = vld [vmem:[#allocation11 + $0x340] ss:$16 sps:$4 sm:$0xff]   ;;  %v13368_v38 = vld [vmem:[#allocation11 + $0x348] ss:$16 sps:$4 sm:$0xff]  }
 0x742   : > { %v11925_v35 = vadd.f32 %v8779_v50, %v15239_v34  ;;  %v11894_v42 = vadd.f32 %v8555_v60, %v15242_v56  ;;  %v8781_v33 = vpop.f32.mrb[245].mxu1  ;;  %v8557_v21 = vpop.f32.mrb[246].mxu0  ;;  %9766 = vmatprep.mubr.bf16.mxu0 %v8889_v3  ;;  %9992 = vmatprep.mubr.bf16.mxu1 %v8889_v3  ;;  %v13373_v40 = vld [vmem:[#allocation11 + $0x364] ss:$16 sps:$4 sm:$0xff]  }
 0x743   : > { %v11926_v31 = vadd.f32 %v8781_v33, %v15245_v4  ;;  %v11895_v53 = vadd.f32 %v8557_v21, %v15236_v55  ;;  %v8783_v36 = vpop.f32.mrb[246].mxu1  ;;  %v8559_v61 = vpop.f32.mrb[247].mxu0  ;;  %9767 = vmatmul.mubr.bf16.gmra.mrb[16].mxu0 %v8888_v29  ;;  %9993 = vmatmul.mubr.bf16.gmra.mrb[16].mxu1 %v8888_v29  ;;  %v8848_v10 = vmax.f32 %v11893_v32, 0.0  ;;  %v13376_v29 = vld [vmem:[#allocation11 + $0x36c] ss:$16 sps:$4 sm:$0xff]  }
 0x744   : > { %v11927_v23 = vadd.f32 %v8783_v36, %v15239_v34  ;;  %v11896_v52 = vadd.f32 %v8559_v61, %v15242_v56  ;;  %v8785_v39 = vpop.f32.mrb[247].mxu1  ;;  %9824 = vmatpush1.bf16.msra.mxu0 %v13353_v54  ;;  %10050 = vmatpush1.bf16.msra.mxu1 %v13356_v22  ;;  %v8850_v11 = vmax.f32 %v11925_v35, 0.0  ;;  %v8849_v46 = vmax.f32 %v11894_v42, 0.0  ;;  %v13371_v42 = vld [vmem:[#allocation11 + $0x360] ss:$16 sps:$4 sm:$0xff]  }
 0x745   : > { %v8852_v44 = vmax.f32 %v11895_v53, 0.0  ;;  %v11928_v62 = vadd.f32 %v8785_v39, %v15245_v4  ;;  %9825 = vmatprep.subr.bf16.mxu0 %v13361_v49  ;;  %10051 = vmatprep.subr.bf16.mxu1 %v13364_v28  ;;  %v8851_v18 = vmax.f32 %v11926_v31, 0.0  ;;  %v13374_v33 = vld [vmem:[#allocation11 + $0x368] ss:$16 sps:$4 sm:$0xff]   ;;  %v13379_v36 = vld [vmem:[#allocation11 + $0x384] ss:$16 sps:$4 sm:$0xff]  }
 0x746   : > { %v8854_v1 = vmax.f32 %v11927_v23, 0.0  ;;  %v8853_v47 = vmax.f32 %v11896_v52, 0.0  ;;  %v13382_v61 = vld [vmem:[#allocation11 + $0x38c] ss:$16 sps:$4 sm:$0xff]  }
 0x747   : > { %v8892_v43 = vpack.c.bf16 %v8852_v44, %v8848_v10  ;;  %v8855_v51 = vmax.f32 %v11928_v62, 0.0 }
 0x748   : > { %v15315_v41 = vpack.c.bf16 %v8854_v1, %v8850_v11  ;;  %v8893_v30 = vpack.c.bf16 %v8853_v47, %v8849_v46  ;;  %v8563_v14 = vpop.f32.mrb[248].mxu0  ;;  %9826 = vmatpush1.bf16.msra.mxu0 %v13359_v16  ;;  %10052 = vmatpush1.bf16.msra.mxu1 %v13362_v37  ;;  %v13377_v11 = vld [vmem:[#allocation11 + $0x380] ss:$16 sps:$4 sm:$0xff]   ;;  %v13380_v46 = vld [vmem:[#allocation11 + $0x388] ss:$16 sps:$4 sm:$0xff]  }
 0x749   : > { %v15317_v63 = vpack.c.bf16 %v8855_v51, %v8851_v18  ;;  %v11897_v17 = vadd.f32 %v8563_v14, %v15236_v55  ;;  %v8789_v24 = vpop.f32.mrb[248].mxu1  ;;  %v8565_v59 = vpop.f32.mrb[249].mxu0  ;;  %9827 = vmatprep.subr.bf16.mxu0 %v13367_v26  ;;  %10053 = vmatprep.subr.bf16.mxu1 %v13370_v2  ;;  %v13385_v51 = vld [vmem:[#allocation11 + $0x3a4] ss:$16 sps:$4 sm:$0xff]  }
 0x74a   : > { %v11929_v13 = vadd.f32 %v8789_v24, %v15239_v34  ;;  %v11898_v3 = vadd.f32 %v8565_v59, %v15242_v56  ;;  %v8791_v19 = vpop.f32.mrb[249].mxu1  ;;  %v8567_v54 = vpop.f32.mrb[250].mxu0  ;;  %9776 = vmatprep.mubr.bf16.mxu0 %v8893_v30  ;;  %10002 = vmatprep.mubr.bf16.mxu1 %v8893_v30  ;;  %v13388_v30 = vld [vmem:[#allocation11 + $0x3ac] ss:$16 sps:$4 sm:$0xff]  }
 0x74b   : > { %v11930_v22 = vadd.f32 %v8791_v19, %v15245_v4  ;;  %v11899_v32 = vadd.f32 %v8567_v54, %v15236_v55  ;;  %v8793_v50 = vpop.f32.mrb[250].mxu1  ;;  %v8569_v60 = vpop.f32.mrb[251].mxu0  ;;  %9777 = vmatmul.mubr.bf16.gmra.mrb[20].mxu0 %v8892_v43  ;;  %10003 = vmatmul.mubr.bf16.gmra.mrb[20].mxu1 %v8892_v43  ;;  %v8856_v21 = vmax.f32 %v11897_v17, 0.0  ;;  %v13383_v54 = vld [vmem:[#allocation11 + $0x3a0] ss:$16 sps:$4 sm:$0xff]  }
 0x74c   : > { %v11931_v49 = vadd.f32 %v8793_v50, %v15239_v34  ;;  %v11900_v28 = vadd.f32 %v8569_v60, %v15242_v56  ;;  %v8795_v35 = vpop.f32.mrb[251].mxu1  ;;  %9828 = vmatpush1.bf16.msra.mxu0 %v13365_v58  ;;  %10054 = vmatpush1.bf16.msra.mxu1 %v13368_v38  ;;  %v8858_v23 = vmax.f32 %v11929_v13, 0.0  ;;  %v8857_v52 = vmax.f32 %v11898_v3, 0.0 }
 0x74d   : > { %v8860_v31 = vmax.f32 %v11899_v32, 0.0  ;;  %v11932_v53 = vadd.f32 %v8795_v35, %v15245_v4  ;;  %9829 = vmatprep.subr.bf16.mxu0 %v13373_v40  ;;  %10055 = vmatprep.subr.bf16.mxu1 %v13376_v29  ;;  %v8859_v37 = vmax.f32 %v11930_v22, 0.0  ;;  %v13386_v22 = vld [vmem:[#allocation11 + $0x3a8] ss:$16 sps:$4 sm:$0xff]  }
 0x74e   : > { %v8862_v39 = vmax.f32 %v11931_v49, 0.0  ;;  %v8861_v16 = vmax.f32 %v11900_v28, 0.0  ;;  %v13394_v49 = vld [vmem:[#allocation11 + $0x3cc] ss:$16 sps:$4 sm:$0xff]  }
 0x74f   : > { %v8896_v10 = vpack.c.bf16 %v8860_v31, %v8856_v21  ;;  %v8863_v44 = vmax.f32 %v11932_v53, 0.0 }
 0x750   : > { %v15327_v62 = vpack.c.bf16 %v8862_v39, %v8858_v23  ;;  %v8897_v26 = vpack.c.bf16 %v8861_v16, %v8857_v52  ;;  %v8573_v2 = vpop.f32.mrb[252].mxu0  ;;  %9830 = vmatpush1.bf16.msra.mxu0 %v13371_v42  ;;  %10056 = vmatpush1.bf16.msra.mxu1 %v13374_v33  ;;  %v13392_v23 = vld [vmem:[#allocation11 + $0x3c8] ss:$16 sps:$4 sm:$0xff]   ;;  %v13400_v52 = vld [vmem:[#allocation11 + $0x3ec] ss:$16 sps:$4 sm:$0xff]  }
 0x751   : > { %v15329_v1 = vpack.c.bf16 %v8863_v44, %v8859_v37  ;;  %v11901_v47 = vadd.f32 %v8573_v2, %v15236_v55  ;;  %v8799_v18 = vpop.f32.mrb[252].mxu1  ;;  %v8575_v43 = vpop.f32.mrb[253].mxu0  ;;  %9831 = vmatprep.subr.bf16.mxu0 %v13379_v36  ;;  %10057 = vmatprep.subr.bf16.mxu1 %v13382_v61  ;;  %v13389_v36 = vld [vmem:[#allocation11 + $0x3c0] ss:$16 sps:$4 sm:$0xff]   ;;  %v13398_v16 = vld [vmem:[#allocation11 + $0x3e8] ss:$16 sps:$4 sm:$0xff]  }
 0x752   : > { %v11933_v14 = vadd.f32 %v8799_v18, %v15239_v34  ;;  %v11902_v58 = vadd.f32 %v8575_v43, %v15242_v56  ;;  %v8801_v38 = vpop.f32.mrb[253].mxu1  ;;  %v8577_v17 = vpop.f32.mrb[254].mxu0  ;;  %9786 = vmatprep.mubr.bf16.mxu0 %v8897_v26  ;;  %10012 = vmatprep.mubr.bf16.mxu1 %v8897_v26  ;;  %v13395_v39 = vld [vmem:[#allocation11 + $0x3e0] ss:$16 sps:$4 sm:$0xff]  }
 0x753   : > { %v11934_v24 = vadd.f32 %v8801_v38, %v15245_v4  ;;  %v11903_v59 = vadd.f32 %v8577_v17, %v15236_v55  ;;  %v8803_v40 = vpop.f32.mrb[254].mxu1  ;;  %v8579_v29 = vpop.f32.mrb[255].mxu0  ;;  %9787 = vmatmul.mubr.bf16.gmra.mrb[24].mxu0 %v8896_v10  ;;  %10013 = vmatmul.mubr.bf16.gmra.mrb[24].mxu1 %v8896_v10  ;;  %v8864_v32 = vmax.f32 %v11901_v47, 0.0  ;;  %v13391_v55 = vld [vmem:[#allocation11 + $0x3c4] ss:$16 sps:$4 sm:$0xff]  }
 0x754   : > { %v11935_v13 = vadd.f32 %v8803_v40, %v15239_v34  ;;  %v11904_v3 = vadd.f32 %v8579_v29, %v15242_v56  ;;  %v8805_v19 = vpop.f32.mrb[255].mxu1  ;;  %9832 = vmatpush1.bf16.msra.mxu0 %v13377_v11  ;;  %10058 = vmatpush1.bf16.msra.mxu1 %v13380_v46  ;;  %v8866_v28 = vmax.f32 %v11933_v14, 0.0  ;;  %v8865_v35 = vmax.f32 %v11902_v58, 0.0 }
 0x755   : > { %v8868_v50 = vmax.f32 %v11903_v59, 0.0  ;;  %v11936_v60 = vadd.f32 %v8805_v19, %v15245_v4  ;;  %9833 = vmatprep.subr.bf16.mxu0 %v13385_v51  ;;  %10059 = vmatprep.subr.bf16.mxu1 %v13388_v30  ;;  %v8867_v34 = vmax.f32 %v11934_v24, 0.0  ;;  %v13397_v4 = vld [vmem:[#allocation11 + $0x3e4] ss:$16 sps:$4 sm:$0xff]  }
 0x756   : > { %v8870_v42 = vmax.f32 %v11935_v13, 0.0  ;;  %v8869_v33 = vmax.f32 %v11904_v3, 0.0 }
 0x757   : > { %v8900_v21 = vpack.c.bf16 %v8868_v50, %v8864_v32  ;;  %v8871_v56 = vmax.f32 %v11936_v60, 0.0 }
 0x758   : > { %v8902_v31 = vpack.c.bf16 %v8870_v42, %v8866_v28  ;;  %v8901_v53 = vpack.c.bf16 %v8869_v33, %v8865_v35  ;;  %9834 = vmatpush1.bf16.msra.mxu0 %v13383_v54  ;;  %10060 = vmatpush1.bf16.msra.mxu1 %v13386_v22 }
 0x759   : > { %v8903_v61 = vpack.c.bf16 %v8871_v56, %v8867_v34  ;;  %9835 = vmatprep.subr.bf16.mxu0 %v13391_v55  ;;  %10061 = vmatprep.subr.bf16.mxu1 %v13394_v49 }
 0x75a   : > { %9796 = vmatprep.mubr.bf16.mxu0 %v8901_v53  ;;  %10022 = vmatprep.mubr.bf16.mxu1 %v8901_v53 }
 0x75b   : > { %9797 = vmatmul.mubr.bf16.gmra.mrb[28].mxu0 %v8900_v21  ;;  %10023 = vmatmul.mubr.bf16.gmra.mrb[28].mxu1 %v8900_v21 }
 0x75c   : > { %9836 = vmatpush1.bf16.msra.mxu0 %v13389_v36  ;;  %9839 = vmatprep.mubr.bf16.mxu0 %v15257_v27 }
 0x75d   : > { %10062 = vmatpush1.bf16.msra.mxu1 %v13392_v23  ;;  %10065 = vmatprep.mubr.bf16.mxu1 %v15257_v27 }
 0x75e   : > { %9837 = vmatprep.subr.bf16.mxu0 %v13397_v4  ;;  %10063 = vmatprep.subr.bf16.mxu1 %v13400_v52 }
 0x760   : > { %9838 = vmatpush1.bf16.msra.mxu0 %v13395_v39 }
 0x761   : > { %10064 = vmatpush1.bf16.msra.mxu1 %v13398_v16 }
 0x763   : > { %9840 = vmatmul.mubr.bf16.vlgmr.msra.gmra.mrb[0].mxu0 %v15255_v48 }
 0x764   : > { %10066 = vmatmul.mubr.bf16.vlgmr.msra.gmra.mrb[0].mxu1 %v15255_v48  ;;  %9849 = vmatprep.mubr.bf16.mxu0 %v15269_v0 }
 0x765   : > { %10075 = vmatprep.mubr.bf16.mxu1 %v15269_v0 }
 0x76b   : > { %9850 = vmatmul.mubr.bf16.gmra.mrb[4].mxu0 %v15267_v57 }
 0x76c   : > { %10076 = vmatmul.mubr.bf16.gmra.mrb[4].mxu1 %v15267_v57  ;;  %9859 = vmatprep.mubr.bf16.mxu0 %v15281_v9 }
 0x76d   : > { %10085 = vmatprep.mubr.bf16.mxu1 %v15281_v9 }
 0x773   : > { %9860 = vmatmul.mubr.bf16.gmra.mrb[8].mxu0 %v15279_v20 }
 0x774   : > { %10086 = vmatmul.mubr.bf16.gmra.mrb[8].mxu1 %v15279_v20  ;;  %9869 = vmatprep.mubr.bf16.mxu0 %v15293_v12 }
 0x775   : > { %10095 = vmatprep.mubr.bf16.mxu1 %v15293_v12 }
 0x77b   : > { %9870 = vmatmul.mubr.bf16.gmra.mrb[12].mxu0 %v15291_v15 }
 0x77c   : > { %10096 = vmatmul.mubr.bf16.gmra.mrb[12].mxu1 %v15291_v15  ;;  %9879 = vmatprep.mubr.bf16.mxu0 %v15305_v25 }
 0x77d   : > { %10105 = vmatprep.mubr.bf16.mxu1 %v15305_v25 }
 0x783   : > { %9880 = vmatmul.mubr.bf16.gmra.mrb[16].mxu0 %v15303_v45 }
 0x784   : > { %10106 = vmatmul.mubr.bf16.gmra.mrb[16].mxu1 %v15303_v45  ;;  %9889 = vmatprep.mubr.bf16.mxu0 %v15317_v63 }
 0x785   : > { %10115 = vmatprep.mubr.bf16.mxu1 %v15317_v63 }
 0x78b   : > { %9890 = vmatmul.mubr.bf16.gmra.mrb[20].mxu0 %v15315_v41 }
 0x78c   : > { %10116 = vmatmul.mubr.bf16.gmra.mrb[20].mxu1 %v15315_v41  ;;  %9899 = vmatprep.mubr.bf16.mxu0 %v15329_v1 }
 0x78d   : > { %10125 = vmatprep.mubr.bf16.mxu1 %v15329_v1 }
 0x793   : > { %9900 = vmatmul.mubr.bf16.gmra.mrb[24].mxu0 %v15327_v62 }
 0x794   : > { %10126 = vmatmul.mubr.bf16.gmra.mrb[24].mxu1 %v15327_v62  ;;  %9909 = vmatprep.mubr.bf16.mxu0 %v8903_v61 }
 0x795   : > { %10135 = vmatprep.mubr.bf16.mxu1 %v8903_v61 }
 0x79b   : > { %9910 = vmatmul.mubr.bf16.gmra.mrb[28].mxu0 %v8902_v31 }
 0x79c   : > { %10136 = vmatmul.mubr.bf16.gmra.mrb[28].mxu1 %v8902_v31 }
 0x79d   : > { %13649 = shalt.err (!%p13646_p5)
}
 0x79e   : > { %s13650_s13 = scalar_lea.hbm %s15372_s27, 2048  ;;  %s13654_s11 = scalar_lea.hbm %s15636_s24, 8192 }
 0x79f   : > { %p13651_p8 = scmp.ne.s32.totalorder %s15372_s27, %s13650_s13  ;;  %p13655_p0 = scmp.lt.u32.totalorder %s15372_s27, %s15636_s24 }
 0x7a0   : > { %p13656_p4 = scmp.lt.u32.totalorder %s13654_s11, %s13650_s13  ;;  %p13658_p6 = scmp.lt.u32.totalorder %s13650_s13, %s15372_s27 }
 0x7a1   : > { %p13652_p9 = pnand %p13651_p8, %p15637_p10 }
 0x7a2   : > { %p13657_p2 = por %p13656_p4, %p13655_p0 }
 0x7a3   : > { %p13653_p3 = pneg %p13652_p9 }
 0x7a4   : > { %p13659_p1 = por %p13658_p6, %p13657_p2 }
 0x7a6   : > { %p13660_p11 = pnand %p13659_p1, %p13653_p3 }
 0x7a8   : > { %13663 = shalt.err (!%p13660_p11)
}
 0x7a9   : > { %s13761_s29 = smov 128   ;;  %s13762_s1 = smov 8   ;;  %v9032_v48 = vld [vmem:[%s15605_s9 + $0x19] sm:$0xf] }
 0x7aa   : > { %12408 = dma.vmem_to_hbm [thread:$0]  (%p15637_p10), %s15374_s25, 2048, %s15372_s27, %s10232_s10, %s13761_s29, %s13761_s29, %s13762_s1   ;;  %v15405_v27 = vrot.slane %v9032_v48, %v14159_v5  ;;  %v15408_v57 = vrot.slane %v9032_v48, %v14162_v6  ;;  %v15411_v0 = vrot.slane %v9032_v48, %v14165_v7  ;;  %v15414_v20 = vrot.slane %v9032_v48, %v14168_v8 }
 0x7ab   : > { %s10446_s2 = sshll.u32 %s14067_s22, 9  ;;  %s11359_s27 = sshll.u32 %s13847_s23, 13 }
 0x7ac   : > { %s15419_s25 = scalar_lea.vmem [#allocation13], %s10446_s2  ;;  %s15638_s11 = sld [smem:[#allocation24_spill]] }
 0x7ad   : > { %s10246_s10 = sshll.u32 %s15419_s25, 4  ;;  %s10227_s15 = scalar_lea.sflag [#allocation4], %s14067_s22  ;;  %s15547_s10 = int_to_ptr.vmem [resolvable:$true] %s10246_s10 }
 0x7ae   : > { %s13664_s29 = scalar_lea.vmem %s15547_s10, 8192  ;;  %s13763_s1 = smov [#allocation13]  }
 0x7af   : > { %p13665_p12 = scmp.ne.s32.totalorder %s15547_s10, %s13664_s29  ;;  %s13668_s26 = sshll.u32 %s13763_s1, 4  ;;  %s13669_s26 = int_to_ptr.vmem [resolvable:$false] %s13668_s26 }
 0x7b0   : > { %s13670_s12 = scalar_lea.vmem %s13669_s26, 16384  ;;  %p13671_p5 = scmp.lt.s32.totalorder %s15547_s10, %s13669_s26 }
 0x7b1   : > { %p13666_p13 = pnand %p13665_p12, %p15637_p10  ;;  %p13672_p8 = scmp.lt.s32.totalorder %s13670_s12, %s13664_s29 }
 0x7b2   : > { %s15545_s28 = scalar_lea.hbm %s15638_s11, %s11359_s27 }
 0x7b3   : > { %p13667_p7 = pneg %p13666_p13  ;;  %p13673_p9 = por %p13672_p8, %p13671_p5 }
 0x7b5   : > { %p13674_p3 = pnand %p13673_p9, %p13667_p7 }
 0x836   : > { %v9841_v9 = vpop.f32.mrb[0].mxu0 }
 0x837   : > { %v11937_v15 = vadd.f32 %v9841_v9, %v15405_v27  ;;  %v10067_v12 = vpop.f32.mrb[0].mxu1  ;;  %v9843_v45 = vpop.f32.mrb[1].mxu0 }
 0x838   : > { %v11969_v25 = vadd.f32 %v10067_v12, %v15408_v57  ;;  %v11938_v41 = vadd.f32 %v9843_v45, %v15411_v0  ;;  %v10069_v5 = vpop.f32.mrb[1].mxu1  ;;  %v9845_v63 = vpop.f32.mrb[2].mxu0 }
 0x839   : > { %10146 = vst [vmem:[%s15419_s25] sm:$0xff] %v11937_v15  ;;  %v11970_v6 = vadd.f32 %v10069_v5, %v15414_v20  ;;  %v11939_v7 = vadd.f32 %v9845_v63, %v15405_v27  ;;  %v10071_v8 = vpop.f32.mrb[2].mxu1  ;;  %v9847_v37 = vpop.f32.mrb[3].mxu0 }
 0x83a   : > { %10148 = vst [vmem:[%s15419_s25 + $0x10] sm:$0xff] %v11969_v25  ;;  %10147 = vst [vmem:[%s15419_s25 + $0x8] sm:$0xff] %v11938_v41  ;;  %v11971_v10 = vadd.f32 %v10071_v8, %v15408_v57  ;;  %v11940_v44 = vadd.f32 %v9847_v37, %v15411_v0  ;;  %v10073_v62 = vpop.f32.mrb[3].mxu1 }
 0x83b   : > { %10149 = vst [vmem:[%s15419_s25 + $0x18] sm:$0xff] %v11970_v6  ;;  %10150 = vst [vmem:[%s15419_s25 + $0x20] sm:$0xff] %v11939_v7  ;;  %v11972_v26 = vadd.f32 %v10073_v62, %v15414_v20 }
 0x83c   : > { %10152 = vst [vmem:[%s15419_s25 + $0x30] sm:$0xff] %v11971_v10  ;;  %10151 = vst [vmem:[%s15419_s25 + $0x28] sm:$0xff] %v11940_v44 }
 0x83d   : > { %10153 = vst [vmem:[%s15419_s25 + $0x38] sm:$0xff] %v11972_v26 }
 0x83e   : > { %v9851_v2 = vpop.f32.mrb[4].mxu0 }
 0x83f   : > { %v11941_v11 = vadd.f32 %v9851_v2, %v15405_v27  ;;  %v10077_v46 = vpop.f32.mrb[4].mxu1  ;;  %v9853_v1 = vpop.f32.mrb[5].mxu0 }
 0x840   : > { %v11973_v47 = vadd.f32 %v10077_v46, %v15408_v57  ;;  %v11942_v18 = vadd.f32 %v9853_v1, %v15411_v0  ;;  %v10079_v43 = vpop.f32.mrb[5].mxu1  ;;  %v9855_v51 = vpop.f32.mrb[6].mxu0 }
 0x841   : > { %10154 = vst [vmem:[%s15419_s25 + $0x40] sm:$0xff] %v11941_v11  ;;  %v11974_v30 = vadd.f32 %v10079_v43, %v15414_v20  ;;  %v11943_v14 = vadd.f32 %v9855_v51, %v15405_v27  ;;  %v10081_v58 = vpop.f32.mrb[6].mxu1  ;;  %v9857_v38 = vpop.f32.mrb[7].mxu0 }
 0x842   : > { %10156 = vst [vmem:[%s15419_s25 + $0x50] sm:$0xff] %v11973_v47  ;;  %10155 = vst [vmem:[%s15419_s25 + $0x48] sm:$0xff] %v11942_v18  ;;  %v11975_v17 = vadd.f32 %v10081_v58, %v15408_v57  ;;  %v11944_v24 = vadd.f32 %v9857_v38, %v15411_v0  ;;  %v10083_v59 = vpop.f32.mrb[7].mxu1 }
 0x843   : > { %10157 = vst [vmem:[%s15419_s25 + $0x58] sm:$0xff] %v11974_v30  ;;  %10158 = vst [vmem:[%s15419_s25 + $0x60] sm:$0xff] %v11943_v14  ;;  %v11976_v40 = vadd.f32 %v10083_v59, %v15414_v20 }
 0x844   : > { %10160 = vst [vmem:[%s15419_s25 + $0x70] sm:$0xff] %v11975_v17  ;;  %10159 = vst [vmem:[%s15419_s25 + $0x68] sm:$0xff] %v11944_v24 }
 0x845   : > { %10161 = vst [vmem:[%s15419_s25 + $0x78] sm:$0xff] %v11976_v40 }
 0x846   : > { %v9861_v29 = vpop.f32.mrb[8].mxu0 }
 0x847   : > { %v11945_v13 = vadd.f32 %v9861_v29, %v15405_v27  ;;  %v10087_v3 = vpop.f32.mrb[8].mxu1  ;;  %v9863_v19 = vpop.f32.mrb[9].mxu0 }
 0x848   : > { %v11977_v54 = vadd.f32 %v10087_v3, %v15408_v57  ;;  %v11946_v22 = vadd.f32 %v9863_v19, %v15411_v0  ;;  %v10089_v32 = vpop.f32.mrb[9].mxu1  ;;  %v9865_v50 = vpop.f32.mrb[10].mxu0 }
 0x849   : > { %10162 = vst [vmem:[%s15419_s25 + $0x80] sm:$0xff] %v11945_v13  ;;  %v11978_v60 = vadd.f32 %v10089_v32, %v15414_v20  ;;  %v11947_v55 = vadd.f32 %v9865_v50, %v15405_v27  ;;  %v10091_v49 = vpop.f32.mrb[10].mxu1  ;;  %v9867_v28 = vpop.f32.mrb[11].mxu0 }
 0x84a   : > { %10164 = vst [vmem:[%s15419_s25 + $0x90] sm:$0xff] %v11977_v54  ;;  %10163 = vst [vmem:[%s15419_s25 + $0x88] sm:$0xff] %v11946_v22  ;;  %v11979_v35 = vadd.f32 %v10091_v49, %v15408_v57  ;;  %v11948_v42 = vadd.f32 %v9867_v28, %v15411_v0  ;;  %v10093_v33 = vpop.f32.mrb[11].mxu1 }
 0x84b   : > { %10165 = vst [vmem:[%s15419_s25 + $0x98] sm:$0xff] %v11978_v60  ;;  %10166 = vst [vmem:[%s15419_s25 + $0xa0] sm:$0xff] %v11947_v55  ;;  %v11980_v34 = vadd.f32 %v10093_v33, %v15414_v20 }
 0x84c   : > { %10168 = vst [vmem:[%s15419_s25 + $0xb0] sm:$0xff] %v11979_v35  ;;  %10167 = vst [vmem:[%s15419_s25 + $0xa8] sm:$0xff] %v11948_v42 }
 0x84d   : > { %10169 = vst [vmem:[%s15419_s25 + $0xb8] sm:$0xff] %v11980_v34 }
 0x84e   : > { %v9871_v21 = vpop.f32.mrb[12].mxu0 }
 0x84f   : > { %v11949_v56 = vadd.f32 %v9871_v21, %v15405_v27  ;;  %v10097_v31 = vpop.f32.mrb[12].mxu1  ;;  %v9873_v53 = vpop.f32.mrb[13].mxu0 }
 0x850   : > { %v11981_v36 = vadd.f32 %v10097_v31, %v15408_v57  ;;  %v11950_v61 = vadd.f32 %v9873_v53, %v15411_v0  ;;  %v10099_v23 = vpop.f32.mrb[13].mxu1  ;;  %v9875_v4 = vpop.f32.mrb[14].mxu0 }
 0x851   : > { %10170 = vst [vmem:[%s15419_s25 + $0xc0] sm:$0xff] %v11949_v56  ;;  %v11982_v52 = vadd.f32 %v10099_v23, %v15414_v20  ;;  %v11951_v39 = vadd.f32 %v9875_v4, %v15405_v27  ;;  %v10101_v16 = vpop.f32.mrb[14].mxu1  ;;  %v9877_v48 = vpop.f32.mrb[15].mxu0 }
 0x852   : > { %10172 = vst [vmem:[%s15419_s25 + $0xd0] sm:$0xff] %v11981_v36  ;;  %10171 = vst [vmem:[%s15419_s25 + $0xc8] sm:$0xff] %v11950_v61  ;;  %v11983_v9 = vadd.f32 %v10101_v16, %v15408_v57  ;;  %v11952_v15 = vadd.f32 %v9877_v48, %v15411_v0  ;;  %v10103_v12 = vpop.f32.mrb[15].mxu1 }
 0x853   : > { %10173 = vst [vmem:[%s15419_s25 + $0xd8] sm:$0xff] %v11982_v52  ;;  %10174 = vst [vmem:[%s15419_s25 + $0xe0] sm:$0xff] %v11951_v39  ;;  %v11984_v45 = vadd.f32 %v10103_v12, %v15414_v20 }
 0x854   : > { %10176 = vst [vmem:[%s15419_s25 + $0xf0] sm:$0xff] %v11983_v9  ;;  %10175 = vst [vmem:[%s15419_s25 + $0xe8] sm:$0xff] %v11952_v15 }
 0x855   : > { %10177 = vst [vmem:[%s15419_s25 + $0xf8] sm:$0xff] %v11984_v45 }
 0x856   : > { %v9881_v25 = vpop.f32.mrb[16].mxu0 }
 0x857   : > { %v11953_v41 = vadd.f32 %v9881_v25, %v15405_v27  ;;  %v10107_v5 = vpop.f32.mrb[16].mxu1  ;;  %v9883_v63 = vpop.f32.mrb[17].mxu0 }
 0x858   : > { %v11985_v6 = vadd.f32 %v10107_v5, %v15408_v57  ;;  %v11954_v7 = vadd.f32 %v9883_v63, %v15411_v0  ;;  %v10109_v8 = vpop.f32.mrb[17].mxu1  ;;  %v9885_v37 = vpop.f32.mrb[18].mxu0 }
 0x859   : > { %10178 = vst [vmem:[%s15419_s25 + $0x100] sm:$0xff] %v11953_v41  ;;  %v11986_v10 = vadd.f32 %v10109_v8, %v15414_v20  ;;  %v11955_v44 = vadd.f32 %v9885_v37, %v15405_v27  ;;  %v10111_v62 = vpop.f32.mrb[18].mxu1  ;;  %v9887_v26 = vpop.f32.mrb[19].mxu0 }
 0x85a   : > { %10180 = vst [vmem:[%s15419_s25 + $0x110] sm:$0xff] %v11985_v6  ;;  %10179 = vst [vmem:[%s15419_s25 + $0x108] sm:$0xff] %v11954_v7  ;;  %v11987_v2 = vadd.f32 %v10111_v62, %v15408_v57  ;;  %v11956_v11 = vadd.f32 %v9887_v26, %v15411_v0  ;;  %v10113_v46 = vpop.f32.mrb[19].mxu1 }
 0x85b   : > { %10181 = vst [vmem:[%s15419_s25 + $0x118] sm:$0xff] %v11986_v10  ;;  %10182 = vst [vmem:[%s15419_s25 + $0x120] sm:$0xff] %v11955_v44  ;;  %v11988_v1 = vadd.f32 %v10113_v46, %v15414_v20 }
 0x85c   : > { %10184 = vst [vmem:[%s15419_s25 + $0x130] sm:$0xff] %v11987_v2  ;;  %10183 = vst [vmem:[%s15419_s25 + $0x128] sm:$0xff] %v11956_v11 }
 0x85d   : > { %10185 = vst [vmem:[%s15419_s25 + $0x138] sm:$0xff] %v11988_v1 }
 0x85e   : > { %v9891_v47 = vpop.f32.mrb[20].mxu0 }
 0x85f   : > { %v11957_v18 = vadd.f32 %v9891_v47, %v15405_v27  ;;  %v10117_v43 = vpop.f32.mrb[20].mxu1  ;;  %v9893_v51 = vpop.f32.mrb[21].mxu0 }
 0x860   : > { %v11989_v30 = vadd.f32 %v10117_v43, %v15408_v57  ;;  %v11958_v14 = vadd.f32 %v9893_v51, %v15411_v0  ;;  %v10119_v58 = vpop.f32.mrb[21].mxu1  ;;  %v9895_v38 = vpop.f32.mrb[22].mxu0 }
 0x861   : > { %10186 = vst [vmem:[%s15419_s25 + $0x140] sm:$0xff] %v11957_v18  ;;  %v11990_v17 = vadd.f32 %v10119_v58, %v15414_v20  ;;  %v11959_v24 = vadd.f32 %v9895_v38, %v15405_v27  ;;  %v10121_v59 = vpop.f32.mrb[22].mxu1  ;;  %v9897_v40 = vpop.f32.mrb[23].mxu0 }
 0x862   : > { %10188 = vst [vmem:[%s15419_s25 + $0x150] sm:$0xff] %v11989_v30  ;;  %10187 = vst [vmem:[%s15419_s25 + $0x148] sm:$0xff] %v11958_v14  ;;  %v11991_v29 = vadd.f32 %v10121_v59, %v15408_v57  ;;  %v11960_v13 = vadd.f32 %v9897_v40, %v15411_v0  ;;  %v10123_v3 = vpop.f32.mrb[23].mxu1 }
 0x863   : > { %10189 = vst [vmem:[%s15419_s25 + $0x158] sm:$0xff] %v11990_v17  ;;  %10190 = vst [vmem:[%s15419_s25 + $0x160] sm:$0xff] %v11959_v24  ;;  %v11992_v19 = vadd.f32 %v10123_v3, %v15414_v20 }
 0x864   : > { %10192 = vst [vmem:[%s15419_s25 + $0x170] sm:$0xff] %v11991_v29  ;;  %10191 = vst [vmem:[%s15419_s25 + $0x168] sm:$0xff] %v11960_v13 }
 0x865   : > { %10193 = vst [vmem:[%s15419_s25 + $0x178] sm:$0xff] %v11992_v19 }
 0x866   : > { %v9901_v54 = vpop.f32.mrb[24].mxu0 }
 0x867   : > { %v11961_v22 = vadd.f32 %v9901_v54, %v15405_v27  ;;  %v10127_v32 = vpop.f32.mrb[24].mxu1  ;;  %v9903_v50 = vpop.f32.mrb[25].mxu0 }
 0x868   : > { %v11993_v60 = vadd.f32 %v10127_v32, %v15408_v57  ;;  %v11962_v55 = vadd.f32 %v9903_v50, %v15411_v0  ;;  %v10129_v49 = vpop.f32.mrb[25].mxu1  ;;  %v9905_v28 = vpop.f32.mrb[26].mxu0 }
 0x869   : > { %10194 = vst [vmem:[%s15419_s25 + $0x180] sm:$0xff] %v11961_v22  ;;  %v11994_v35 = vadd.f32 %v10129_v49, %v15414_v20  ;;  %v11963_v42 = vadd.f32 %v9905_v28, %v15405_v27  ;;  %v10131_v33 = vpop.f32.mrb[26].mxu1  ;;  %v9907_v34 = vpop.f32.mrb[27].mxu0 }
 0x86a   : > { %10196 = vst [vmem:[%s15419_s25 + $0x190] sm:$0xff] %v11993_v60  ;;  %10195 = vst [vmem:[%s15419_s25 + $0x188] sm:$0xff] %v11962_v55  ;;  %v11995_v21 = vadd.f32 %v10131_v33, %v15408_v57  ;;  %v11964_v56 = vadd.f32 %v9907_v34, %v15411_v0  ;;  %v10133_v31 = vpop.f32.mrb[27].mxu1 }
 0x86b   : > { %10197 = vst [vmem:[%s15419_s25 + $0x198] sm:$0xff] %v11994_v35  ;;  %10198 = vst [vmem:[%s15419_s25 + $0x1a0] sm:$0xff] %v11963_v42  ;;  %v11996_v53 = vadd.f32 %v10133_v31, %v15414_v20 }
 0x86c   : > { %10200 = vst [vmem:[%s15419_s25 + $0x1b0] sm:$0xff] %v11995_v21  ;;  %10199 = vst [vmem:[%s15419_s25 + $0x1a8] sm:$0xff] %v11964_v56 }
 0x86d   : > { %10201 = vst [vmem:[%s15419_s25 + $0x1b8] sm:$0xff] %v11996_v53 }
 0x86e   : > { %v9911_v36 = vpop.f32.mrb[28].mxu0 }
 0x86f   : > { %v11965_v61 = vadd.f32 %v9911_v36, %v15405_v27  ;;  %v10137_v23 = vpop.f32.mrb[28].mxu1  ;;  %v9913_v4 = vpop.f32.mrb[29].mxu0 }
 0x870   : > { %v11997_v52 = vadd.f32 %v10137_v23, %v15408_v57  ;;  %v11966_v39 = vadd.f32 %v9913_v4, %v15411_v0  ;;  %v10139_v16 = vpop.f32.mrb[29].mxu1  ;;  %v9915_v48 = vpop.f32.mrb[30].mxu0 }
 0x871   : > { %10202 = vst [vmem:[%s15419_s25 + $0x1c0] sm:$0xff] %v11965_v61  ;;  %v11998_v9 = vadd.f32 %v10139_v16, %v15414_v20  ;;  %v11967_v15 = vadd.f32 %v9915_v48, %v15405_v27  ;;  %v10141_v12 = vpop.f32.mrb[30].mxu1  ;;  %v9917_v45 = vpop.f32.mrb[31].mxu0 }
 0x872   : > { %10204 = vst [vmem:[%s15419_s25 + $0x1d0] sm:$0xff] %v11997_v52  ;;  %10203 = vst [vmem:[%s15419_s25 + $0x1c8] sm:$0xff] %v11966_v39  ;;  %v11999_v25 = vadd.f32 %v10141_v12, %v15408_v57  ;;  %v11968_v41 = vadd.f32 %v9917_v45, %v15411_v0  ;;  %v10143_v5 = vpop.f32.mrb[31].mxu1 }
 0x873   : > { %10205 = vst [vmem:[%s15419_s25 + $0x1d8] sm:$0xff] %v11998_v9  ;;  %10206 = vst [vmem:[%s15419_s25 + $0x1e0] sm:$0xff] %v11967_v15  ;;  %v12000_v27 = vadd.f32 %v10143_v5, %v15414_v20 }
 0x874   : > { %10208 = vst [vmem:[%s15419_s25 + $0x1f0] sm:$0xff] %v11999_v25  ;;  %10207 = vst [vmem:[%s15419_s25 + $0x1e8] sm:$0xff] %v11968_v41 }
 0x875   : > { %10209 = vst [vmem:[%s15419_s25 + $0x1f8] sm:$0xff] %v12000_v27 }
 0x876   : > { %13677 = shalt.err (!%p13674_p3)
}
 0x877   : > { %s13678_s2 = scalar_lea.hbm %s15545_s28, 8192  ;;  %s13682_s23 = scalar_lea.hbm %s15638_s11, 32768 }
 0x878   : > { %p13679_p0 = scmp.ne.s32.totalorder %s15545_s28, %s13678_s2  ;;  %p13683_p6 = scmp.lt.u32.totalorder %s15545_s28, %s15638_s11 }
 0x879   : > { %p13684_p1 = scmp.lt.u32.totalorder %s13682_s23, %s13678_s2  ;;  %p13686_p12 = scmp.lt.u32.totalorder %s13678_s2, %s15545_s28 }
 0x87a   : > { %p13680_p4 = pnand %p13679_p0, %p15637_p10 }
 0x87b   : > { %p13685_p11 = por %p13684_p1, %p13683_p6 }
 0x87c   : > { %p13681_p2 = pneg %p13680_p4 }
 0x87d   : > { %p13687_p13 = por %p13686_p12, %p13685_p11 }
 0x87f   : > { %p13688_p7 = pnand %p13687_p13, %p13681_p2 }
 0x881   : > { %13691 = shalt.err (!%p13688_p7)
}
 0x882   : > { %s13764_s29 = smov 512   ;;  %s13765_s26 = smov 32  }
 0x883   : > { %12407 = dma.vmem_to_hbm [thread:$0]  (%p15637_p10), %s15547_s10, 8192, %s15545_s28, %s10227_s15, %s13764_s29, %s13764_s29, %s13765_s26  }
 0x884 PF: > { %p12449_p5 = scmp.ge.s32.totalorder %s13746_s20, 2  ;;  %s10277_s12 = sand.u32 1, %s13734_s17  }
 0x885   : > { %p15639_p8 = scmp.ne.s32.totalorder %s15625_s21, 0  ;;  %s10278_s2 = scalar_lea.sflag [#allocation4], %s10277_s12 }
 0x887   : > { %p12432_p9 = pnand %p12449_p5, %p15639_p8 }
 0x889   : > { %13725 = dma.done.wait (!%p12432_p9), %s10278_s2, 8192  }
 0x88a   : > { %13727 = vsyncadd (!%p12432_p9), %s10278_s2, 4294959104  ;;  %s10287_s25 = scalar_lea.sflag [#allocation15], %s10277_s12 }
 0x88b   : > { %13729 = dma.done.wait (!%p12432_p9), %s10287_s25, 2048  }
 0x88c   : > { %13731 = vsyncadd (!%p12432_p9), %s10287_s25, 4294965248  ;;  %p31_p10 = scmp.ge.s32.totalorder %s13991_s16, 6   ;;  %s15640_s17 = smov %s13738_s18 }
 0x88d   : > { %s15641_s18 = smov %s13742_s19  ;;  %s15642_s19 = smov %s14003_s30 }
 0x88e   : > { %s15643_s20 = smov %s13991_s16  ;;  %33 = sbr.rel (!%p31_p10) target bundleno = 15 (0xf), region = 145 }
 0x895   :  { %10292 = vsyncpa [#allocation3], 1 }
 0x896   :  { %10294 = vsyncpa [#allocation3 + $0x1], 1 }
 0x897   :  { %10295 = vsyncpa [#allocation6], 1 }
 0x898   :  { %10296 = vsyncpa [#allocation9], 1 }
 0x899   :  { %10297 = vsyncpa [#allocation12], 1 }
 0x89a   :  { %10298 = vsyncpa [#allocation4], 1 }
 0x89b   :  { %10300 = vsyncpa [#allocation4 + $0x1], 1 }
 0x89c   :  { %10301 = vsyncpa [#allocation15], 1 }
 0x89d   :  { %10303 = vsyncpa [#allocation15 + $0x1], 1 }

</bundles_post_ra>
